<compile_context>
chip_gen: v5e
topology: v5e:2x2
jax: 0.10.0
libtpu: 0.0.40
codegen_flags: <defaults>
</compile_context>

<pallas_src>
import functools

import jax
import jax.numpy as jnp
from jax import lax
from jax.experimental import pallas as pl
from jax.experimental.pallas import tpu as pltpu

_MIB = 1024 * 1024


# ----------------------------------------------------------------------------
# generation-aware VMEM budget (conservative fallback = v7x-safe)
# ----------------------------------------------------------------------------
def _vmem_plan():
    """Returns (tile_budget_bytes, vmem_limit_bytes)."""
    cap = None
    try:
        cap = getattr(pltpu.get_tpu_info(), "vmem_capacity_bytes", None)
    except Exception:
        cap = None
    if cap is not None and cap >= 100 * _MIB:        # v5e / v6e: 128 MiB physical
        return 80 * _MIB, 100 * _MIB
    return 44 * _MIB, 56 * _MIB                      # v7x: 64 MiB physical per TC


# ----------------------------------------------------------------------------
# tile planning helpers (budget-guarded, no silent over-budget fallbacks)
# ----------------------------------------------------------------------------
def _pick_tm(M, target=512, align=16):
    """Full M if it fits, else the largest aligned divisor <= target."""
    if M <= target:
        return M
    t = (target // align) * align
    while t >= align:
        if M % t == 0:
            return t
        t -= align
    return M


def _aligned_divisors(dim, align=128):
    return [d for d in range(align, dim + 1, align) if dim % d == 0]


def _pick_tk(tm, K, tn, *, x_bytes, w_bytes, out_bytes, extra, budget):
    """Largest 128-aligned divisor of K whose double-buffered footprint fits."""
    fixed = tm * tn * 4 + 2 * tm * tn * out_bytes + extra        # acc + out bufs
    divs = _aligned_divisors(K, 128)
    if not divs:
        return K
    best = divs[0]
    for d in divs:
        per = 2 * tm * d * x_bytes + 2 * d * tn * w_bytes        # x + w double buf
        if fixed + per <= budget:
            best = d
    return best


# ----------------------------------------------------------------------------
# RoI max-pool bin bounds (caffe RoIPool semantics), computed on host/XLA side
# ----------------------------------------------------------------------------
def _roi_bin_bounds(rois, spatial_scale, H, W, P=7):
    x1, y1, x2, y2 = rois[:, 0], rois[:, 1], rois[:, 2], rois[:, 3]
    rnd = lambda v: jnp.floor(v * spatial_scale + 0.5).astype(jnp.int32)
    sw, sh, ew, eh = rnd(x1), rnd(y1), rnd(x2), rnd(y2)
    roi_w = jnp.maximum(ew - sw + 1, 1).astype(jnp.float32)
    roi_h = jnp.maximum(eh - sh + 1, 1).astype(jnp.float32)
    bin_w = roi_w / P
    bin_h = roi_h / P
    p = jnp.arange(P, dtype=jnp.float32)[None, :]
    hstart = jnp.clip(jnp.floor(p * bin_h[:, None]).astype(jnp.int32) + sh[:, None], 0, H)
    hend = jnp.clip(jnp.ceil((p + 1.0) * bin_h[:, None]).astype(jnp.int32) + sh[:, None], 0, H)
    wstart = jnp.clip(jnp.floor(p * bin_w[:, None]).astype(jnp.int32) + sw[:, None], 0, W)
    wend = jnp.clip(jnp.ceil((p + 1.0) * bin_w[:, None]).astype(jnp.int32) + sw[:, None], 0, W)
    return hstart, hend, wstart, wend


# ----------------------------------------------------------------------------
# RoI max-pool kernel
#   - bin bounds live in SMEM (scalar prefetch), feature map in VMEM (HWC).
#   - per (roi, output-row ph): dynamic fori_loop max over the H window into a
#     (W, C) slab, then 7 masked sublane reductions whose results are packed
#     into one (7, C) slab and stored once (aggregated stores).
#   - results collected in an f32 VMEM scratch; the final bf16 block is written
#     with one full-block store.
# ----------------------------------------------------------------------------
def _roi_pool_kernel(hs_ref, he_ref, ws_ref, we_ref, feat_ref, out_ref, buf_ref, *, bins):
    g = pl.program_id(0)
    RB = out_ref.shape[0]
    H, W, C = feat_ref.shape
    NEG = jnp.float32(-jnp.inf)
    w_iota = lax.broadcasted_iota(jnp.int32, (W, 1), 0)   # hoisted out of loops

    def roi_body(rr, carry):
        r = g * RB + rr                                   # global roi index
        for ph in range(bins):                            # static unroll (7)
            h0 = hs_ref[r * bins + ph]
            h1 = he_ref[r * bins + ph]
            # masked max over rows [h0, h1)  ->  (W, C) slab
            slab = lax.fori_loop(
                h0, h1,
                lambda h, acc: jnp.maximum(acc, feat_ref[h]),
                jnp.full((W, C), NEG, jnp.float32))
            rows = []
            for pw in range(bins):                        # static unroll (7)
                w0 = ws_ref[r * bins + pw]
                w1 = we_ref[r * bins + pw]
                wm = (w_iota >= w0) & (w_iota < w1)       # (W, 1)
                bmax = jnp.max(jnp.where(wm, slab, NEG), axis=0, keepdims=True)
                # empty bin -> 0 (Caffe RoIPool); would also zero a genuine -inf
                # feature value, which does not occur for real feature maps.
                bmax = jnp.where(bmax == NEG, jnp.float32(0.0), bmax)
                rows.append(bmax)
            row_slab = jnp.concatenate(rows, axis=0)      # (bins, C)
            buf_ref[pl.ds(rr, 1), pl.ds(ph * bins, bins), :] = row_slab[None]
        return carry

    lax.fori_loop(0, RB, roi_body, 0)
    out_ref[...] = buf_ref[...].astype(out_ref.dtype)     # one full-block bf16 store


def roi_pool(features_nchw, rois, spatial_scale, R_pad, P=7, RB=8):
    """Returns pooled features flattened in (ph, pw, c) order: (R_pad, P*P*C) bf16."""
    N, C, H, W = features_nchw.shape
    assert N == 1, "single-image batch (image index column is all zeros)"
    R = rois.shape[0]
    feat_hwc = jnp.transpose(features_nchw[0], (1, 2, 0))  # (H, W, C), C on lanes

    hs, he, ws, we = _roi_bin_bounds(rois, spatial_scale, H, W, P)
    pad = R_pad - R
    flat = lambda a: jnp.pad(a, ((0, pad), (0, 0))).reshape(-1).astype(jnp.int32)
    hs, he, ws, we = flat(hs), flat(he), flat(ws), flat(we)  # padded rois -> tiny bins

    RB = min(RB, R_pad)
    assert R_pad % RB == 0

    kernel = functools.partial(_roi_pool_kernel, bins=P)
    pooled = pl.pallas_call(
        kernel,
        out_shape=jax.ShapeDtypeStruct((R_pad, P * P, C), jnp.bfloat16),
        grid_spec=pltpu.PrefetchScalarGridSpec(
            num_scalar_prefetch=4,
            grid=(R_pad // RB,),
            in_specs=[
                pl.BlockSpec((H, W, C), lambda g, hs, he, ws, we: (0, 0, 0)),
            ],
            out_specs=pl.BlockSpec((RB, P * P, C),
                                   lambda g, hs, he, ws, we: (g, 0, 0)),
            scratch_shapes=[pltpu.VMEM((RB, P * P, C), jnp.float32)],
        ),
        compiler_params=pltpu.CompilerParams(
            dimension_semantics=("parallel",)),
    )(hs, he, ws, we, feat_hwc)

    return pooled.reshape(R_pad, P * P * C)


# ----------------------------------------------------------------------------
# int8-weight Linear (+bias, optional ReLU): bf16 MXU matmul, f32 accumulator,
# per-output-channel dequant scale folded into the epilogue.
# ----------------------------------------------------------------------------
def _linear_q_kernel(x_ref, w_ref, s_ref, b_ref, o_ref, acc_ref, *, relu):
    k = pl.program_id(2)

    @pl.when(k == 0)
    def _init():
        acc_ref[...] = jnp.zeros_like(acc_ref)

    acc_ref[...] += jnp.dot(x_ref[...], w_ref[...].astype(jnp.bfloat16),
                            preferred_element_type=jnp.float32)

    @pl.when(k == pl.num_programs(2) - 1)
    def _fin():
        out = acc_ref[...] * s_ref[...] + b_ref[...]
        if relu:
            out = jnp.maximum(out, 0.0)
        o_ref[...] = out.astype(o_ref.dtype)


def linear_q(x, wq, scale, b, *, relu, out_dtype, budget, vmem_limit):
    """y = (x @ dequant(wq)) + b ;  wq is (K, N) int8, scale/b are (1, N) f32."""
    M, K = x.shape
    K2, N = wq.shape
    assert K == K2
    tm = _pick_tm(M)
    tn = N                                             # full-N: contiguous weight DMAs
    extra = 2 * 2 * N * 4                              # scale + bias double buffers
    tk = _pick_tk(tm, K, tn, x_bytes=x.dtype.itemsize, w_bytes=1,
                  out_bytes=jnp.dtype(out_dtype).itemsize, extra=extra, budget=budget)
    grid = (M // tm, N // tn, K // tk)
    kernel = functools.partial(_linear_q_kernel, relu=relu)
    return pl.pallas_call(
        kernel,
        out_shape=jax.ShapeDtypeStruct((M, N), out_dtype),
        grid_spec=pltpu.PrefetchScalarGridSpec(
            num_scalar_prefetch=0,
            grid=grid,
            in_specs=[
                pl.BlockSpec((tm, tk), lambda i, j, k: (i, k)),
                pl.BlockSpec((tk, tn), lambda i, j, k: (k, j)),
                pl.BlockSpec((1, tn), lambda i, j, k: (0, j)),
                pl.BlockSpec((1, tn), lambda i, j, k: (0, j)),
            ],
            out_specs=pl.BlockSpec((tm, tn), lambda i, j, k: (i, j)),
            scratch_shapes=[pltpu.VMEM((tm, tn), jnp.float32)],
        ),
        compiler_params=pltpu.CompilerParams(
            dimension_semantics=("parallel", "parallel", "arbitrary"),
            vmem_limit_bytes=vmem_limit),
    )(x, wq, scale, b)


# ----------------------------------------------------------------------------
# fc2 (+ReLU) fused with the two heads: h2 never round-trips through HBM.
# ----------------------------------------------------------------------------
def _fc2_heads_kernel(x_ref, w_ref, s_ref, b_ref, wh_ref, bh_ref, head_ref, acc_ref):
    k = pl.program_id(1)

    @pl.when(k == 0)
    def _init():
        acc_ref[...] = jnp.zeros_like(acc_ref)

    acc_ref[...] += jnp.dot(x_ref[...], w_ref[...].astype(jnp.bfloat16),
                            preferred_element_type=jnp.float32)

    @pl.when(k == pl.num_programs(1) - 1)
    def _fin():
        h2 = jnp.maximum(acc_ref[...] * s_ref[...] + b_ref[...], 0.0)
        head = jnp.dot(h2.astype(jnp.bfloat16), wh_ref[...],
                       preferred_element_type=jnp.float32) + bh_ref[...]
        head_ref[...] = head.astype(head_ref.dtype)


def fc2_heads(x, wq, scale, b, wh, bh, *, budget, vmem_limit):
    M, K = x.shape
    K2, N = wq.shape
    assert K == K2
    Nh = wh.shape[1]
    tm = _pick_tm(M)
    extra = (2 * N * Nh * wh.dtype.itemsize    # head weight double buffer
             + 2 * Nh * 4                      # head bias
             + 2 * 2 * N * 4                   # fc2 scale + bias
             + 2 * tm * Nh * 4)                # head output double buffer
    tk = _pick_tk(tm, K, N, x_bytes=x.dtype.itemsize, w_bytes=1,
                  out_bytes=0, extra=extra, budget=budget)
    grid = (M // tm, K // tk)
    return pl.pallas_call(
        _fc2_heads_kernel,
        out_shape=jax.ShapeDtypeStruct((M, Nh), jnp.float32),
        grid_spec=pltpu.PrefetchScalarGridSpec(
            num_scalar_prefetch=0,
            grid=grid,
            in_specs=[
                pl.BlockSpec((tm, tk), lambda i, k: (i, k)),
                pl.BlockSpec((tk, N), lambda i, k: (k, 0)),
                pl.BlockSpec((1, N), lambda i, k: (0, 0)),
                pl.BlockSpec((1, N), lambda i, k: (0, 0)),
                pl.BlockSpec((N, Nh), lambda i, k: (0, 0)),
                pl.BlockSpec((1, Nh), lambda i, k: (0, 0)),
            ],
            out_specs=pl.BlockSpec((tm, Nh), lambda i, k: (i, 0)),
            scratch_shapes=[pltpu.VMEM((tm, N), jnp.float32)],
        ),
        compiler_params=pltpu.CompilerParams(
            dimension_semantics=("parallel", "arbitrary"),
            vmem_limit_bytes=vmem_limit),
    )(x, wq, scale, b, wh, bh)


# ----------------------------------------------------------------------------
# parameter preparation (PyTorch layout -> kernel layout), done once at init
# ----------------------------------------------------------------------------
def _quantize_per_col(w):
    """Symmetric per-output-channel int8 quantization; returns (int8 w, (1,N) scale)."""
    amax = jnp.max(jnp.abs(w), axis=0)
    scale = jnp.maximum(amax, 1e-8) / 127.0
    wq = jnp.clip(jnp.round(w / scale[None, :]), -127, 127).astype(jnp.int8)
    return wq, scale.astype(jnp.float32).reshape(1, -1)


def prepare_params(torch_params, n_class, C=512, P=7):
    """PyTorch weights are (out_features, in_features).  Transpose to (K, N),
    permute fc1 rows from NCHW-flatten (c,ph,pw) to the kernel's pooled (ph,pw,c)
    order, quantize fc1/fc2 weights to int8 with per-column scales, and fuse the
    two heads ([cls_score | bbox]) into one lane-padded bf16 weight."""
    nf1 = torch_params["cls_fc1.weight"].shape[0]
    w1 = torch_params["cls_fc1.weight"].T                       # (C*P*P, 4096)
    w1 = w1.reshape(C, P, P, nf1).transpose(1, 2, 0, 3).reshape(C * P * P, nf1)
    w1q, s1 = _quantize_per_col(w1)

    w2q, s2 = _quantize_per_col(torch_params["cls_fc2.weight"].T)

    wc = torch_params["cls_score.weight"].T                     # (4096, n_class)
    wb = torch_params["bbox.weight"].T                          # (4096, 4*n_class)
    wh = jnp.concatenate([wc, wb], axis=1)                      # (4096, 5*n_class)
    bh = jnp.concatenate([torch_params["cls_score.bias"],
                          torch_params["bbox.bias"]])
    n_head = 5 * n_class
    n_head_pad = max(128, ((n_head + 127) // 128) * 128)        # lane-dense output
    padn = n_head_pad - n_head

    return {
        "w1q": w1q, "s1": s1,
        "b1": torch_params["cls_fc1.bias"].astype(jnp.float32).reshape(1, -1),
        "w2q": w2q, "s2": s2,
        "b2": torch_params["cls_fc2.bias"].astype(jnp.float32).reshape(1, -1),
        "wh": jnp.pad(wh, ((0, 0), (0, padn))).astype(jnp.bfloat16),
        "bh": jnp.pad(bh, (0, padn)).astype(jnp.float32).reshape(1, -1),
    }


# ----------------------------------------------------------------------------
# cls_layer forward
# ----------------------------------------------------------------------------
def cls_layer_forward(features, rois, params, spatial_scale, n_class):
    R = rois.shape[0]
    # pad the roi dimension so the M axis of the matmuls tiles cleanly
    if R <= 512:
        R_pad = ((R + 15) // 16) * 16
    else:
        R_pad = ((R + 511) // 512) * 512

    budget, vmem_limit = _vmem_plan()

    pooled = roi_pool(features, rois, spatial_scale, R_pad)        # (R_pad, 25088) bf16

    h1 = linear_q(pooled, params["w1q"], params["s1"], params["b1"],
                  relu=True, out_dtype=jnp.bfloat16,
                  budget=budget, vmem_limit=vmem_limit)            # fc1 + ReLU
    # TODO(synk): Dropout(p=0.5) is identity in eval mode; training-mode RNG mask
    # (pltpu.prng_random_bits) not reproduced here.
    head = fc2_heads(h1, params["w2q"], params["s2"], params["b2"],
                     params["wh"], params["bh"],
                     budget=budget, vmem_limit=vmem_limit)         # fc2+ReLU+heads

    cls_score = head[:R, :n_class]
    bbox = head[:R, n_class:5 * n_class]
    return cls_score, bbox


if __name__ == "__main__":
    key = jax.random.PRNGKey(0)
    ks = jax.random.split(key, 12)

    # VGG-style feature map (1, 512, 16, 16), 8 RoIs, n_class = 4, scale = 1/16.
    C, H, W = 512, 16, 16
    R = 8
    n_class = 4
    spatial_scale = 1.0 / 16.0
    img_h, img_w = H / spatial_scale, W / spatial_scale

    features = jax.random.normal(ks[0], (1, C, H, W), jnp.float32)

    x1 = jax.random.uniform(ks[1], (R,), minval=0.0, maxval=img_w * 0.6)
    y1 = jax.random.uniform(ks[2], (R,), minval=0.0, maxval=img_h * 0.6)
    bw = jax.random.uniform(ks[3], (R,), minval=32.0, maxval=128.0)
    bh = jax.random.uniform(ks[4], (R,), minval=32.0, maxval=128.0)
    rois = jnp.stack(
        [x1, y1,
         jnp.clip(x1 + bw, 0.0, img_w - 1.0),
         jnp.clip(y1 + bh, 0.0, img_h - 1.0)], axis=1).astype(jnp.float32)

    K1 = C * 7 * 7  # 25088
    torch_params = {
        # PyTorch layout: (out_features, in_features)
        "cls_fc1.weight": jax.random.normal(ks[5], (4096, K1), jnp.float32) * 0.01,
        "cls_fc1.bias": jax.random.normal(ks[6], (4096,), jnp.float32) * 0.01,
        "cls_fc2.weight": jax.random.normal(ks[7], (4096, 4096), jnp.float32) * 0.01,
        "cls_fc2.bias": jax.random.normal(ks[8], (4096,), jnp.float32) * 0.01,
        "bbox.weight": jax.random.normal(ks[9], (n_class * 4, 4096), jnp.float32) * 0.01,
        "bbox.bias": jnp.zeros((n_class * 4,), jnp.float32),
        "cls_score.weight": jax.random.normal(ks[10], (n_class, 4096), jnp.float32) * 0.01,
        "cls_score.bias": jnp.zeros((n_class,), jnp.float32),
    }
    params = prepare_params(torch_params, n_class, C=C)

    cls_score, bbox = cls_layer_forward(features, rois, params, spatial_scale, n_class)
    jax.block_until_ready((cls_score, bbox))

    assert cls_score.shape == (R, n_class)
    assert bbox.shape == (R, n_class * 4)
    assert bool(jnp.all(jnp.isfinite(cls_score))) and bool(jnp.all(jnp.isfinite(bbox)))
    print("KERNEL_OK")
</pallas_src>

<mosaic_0001>
module attributes {stable_mosaic.version = 11 : i64} {
  func.func @_roi_pool_kernel(%arg0: i32, %arg1: memref<112xi32, #tpu.memory_space<smem>>, %arg2: memref<112xi32, #tpu.memory_space<smem>>, %arg3: memref<112xi32, #tpu.memory_space<smem>>, %arg4: memref<112xi32, #tpu.memory_space<smem>>, %arg5: memref<16x16x512xf32, #tpu.memory_space<vmem>>, %arg6: memref<8x49x512xbf16, #tpu.memory_space<vmem>>, %arg7: memref<8x49x512xf32, #tpu.memory_space<vmem>>) attributes {dimension_semantics = [#tpu.dimension_semantics<parallel>], iteration_bounds = array<i64: 2>, scalar_prefetch = 4 : i64, scratch_operands = 1 : i64, tpu.core_type = #tpu.core_type<tc>, window_params = [{pipeline_mode = #tpu.pipeline_mode<synchronous>, transform_indices = @transform_0, window_bounds = array<i64: 16, 16, 512>}, {transform_indices = @transform_1, window_bounds = array<i64: 8, 49, 512>}]} {
    %0 = tpu.iota {dimensions = array<i32: 0>} : vector<16x1xi32>
    %cst = arith.constant 0xFF800000 : f32
    %c0_i32 = arith.constant 0 : i32
    %c8_i32 = arith.constant 8 : i32
    %1 = arith.addi %c0_i32, %c8_i32 : i32
    %c1_i32 = arith.constant 1 : i32
    scf.for %arg8 = %c0_i32 to %1 step %c1_i32  : i32 {
      %c8_i32_6 = arith.constant 8 : i32
      %5 = arith.muli %arg0, %c8_i32_6 : i32
      %6 = arith.addi %5, %arg8 : i32
      %c7_i32 = arith.constant 7 : i32
      %7 = arith.muli %6, %c7_i32 : i32
      %c0_i32_7 = arith.constant 0 : i32
      %8 = arith.addi %7, %c0_i32_7 : i32
      %9 = arith.index_cast %8 : i32 to index
      %10 = memref.load %arg1[%9] : memref<112xi32, #tpu.memory_space<smem>>
      %c7_i32_8 = arith.constant 7 : i32
      %11 = arith.muli %6, %c7_i32_8 : i32
      %c0_i32_9 = arith.constant 0 : i32
      %12 = arith.addi %11, %c0_i32_9 : i32
      %13 = arith.index_cast %12 : i32 to index
      %14 = memref.load %arg2[%13] : memref<112xi32, #tpu.memory_space<smem>>
      %15 = vector.broadcast %cst : f32 to vector<16x512xf32>
      %16 = arith.subi %14, %10 : i32
      %17 = arith.addi %10, %16 : i32
      %c1_i32_10 = arith.constant 1 : i32
      %18 = scf.for %arg9 = %10 to %17 step %c1_i32_10 iter_args(%arg10 = %15) -> (vector<16x512xf32>)  : i32 {
        %1246 = arith.index_cast %arg9 : i32 to index
        %c0_338 = arith.constant 0 : index
        %c0_339 = arith.constant 0 : index
        %1247 = vector.load %arg5[%1246, %c0_338, %c0_339] : memref<16x16x512xf32, #tpu.memory_space<vmem>>, vector<1x16x512xf32>
        %1248 = vector.shape_cast %1247 : vector<1x16x512xf32> to vector<16x512xf32>
        %1249 = arith.maximumf %arg10, %1248 : vector<16x512xf32>
        scf.yield %1249 : vector<16x512xf32>
      }
      %c7_i32_11 = arith.constant 7 : i32
      %19 = arith.muli %6, %c7_i32_11 : i32
      %c0_i32_12 = arith.constant 0 : i32
      %20 = arith.addi %19, %c0_i32_12 : i32
      %21 = arith.index_cast %20 : i32 to index
      %22 = memref.load %arg3[%21] : memref<112xi32, #tpu.memory_space<smem>>
      %c7_i32_13 = arith.constant 7 : i32
      %23 = arith.muli %6, %c7_i32_13 : i32
      %c0_i32_14 = arith.constant 0 : i32
      %24 = arith.addi %23, %c0_i32_14 : i32
      %25 = arith.index_cast %24 : i32 to index
      %26 = memref.load %arg4[%25] : memref<112xi32, #tpu.memory_space<smem>>
      %27 = vector.broadcast %22 : i32 to vector<16x1xi32>
      %28 = arith.cmpi sge, %0, %27 : vector<16x1xi32>
      %29 = vector.broadcast %26 : i32 to vector<16x1xi32>
      %30 = arith.cmpi slt, %0, %29 : vector<16x1xi32>
      %31 = arith.andi %28, %30 : vector<16x1xi1>
      %32 = vector.shape_cast %31 : vector<16x1xi1> to vector<16x1xi1>
      %33 = vector.broadcast %32 : vector<16x1xi1> to vector<16x512xi1>
      %34 = vector.broadcast %cst : f32 to vector<16x512xf32>
      %35 = arith.select %33, %18, %34 : vector<16x512xi1>, vector<16x512xf32>
      %cst_15 = arith.constant dense<0xFF800000> : vector<512xf32>
      %36 = vector.multi_reduction <maximumf>, %35, %cst_15 [0] : vector<16x512xf32> to vector<512xf32>
      %37 = vector.shape_cast %36 : vector<512xf32> to vector<1x512xf32>
      %38 = vector.broadcast %cst : f32 to vector<1x512xf32>
      %39 = arith.cmpf oeq, %37, %38 : vector<1x512xf32>
      %cst_16 = arith.constant 0.000000e+00 : f32
      %40 = vector.broadcast %cst_16 : f32 to vector<1x512xf32>
      %41 = arith.select %39, %40, %37 : vector<1x512xi1>, vector<1x512xf32>
      %c7_i32_17 = arith.constant 7 : i32
      %42 = arith.muli %6, %c7_i32_17 : i32
      %c1_i32_18 = arith.constant 1 : i32
      %43 = arith.addi %42, %c1_i32_18 : i32
      %44 = arith.index_cast %43 : i32 to index
      %45 = memref.load %arg3[%44] : memref<112xi32, #tpu.memory_space<smem>>
      %c7_i32_19 = arith.constant 7 : i32
      %46 = arith.muli %6, %c7_i32_19 : i32
      %c1_i32_20 = arith.constant 1 : i32
      %47 = arith.addi %46, %c1_i32_20 : i32
      %48 = arith.index_cast %47 : i32 to index
      %49 = memref.load %arg4[%48] : memref<112xi32, #tpu.memory_space<smem>>
      %50 = vector.broadcast %45 : i32 to vector<16x1xi32>
      %51 = arith.cmpi sge, %0, %50 : vector<16x1xi32>
      %52 = vector.broadcast %49 : i32 to vector<16x1xi32>
      %53 = arith.cmpi slt, %0, %52 : vector<16x1xi32>
      %54 = arith.andi %51, %53 : vector<16x1xi1>
      %55 = vector.shape_cast %54 : vector<16x1xi1> to vector<16x1xi1>
      %56 = vector.broadcast %55 : vector<16x1xi1> to vector<16x512xi1>
      %57 = vector.broadcast %cst : f32 to vector<16x512xf32>
      %58 = arith.select %56, %18, %57 : vector<16x512xi1>, vector<16x512xf32>
      %cst_21 = arith.constant dense<0xFF800000> : vector<512xf32>
      %59 = vector.multi_reduction <maximumf>, %58, %cst_21 [0] : vector<16x512xf32> to vector<512xf32>
      %60 = vector.shape_cast %59 : vector<512xf32> to vector<1x512xf32>
      %61 = vector.broadcast %cst : f32 to vector<1x512xf32>
      %62 = arith.cmpf oeq, %60, %61 : vector<1x512xf32>
      %cst_22 = arith.constant 0.000000e+00 : f32
      %63 = vector.broadcast %cst_22 : f32 to vector<1x512xf32>
      %64 = arith.select %62, %63, %60 : vector<1x512xi1>, vector<1x512xf32>
      %c7_i32_23 = arith.constant 7 : i32
      %65 = arith.muli %6, %c7_i32_23 : i32
      %c2_i32 = arith.constant 2 : i32
      %66 = arith.addi %65, %c2_i32 : i32
      %67 = arith.index_cast %66 : i32 to index
      %68 = memref.load %arg3[%67] : memref<112xi32, #tpu.memory_space<smem>>
      %c7_i32_24 = arith.constant 7 : i32
      %69 = arith.muli %6, %c7_i32_24 : i32
      %c2_i32_25 = arith.constant 2 : i32
      %70 = arith.addi %69, %c2_i32_25 : i32
      %71 = arith.index_cast %70 : i32 to index
      %72 = memref.load %arg4[%71] : memref<112xi32, #tpu.memory_space<smem>>
      %73 = vector.broadcast %68 : i32 to vector<16x1xi32>
      %74 = arith.cmpi sge, %0, %73 : vector<16x1xi32>
      %75 = vector.broadcast %72 : i32 to vector<16x1xi32>
      %76 = arith.cmpi slt, %0, %75 : vector<16x1xi32>
      %77 = arith.andi %74, %76 : vector<16x1xi1>
      %78 = vector.shape_cast %77 : vector<16x1xi1> to vector<16x1xi1>
      %79 = vector.broadcast %78 : vector<16x1xi1> to vector<16x512xi1>
      %80 = vector.broadcast %cst : f32 to vector<16x512xf32>
      %81 = arith.select %79, %18, %80 : vector<16x512xi1>, vector<16x512xf32>
      %cst_26 = arith.constant dense<0xFF800000> : vector<512xf32>
      %82 = vector.multi_reduction <maximumf>, %81, %cst_26 [0] : vector<16x512xf32> to vector<512xf32>
      %83 = vector.shape_cast %82 : vector<512xf32> to vector<1x512xf32>
      %84 = vector.broadcast %cst : f32 to vector<1x512xf32>
      %85 = arith.cmpf oeq, %83, %84 : vector<1x512xf32>
      %cst_27 = arith.constant 0.000000e+00 : f32
      %86 = vector.broadcast %cst_27 : f32 to vector<1x512xf32>
      %87 = arith.select %85, %86, %83 : vector<1x512xi1>, vector<1x512xf32>
      %c7_i32_28 = arith.constant 7 : i32
      %88 = arith.muli %6, %c7_i32_28 : i32
      %c3_i32 = arith.constant 3 : i32
      %89 = arith.addi %88, %c3_i32 : i32
      %90 = arith.index_cast %89 : i32 to index
      %91 = memref.load %arg3[%90] : memref<112xi32, #tpu.memory_space<smem>>
      %c7_i32_29 = arith.constant 7 : i32
      %92 = arith.muli %6, %c7_i32_29 : i32
      %c3_i32_30 = arith.constant 3 : i32
      %93 = arith.addi %92, %c3_i32_30 : i32
      %94 = arith.index_cast %93 : i32 to index
      %95 = memref.load %arg4[%94] : memref<112xi32, #tpu.memory_space<smem>>
      %96 = vector.broadcast %91 : i32 to vector<16x1xi32>
      %97 = arith.cmpi sge, %0, %96 : vector<16x1xi32>
      %98 = vector.broadcast %95 : i32 to vector<16x1xi32>
      %99 = arith.cmpi slt, %0, %98 : vector<16x1xi32>
      %100 = arith.andi %97, %99 : vector<16x1xi1>
      %101 = vector.shape_cast %100 : vector<16x1xi1> to vector<16x1xi1>
      %102 = vector.broadcast %101 : vector<16x1xi1> to vector<16x512xi1>
      %103 = vector.broadcast %cst : f32 to vector<16x512xf32>
      %104 = arith.select %102, %18, %103 : vector<16x512xi1>, vector<16x512xf32>
      %cst_31 = arith.constant dense<0xFF800000> : vector<512xf32>
      %105 = vector.multi_reduction <maximumf>, %104, %cst_31 [0] : vector<16x512xf32> to vector<512xf32>
      %106 = vector.shape_cast %105 : vector<512xf32> to vector<1x512xf32>
      %107 = vector.broadcast %cst : f32 to vector<1x512xf32>
      %108 = arith.cmpf oeq, %106, %107 : vector<1x512xf32>
      %cst_32 = arith.constant 0.000000e+00 : f32
      %109 = vector.broadcast %cst_32 : f32 to vector<1x512xf32>
      %110 = arith.select %108, %109, %106 : vector<1x512xi1>, vector<1x512xf32>
      %c7_i32_33 = arith.constant 7 : i32
      %111 = arith.muli %6, %c7_i32_33 : i32
      %c4_i32 = arith.constant 4 : i32
      %112 = arith.addi %111, %c4_i32 : i32
      %113 = arith.index_cast %112 : i32 to index
      %114 = memref.load %arg3[%113] : memref<112xi32, #tpu.memory_space<smem>>
      %c7_i32_34 = arith.constant 7 : i32
      %115 = arith.muli %6, %c7_i32_34 : i32
      %c4_i32_35 = arith.constant 4 : i32
      %116 = arith.addi %115, %c4_i32_35 : i32
      %117 = arith.index_cast %116 : i32 to index
      %118 = memref.load %arg4[%117] : memref<112xi32, #tpu.memory_space<smem>>
      %119 = vector.broadcast %114 : i32 to vector<16x1xi32>
      %120 = arith.cmpi sge, %0, %119 : vector<16x1xi32>
      %121 = vector.broadcast %118 : i32 to vector<16x1xi32>
      %122 = arith.cmpi slt, %0, %121 : vector<16x1xi32>
      %123 = arith.andi %120, %122 : vector<16x1xi1>
      %124 = vector.shape_cast %123 : vector<16x1xi1> to vector<16x1xi1>
      %125 = vector.broadcast %124 : vector<16x1xi1> to vector<16x512xi1>
      %126 = vector.broadcast %cst : f32 to vector<16x512xf32>
      %127 = arith.select %125, %18, %126 : vector<16x512xi1>, vector<16x512xf32>
      %cst_36 = arith.constant dense<0xFF800000> : vector<512xf32>
      %128 = vector.multi_reduction <maximumf>, %127, %cst_36 [0] : vector<16x512xf32> to vector<512xf32>
      %129 = vector.shape_cast %128 : vector<512xf32> to vector<1x512xf32>
      %130 = vector.broadcast %cst : f32 to vector<1x512xf32>
      %131 = arith.cmpf oeq, %129, %130 : vector<1x512xf32>
      %cst_37 = arith.constant 0.000000e+00 : f32
      %132 = vector.broadcast %cst_37 : f32 to vector<1x512xf32>
      %133 = arith.select %131, %132, %129 : vector<1x512xi1>, vector<1x512xf32>
      %c7_i32_38 = arith.constant 7 : i32
      %134 = arith.muli %6, %c7_i32_38 : i32
      %c5_i32 = arith.constant 5 : i32
      %135 = arith.addi %134, %c5_i32 : i32
      %136 = arith.index_cast %135 : i32 to index
      %137 = memref.load %arg3[%136] : memref<112xi32, #tpu.memory_space<smem>>
      %c7_i32_39 = arith.constant 7 : i32
      %138 = arith.muli %6, %c7_i32_39 : i32
      %c5_i32_40 = arith.constant 5 : i32
      %139 = arith.addi %138, %c5_i32_40 : i32
      %140 = arith.index_cast %139 : i32 to index
      %141 = memref.load %arg4[%140] : memref<112xi32, #tpu.memory_space<smem>>
      %142 = vector.broadcast %137 : i32 to vector<16x1xi32>
      %143 = arith.cmpi sge, %0, %142 : vector<16x1xi32>
      %144 = vector.broadcast %141 : i32 to vector<16x1xi32>
      %145 = arith.cmpi slt, %0, %144 : vector<16x1xi32>
      %146 = arith.andi %143, %145 : vector<16x1xi1>
      %147 = vector.shape_cast %146 : vector<16x1xi1> to vector<16x1xi1>
      %148 = vector.broadcast %147 : vector<16x1xi1> to vector<16x512xi1>
      %149 = vector.broadcast %cst : f32 to vector<16x512xf32>
      %150 = arith.select %148, %18, %149 : vector<16x512xi1>, vector<16x512xf32>
      %cst_41 = arith.constant dense<0xFF800000> : vector<512xf32>
      %151 = vector.multi_reduction <maximumf>, %150, %cst_41 [0] : vector<16x512xf32> to vector<512xf32>
      %152 = vector.shape_cast %151 : vector<512xf32> to vector<1x512xf32>
      %153 = vector.broadcast %cst : f32 to vector<1x512xf32>
      %154 = arith.cmpf oeq, %152, %153 : vector<1x512xf32>
      %cst_42 = arith.constant 0.000000e+00 : f32
      %155 = vector.broadcast %cst_42 : f32 to vector<1x512xf32>
      %156 = arith.select %154, %155, %152 : vector<1x512xi1>, vector<1x512xf32>
      %c7_i32_43 = arith.constant 7 : i32
      %157 = arith.muli %6, %c7_i32_43 : i32
      %c6_i32 = arith.constant 6 : i32
      %158 = arith.addi %157, %c6_i32 : i32
      %159 = arith.index_cast %158 : i32 to index
      %160 = memref.load %arg3[%159] : memref<112xi32, #tpu.memory_space<smem>>
      %c7_i32_44 = arith.constant 7 : i32
      %161 = arith.muli %6, %c7_i32_44 : i32
      %c6_i32_45 = arith.constant 6 : i32
      %162 = arith.addi %161, %c6_i32_45 : i32
      %163 = arith.index_cast %162 : i32 to index
      %164 = memref.load %arg4[%163] : memref<112xi32, #tpu.memory_space<smem>>
      %165 = vector.broadcast %160 : i32 to vector<16x1xi32>
      %166 = arith.cmpi sge, %0, %165 : vector<16x1xi32>
      %167 = vector.broadcast %164 : i32 to vector<16x1xi32>
      %168 = arith.cmpi slt, %0, %167 : vector<16x1xi32>
      %169 = arith.andi %166, %168 : vector<16x1xi1>
      %170 = vector.shape_cast %169 : vector<16x1xi1> to vector<16x1xi1>
      %171 = vector.broadcast %170 : vector<16x1xi1> to vector<16x512xi1>
      %172 = vector.broadcast %cst : f32 to vector<16x512xf32>
      %173 = arith.select %171, %18, %172 : vector<16x512xi1>, vector<16x512xf32>
      %cst_46 = arith.constant dense<0xFF800000> : vector<512xf32>
      %174 = vector.multi_reduction <maximumf>, %173, %cst_46 [0] : vector<16x512xf32> to vector<512xf32>
      %175 = vector.shape_cast %174 : vector<512xf32> to vector<1x512xf32>
      %176 = vector.broadcast %cst : f32 to vector<1x512xf32>
      %177 = arith.cmpf oeq, %175, %176 : vector<1x512xf32>
      %cst_47 = arith.constant 0.000000e+00 : f32
      %178 = vector.broadcast %cst_47 : f32 to vector<1x512xf32>
      %179 = arith.select %177, %178, %175 : vector<1x512xi1>, vector<1x512xf32>
      %180 = tpu.concatenate %41, %64, %87, %110, %133, %156, %179 in 0 : vector<1x512xf32>, vector<1x512xf32>, vector<1x512xf32>, vector<1x512xf32>, vector<1x512xf32>, vector<1x512xf32>, vector<1x512xf32> -> vector<7x512xf32>
      %181 = vector.shape_cast %180 : vector<7x512xf32> to vector<1x7x512xf32>
      %182 = arith.index_cast %arg8 : i32 to index
      %c0_48 = arith.constant 0 : index
      %c0_49 = arith.constant 0 : index
      %183 = vector.load %arg7[%182, %c0_48, %c0_49] : memref<8x49x512xf32, #tpu.memory_space<vmem>>, vector<1x7x512xf32>
      tpu.vector_store %arg7[%182, %c0_48, %c0_49], %181 {strides = array<i32>} : memref<8x49x512xf32, #tpu.memory_space<vmem>>, vector<1x7x512xf32>,
      %c7_i32_50 = arith.constant 7 : i32
      %184 = arith.muli %6, %c7_i32_50 : i32
      %c1_i32_51 = arith.constant 1 : i32
      %185 = arith.addi %184, %c1_i32_51 : i32
      %186 = arith.index_cast %185 : i32 to index
      %187 = memref.load %arg1[%186] : memref<112xi32, #tpu.memory_space<smem>>
      %c7_i32_52 = arith.constant 7 : i32
      %188 = arith.muli %6, %c7_i32_52 : i32
      %c1_i32_53 = arith.constant 1 : i32
      %189 = arith.addi %188, %c1_i32_53 : i32
      %190 = arith.index_cast %189 : i32 to index
      %191 = memref.load %arg2[%190] : memref<112xi32, #tpu.memory_space<smem>>
      %192 = vector.broadcast %cst : f32 to vector<16x512xf32>
      %193 = arith.subi %191, %187 : i32
      %194 = arith.addi %187, %193 : i32
      %c1_i32_54 = arith.constant 1 : i32
      %195 = scf.for %arg9 = %187 to %194 step %c1_i32_54 iter_args(%arg10 = %192) -> (vector<16x512xf32>)  : i32 {
        %1246 = arith.index_cast %arg9 : i32 to index
        %c0_338 = arith.constant 0 : index
        %c0_339 = arith.constant 0 : index
        %1247 = vector.load %arg5[%1246, %c0_338, %c0_339] : memref<16x16x512xf32, #tpu.memory_space<vmem>>, vector<1x16x512xf32>
        %1248 = vector.shape_cast %1247 : vector<1x16x512xf32> to vector<16x512xf32>
        %1249 = arith.maximumf %arg10, %1248 : vector<16x512xf32>
        scf.yield %1249 : vector<16x512xf32>
      }
      %c7_i32_55 = arith.constant 7 : i32
      %196 = arith.muli %6, %c7_i32_55 : i32
      %c0_i32_56 = arith.constant 0 : i32
      %197 = arith.addi %196, %c0_i32_56 : i32
      %198 = arith.index_cast %197 : i32 to index
      %199 = memref.load %arg3[%198] : memref<112xi32, #tpu.memory_space<smem>>
      %c7_i32_57 = arith.constant 7 : i32
      %200 = arith.muli %6, %c7_i32_57 : i32
      %c0_i32_58 = arith.constant 0 : i32
      %201 = arith.addi %200, %c0_i32_58 : i32
      %202 = arith.index_cast %201 : i32 to index
      %203 = memref.load %arg4[%202] : memref<112xi32, #tpu.memory_space<smem>>
      %204 = vector.broadcast %199 : i32 to vector<16x1xi32>
      %205 = arith.cmpi sge, %0, %204 : vector<16x1xi32>
      %206 = vector.broadcast %203 : i32 to vector<16x1xi32>
      %207 = arith.cmpi slt, %0, %206 : vector<16x1xi32>
      %208 = arith.andi %205, %207 : vector<16x1xi1>
      %209 = vector.shape_cast %208 : vector<16x1xi1> to vector<16x1xi1>
      %210 = vector.broadcast %209 : vector<16x1xi1> to vector<16x512xi1>
      %211 = vector.broadcast %cst : f32 to vector<16x512xf32>
      %212 = arith.select %210, %195, %211 : vector<16x512xi1>, vector<16x512xf32>
      %cst_59 = arith.constant dense<0xFF800000> : vector<512xf32>
      %213 = vector.multi_reduction <maximumf>, %212, %cst_59 [0] : vector<16x512xf32> to vector<512xf32>
      %214 = vector.shape_cast %213 : vector<512xf32> to vector<1x512xf32>
      %215 = vector.broadcast %cst : f32 to vector<1x512xf32>
      %216 = arith.cmpf oeq, %214, %215 : vector<1x512xf32>
      %cst_60 = arith.constant 0.000000e+00 : f32
      %217 = vector.broadcast %cst_60 : f32 to vector<1x512xf32>
      %218 = arith.select %216, %217, %214 : vector<1x512xi1>, vector<1x512xf32>
      %c7_i32_61 = arith.constant 7 : i32
      %219 = arith.muli %6, %c7_i32_61 : i32
      %c1_i32_62 = arith.constant 1 : i32
      %220 = arith.addi %219, %c1_i32_62 : i32
      %221 = arith.index_cast %220 : i32 to index
      %222 = memref.load %arg3[%221] : memref<112xi32, #tpu.memory_space<smem>>
      %c7_i32_63 = arith.constant 7 : i32
      %223 = arith.muli %6, %c7_i32_63 : i32
      %c1_i32_64 = arith.constant 1 : i32
      %224 = arith.addi %223, %c1_i32_64 : i32
      %225 = arith.index_cast %224 : i32 to index
      %226 = memref.load %arg4[%225] : memref<112xi32, #tpu.memory_space<smem>>
      %227 = vector.broadcast %222 : i32 to vector<16x1xi32>
      %228 = arith.cmpi sge, %0, %227 : vector<16x1xi32>
      %229 = vector.broadcast %226 : i32 to vector<16x1xi32>
      %230 = arith.cmpi slt, %0, %229 : vector<16x1xi32>
      %231 = arith.andi %228, %230 : vector<16x1xi1>
      %232 = vector.shape_cast %231 : vector<16x1xi1> to vector<16x1xi1>
      %233 = vector.broadcast %232 : vector<16x1xi1> to vector<16x512xi1>
      %234 = vector.broadcast %cst : f32 to vector<16x512xf32>
      %235 = arith.select %233, %195, %234 : vector<16x512xi1>, vector<16x512xf32>
      %cst_65 = arith.constant dense<0xFF800000> : vector<512xf32>
      %236 = vector.multi_reduction <maximumf>, %235, %cst_65 [0] : vector<16x512xf32> to vector<512xf32>
      %237 = vector.shape_cast %236 : vector<512xf32> to vector<1x512xf32>
      %238 = vector.broadcast %cst : f32 to vector<1x512xf32>
      %239 = arith.cmpf oeq, %237, %238 : vector<1x512xf32>
      %cst_66 = arith.constant 0.000000e+00 : f32
      %240 = vector.broadcast %cst_66 : f32 to vector<1x512xf32>
      %241 = arith.select %239, %240, %237 : vector<1x512xi1>, vector<1x512xf32>
      %c7_i32_67 = arith.constant 7 : i32
      %242 = arith.muli %6, %c7_i32_67 : i32
      %c2_i32_68 = arith.constant 2 : i32
      %243 = arith.addi %242, %c2_i32_68 : i32
      %244 = arith.index_cast %243 : i32 to index
      %245 = memref.load %arg3[%244] : memref<112xi32, #tpu.memory_space<smem>>
      %c7_i32_69 = arith.constant 7 : i32
      %246 = arith.muli %6, %c7_i32_69 : i32
      %c2_i32_70 = arith.constant 2 : i32
      %247 = arith.addi %246, %c2_i32_70 : i32
      %248 = arith.index_cast %247 : i32 to index
      %249 = memref.load %arg4[%248] : memref<112xi32, #tpu.memory_space<smem>>
      %250 = vector.broadcast %245 : i32 to vector<16x1xi32>
      %251 = arith.cmpi sge, %0, %250 : vector<16x1xi32>
      %252 = vector.broadcast %249 : i32 to vector<16x1xi32>
      %253 = arith.cmpi slt, %0, %252 : vector<16x1xi32>
      %254 = arith.andi %251, %253 : vector<16x1xi1>
      %255 = vector.shape_cast %254 : vector<16x1xi1> to vector<16x1xi1>
      %256 = vector.broadcast %255 : vector<16x1xi1> to vector<16x512xi1>
      %257 = vector.broadcast %cst : f32 to vector<16x512xf32>
      %258 = arith.select %256, %195, %257 : vector<16x512xi1>, vector<16x512xf32>
      %cst_71 = arith.constant dense<0xFF800000> : vector<512xf32>
      %259 = vector.multi_reduction <maximumf>, %258, %cst_71 [0] : vector<16x512xf32> to vector<512xf32>
      %260 = vector.shape_cast %259 : vector<512xf32> to vector<1x512xf32>
      %261 = vector.broadcast %cst : f32 to vector<1x512xf32>
      %262 = arith.cmpf oeq, %260, %261 : vector<1x512xf32>
      %cst_72 = arith.constant 0.000000e+00 : f32
      %263 = vector.broadcast %cst_72 : f32 to vector<1x512xf32>
      %264 = arith.select %262, %263, %260 : vector<1x512xi1>, vector<1x512xf32>
      %c7_i32_73 = arith.constant 7 : i32
      %265 = arith.muli %6, %c7_i32_73 : i32
      %c3_i32_74 = arith.constant 3 : i32
      %266 = arith.addi %265, %c3_i32_74 : i32
      %267 = arith.index_cast %266 : i32 to index
      %268 = memref.load %arg3[%267] : memref<112xi32, #tpu.memory_space<smem>>
      %c7_i32_75 = arith.constant 7 : i32
      %269 = arith.muli %6, %c7_i32_75 : i32
      %c3_i32_76 = arith.constant 3 : i32
      %270 = arith.addi %269, %c3_i32_76 : i32
      %271 = arith.index_cast %270 : i32 to index
      %272 = memref.load %arg4[%271] : memref<112xi32, #tpu.memory_space<smem>>
      %273 = vector.broadcast %268 : i32 to vector<16x1xi32>
      %274 = arith.cmpi sge, %0, %273 : vector<16x1xi32>
      %275 = vector.broadcast %272 : i32 to vector<16x1xi32>
      %276 = arith.cmpi slt, %0, %275 : vector<16x1xi32>
      %277 = arith.andi %274, %276 : vector<16x1xi1>
      %278 = vector.shape_cast %277 : vector<16x1xi1> to vector<16x1xi1>
      %279 = vector.broadcast %278 : vector<16x1xi1> to vector<16x512xi1>
      %280 = vector.broadcast %cst : f32 to vector<16x512xf32>
      %281 = arith.select %279, %195, %280 : vector<16x512xi1>, vector<16x512xf32>
      %cst_77 = arith.constant dense<0xFF800000> : vector<512xf32>
      %282 = vector.multi_reduction <maximumf>, %281, %cst_77 [0] : vector<16x512xf32> to vector<512xf32>
      %283 = vector.shape_cast %282 : vector<512xf32> to vector<1x512xf32>
      %284 = vector.broadcast %cst : f32 to vector<1x512xf32>
      %285 = arith.cmpf oeq, %283, %284 : vector<1x512xf32>
      %cst_78 = arith.constant 0.000000e+00 : f32
      %286 = vector.broadcast %cst_78 : f32 to vector<1x512xf32>
      %287 = arith.select %285, %286, %283 : vector<1x512xi1>, vector<1x512xf32>
      %c7_i32_79 = arith.constant 7 : i32
      %288 = arith.muli %6, %c7_i32_79 : i32
      %c4_i32_80 = arith.constant 4 : i32
      %289 = arith.addi %288, %c4_i32_80 : i32
      %290 = arith.index_cast %289 : i32 to index
      %291 = memref.load %arg3[%290] : memref<112xi32, #tpu.memory_space<smem>>
      %c7_i32_81 = arith.constant 7 : i32
      %292 = arith.muli %6, %c7_i32_81 : i32
      %c4_i32_82 = arith.constant 4 : i32
      %293 = arith.addi %292, %c4_i32_82 : i32
      %294 = arith.index_cast %293 : i32 to index
      %295 = memref.load %arg4[%294] : memref<112xi32, #tpu.memory_space<smem>>
      %296 = vector.broadcast %291 : i32 to vector<16x1xi32>
      %297 = arith.cmpi sge, %0, %296 : vector<16x1xi32>
      %298 = vector.broadcast %295 : i32 to vector<16x1xi32>
      %299 = arith.cmpi slt, %0, %298 : vector<16x1xi32>
      %300 = arith.andi %297, %299 : vector<16x1xi1>
      %301 = vector.shape_cast %300 : vector<16x1xi1> to vector<16x1xi1>
      %302 = vector.broadcast %301 : vector<16x1xi1> to vector<16x512xi1>
      %303 = vector.broadcast %cst : f32 to vector<16x512xf32>
      %304 = arith.select %302, %195, %303 : vector<16x512xi1>, vector<16x512xf32>
      %cst_83 = arith.constant dense<0xFF800000> : vector<512xf32>
      %305 = vector.multi_reduction <maximumf>, %304, %cst_83 [0] : vector<16x512xf32> to vector<512xf32>
      %306 = vector.shape_cast %305 : vector<512xf32> to vector<1x512xf32>
      %307 = vector.broadcast %cst : f32 to vector<1x512xf32>
      %308 = arith.cmpf oeq, %306, %307 : vector<1x512xf32>
      %cst_84 = arith.constant 0.000000e+00 : f32
      %309 = vector.broadcast %cst_84 : f32 to vector<1x512xf32>
      %310 = arith.select %308, %309, %306 : vector<1x512xi1>, vector<1x512xf32>
      %c7_i32_85 = arith.constant 7 : i32
      %311 = arith.muli %6, %c7_i32_85 : i32
      %c5_i32_86 = arith.constant 5 : i32
      %312 = arith.addi %311, %c5_i32_86 : i32
      %313 = arith.index_cast %312 : i32 to index
      %314 = memref.load %arg3[%313] : memref<112xi32, #tpu.memory_space<smem>>
      %c7_i32_87 = arith.constant 7 : i32
      %315 = arith.muli %6, %c7_i32_87 : i32
      %c5_i32_88 = arith.constant 5 : i32
      %316 = arith.addi %315, %c5_i32_88 : i32
      %317 = arith.index_cast %316 : i32 to index
      %318 = memref.load %arg4[%317] : memref<112xi32, #tpu.memory_space<smem>>
      %319 = vector.broadcast %314 : i32 to vector<16x1xi32>
      %320 = arith.cmpi sge, %0, %319 : vector<16x1xi32>
      %321 = vector.broadcast %318 : i32 to vector<16x1xi32>
      %322 = arith.cmpi slt, %0, %321 : vector<16x1xi32>
      %323 = arith.andi %320, %322 : vector<16x1xi1>
      %324 = vector.shape_cast %323 : vector<16x1xi1> to vector<16x1xi1>
      %325 = vector.broadcast %324 : vector<16x1xi1> to vector<16x512xi1>
      %326 = vector.broadcast %cst : f32 to vector<16x512xf32>
      %327 = arith.select %325, %195, %326 : vector<16x512xi1>, vector<16x512xf32>
      %cst_89 = arith.constant dense<0xFF800000> : vector<512xf32>
      %328 = vector.multi_reduction <maximumf>, %327, %cst_89 [0] : vector<16x512xf32> to vector<512xf32>
      %329 = vector.shape_cast %328 : vector<512xf32> to vector<1x512xf32>
      %330 = vector.broadcast %cst : f32 to vector<1x512xf32>
      %331 = arith.cmpf oeq, %329, %330 : vector<1x512xf32>
      %cst_90 = arith.constant 0.000000e+00 : f32
      %332 = vector.broadcast %cst_90 : f32 to vector<1x512xf32>
      %333 = arith.select %331, %332, %329 : vector<1x512xi1>, vector<1x512xf32>
      %c7_i32_91 = arith.constant 7 : i32
      %334 = arith.muli %6, %c7_i32_91 : i32
      %c6_i32_92 = arith.constant 6 : i32
      %335 = arith.addi %334, %c6_i32_92 : i32
      %336 = arith.index_cast %335 : i32 to index
      %337 = memref.load %arg3[%336] : memref<112xi32, #tpu.memory_space<smem>>
      %c7_i32_93 = arith.constant 7 : i32
      %338 = arith.muli %6, %c7_i32_93 : i32
      %c6_i32_94 = arith.constant 6 : i32
      %339 = arith.addi %338, %c6_i32_94 : i32
      %340 = arith.index_cast %339 : i32 to index
      %341 = memref.load %arg4[%340] : memref<112xi32, #tpu.memory_space<smem>>
      %342 = vector.broadcast %337 : i32 to vector<16x1xi32>
      %343 = arith.cmpi sge, %0, %342 : vector<16x1xi32>
      %344 = vector.broadcast %341 : i32 to vector<16x1xi32>
      %345 = arith.cmpi slt, %0, %344 : vector<16x1xi32>
      %346 = arith.andi %343, %345 : vector<16x1xi1>
      %347 = vector.shape_cast %346 : vector<16x1xi1> to vector<16x1xi1>
      %348 = vector.broadcast %347 : vector<16x1xi1> to vector<16x512xi1>
      %349 = vector.broadcast %cst : f32 to vector<16x512xf32>
      %350 = arith.select %348, %195, %349 : vector<16x512xi1>, vector<16x512xf32>
      %cst_95 = arith.constant dense<0xFF800000> : vector<512xf32>
      %351 = vector.multi_reduction <maximumf>, %350, %cst_95 [0] : vector<16x512xf32> to vector<512xf32>
      %352 = vector.shape_cast %351 : vector<512xf32> to vector<1x512xf32>
      %353 = vector.broadcast %cst : f32 to vector<1x512xf32>
      %354 = arith.cmpf oeq, %352, %353 : vector<1x512xf32>
      %cst_96 = arith.constant 0.000000e+00 : f32
      %355 = vector.broadcast %cst_96 : f32 to vector<1x512xf32>
      %356 = arith.select %354, %355, %352 : vector<1x512xi1>, vector<1x512xf32>
      %357 = tpu.concatenate %218, %241, %264, %287, %310, %333, %356 in 0 : vector<1x512xf32>, vector<1x512xf32>, vector<1x512xf32>, vector<1x512xf32>, vector<1x512xf32>, vector<1x512xf32>, vector<1x512xf32> -> vector<7x512xf32>
      %358 = vector.shape_cast %357 : vector<7x512xf32> to vector<1x7x512xf32>
      %359 = arith.index_cast %arg8 : i32 to index
      %c7 = arith.constant 7 : index
      %c0_97 = arith.constant 0 : index
      %360 = vector.load %arg7[%359, %c7, %c0_97] : memref<8x49x512xf32, #tpu.memory_space<vmem>>, vector<1x7x512xf32>
      tpu.vector_store %arg7[%359, %c7, %c0_97], %358 {strides = array<i32>} : memref<8x49x512xf32, #tpu.memory_space<vmem>>, vector<1x7x512xf32>,
      %c7_i32_98 = arith.constant 7 : i32
      %361 = arith.muli %6, %c7_i32_98 : i32
      %c2_i32_99 = arith.constant 2 : i32
      %362 = arith.addi %361, %c2_i32_99 : i32
      %363 = arith.index_cast %362 : i32 to index
      %364 = memref.load %arg1[%363] : memref<112xi32, #tpu.memory_space<smem>>
      %c7_i32_100 = arith.constant 7 : i32
      %365 = arith.muli %6, %c7_i32_100 : i32
      %c2_i32_101 = arith.constant 2 : i32
      %366 = arith.addi %365, %c2_i32_101 : i32
      %367 = arith.index_cast %366 : i32 to index
      %368 = memref.load %arg2[%367] : memref<112xi32, #tpu.memory_space<smem>>
      %369 = vector.broadcast %cst : f32 to vector<16x512xf32>
      %370 = arith.subi %368, %364 : i32
      %371 = arith.addi %364, %370 : i32
      %c1_i32_102 = arith.constant 1 : i32
      %372 = scf.for %arg9 = %364 to %371 step %c1_i32_102 iter_args(%arg10 = %369) -> (vector<16x512xf32>)  : i32 {
        %1246 = arith.index_cast %arg9 : i32 to index
        %c0_338 = arith.constant 0 : index
        %c0_339 = arith.constant 0 : index
        %1247 = vector.load %arg5[%1246, %c0_338, %c0_339] : memref<16x16x512xf32, #tpu.memory_space<vmem>>, vector<1x16x512xf32>
        %1248 = vector.shape_cast %1247 : vector<1x16x512xf32> to vector<16x512xf32>
        %1249 = arith.maximumf %arg10, %1248 : vector<16x512xf32>
        scf.yield %1249 : vector<16x512xf32>
      }
      %c7_i32_103 = arith.constant 7 : i32
      %373 = arith.muli %6, %c7_i32_103 : i32
      %c0_i32_104 = arith.constant 0 : i32
      %374 = arith.addi %373, %c0_i32_104 : i32
      %375 = arith.index_cast %374 : i32 to index
      %376 = memref.load %arg3[%375] : memref<112xi32, #tpu.memory_space<smem>>
      %c7_i32_105 = arith.constant 7 : i32
      %377 = arith.muli %6, %c7_i32_105 : i32
      %c0_i32_106 = arith.constant 0 : i32
      %378 = arith.addi %377, %c0_i32_106 : i32
      %379 = arith.index_cast %378 : i32 to index
      %380 = memref.load %arg4[%379] : memref<112xi32, #tpu.memory_space<smem>>
      %381 = vector.broadcast %376 : i32 to vector<16x1xi32>
      %382 = arith.cmpi sge, %0, %381 : vector<16x1xi32>
      %383 = vector.broadcast %380 : i32 to vector<16x1xi32>
      %384 = arith.cmpi slt, %0, %383 : vector<16x1xi32>
      %385 = arith.andi %382, %384 : vector<16x1xi1>
      %386 = vector.shape_cast %385 : vector<16x1xi1> to vector<16x1xi1>
      %387 = vector.broadcast %386 : vector<16x1xi1> to vector<16x512xi1>
      %388 = vector.broadcast %cst : f32 to vector<16x512xf32>
      %389 = arith.select %387, %372, %388 : vector<16x512xi1>, vector<16x512xf32>
      %cst_107 = arith.constant dense<0xFF800000> : vector<512xf32>
      %390 = vector.multi_reduction <maximumf>, %389, %cst_107 [0] : vector<16x512xf32> to vector<512xf32>
      %391 = vector.shape_cast %390 : vector<512xf32> to vector<1x512xf32>
      %392 = vector.broadcast %cst : f32 to vector<1x512xf32>
      %393 = arith.cmpf oeq, %391, %392 : vector<1x512xf32>
      %cst_108 = arith.constant 0.000000e+00 : f32
      %394 = vector.broadcast %cst_108 : f32 to vector<1x512xf32>
      %395 = arith.select %393, %394, %391 : vector<1x512xi1>, vector<1x512xf32>
      %c7_i32_109 = arith.constant 7 : i32
      %396 = arith.muli %6, %c7_i32_109 : i32
      %c1_i32_110 = arith.constant 1 : i32
      %397 = arith.addi %396, %c1_i32_110 : i32
      %398 = arith.index_cast %397 : i32 to index
      %399 = memref.load %arg3[%398] : memref<112xi32, #tpu.memory_space<smem>>
      %c7_i32_111 = arith.constant 7 : i32
      %400 = arith.muli %6, %c7_i32_111 : i32
      %c1_i32_112 = arith.constant 1 : i32
      %401 = arith.addi %400, %c1_i32_112 : i32
      %402 = arith.index_cast %401 : i32 to index
      %403 = memref.load %arg4[%402] : memref<112xi32, #tpu.memory_space<smem>>
      %404 = vector.broadcast %399 : i32 to vector<16x1xi32>
      %405 = arith.cmpi sge, %0, %404 : vector<16x1xi32>
      %406 = vector.broadcast %403 : i32 to vector<16x1xi32>
      %407 = arith.cmpi slt, %0, %406 : vector<16x1xi32>
      %408 = arith.andi %405, %407 : vector<16x1xi1>
      %409 = vector.shape_cast %408 : vector<16x1xi1> to vector<16x1xi1>
      %410 = vector.broadcast %409 : vector<16x1xi1> to vector<16x512xi1>
      %411 = vector.broadcast %cst : f32 to vector<16x512xf32>
      %412 = arith.select %410, %372, %411 : vector<16x512xi1>, vector<16x512xf32>
      %cst_113 = arith.constant dense<0xFF800000> : vector<512xf32>
      %413 = vector.multi_reduction <maximumf>, %412, %cst_113 [0] : vector<16x512xf32> to vector<512xf32>
      %414 = vector.shape_cast %413 : vector<512xf32> to vector<1x512xf32>
      %415 = vector.broadcast %cst : f32 to vector<1x512xf32>
      %416 = arith.cmpf oeq, %414, %415 : vector<1x512xf32>
      %cst_114 = arith.constant 0.000000e+00 : f32
      %417 = vector.broadcast %cst_114 : f32 to vector<1x512xf32>
      %418 = arith.select %416, %417, %414 : vector<1x512xi1>, vector<1x512xf32>
      %c7_i32_115 = arith.constant 7 : i32
      %419 = arith.muli %6, %c7_i32_115 : i32
      %c2_i32_116 = arith.constant 2 : i32
      %420 = arith.addi %419, %c2_i32_116 : i32
      %421 = arith.index_cast %420 : i32 to index
      %422 = memref.load %arg3[%421] : memref<112xi32, #tpu.memory_space<smem>>
      %c7_i32_117 = arith.constant 7 : i32
      %423 = arith.muli %6, %c7_i32_117 : i32
      %c2_i32_118 = arith.constant 2 : i32
      %424 = arith.addi %423, %c2_i32_118 : i32
      %425 = arith.index_cast %424 : i32 to index
      %426 = memref.load %arg4[%425] : memref<112xi32, #tpu.memory_space<smem>>
      %427 = vector.broadcast %422 : i32 to vector<16x1xi32>
      %428 = arith.cmpi sge, %0, %427 : vector<16x1xi32>
      %429 = vector.broadcast %426 : i32 to vector<16x1xi32>
      %430 = arith.cmpi slt, %0, %429 : vector<16x1xi32>
      %431 = arith.andi %428, %430 : vector<16x1xi1>
      %432 = vector.shape_cast %431 : vector<16x1xi1> to vector<16x1xi1>
      %433 = vector.broadcast %432 : vector<16x1xi1> to vector<16x512xi1>
      %434 = vector.broadcast %cst : f32 to vector<16x512xf32>
      %435 = arith.select %433, %372, %434 : vector<16x512xi1>, vector<16x512xf32>
      %cst_119 = arith.constant dense<0xFF800000> : vector<512xf32>
      %436 = vector.multi_reduction <maximumf>, %435, %cst_119 [0] : vector<16x512xf32> to vector<512xf32>
      %437 = vector.shape_cast %436 : vector<512xf32> to vector<1x512xf32>
      %438 = vector.broadcast %cst : f32 to vector<1x512xf32>
      %439 = arith.cmpf oeq, %437, %438 : vector<1x512xf32>
      %cst_120 = arith.constant 0.000000e+00 : f32
      %440 = vector.broadcast %cst_120 : f32 to vector<1x512xf32>
      %441 = arith.select %439, %440, %437 : vector<1x512xi1>, vector<1x512xf32>
      %c7_i32_121 = arith.constant 7 : i32
      %442 = arith.muli %6, %c7_i32_121 : i32
      %c3_i32_122 = arith.constant 3 : i32
      %443 = arith.addi %442, %c3_i32_122 : i32
      %444 = arith.index_cast %443 : i32 to index
      %445 = memref.load %arg3[%444] : memref<112xi32, #tpu.memory_space<smem>>
      %c7_i32_123 = arith.constant 7 : i32
      %446 = arith.muli %6, %c7_i32_123 : i32
      %c3_i32_124 = arith.constant 3 : i32
      %447 = arith.addi %446, %c3_i32_124 : i32
      %448 = arith.index_cast %447 : i32 to index
      %449 = memref.load %arg4[%448] : memref<112xi32, #tpu.memory_space<smem>>
      %450 = vector.broadcast %445 : i32 to vector<16x1xi32>
      %451 = arith.cmpi sge, %0, %450 : vector<16x1xi32>
      %452 = vector.broadcast %449 : i32 to vector<16x1xi32>
      %453 = arith.cmpi slt, %0, %452 : vector<16x1xi32>
      %454 = arith.andi %451, %453 : vector<16x1xi1>
      %455 = vector.shape_cast %454 : vector<16x1xi1> to vector<16x1xi1>
      %456 = vector.broadcast %455 : vector<16x1xi1> to vector<16x512xi1>
      %457 = vector.broadcast %cst : f32 to vector<16x512xf32>
      %458 = arith.select %456, %372, %457 : vector<16x512xi1>, vector<16x512xf32>
      %cst_125 = arith.constant dense<0xFF800000> : vector<512xf32>
      %459 = vector.multi_reduction <maximumf>, %458, %cst_125 [0] : vector<16x512xf32> to vector<512xf32>
      %460 = vector.shape_cast %459 : vector<512xf32> to vector<1x512xf32>
      %461 = vector.broadcast %cst : f32 to vector<1x512xf32>
      %462 = arith.cmpf oeq, %460, %461 : vector<1x512xf32>
      %cst_126 = arith.constant 0.000000e+00 : f32
      %463 = vector.broadcast %cst_126 : f32 to vector<1x512xf32>
      %464 = arith.select %462, %463, %460 : vector<1x512xi1>, vector<1x512xf32>
      %c7_i32_127 = arith.constant 7 : i32
      %465 = arith.muli %6, %c7_i32_127 : i32
      %c4_i32_128 = arith.constant 4 : i32
      %466 = arith.addi %465, %c4_i32_128 : i32
      %467 = arith.index_cast %466 : i32 to index
      %468 = memref.load %arg3[%467] : memref<112xi32, #tpu.memory_space<smem>>
      %c7_i32_129 = arith.constant 7 : i32
      %469 = arith.muli %6, %c7_i32_129 : i32
      %c4_i32_130 = arith.constant 4 : i32
      %470 = arith.addi %469, %c4_i32_130 : i32
      %471 = arith.index_cast %470 : i32 to index
      %472 = memref.load %arg4[%471] : memref<112xi32, #tpu.memory_space<smem>>
      %473 = vector.broadcast %468 : i32 to vector<16x1xi32>
      %474 = arith.cmpi sge, %0, %473 : vector<16x1xi32>
      %475 = vector.broadcast %472 : i32 to vector<16x1xi32>
      %476 = arith.cmpi slt, %0, %475 : vector<16x1xi32>
      %477 = arith.andi %474, %476 : vector<16x1xi1>
      %478 = vector.shape_cast %477 : vector<16x1xi1> to vector<16x1xi1>
      %479 = vector.broadcast %478 : vector<16x1xi1> to vector<16x512xi1>
      %480 = vector.broadcast %cst : f32 to vector<16x512xf32>
      %481 = arith.select %479, %372, %480 : vector<16x512xi1>, vector<16x512xf32>
      %cst_131 = arith.constant dense<0xFF800000> : vector<512xf32>
      %482 = vector.multi_reduction <maximumf>, %481, %cst_131 [0] : vector<16x512xf32> to vector<512xf32>
      %483 = vector.shape_cast %482 : vector<512xf32> to vector<1x512xf32>
      %484 = vector.broadcast %cst : f32 to vector<1x512xf32>
      %485 = arith.cmpf oeq, %483, %484 : vector<1x512xf32>
      %cst_132 = arith.constant 0.000000e+00 : f32
      %486 = vector.broadcast %cst_132 : f32 to vector<1x512xf32>
      %487 = arith.select %485, %486, %483 : vector<1x512xi1>, vector<1x512xf32>
      %c7_i32_133 = arith.constant 7 : i32
      %488 = arith.muli %6, %c7_i32_133 : i32
      %c5_i32_134 = arith.constant 5 : i32
      %489 = arith.addi %488, %c5_i32_134 : i32
      %490 = arith.index_cast %489 : i32 to index
      %491 = memref.load %arg3[%490] : memref<112xi32, #tpu.memory_space<smem>>
      %c7_i32_135 = arith.constant 7 : i32
      %492 = arith.muli %6, %c7_i32_135 : i32
      %c5_i32_136 = arith.constant 5 : i32
      %493 = arith.addi %492, %c5_i32_136 : i32
      %494 = arith.index_cast %493 : i32 to index
      %495 = memref.load %arg4[%494] : memref<112xi32, #tpu.memory_space<smem>>
      %496 = vector.broadcast %491 : i32 to vector<16x1xi32>
      %497 = arith.cmpi sge, %0, %496 : vector<16x1xi32>
      %498 = vector.broadcast %495 : i32 to vector<16x1xi32>
      %499 = arith.cmpi slt, %0, %498 : vector<16x1xi32>
      %500 = arith.andi %497, %499 : vector<16x1xi1>
      %501 = vector.shape_cast %500 : vector<16x1xi1> to vector<16x1xi1>
      %502 = vector.broadcast %501 : vector<16x1xi1> to vector<16x512xi1>
      %503 = vector.broadcast %cst : f32 to vector<16x512xf32>
      %504 = arith.select %502, %372, %503 : vector<16x512xi1>, vector<16x512xf32>
      %cst_137 = arith.constant dense<0xFF800000> : vector<512xf32>
      %505 = vector.multi_reduction <maximumf>, %504, %cst_137 [0] : vector<16x512xf32> to vector<512xf32>
      %506 = vector.shape_cast %505 : vector<512xf32> to vector<1x512xf32>
      %507 = vector.broadcast %cst : f32 to vector<1x512xf32>
      %508 = arith.cmpf oeq, %506, %507 : vector<1x512xf32>
      %cst_138 = arith.constant 0.000000e+00 : f32
      %509 = vector.broadcast %cst_138 : f32 to vector<1x512xf32>
      %510 = arith.select %508, %509, %506 : vector<1x512xi1>, vector<1x512xf32>
      %c7_i32_139 = arith.constant 7 : i32
      %511 = arith.muli %6, %c7_i32_139 : i32
      %c6_i32_140 = arith.constant 6 : i32
      %512 = arith.addi %511, %c6_i32_140 : i32
      %513 = arith.index_cast %512 : i32 to index
      %514 = memref.load %arg3[%513] : memref<112xi32, #tpu.memory_space<smem>>
      %c7_i32_141 = arith.constant 7 : i32
      %515 = arith.muli %6, %c7_i32_141 : i32
      %c6_i32_142 = arith.constant 6 : i32
      %516 = arith.addi %515, %c6_i32_142 : i32
      %517 = arith.index_cast %516 : i32 to index
      %518 = memref.load %arg4[%517] : memref<112xi32, #tpu.memory_space<smem>>
      %519 = vector.broadcast %514 : i32 to vector<16x1xi32>
      %520 = arith.cmpi sge, %0, %519 : vector<16x1xi32>
      %521 = vector.broadcast %518 : i32 to vector<16x1xi32>
      %522 = arith.cmpi slt, %0, %521 : vector<16x1xi32>
      %523 = arith.andi %520, %522 : vector<16x1xi1>
      %524 = vector.shape_cast %523 : vector<16x1xi1> to vector<16x1xi1>
      %525 = vector.broadcast %524 : vector<16x1xi1> to vector<16x512xi1>
      %526 = vector.broadcast %cst : f32 to vector<16x512xf32>
      %527 = arith.select %525, %372, %526 : vector<16x512xi1>, vector<16x512xf32>
      %cst_143 = arith.constant dense<0xFF800000> : vector<512xf32>
      %528 = vector.multi_reduction <maximumf>, %527, %cst_143 [0] : vector<16x512xf32> to vector<512xf32>
      %529 = vector.shape_cast %528 : vector<512xf32> to vector<1x512xf32>
      %530 = vector.broadcast %cst : f32 to vector<1x512xf32>
      %531 = arith.cmpf oeq, %529, %530 : vector<1x512xf32>
      %cst_144 = arith.constant 0.000000e+00 : f32
      %532 = vector.broadcast %cst_144 : f32 to vector<1x512xf32>
      %533 = arith.select %531, %532, %529 : vector<1x512xi1>, vector<1x512xf32>
      %534 = tpu.concatenate %395, %418, %441, %464, %487, %510, %533 in 0 : vector<1x512xf32>, vector<1x512xf32>, vector<1x512xf32>, vector<1x512xf32>, vector<1x512xf32>, vector<1x512xf32>, vector<1x512xf32> -> vector<7x512xf32>
      %535 = vector.shape_cast %534 : vector<7x512xf32> to vector<1x7x512xf32>
      %536 = arith.index_cast %arg8 : i32 to index
      %c14 = arith.constant 14 : index
      %c0_145 = arith.constant 0 : index
      %537 = vector.load %arg7[%536, %c14, %c0_145] : memref<8x49x512xf32, #tpu.memory_space<vmem>>, vector<1x7x512xf32>
      tpu.vector_store %arg7[%536, %c14, %c0_145], %535 {strides = array<i32>} : memref<8x49x512xf32, #tpu.memory_space<vmem>>, vector<1x7x512xf32>,
      %c7_i32_146 = arith.constant 7 : i32
      %538 = arith.muli %6, %c7_i32_146 : i32
      %c3_i32_147 = arith.constant 3 : i32
      %539 = arith.addi %538, %c3_i32_147 : i32
      %540 = arith.index_cast %539 : i32 to index
      %541 = memref.load %arg1[%540] : memref<112xi32, #tpu.memory_space<smem>>
      %c7_i32_148 = arith.constant 7 : i32
      %542 = arith.muli %6, %c7_i32_148 : i32
      %c3_i32_149 = arith.constant 3 : i32
      %543 = arith.addi %542, %c3_i32_149 : i32
      %544 = arith.index_cast %543 : i32 to index
      %545 = memref.load %arg2[%544] : memref<112xi32, #tpu.memory_space<smem>>
      %546 = vector.broadcast %cst : f32 to vector<16x512xf32>
      %547 = arith.subi %545, %541 : i32
      %548 = arith.addi %541, %547 : i32
      %c1_i32_150 = arith.constant 1 : i32
      %549 = scf.for %arg9 = %541 to %548 step %c1_i32_150 iter_args(%arg10 = %546) -> (vector<16x512xf32>)  : i32 {
        %1246 = arith.index_cast %arg9 : i32 to index
        %c0_338 = arith.constant 0 : index
        %c0_339 = arith.constant 0 : index
        %1247 = vector.load %arg5[%1246, %c0_338, %c0_339] : memref<16x16x512xf32, #tpu.memory_space<vmem>>, vector<1x16x512xf32>
        %1248 = vector.shape_cast %1247 : vector<1x16x512xf32> to vector<16x512xf32>
        %1249 = arith.maximumf %arg10, %1248 : vector<16x512xf32>
        scf.yield %1249 : vector<16x512xf32>
      }
      %c7_i32_151 = arith.constant 7 : i32
      %550 = arith.muli %6, %c7_i32_151 : i32
      %c0_i32_152 = arith.constant 0 : i32
      %551 = arith.addi %550, %c0_i32_152 : i32
      %552 = arith.index_cast %551 : i32 to index
      %553 = memref.load %arg3[%552] : memref<112xi32, #tpu.memory_space<smem>>
      %c7_i32_153 = arith.constant 7 : i32
      %554 = arith.muli %6, %c7_i32_153 : i32
      %c0_i32_154 = arith.constant 0 : i32
      %555 = arith.addi %554, %c0_i32_154 : i32
      %556 = arith.index_cast %555 : i32 to index
      %557 = memref.load %arg4[%556] : memref<112xi32, #tpu.memory_space<smem>>
      %558 = vector.broadcast %553 : i32 to vector<16x1xi32>
      %559 = arith.cmpi sge, %0, %558 : vector<16x1xi32>
      %560 = vector.broadcast %557 : i32 to vector<16x1xi32>
      %561 = arith.cmpi slt, %0, %560 : vector<16x1xi32>
      %562 = arith.andi %559, %561 : vector<16x1xi1>
      %563 = vector.shape_cast %562 : vector<16x1xi1> to vector<16x1xi1>
      %564 = vector.broadcast %563 : vector<16x1xi1> to vector<16x512xi1>
      %565 = vector.broadcast %cst : f32 to vector<16x512xf32>
      %566 = arith.select %564, %549, %565 : vector<16x512xi1>, vector<16x512xf32>
      %cst_155 = arith.constant dense<0xFF800000> : vector<512xf32>
      %567 = vector.multi_reduction <maximumf>, %566, %cst_155 [0] : vector<16x512xf32> to vector<512xf32>
      %568 = vector.shape_cast %567 : vector<512xf32> to vector<1x512xf32>
      %569 = vector.broadcast %cst : f32 to vector<1x512xf32>
      %570 = arith.cmpf oeq, %568, %569 : vector<1x512xf32>
      %cst_156 = arith.constant 0.000000e+00 : f32
      %571 = vector.broadcast %cst_156 : f32 to vector<1x512xf32>
      %572 = arith.select %570, %571, %568 : vector<1x512xi1>, vector<1x512xf32>
      %c7_i32_157 = arith.constant 7 : i32
      %573 = arith.muli %6, %c7_i32_157 : i32
      %c1_i32_158 = arith.constant 1 : i32
      %574 = arith.addi %573, %c1_i32_158 : i32
      %575 = arith.index_cast %574 : i32 to index
      %576 = memref.load %arg3[%575] : memref<112xi32, #tpu.memory_space<smem>>
      %c7_i32_159 = arith.constant 7 : i32
      %577 = arith.muli %6, %c7_i32_159 : i32
      %c1_i32_160 = arith.constant 1 : i32
      %578 = arith.addi %577, %c1_i32_160 : i32
      %579 = arith.index_cast %578 : i32 to index
      %580 = memref.load %arg4[%579] : memref<112xi32, #tpu.memory_space<smem>>
      %581 = vector.broadcast %576 : i32 to vector<16x1xi32>
      %582 = arith.cmpi sge, %0, %581 : vector<16x1xi32>
      %583 = vector.broadcast %580 : i32 to vector<16x1xi32>
      %584 = arith.cmpi slt, %0, %583 : vector<16x1xi32>
      %585 = arith.andi %582, %584 : vector<16x1xi1>
      %586 = vector.shape_cast %585 : vector<16x1xi1> to vector<16x1xi1>
      %587 = vector.broadcast %586 : vector<16x1xi1> to vector<16x512xi1>
      %588 = vector.broadcast %cst : f32 to vector<16x512xf32>
      %589 = arith.select %587, %549, %588 : vector<16x512xi1>, vector<16x512xf32>
      %cst_161 = arith.constant dense<0xFF800000> : vector<512xf32>
      %590 = vector.multi_reduction <maximumf>, %589, %cst_161 [0] : vector<16x512xf32> to vector<512xf32>
      %591 = vector.shape_cast %590 : vector<512xf32> to vector<1x512xf32>
      %592 = vector.broadcast %cst : f32 to vector<1x512xf32>
      %593 = arith.cmpf oeq, %591, %592 : vector<1x512xf32>
      %cst_162 = arith.constant 0.000000e+00 : f32
      %594 = vector.broadcast %cst_162 : f32 to vector<1x512xf32>
      %595 = arith.select %593, %594, %591 : vector<1x512xi1>, vector<1x512xf32>
      %c7_i32_163 = arith.constant 7 : i32
      %596 = arith.muli %6, %c7_i32_163 : i32
      %c2_i32_164 = arith.constant 2 : i32
      %597 = arith.addi %596, %c2_i32_164 : i32
      %598 = arith.index_cast %597 : i32 to index
      %599 = memref.load %arg3[%598] : memref<112xi32, #tpu.memory_space<smem>>
      %c7_i32_165 = arith.constant 7 : i32
      %600 = arith.muli %6, %c7_i32_165 : i32
      %c2_i32_166 = arith.constant 2 : i32
      %601 = arith.addi %600, %c2_i32_166 : i32
      %602 = arith.index_cast %601 : i32 to index
      %603 = memref.load %arg4[%602] : memref<112xi32, #tpu.memory_space<smem>>
      %604 = vector.broadcast %599 : i32 to vector<16x1xi32>
      %605 = arith.cmpi sge, %0, %604 : vector<16x1xi32>
      %606 = vector.broadcast %603 : i32 to vector<16x1xi32>
      %607 = arith.cmpi slt, %0, %606 : vector<16x1xi32>
      %608 = arith.andi %605, %607 : vector<16x1xi1>
      %609 = vector.shape_cast %608 : vector<16x1xi1> to vector<16x1xi1>
      %610 = vector.broadcast %609 : vector<16x1xi1> to vector<16x512xi1>
      %611 = vector.broadcast %cst : f32 to vector<16x512xf32>
      %612 = arith.select %610, %549, %611 : vector<16x512xi1>, vector<16x512xf32>
      %cst_167 = arith.constant dense<0xFF800000> : vector<512xf32>
      %613 = vector.multi_reduction <maximumf>, %612, %cst_167 [0] : vector<16x512xf32> to vector<512xf32>
      %614 = vector.shape_cast %613 : vector<512xf32> to vector<1x512xf32>
      %615 = vector.broadcast %cst : f32 to vector<1x512xf32>
      %616 = arith.cmpf oeq, %614, %615 : vector<1x512xf32>
      %cst_168 = arith.constant 0.000000e+00 : f32
      %617 = vector.broadcast %cst_168 : f32 to vector<1x512xf32>
      %618 = arith.select %616, %617, %614 : vector<1x512xi1>, vector<1x512xf32>
      %c7_i32_169 = arith.constant 7 : i32
      %619 = arith.muli %6, %c7_i32_169 : i32
      %c3_i32_170 = arith.constant 3 : i32
      %620 = arith.addi %619, %c3_i32_170 : i32
      %621 = arith.index_cast %620 : i32 to index
      %622 = memref.load %arg3[%621] : memref<112xi32, #tpu.memory_space<smem>>
      %c7_i32_171 = arith.constant 7 : i32
      %623 = arith.muli %6, %c7_i32_171 : i32
      %c3_i32_172 = arith.constant 3 : i32
      %624 = arith.addi %623, %c3_i32_172 : i32
      %625 = arith.index_cast %624 : i32 to index
      %626 = memref.load %arg4[%625] : memref<112xi32, #tpu.memory_space<smem>>
      %627 = vector.broadcast %622 : i32 to vector<16x1xi32>
      %628 = arith.cmpi sge, %0, %627 : vector<16x1xi32>
      %629 = vector.broadcast %626 : i32 to vector<16x1xi32>
      %630 = arith.cmpi slt, %0, %629 : vector<16x1xi32>
      %631 = arith.andi %628, %630 : vector<16x1xi1>
      %632 = vector.shape_cast %631 : vector<16x1xi1> to vector<16x1xi1>
      %633 = vector.broadcast %632 : vector<16x1xi1> to vector<16x512xi1>
      %634 = vector.broadcast %cst : f32 to vector<16x512xf32>
      %635 = arith.select %633, %549, %634 : vector<16x512xi1>, vector<16x512xf32>
      %cst_173 = arith.constant dense<0xFF800000> : vector<512xf32>
      %636 = vector.multi_reduction <maximumf>, %635, %cst_173 [0] : vector<16x512xf32> to vector<512xf32>
      %637 = vector.shape_cast %636 : vector<512xf32> to vector<1x512xf32>
      %638 = vector.broadcast %cst : f32 to vector<1x512xf32>
      %639 = arith.cmpf oeq, %637, %638 : vector<1x512xf32>
      %cst_174 = arith.constant 0.000000e+00 : f32
      %640 = vector.broadcast %cst_174 : f32 to vector<1x512xf32>
      %641 = arith.select %639, %640, %637 : vector<1x512xi1>, vector<1x512xf32>
      %c7_i32_175 = arith.constant 7 : i32
      %642 = arith.muli %6, %c7_i32_175 : i32
      %c4_i32_176 = arith.constant 4 : i32
      %643 = arith.addi %642, %c4_i32_176 : i32
      %644 = arith.index_cast %643 : i32 to index
      %645 = memref.load %arg3[%644] : memref<112xi32, #tpu.memory_space<smem>>
      %c7_i32_177 = arith.constant 7 : i32
      %646 = arith.muli %6, %c7_i32_177 : i32
      %c4_i32_178 = arith.constant 4 : i32
      %647 = arith.addi %646, %c4_i32_178 : i32
      %648 = arith.index_cast %647 : i32 to index
      %649 = memref.load %arg4[%648] : memref<112xi32, #tpu.memory_space<smem>>
      %650 = vector.broadcast %645 : i32 to vector<16x1xi32>
      %651 = arith.cmpi sge, %0, %650 : vector<16x1xi32>
      %652 = vector.broadcast %649 : i32 to vector<16x1xi32>
      %653 = arith.cmpi slt, %0, %652 : vector<16x1xi32>
      %654 = arith.andi %651, %653 : vector<16x1xi1>
      %655 = vector.shape_cast %654 : vector<16x1xi1> to vector<16x1xi1>
      %656 = vector.broadcast %655 : vector<16x1xi1> to vector<16x512xi1>
      %657 = vector.broadcast %cst : f32 to vector<16x512xf32>
      %658 = arith.select %656, %549, %657 : vector<16x512xi1>, vector<16x512xf32>
      %cst_179 = arith.constant dense<0xFF800000> : vector<512xf32>
      %659 = vector.multi_reduction <maximumf>, %658, %cst_179 [0] : vector<16x512xf32> to vector<512xf32>
      %660 = vector.shape_cast %659 : vector<512xf32> to vector<1x512xf32>
      %661 = vector.broadcast %cst : f32 to vector<1x512xf32>
      %662 = arith.cmpf oeq, %660, %661 : vector<1x512xf32>
      %cst_180 = arith.constant 0.000000e+00 : f32
      %663 = vector.broadcast %cst_180 : f32 to vector<1x512xf32>
      %664 = arith.select %662, %663, %660 : vector<1x512xi1>, vector<1x512xf32>
      %c7_i32_181 = arith.constant 7 : i32
      %665 = arith.muli %6, %c7_i32_181 : i32
      %c5_i32_182 = arith.constant 5 : i32
      %666 = arith.addi %665, %c5_i32_182 : i32
      %667 = arith.index_cast %666 : i32 to index
      %668 = memref.load %arg3[%667] : memref<112xi32, #tpu.memory_space<smem>>
      %c7_i32_183 = arith.constant 7 : i32
      %669 = arith.muli %6, %c7_i32_183 : i32
      %c5_i32_184 = arith.constant 5 : i32
      %670 = arith.addi %669, %c5_i32_184 : i32
      %671 = arith.index_cast %670 : i32 to index
      %672 = memref.load %arg4[%671] : memref<112xi32, #tpu.memory_space<smem>>
      %673 = vector.broadcast %668 : i32 to vector<16x1xi32>
      %674 = arith.cmpi sge, %0, %673 : vector<16x1xi32>
      %675 = vector.broadcast %672 : i32 to vector<16x1xi32>
      %676 = arith.cmpi slt, %0, %675 : vector<16x1xi32>
      %677 = arith.andi %674, %676 : vector<16x1xi1>
      %678 = vector.shape_cast %677 : vector<16x1xi1> to vector<16x1xi1>
      %679 = vector.broadcast %678 : vector<16x1xi1> to vector<16x512xi1>
      %680 = vector.broadcast %cst : f32 to vector<16x512xf32>
      %681 = arith.select %679, %549, %680 : vector<16x512xi1>, vector<16x512xf32>
      %cst_185 = arith.constant dense<0xFF800000> : vector<512xf32>
      %682 = vector.multi_reduction <maximumf>, %681, %cst_185 [0] : vector<16x512xf32> to vector<512xf32>
      %683 = vector.shape_cast %682 : vector<512xf32> to vector<1x512xf32>
      %684 = vector.broadcast %cst : f32 to vector<1x512xf32>
      %685 = arith.cmpf oeq, %683, %684 : vector<1x512xf32>
      %cst_186 = arith.constant 0.000000e+00 : f32
      %686 = vector.broadcast %cst_186 : f32 to vector<1x512xf32>
      %687 = arith.select %685, %686, %683 : vector<1x512xi1>, vector<1x512xf32>
      %c7_i32_187 = arith.constant 7 : i32
      %688 = arith.muli %6, %c7_i32_187 : i32
      %c6_i32_188 = arith.constant 6 : i32
      %689 = arith.addi %688, %c6_i32_188 : i32
      %690 = arith.index_cast %689 : i32 to index
      %691 = memref.load %arg3[%690] : memref<112xi32, #tpu.memory_space<smem>>
      %c7_i32_189 = arith.constant 7 : i32
      %692 = arith.muli %6, %c7_i32_189 : i32
      %c6_i32_190 = arith.constant 6 : i32
      %693 = arith.addi %692, %c6_i32_190 : i32
      %694 = arith.index_cast %693 : i32 to index
      %695 = memref.load %arg4[%694] : memref<112xi32, #tpu.memory_space<smem>>
      %696 = vector.broadcast %691 : i32 to vector<16x1xi32>
      %697 = arith.cmpi sge, %0, %696 : vector<16x1xi32>
      %698 = vector.broadcast %695 : i32 to vector<16x1xi32>
      %699 = arith.cmpi slt, %0, %698 : vector<16x1xi32>
      %700 = arith.andi %697, %699 : vector<16x1xi1>
      %701 = vector.shape_cast %700 : vector<16x1xi1> to vector<16x1xi1>
      %702 = vector.broadcast %701 : vector<16x1xi1> to vector<16x512xi1>
      %703 = vector.broadcast %cst : f32 to vector<16x512xf32>
      %704 = arith.select %702, %549, %703 : vector<16x512xi1>, vector<16x512xf32>
      %cst_191 = arith.constant dense<0xFF800000> : vector<512xf32>
      %705 = vector.multi_reduction <maximumf>, %704, %cst_191 [0] : vector<16x512xf32> to vector<512xf32>
      %706 = vector.shape_cast %705 : vector<512xf32> to vector<1x512xf32>
      %707 = vector.broadcast %cst : f32 to vector<1x512xf32>
      %708 = arith.cmpf oeq, %706, %707 : vector<1x512xf32>
      %cst_192 = arith.constant 0.000000e+00 : f32
      %709 = vector.broadcast %cst_192 : f32 to vector<1x512xf32>
      %710 = arith.select %708, %709, %706 : vector<1x512xi1>, vector<1x512xf32>
      %711 = tpu.concatenate %572, %595, %618, %641, %664, %687, %710 in 0 : vector<1x512xf32>, vector<1x512xf32>, vector<1x512xf32>, vector<1x512xf32>, vector<1x512xf32>, vector<1x512xf32>, vector<1x512xf32> -> vector<7x512xf32>
      %712 = vector.shape_cast %711 : vector<7x512xf32> to vector<1x7x512xf32>
      %713 = arith.index_cast %arg8 : i32 to index
      %c21 = arith.constant 21 : index
      %c0_193 = arith.constant 0 : index
      %714 = vector.load %arg7[%713, %c21, %c0_193] : memref<8x49x512xf32, #tpu.memory_space<vmem>>, vector<1x7x512xf32>
      tpu.vector_store %arg7[%713, %c21, %c0_193], %712 {strides = array<i32>} : memref<8x49x512xf32, #tpu.memory_space<vmem>>, vector<1x7x512xf32>,
      %c7_i32_194 = arith.constant 7 : i32
      %715 = arith.muli %6, %c7_i32_194 : i32
      %c4_i32_195 = arith.constant 4 : i32
      %716 = arith.addi %715, %c4_i32_195 : i32
      %717 = arith.index_cast %716 : i32 to index
      %718 = memref.load %arg1[%717] : memref<112xi32, #tpu.memory_space<smem>>
      %c7_i32_196 = arith.constant 7 : i32
      %719 = arith.muli %6, %c7_i32_196 : i32
      %c4_i32_197 = arith.constant 4 : i32
      %720 = arith.addi %719, %c4_i32_197 : i32
      %721 = arith.index_cast %720 : i32 to index
      %722 = memref.load %arg2[%721] : memref<112xi32, #tpu.memory_space<smem>>
      %723 = vector.broadcast %cst : f32 to vector<16x512xf32>
      %724 = arith.subi %722, %718 : i32
      %725 = arith.addi %718, %724 : i32
      %c1_i32_198 = arith.constant 1 : i32
      %726 = scf.for %arg9 = %718 to %725 step %c1_i32_198 iter_args(%arg10 = %723) -> (vector<16x512xf32>)  : i32 {
        %1246 = arith.index_cast %arg9 : i32 to index
        %c0_338 = arith.constant 0 : index
        %c0_339 = arith.constant 0 : index
        %1247 = vector.load %arg5[%1246, %c0_338, %c0_339] : memref<16x16x512xf32, #tpu.memory_space<vmem>>, vector<1x16x512xf32>
        %1248 = vector.shape_cast %1247 : vector<1x16x512xf32> to vector<16x512xf32>
        %1249 = arith.maximumf %arg10, %1248 : vector<16x512xf32>
        scf.yield %1249 : vector<16x512xf32>
      }
      %c7_i32_199 = arith.constant 7 : i32
      %727 = arith.muli %6, %c7_i32_199 : i32
      %c0_i32_200 = arith.constant 0 : i32
      %728 = arith.addi %727, %c0_i32_200 : i32
      %729 = arith.index_cast %728 : i32 to index
      %730 = memref.load %arg3[%729] : memref<112xi32, #tpu.memory_space<smem>>
      %c7_i32_201 = arith.constant 7 : i32
      %731 = arith.muli %6, %c7_i32_201 : i32
      %c0_i32_202 = arith.constant 0 : i32
      %732 = arith.addi %731, %c0_i32_202 : i32
      %733 = arith.index_cast %732 : i32 to index
      %734 = memref.load %arg4[%733] : memref<112xi32, #tpu.memory_space<smem>>
      %735 = vector.broadcast %730 : i32 to vector<16x1xi32>
      %736 = arith.cmpi sge, %0, %735 : vector<16x1xi32>
      %737 = vector.broadcast %734 : i32 to vector<16x1xi32>
      %738 = arith.cmpi slt, %0, %737 : vector<16x1xi32>
      %739 = arith.andi %736, %738 : vector<16x1xi1>
      %740 = vector.shape_cast %739 : vector<16x1xi1> to vector<16x1xi1>
      %741 = vector.broadcast %740 : vector<16x1xi1> to vector<16x512xi1>
      %742 = vector.broadcast %cst : f32 to vector<16x512xf32>
      %743 = arith.select %741, %726, %742 : vector<16x512xi1>, vector<16x512xf32>
      %cst_203 = arith.constant dense<0xFF800000> : vector<512xf32>
      %744 = vector.multi_reduction <maximumf>, %743, %cst_203 [0] : vector<16x512xf32> to vector<512xf32>
      %745 = vector.shape_cast %744 : vector<512xf32> to vector<1x512xf32>
      %746 = vector.broadcast %cst : f32 to vector<1x512xf32>
      %747 = arith.cmpf oeq, %745, %746 : vector<1x512xf32>
      %cst_204 = arith.constant 0.000000e+00 : f32
      %748 = vector.broadcast %cst_204 : f32 to vector<1x512xf32>
      %749 = arith.select %747, %748, %745 : vector<1x512xi1>, vector<1x512xf32>
      %c7_i32_205 = arith.constant 7 : i32
      %750 = arith.muli %6, %c7_i32_205 : i32
      %c1_i32_206 = arith.constant 1 : i32
      %751 = arith.addi %750, %c1_i32_206 : i32
      %752 = arith.index_cast %751 : i32 to index
      %753 = memref.load %arg3[%752] : memref<112xi32, #tpu.memory_space<smem>>
      %c7_i32_207 = arith.constant 7 : i32
      %754 = arith.muli %6, %c7_i32_207 : i32
      %c1_i32_208 = arith.constant 1 : i32
      %755 = arith.addi %754, %c1_i32_208 : i32
      %756 = arith.index_cast %755 : i32 to index
      %757 = memref.load %arg4[%756] : memref<112xi32, #tpu.memory_space<smem>>
      %758 = vector.broadcast %753 : i32 to vector<16x1xi32>
      %759 = arith.cmpi sge, %0, %758 : vector<16x1xi32>
      %760 = vector.broadcast %757 : i32 to vector<16x1xi32>
      %761 = arith.cmpi slt, %0, %760 : vector<16x1xi32>
      %762 = arith.andi %759, %761 : vector<16x1xi1>
      %763 = vector.shape_cast %762 : vector<16x1xi1> to vector<16x1xi1>
      %764 = vector.broadcast %763 : vector<16x1xi1> to vector<16x512xi1>
      %765 = vector.broadcast %cst : f32 to vector<16x512xf32>
      %766 = arith.select %764, %726, %765 : vector<16x512xi1>, vector<16x512xf32>
      %cst_209 = arith.constant dense<0xFF800000> : vector<512xf32>
      %767 = vector.multi_reduction <maximumf>, %766, %cst_209 [0] : vector<16x512xf32> to vector<512xf32>
      %768 = vector.shape_cast %767 : vector<512xf32> to vector<1x512xf32>
      %769 = vector.broadcast %cst : f32 to vector<1x512xf32>
      %770 = arith.cmpf oeq, %768, %769 : vector<1x512xf32>
      %cst_210 = arith.constant 0.000000e+00 : f32
      %771 = vector.broadcast %cst_210 : f32 to vector<1x512xf32>
      %772 = arith.select %770, %771, %768 : vector<1x512xi1>, vector<1x512xf32>
      %c7_i32_211 = arith.constant 7 : i32
      %773 = arith.muli %6, %c7_i32_211 : i32
      %c2_i32_212 = arith.constant 2 : i32
      %774 = arith.addi %773, %c2_i32_212 : i32
      %775 = arith.index_cast %774 : i32 to index
      %776 = memref.load %arg3[%775] : memref<112xi32, #tpu.memory_space<smem>>
      %c7_i32_213 = arith.constant 7 : i32
      %777 = arith.muli %6, %c7_i32_213 : i32
      %c2_i32_214 = arith.constant 2 : i32
      %778 = arith.addi %777, %c2_i32_214 : i32
      %779 = arith.index_cast %778 : i32 to index
      %780 = memref.load %arg4[%779] : memref<112xi32, #tpu.memory_space<smem>>
      %781 = vector.broadcast %776 : i32 to vector<16x1xi32>
      %782 = arith.cmpi sge, %0, %781 : vector<16x1xi32>
      %783 = vector.broadcast %780 : i32 to vector<16x1xi32>
      %784 = arith.cmpi slt, %0, %783 : vector<16x1xi32>
      %785 = arith.andi %782, %784 : vector<16x1xi1>
      %786 = vector.shape_cast %785 : vector<16x1xi1> to vector<16x1xi1>
      %787 = vector.broadcast %786 : vector<16x1xi1> to vector<16x512xi1>
      %788 = vector.broadcast %cst : f32 to vector<16x512xf32>
      %789 = arith.select %787, %726, %788 : vector<16x512xi1>, vector<16x512xf32>
      %cst_215 = arith.constant dense<0xFF800000> : vector<512xf32>
      %790 = vector.multi_reduction <maximumf>, %789, %cst_215 [0] : vector<16x512xf32> to vector<512xf32>
      %791 = vector.shape_cast %790 : vector<512xf32> to vector<1x512xf32>
      %792 = vector.broadcast %cst : f32 to vector<1x512xf32>
      %793 = arith.cmpf oeq, %791, %792 : vector<1x512xf32>
      %cst_216 = arith.constant 0.000000e+00 : f32
      %794 = vector.broadcast %cst_216 : f32 to vector<1x512xf32>
      %795 = arith.select %793, %794, %791 : vector<1x512xi1>, vector<1x512xf32>
      %c7_i32_217 = arith.constant 7 : i32
      %796 = arith.muli %6, %c7_i32_217 : i32
      %c3_i32_218 = arith.constant 3 : i32
      %797 = arith.addi %796, %c3_i32_218 : i32
      %798 = arith.index_cast %797 : i32 to index
      %799 = memref.load %arg3[%798] : memref<112xi32, #tpu.memory_space<smem>>
      %c7_i32_219 = arith.constant 7 : i32
      %800 = arith.muli %6, %c7_i32_219 : i32
      %c3_i32_220 = arith.constant 3 : i32
      %801 = arith.addi %800, %c3_i32_220 : i32
      %802 = arith.index_cast %801 : i32 to index
      %803 = memref.load %arg4[%802] : memref<112xi32, #tpu.memory_space<smem>>
      %804 = vector.broadcast %799 : i32 to vector<16x1xi32>
      %805 = arith.cmpi sge, %0, %804 : vector<16x1xi32>
      %806 = vector.broadcast %803 : i32 to vector<16x1xi32>
      %807 = arith.cmpi slt, %0, %806 : vector<16x1xi32>
      %808 = arith.andi %805, %807 : vector<16x1xi1>
      %809 = vector.shape_cast %808 : vector<16x1xi1> to vector<16x1xi1>
      %810 = vector.broadcast %809 : vector<16x1xi1> to vector<16x512xi1>
      %811 = vector.broadcast %cst : f32 to vector<16x512xf32>
      %812 = arith.select %810, %726, %811 : vector<16x512xi1>, vector<16x512xf32>
      %cst_221 = arith.constant dense<0xFF800000> : vector<512xf32>
      %813 = vector.multi_reduction <maximumf>, %812, %cst_221 [0] : vector<16x512xf32> to vector<512xf32>
      %814 = vector.shape_cast %813 : vector<512xf32> to vector<1x512xf32>
      %815 = vector.broadcast %cst : f32 to vector<1x512xf32>
      %816 = arith.cmpf oeq, %814, %815 : vector<1x512xf32>
      %cst_222 = arith.constant 0.000000e+00 : f32
      %817 = vector.broadcast %cst_222 : f32 to vector<1x512xf32>
      %818 = arith.select %816, %817, %814 : vector<1x512xi1>, vector<1x512xf32>
      %c7_i32_223 = arith.constant 7 : i32
      %819 = arith.muli %6, %c7_i32_223 : i32
      %c4_i32_224 = arith.constant 4 : i32
      %820 = arith.addi %819, %c4_i32_224 : i32
      %821 = arith.index_cast %820 : i32 to index
      %822 = memref.load %arg3[%821] : memref<112xi32, #tpu.memory_space<smem>>
      %c7_i32_225 = arith.constant 7 : i32
      %823 = arith.muli %6, %c7_i32_225 : i32
      %c4_i32_226 = arith.constant 4 : i32
      %824 = arith.addi %823, %c4_i32_226 : i32
      %825 = arith.index_cast %824 : i32 to index
      %826 = memref.load %arg4[%825] : memref<112xi32, #tpu.memory_space<smem>>
      %827 = vector.broadcast %822 : i32 to vector<16x1xi32>
      %828 = arith.cmpi sge, %0, %827 : vector<16x1xi32>
      %829 = vector.broadcast %826 : i32 to vector<16x1xi32>
      %830 = arith.cmpi slt, %0, %829 : vector<16x1xi32>
      %831 = arith.andi %828, %830 : vector<16x1xi1>
      %832 = vector.shape_cast %831 : vector<16x1xi1> to vector<16x1xi1>
      %833 = vector.broadcast %832 : vector<16x1xi1> to vector<16x512xi1>
      %834 = vector.broadcast %cst : f32 to vector<16x512xf32>
      %835 = arith.select %833, %726, %834 : vector<16x512xi1>, vector<16x512xf32>
      %cst_227 = arith.constant dense<0xFF800000> : vector<512xf32>
      %836 = vector.multi_reduction <maximumf>, %835, %cst_227 [0] : vector<16x512xf32> to vector<512xf32>
      %837 = vector.shape_cast %836 : vector<512xf32> to vector<1x512xf32>
      %838 = vector.broadcast %cst : f32 to vector<1x512xf32>
      %839 = arith.cmpf oeq, %837, %838 : vector<1x512xf32>
      %cst_228 = arith.constant 0.000000e+00 : f32
      %840 = vector.broadcast %cst_228 : f32 to vector<1x512xf32>
      %841 = arith.select %839, %840, %837 : vector<1x512xi1>, vector<1x512xf32>
      %c7_i32_229 = arith.constant 7 : i32
      %842 = arith.muli %6, %c7_i32_229 : i32
      %c5_i32_230 = arith.constant 5 : i32
      %843 = arith.addi %842, %c5_i32_230 : i32
      %844 = arith.index_cast %843 : i32 to index
      %845 = memref.load %arg3[%844] : memref<112xi32, #tpu.memory_space<smem>>
      %c7_i32_231 = arith.constant 7 : i32
      %846 = arith.muli %6, %c7_i32_231 : i32
      %c5_i32_232 = arith.constant 5 : i32
      %847 = arith.addi %846, %c5_i32_232 : i32
      %848 = arith.index_cast %847 : i32 to index
      %849 = memref.load %arg4[%848] : memref<112xi32, #tpu.memory_space<smem>>
      %850 = vector.broadcast %845 : i32 to vector<16x1xi32>
      %851 = arith.cmpi sge, %0, %850 : vector<16x1xi32>
      %852 = vector.broadcast %849 : i32 to vector<16x1xi32>
      %853 = arith.cmpi slt, %0, %852 : vector<16x1xi32>
      %854 = arith.andi %851, %853 : vector<16x1xi1>
      %855 = vector.shape_cast %854 : vector<16x1xi1> to vector<16x1xi1>
      %856 = vector.broadcast %855 : vector<16x1xi1> to vector<16x512xi1>
      %857 = vector.broadcast %cst : f32 to vector<16x512xf32>
      %858 = arith.select %856, %726, %857 : vector<16x512xi1>, vector<16x512xf32>
      %cst_233 = arith.constant dense<0xFF800000> : vector<512xf32>
      %859 = vector.multi_reduction <maximumf>, %858, %cst_233 [0] : vector<16x512xf32> to vector<512xf32>
      %860 = vector.shape_cast %859 : vector<512xf32> to vector<1x512xf32>
      %861 = vector.broadcast %cst : f32 to vector<1x512xf32>
      %862 = arith.cmpf oeq, %860, %861 : vector<1x512xf32>
      %cst_234 = arith.constant 0.000000e+00 : f32
      %863 = vector.broadcast %cst_234 : f32 to vector<1x512xf32>
      %864 = arith.select %862, %863, %860 : vector<1x512xi1>, vector<1x512xf32>
      %c7_i32_235 = arith.constant 7 : i32
      %865 = arith.muli %6, %c7_i32_235 : i32
      %c6_i32_236 = arith.constant 6 : i32
      %866 = arith.addi %865, %c6_i32_236 : i32
      %867 = arith.index_cast %866 : i32 to index
      %868 = memref.load %arg3[%867] : memref<112xi32, #tpu.memory_space<smem>>
      %c7_i32_237 = arith.constant 7 : i32
      %869 = arith.muli %6, %c7_i32_237 : i32
      %c6_i32_238 = arith.constant 6 : i32
      %870 = arith.addi %869, %c6_i32_238 : i32
      %871 = arith.index_cast %870 : i32 to index
      %872 = memref.load %arg4[%871] : memref<112xi32, #tpu.memory_space<smem>>
      %873 = vector.broadcast %868 : i32 to vector<16x1xi32>
      %874 = arith.cmpi sge, %0, %873 : vector<16x1xi32>
      %875 = vector.broadcast %872 : i32 to vector<16x1xi32>
      %876 = arith.cmpi slt, %0, %875 : vector<16x1xi32>
      %877 = arith.andi %874, %876 : vector<16x1xi1>
      %878 = vector.shape_cast %877 : vector<16x1xi1> to vector<16x1xi1>
      %879 = vector.broadcast %878 : vector<16x1xi1> to vector<16x512xi1>
      %880 = vector.broadcast %cst : f32 to vector<16x512xf32>
      %881 = arith.select %879, %726, %880 : vector<16x512xi1>, vector<16x512xf32>
      %cst_239 = arith.constant dense<0xFF800000> : vector<512xf32>
      %882 = vector.multi_reduction <maximumf>, %881, %cst_239 [0] : vector<16x512xf32> to vector<512xf32>
      %883 = vector.shape_cast %882 : vector<512xf32> to vector<1x512xf32>
      %884 = vector.broadcast %cst : f32 to vector<1x512xf32>
      %885 = arith.cmpf oeq, %883, %884 : vector<1x512xf32>
      %cst_240 = arith.constant 0.000000e+00 : f32
      %886 = vector.broadcast %cst_240 : f32 to vector<1x512xf32>
      %887 = arith.select %885, %886, %883 : vector<1x512xi1>, vector<1x512xf32>
      %888 = tpu.concatenate %749, %772, %795, %818, %841, %864, %887 in 0 : vector<1x512xf32>, vector<1x512xf32>, vector<1x512xf32>, vector<1x512xf32>, vector<1x512xf32>, vector<1x512xf32>, vector<1x512xf32> -> vector<7x512xf32>
      %889 = vector.shape_cast %888 : vector<7x512xf32> to vector<1x7x512xf32>
      %890 = arith.index_cast %arg8 : i32 to index
      %c28 = arith.constant 28 : index
      %c0_241 = arith.constant 0 : index
      %891 = vector.load %arg7[%890, %c28, %c0_241] : memref<8x49x512xf32, #tpu.memory_space<vmem>>, vector<1x7x512xf32>
      tpu.vector_store %arg7[%890, %c28, %c0_241], %889 {strides = array<i32>} : memref<8x49x512xf32, #tpu.memory_space<vmem>>, vector<1x7x512xf32>,
      %c7_i32_242 = arith.constant 7 : i32
      %892 = arith.muli %6, %c7_i32_242 : i32
      %c5_i32_243 = arith.constant 5 : i32
      %893 = arith.addi %892, %c5_i32_243 : i32
      %894 = arith.index_cast %893 : i32 to index
      %895 = memref.load %arg1[%894] : memref<112xi32, #tpu.memory_space<smem>>
      %c7_i32_244 = arith.constant 7 : i32
      %896 = arith.muli %6, %c7_i32_244 : i32
      %c5_i32_245 = arith.constant 5 : i32
      %897 = arith.addi %896, %c5_i32_245 : i32
      %898 = arith.index_cast %897 : i32 to index
      %899 = memref.load %arg2[%898] : memref<112xi32, #tpu.memory_space<smem>>
      %900 = vector.broadcast %cst : f32 to vector<16x512xf32>
      %901 = arith.subi %899, %895 : i32
      %902 = arith.addi %895, %901 : i32
      %c1_i32_246 = arith.constant 1 : i32
      %903 = scf.for %arg9 = %895 to %902 step %c1_i32_246 iter_args(%arg10 = %900) -> (vector<16x512xf32>)  : i32 {
        %1246 = arith.index_cast %arg9 : i32 to index
        %c0_338 = arith.constant 0 : index
        %c0_339 = arith.constant 0 : index
        %1247 = vector.load %arg5[%1246, %c0_338, %c0_339] : memref<16x16x512xf32, #tpu.memory_space<vmem>>, vector<1x16x512xf32>
        %1248 = vector.shape_cast %1247 : vector<1x16x512xf32> to vector<16x512xf32>
        %1249 = arith.maximumf %arg10, %1248 : vector<16x512xf32>
        scf.yield %1249 : vector<16x512xf32>
      }
      %c7_i32_247 = arith.constant 7 : i32
      %904 = arith.muli %6, %c7_i32_247 : i32
      %c0_i32_248 = arith.constant 0 : i32
      %905 = arith.addi %904, %c0_i32_248 : i32
      %906 = arith.index_cast %905 : i32 to index
      %907 = memref.load %arg3[%906] : memref<112xi32, #tpu.memory_space<smem>>
      %c7_i32_249 = arith.constant 7 : i32
      %908 = arith.muli %6, %c7_i32_249 : i32
      %c0_i32_250 = arith.constant 0 : i32
      %909 = arith.addi %908, %c0_i32_250 : i32
      %910 = arith.index_cast %909 : i32 to index
      %911 = memref.load %arg4[%910] : memref<112xi32, #tpu.memory_space<smem>>
      %912 = vector.broadcast %907 : i32 to vector<16x1xi32>
      %913 = arith.cmpi sge, %0, %912 : vector<16x1xi32>
      %914 = vector.broadcast %911 : i32 to vector<16x1xi32>
      %915 = arith.cmpi slt, %0, %914 : vector<16x1xi32>
      %916 = arith.andi %913, %915 : vector<16x1xi1>
      %917 = vector.shape_cast %916 : vector<16x1xi1> to vector<16x1xi1>
      %918 = vector.broadcast %917 : vector<16x1xi1> to vector<16x512xi1>
      %919 = vector.broadcast %cst : f32 to vector<16x512xf32>
      %920 = arith.select %918, %903, %919 : vector<16x512xi1>, vector<16x512xf32>
      %cst_251 = arith.constant dense<0xFF800000> : vector<512xf32>
      %921 = vector.multi_reduction <maximumf>, %920, %cst_251 [0] : vector<16x512xf32> to vector<512xf32>
      %922 = vector.shape_cast %921 : vector<512xf32> to vector<1x512xf32>
      %923 = vector.broadcast %cst : f32 to vector<1x512xf32>
      %924 = arith.cmpf oeq, %922, %923 : vector<1x512xf32>
      %cst_252 = arith.constant 0.000000e+00 : f32
      %925 = vector.broadcast %cst_252 : f32 to vector<1x512xf32>
      %926 = arith.select %924, %925, %922 : vector<1x512xi1>, vector<1x512xf32>
      %c7_i32_253 = arith.constant 7 : i32
      %927 = arith.muli %6, %c7_i32_253 : i32
      %c1_i32_254 = arith.constant 1 : i32
      %928 = arith.addi %927, %c1_i32_254 : i32
      %929 = arith.index_cast %928 : i32 to index
      %930 = memref.load %arg3[%929] : memref<112xi32, #tpu.memory_space<smem>>
      %c7_i32_255 = arith.constant 7 : i32
      %931 = arith.muli %6, %c7_i32_255 : i32
      %c1_i32_256 = arith.constant 1 : i32
      %932 = arith.addi %931, %c1_i32_256 : i32
      %933 = arith.index_cast %932 : i32 to index
      %934 = memref.load %arg4[%933] : memref<112xi32, #tpu.memory_space<smem>>
      %935 = vector.broadcast %930 : i32 to vector<16x1xi32>
      %936 = arith.cmpi sge, %0, %935 : vector<16x1xi32>
      %937 = vector.broadcast %934 : i32 to vector<16x1xi32>
      %938 = arith.cmpi slt, %0, %937 : vector<16x1xi32>
      %939 = arith.andi %936, %938 : vector<16x1xi1>
      %940 = vector.shape_cast %939 : vector<16x1xi1> to vector<16x1xi1>
      %941 = vector.broadcast %940 : vector<16x1xi1> to vector<16x512xi1>
      %942 = vector.broadcast %cst : f32 to vector<16x512xf32>
      %943 = arith.select %941, %903, %942 : vector<16x512xi1>, vector<16x512xf32>
      %cst_257 = arith.constant dense<0xFF800000> : vector<512xf32>
      %944 = vector.multi_reduction <maximumf>, %943, %cst_257 [0] : vector<16x512xf32> to vector<512xf32>
      %945 = vector.shape_cast %944 : vector<512xf32> to vector<1x512xf32>
      %946 = vector.broadcast %cst : f32 to vector<1x512xf32>
      %947 = arith.cmpf oeq, %945, %946 : vector<1x512xf32>
      %cst_258 = arith.constant 0.000000e+00 : f32
      %948 = vector.broadcast %cst_258 : f32 to vector<1x512xf32>
      %949 = arith.select %947, %948, %945 : vector<1x512xi1>, vector<1x512xf32>
      %c7_i32_259 = arith.constant 7 : i32
      %950 = arith.muli %6, %c7_i32_259 : i32
      %c2_i32_260 = arith.constant 2 : i32
      %951 = arith.addi %950, %c2_i32_260 : i32
      %952 = arith.index_cast %951 : i32 to index
      %953 = memref.load %arg3[%952] : memref<112xi32, #tpu.memory_space<smem>>
      %c7_i32_261 = arith.constant 7 : i32
      %954 = arith.muli %6, %c7_i32_261 : i32
      %c2_i32_262 = arith.constant 2 : i32
      %955 = arith.addi %954, %c2_i32_262 : i32
      %956 = arith.index_cast %955 : i32 to index
      %957 = memref.load %arg4[%956] : memref<112xi32, #tpu.memory_space<smem>>
      %958 = vector.broadcast %953 : i32 to vector<16x1xi32>
      %959 = arith.cmpi sge, %0, %958 : vector<16x1xi32>
      %960 = vector.broadcast %957 : i32 to vector<16x1xi32>
      %961 = arith.cmpi slt, %0, %960 : vector<16x1xi32>
      %962 = arith.andi %959, %961 : vector<16x1xi1>
      %963 = vector.shape_cast %962 : vector<16x1xi1> to vector<16x1xi1>
      %964 = vector.broadcast %963 : vector<16x1xi1> to vector<16x512xi1>
      %965 = vector.broadcast %cst : f32 to vector<16x512xf32>
      %966 = arith.select %964, %903, %965 : vector<16x512xi1>, vector<16x512xf32>
      %cst_263 = arith.constant dense<0xFF800000> : vector<512xf32>
      %967 = vector.multi_reduction <maximumf>, %966, %cst_263 [0] : vector<16x512xf32> to vector<512xf32>
      %968 = vector.shape_cast %967 : vector<512xf32> to vector<1x512xf32>
      %969 = vector.broadcast %cst : f32 to vector<1x512xf32>
      %970 = arith.cmpf oeq, %968, %969 : vector<1x512xf32>
      %cst_264 = arith.constant 0.000000e+00 : f32
      %971 = vector.broadcast %cst_264 : f32 to vector<1x512xf32>
      %972 = arith.select %970, %971, %968 : vector<1x512xi1>, vector<1x512xf32>
      %c7_i32_265 = arith.constant 7 : i32
      %973 = arith.muli %6, %c7_i32_265 : i32
      %c3_i32_266 = arith.constant 3 : i32
      %974 = arith.addi %973, %c3_i32_266 : i32
      %975 = arith.index_cast %974 : i32 to index
      %976 = memref.load %arg3[%975] : memref<112xi32, #tpu.memory_space<smem>>
      %c7_i32_267 = arith.constant 7 : i32
      %977 = arith.muli %6, %c7_i32_267 : i32
      %c3_i32_268 = arith.constant 3 : i32
      %978 = arith.addi %977, %c3_i32_268 : i32
      %979 = arith.index_cast %978 : i32 to index
      %980 = memref.load %arg4[%979] : memref<112xi32, #tpu.memory_space<smem>>
      %981 = vector.broadcast %976 : i32 to vector<16x1xi32>
      %982 = arith.cmpi sge, %0, %981 : vector<16x1xi32>
      %983 = vector.broadcast %980 : i32 to vector<16x1xi32>
      %984 = arith.cmpi slt, %0, %983 : vector<16x1xi32>
      %985 = arith.andi %982, %984 : vector<16x1xi1>
      %986 = vector.shape_cast %985 : vector<16x1xi1> to vector<16x1xi1>
      %987 = vector.broadcast %986 : vector<16x1xi1> to vector<16x512xi1>
      %988 = vector.broadcast %cst : f32 to vector<16x512xf32>
      %989 = arith.select %987, %903, %988 : vector<16x512xi1>, vector<16x512xf32>
      %cst_269 = arith.constant dense<0xFF800000> : vector<512xf32>
      %990 = vector.multi_reduction <maximumf>, %989, %cst_269 [0] : vector<16x512xf32> to vector<512xf32>
      %991 = vector.shape_cast %990 : vector<512xf32> to vector<1x512xf32>
      %992 = vector.broadcast %cst : f32 to vector<1x512xf32>
      %993 = arith.cmpf oeq, %991, %992 : vector<1x512xf32>
      %cst_270 = arith.constant 0.000000e+00 : f32
      %994 = vector.broadcast %cst_270 : f32 to vector<1x512xf32>
      %995 = arith.select %993, %994, %991 : vector<1x512xi1>, vector<1x512xf32>
      %c7_i32_271 = arith.constant 7 : i32
      %996 = arith.muli %6, %c7_i32_271 : i32
      %c4_i32_272 = arith.constant 4 : i32
      %997 = arith.addi %996, %c4_i32_272 : i32
      %998 = arith.index_cast %997 : i32 to index
      %999 = memref.load %arg3[%998] : memref<112xi32, #tpu.memory_space<smem>>
      %c7_i32_273 = arith.constant 7 : i32
      %1000 = arith.muli %6, %c7_i32_273 : i32
      %c4_i32_274 = arith.constant 4 : i32
      %1001 = arith.addi %1000, %c4_i32_274 : i32
      %1002 = arith.index_cast %1001 : i32 to index
      %1003 = memref.load %arg4[%1002] : memref<112xi32, #tpu.memory_space<smem>>
      %1004 = vector.broadcast %999 : i32 to vector<16x1xi32>
      %1005 = arith.cmpi sge, %0, %1004 : vector<16x1xi32>
      %1006 = vector.broadcast %1003 : i32 to vector<16x1xi32>
      %1007 = arith.cmpi slt, %0, %1006 : vector<16x1xi32>
      %1008 = arith.andi %1005, %1007 : vector<16x1xi1>
      %1009 = vector.shape_cast %1008 : vector<16x1xi1> to vector<16x1xi1>
      %1010 = vector.broadcast %1009 : vector<16x1xi1> to vector<16x512xi1>
      %1011 = vector.broadcast %cst : f32 to vector<16x512xf32>
      %1012 = arith.select %1010, %903, %1011 : vector<16x512xi1>, vector<16x512xf32>
      %cst_275 = arith.constant dense<0xFF800000> : vector<512xf32>
      %1013 = vector.multi_reduction <maximumf>, %1012, %cst_275 [0] : vector<16x512xf32> to vector<512xf32>
      %1014 = vector.shape_cast %1013 : vector<512xf32> to vector<1x512xf32>
      %1015 = vector.broadcast %cst : f32 to vector<1x512xf32>
      %1016 = arith.cmpf oeq, %1014, %1015 : vector<1x512xf32>
      %cst_276 = arith.constant 0.000000e+00 : f32
      %1017 = vector.broadcast %cst_276 : f32 to vector<1x512xf32>
      %1018 = arith.select %1016, %1017, %1014 : vector<1x512xi1>, vector<1x512xf32>
      %c7_i32_277 = arith.constant 7 : i32
      %1019 = arith.muli %6, %c7_i32_277 : i32
      %c5_i32_278 = arith.constant 5 : i32
      %1020 = arith.addi %1019, %c5_i32_278 : i32
      %1021 = arith.index_cast %1020 : i32 to index
      %1022 = memref.load %arg3[%1021] : memref<112xi32, #tpu.memory_space<smem>>
      %c7_i32_279 = arith.constant 7 : i32
      %1023 = arith.muli %6, %c7_i32_279 : i32
      %c5_i32_280 = arith.constant 5 : i32
      %1024 = arith.addi %1023, %c5_i32_280 : i32
      %1025 = arith.index_cast %1024 : i32 to index
      %1026 = memref.load %arg4[%1025] : memref<112xi32, #tpu.memory_space<smem>>
      %1027 = vector.broadcast %1022 : i32 to vector<16x1xi32>
      %1028 = arith.cmpi sge, %0, %1027 : vector<16x1xi32>
      %1029 = vector.broadcast %1026 : i32 to vector<16x1xi32>
      %1030 = arith.cmpi slt, %0, %1029 : vector<16x1xi32>
      %1031 = arith.andi %1028, %1030 : vector<16x1xi1>
      %1032 = vector.shape_cast %1031 : vector<16x1xi1> to vector<16x1xi1>
      %1033 = vector.broadcast %1032 : vector<16x1xi1> to vector<16x512xi1>
      %1034 = vector.broadcast %cst : f32 to vector<16x512xf32>
      %1035 = arith.select %1033, %903, %1034 : vector<16x512xi1>, vector<16x512xf32>
      %cst_281 = arith.constant dense<0xFF800000> : vector<512xf32>
      %1036 = vector.multi_reduction <maximumf>, %1035, %cst_281 [0] : vector<16x512xf32> to vector<512xf32>
      %1037 = vector.shape_cast %1036 : vector<512xf32> to vector<1x512xf32>
      %1038 = vector.broadcast %cst : f32 to vector<1x512xf32>
      %1039 = arith.cmpf oeq, %1037, %1038 : vector<1x512xf32>
      %cst_282 = arith.constant 0.000000e+00 : f32
      %1040 = vector.broadcast %cst_282 : f32 to vector<1x512xf32>
      %1041 = arith.select %1039, %1040, %1037 : vector<1x512xi1>, vector<1x512xf32>
      %c7_i32_283 = arith.constant 7 : i32
      %1042 = arith.muli %6, %c7_i32_283 : i32
      %c6_i32_284 = arith.constant 6 : i32
      %1043 = arith.addi %1042, %c6_i32_284 : i32
      %1044 = arith.index_cast %1043 : i32 to index
      %1045 = memref.load %arg3[%1044] : memref<112xi32, #tpu.memory_space<smem>>
      %c7_i32_285 = arith.constant 7 : i32
      %1046 = arith.muli %6, %c7_i32_285 : i32
      %c6_i32_286 = arith.constant 6 : i32
      %1047 = arith.addi %1046, %c6_i32_286 : i32
      %1048 = arith.index_cast %1047 : i32 to index
      %1049 = memref.load %arg4[%1048] : memref<112xi32, #tpu.memory_space<smem>>
      %1050 = vector.broadcast %1045 : i32 to vector<16x1xi32>
      %1051 = arith.cmpi sge, %0, %1050 : vector<16x1xi32>
      %1052 = vector.broadcast %1049 : i32 to vector<16x1xi32>
      %1053 = arith.cmpi slt, %0, %1052 : vector<16x1xi32>
      %1054 = arith.andi %1051, %1053 : vector<16x1xi1>
      %1055 = vector.shape_cast %1054 : vector<16x1xi1> to vector<16x1xi1>
      %1056 = vector.broadcast %1055 : vector<16x1xi1> to vector<16x512xi1>
      %1057 = vector.broadcast %cst : f32 to vector<16x512xf32>
      %1058 = arith.select %1056, %903, %1057 : vector<16x512xi1>, vector<16x512xf32>
      %cst_287 = arith.constant dense<0xFF800000> : vector<512xf32>
      %1059 = vector.multi_reduction <maximumf>, %1058, %cst_287 [0] : vector<16x512xf32> to vector<512xf32>
      %1060 = vector.shape_cast %1059 : vector<512xf32> to vector<1x512xf32>
      %1061 = vector.broadcast %cst : f32 to vector<1x512xf32>
      %1062 = arith.cmpf oeq, %1060, %1061 : vector<1x512xf32>
      %cst_288 = arith.constant 0.000000e+00 : f32
      %1063 = vector.broadcast %cst_288 : f32 to vector<1x512xf32>
      %1064 = arith.select %1062, %1063, %1060 : vector<1x512xi1>, vector<1x512xf32>
      %1065 = tpu.concatenate %926, %949, %972, %995, %1018, %1041, %1064 in 0 : vector<1x512xf32>, vector<1x512xf32>, vector<1x512xf32>, vector<1x512xf32>, vector<1x512xf32>, vector<1x512xf32>, vector<1x512xf32> -> vector<7x512xf32>
      %1066 = vector.shape_cast %1065 : vector<7x512xf32> to vector<1x7x512xf32>
      %1067 = arith.index_cast %arg8 : i32 to index
      %c35 = arith.constant 35 : index
      %c0_289 = arith.constant 0 : index
      %1068 = vector.load %arg7[%1067, %c35, %c0_289] : memref<8x49x512xf32, #tpu.memory_space<vmem>>, vector<1x7x512xf32>
      tpu.vector_store %arg7[%1067, %c35, %c0_289], %1066 {strides = array<i32>} : memref<8x49x512xf32, #tpu.memory_space<vmem>>, vector<1x7x512xf32>,
      %c7_i32_290 = arith.constant 7 : i32
      %1069 = arith.muli %6, %c7_i32_290 : i32
      %c6_i32_291 = arith.constant 6 : i32
      %1070 = arith.addi %1069, %c6_i32_291 : i32
      %1071 = arith.index_cast %1070 : i32 to index
      %1072 = memref.load %arg1[%1071] : memref<112xi32, #tpu.memory_space<smem>>
      %c7_i32_292 = arith.constant 7 : i32
      %1073 = arith.muli %6, %c7_i32_292 : i32
      %c6_i32_293 = arith.constant 6 : i32
      %1074 = arith.addi %1073, %c6_i32_293 : i32
      %1075 = arith.index_cast %1074 : i32 to index
      %1076 = memref.load %arg2[%1075] : memref<112xi32, #tpu.memory_space<smem>>
      %1077 = vector.broadcast %cst : f32 to vector<16x512xf32>
      %1078 = arith.subi %1076, %1072 : i32
      %1079 = arith.addi %1072, %1078 : i32
      %c1_i32_294 = arith.constant 1 : i32
      %1080 = scf.for %arg9 = %1072 to %1079 step %c1_i32_294 iter_args(%arg10 = %1077) -> (vector<16x512xf32>)  : i32 {
        %1246 = arith.index_cast %arg9 : i32 to index
        %c0_338 = arith.constant 0 : index
        %c0_339 = arith.constant 0 : index
        %1247 = vector.load %arg5[%1246, %c0_338, %c0_339] : memref<16x16x512xf32, #tpu.memory_space<vmem>>, vector<1x16x512xf32>
        %1248 = vector.shape_cast %1247 : vector<1x16x512xf32> to vector<16x512xf32>
        %1249 = arith.maximumf %arg10, %1248 : vector<16x512xf32>
        scf.yield %1249 : vector<16x512xf32>
      }
      %c7_i32_295 = arith.constant 7 : i32
      %1081 = arith.muli %6, %c7_i32_295 : i32
      %c0_i32_296 = arith.constant 0 : i32
      %1082 = arith.addi %1081, %c0_i32_296 : i32
      %1083 = arith.index_cast %1082 : i32 to index
      %1084 = memref.load %arg3[%1083] : memref<112xi32, #tpu.memory_space<smem>>
      %c7_i32_297 = arith.constant 7 : i32
      %1085 = arith.muli %6, %c7_i32_297 : i32
      %c0_i32_298 = arith.constant 0 : i32
      %1086 = arith.addi %1085, %c0_i32_298 : i32
      %1087 = arith.index_cast %1086 : i32 to index
      %1088 = memref.load %arg4[%1087] : memref<112xi32, #tpu.memory_space<smem>>
      %1089 = vector.broadcast %1084 : i32 to vector<16x1xi32>
      %1090 = arith.cmpi sge, %0, %1089 : vector<16x1xi32>
      %1091 = vector.broadcast %1088 : i32 to vector<16x1xi32>
      %1092 = arith.cmpi slt, %0, %1091 : vector<16x1xi32>
      %1093 = arith.andi %1090, %1092 : vector<16x1xi1>
      %1094 = vector.shape_cast %1093 : vector<16x1xi1> to vector<16x1xi1>
      %1095 = vector.broadcast %1094 : vector<16x1xi1> to vector<16x512xi1>
      %1096 = vector.broadcast %cst : f32 to vector<16x512xf32>
      %1097 = arith.select %1095, %1080, %1096 : vector<16x512xi1>, vector<16x512xf32>
      %cst_299 = arith.constant dense<0xFF800000> : vector<512xf32>
      %1098 = vector.multi_reduction <maximumf>, %1097, %cst_299 [0] : vector<16x512xf32> to vector<512xf32>
      %1099 = vector.shape_cast %1098 : vector<512xf32> to vector<1x512xf32>
      %1100 = vector.broadcast %cst : f32 to vector<1x512xf32>
      %1101 = arith.cmpf oeq, %1099, %1100 : vector<1x512xf32>
      %cst_300 = arith.constant 0.000000e+00 : f32
      %1102 = vector.broadcast %cst_300 : f32 to vector<1x512xf32>
      %1103 = arith.select %1101, %1102, %1099 : vector<1x512xi1>, vector<1x512xf32>
      %c7_i32_301 = arith.constant 7 : i32
      %1104 = arith.muli %6, %c7_i32_301 : i32
      %c1_i32_302 = arith.constant 1 : i32
      %1105 = arith.addi %1104, %c1_i32_302 : i32
      %1106 = arith.index_cast %1105 : i32 to index
      %1107 = memref.load %arg3[%1106] : memref<112xi32, #tpu.memory_space<smem>>
      %c7_i32_303 = arith.constant 7 : i32
      %1108 = arith.muli %6, %c7_i32_303 : i32
      %c1_i32_304 = arith.constant 1 : i32
      %1109 = arith.addi %1108, %c1_i32_304 : i32
      %1110 = arith.index_cast %1109 : i32 to index
      %1111 = memref.load %arg4[%1110] : memref<112xi32, #tpu.memory_space<smem>>
      %1112 = vector.broadcast %1107 : i32 to vector<16x1xi32>
      %1113 = arith.cmpi sge, %0, %1112 : vector<16x1xi32>
      %1114 = vector.broadcast %1111 : i32 to vector<16x1xi32>
      %1115 = arith.cmpi slt, %0, %1114 : vector<16x1xi32>
      %1116 = arith.andi %1113, %1115 : vector<16x1xi1>
      %1117 = vector.shape_cast %1116 : vector<16x1xi1> to vector<16x1xi1>
      %1118 = vector.broadcast %1117 : vector<16x1xi1> to vector<16x512xi1>
      %1119 = vector.broadcast %cst : f32 to vector<16x512xf32>
      %1120 = arith.select %1118, %1080, %1119 : vector<16x512xi1>, vector<16x512xf32>
      %cst_305 = arith.constant dense<0xFF800000> : vector<512xf32>
      %1121 = vector.multi_reduction <maximumf>, %1120, %cst_305 [0] : vector<16x512xf32> to vector<512xf32>
      %1122 = vector.shape_cast %1121 : vector<512xf32> to vector<1x512xf32>
      %1123 = vector.broadcast %cst : f32 to vector<1x512xf32>
      %1124 = arith.cmpf oeq, %1122, %1123 : vector<1x512xf32>
      %cst_306 = arith.constant 0.000000e+00 : f32
      %1125 = vector.broadcast %cst_306 : f32 to vector<1x512xf32>
      %1126 = arith.select %1124, %1125, %1122 : vector<1x512xi1>, vector<1x512xf32>
      %c7_i32_307 = arith.constant 7 : i32
      %1127 = arith.muli %6, %c7_i32_307 : i32
      %c2_i32_308 = arith.constant 2 : i32
      %1128 = arith.addi %1127, %c2_i32_308 : i32
      %1129 = arith.index_cast %1128 : i32 to index
      %1130 = memref.load %arg3[%1129] : memref<112xi32, #tpu.memory_space<smem>>
      %c7_i32_309 = arith.constant 7 : i32
      %1131 = arith.muli %6, %c7_i32_309 : i32
      %c2_i32_310 = arith.constant 2 : i32
      %1132 = arith.addi %1131, %c2_i32_310 : i32
      %1133 = arith.index_cast %1132 : i32 to index
      %1134 = memref.load %arg4[%1133] : memref<112xi32, #tpu.memory_space<smem>>
      %1135 = vector.broadcast %1130 : i32 to vector<16x1xi32>
      %1136 = arith.cmpi sge, %0, %1135 : vector<16x1xi32>
      %1137 = vector.broadcast %1134 : i32 to vector<16x1xi32>
      %1138 = arith.cmpi slt, %0, %1137 : vector<16x1xi32>
      %1139 = arith.andi %1136, %1138 : vector<16x1xi1>
      %1140 = vector.shape_cast %1139 : vector<16x1xi1> to vector<16x1xi1>
      %1141 = vector.broadcast %1140 : vector<16x1xi1> to vector<16x512xi1>
      %1142 = vector.broadcast %cst : f32 to vector<16x512xf32>
      %1143 = arith.select %1141, %1080, %1142 : vector<16x512xi1>, vector<16x512xf32>
      %cst_311 = arith.constant dense<0xFF800000> : vector<512xf32>
      %1144 = vector.multi_reduction <maximumf>, %1143, %cst_311 [0] : vector<16x512xf32> to vector<512xf32>
      %1145 = vector.shape_cast %1144 : vector<512xf32> to vector<1x512xf32>
      %1146 = vector.broadcast %cst : f32 to vector<1x512xf32>
      %1147 = arith.cmpf oeq, %1145, %1146 : vector<1x512xf32>
      %cst_312 = arith.constant 0.000000e+00 : f32
      %1148 = vector.broadcast %cst_312 : f32 to vector<1x512xf32>
      %1149 = arith.select %1147, %1148, %1145 : vector<1x512xi1>, vector<1x512xf32>
      %c7_i32_313 = arith.constant 7 : i32
      %1150 = arith.muli %6, %c7_i32_313 : i32
      %c3_i32_314 = arith.constant 3 : i32
      %1151 = arith.addi %1150, %c3_i32_314 : i32
      %1152 = arith.index_cast %1151 : i32 to index
      %1153 = memref.load %arg3[%1152] : memref<112xi32, #tpu.memory_space<smem>>
      %c7_i32_315 = arith.constant 7 : i32
      %1154 = arith.muli %6, %c7_i32_315 : i32
      %c3_i32_316 = arith.constant 3 : i32
      %1155 = arith.addi %1154, %c3_i32_316 : i32
      %1156 = arith.index_cast %1155 : i32 to index
      %1157 = memref.load %arg4[%1156] : memref<112xi32, #tpu.memory_space<smem>>
      %1158 = vector.broadcast %1153 : i32 to vector<16x1xi32>
      %1159 = arith.cmpi sge, %0, %1158 : vector<16x1xi32>
      %1160 = vector.broadcast %1157 : i32 to vector<16x1xi32>
      %1161 = arith.cmpi slt, %0, %1160 : vector<16x1xi32>
      %1162 = arith.andi %1159, %1161 : vector<16x1xi1>
      %1163 = vector.shape_cast %1162 : vector<16x1xi1> to vector<16x1xi1>
      %1164 = vector.broadcast %1163 : vector<16x1xi1> to vector<16x512xi1>
      %1165 = vector.broadcast %cst : f32 to vector<16x512xf32>
      %1166 = arith.select %1164, %1080, %1165 : vector<16x512xi1>, vector<16x512xf32>
      %cst_317 = arith.constant dense<0xFF800000> : vector<512xf32>
      %1167 = vector.multi_reduction <maximumf>, %1166, %cst_317 [0] : vector<16x512xf32> to vector<512xf32>
      %1168 = vector.shape_cast %1167 : vector<512xf32> to vector<1x512xf32>
      %1169 = vector.broadcast %cst : f32 to vector<1x512xf32>
      %1170 = arith.cmpf oeq, %1168, %1169 : vector<1x512xf32>
      %cst_318 = arith.constant 0.000000e+00 : f32
      %1171 = vector.broadcast %cst_318 : f32 to vector<1x512xf32>
      %1172 = arith.select %1170, %1171, %1168 : vector<1x512xi1>, vector<1x512xf32>
      %c7_i32_319 = arith.constant 7 : i32
      %1173 = arith.muli %6, %c7_i32_319 : i32
      %c4_i32_320 = arith.constant 4 : i32
      %1174 = arith.addi %1173, %c4_i32_320 : i32
      %1175 = arith.index_cast %1174 : i32 to index
      %1176 = memref.load %arg3[%1175] : memref<112xi32, #tpu.memory_space<smem>>
      %c7_i32_321 = arith.constant 7 : i32
      %1177 = arith.muli %6, %c7_i32_321 : i32
      %c4_i32_322 = arith.constant 4 : i32
      %1178 = arith.addi %1177, %c4_i32_322 : i32
      %1179 = arith.index_cast %1178 : i32 to index
      %1180 = memref.load %arg4[%1179] : memref<112xi32, #tpu.memory_space<smem>>
      %1181 = vector.broadcast %1176 : i32 to vector<16x1xi32>
      %1182 = arith.cmpi sge, %0, %1181 : vector<16x1xi32>
      %1183 = vector.broadcast %1180 : i32 to vector<16x1xi32>
      %1184 = arith.cmpi slt, %0, %1183 : vector<16x1xi32>
      %1185 = arith.andi %1182, %1184 : vector<16x1xi1>
      %1186 = vector.shape_cast %1185 : vector<16x1xi1> to vector<16x1xi1>
      %1187 = vector.broadcast %1186 : vector<16x1xi1> to vector<16x512xi1>
      %1188 = vector.broadcast %cst : f32 to vector<16x512xf32>
      %1189 = arith.select %1187, %1080, %1188 : vector<16x512xi1>, vector<16x512xf32>
      %cst_323 = arith.constant dense<0xFF800000> : vector<512xf32>
      %1190 = vector.multi_reduction <maximumf>, %1189, %cst_323 [0] : vector<16x512xf32> to vector<512xf32>
      %1191 = vector.shape_cast %1190 : vector<512xf32> to vector<1x512xf32>
      %1192 = vector.broadcast %cst : f32 to vector<1x512xf32>
      %1193 = arith.cmpf oeq, %1191, %1192 : vector<1x512xf32>
      %cst_324 = arith.constant 0.000000e+00 : f32
      %1194 = vector.broadcast %cst_324 : f32 to vector<1x512xf32>
      %1195 = arith.select %1193, %1194, %1191 : vector<1x512xi1>, vector<1x512xf32>
      %c7_i32_325 = arith.constant 7 : i32
      %1196 = arith.muli %6, %c7_i32_325 : i32
      %c5_i32_326 = arith.constant 5 : i32
      %1197 = arith.addi %1196, %c5_i32_326 : i32
      %1198 = arith.index_cast %1197 : i32 to index
      %1199 = memref.load %arg3[%1198] : memref<112xi32, #tpu.memory_space<smem>>
      %c7_i32_327 = arith.constant 7 : i32
      %1200 = arith.muli %6, %c7_i32_327 : i32
      %c5_i32_328 = arith.constant 5 : i32
      %1201 = arith.addi %1200, %c5_i32_328 : i32
      %1202 = arith.index_cast %1201 : i32 to index
      %1203 = memref.load %arg4[%1202] : memref<112xi32, #tpu.memory_space<smem>>
      %1204 = vector.broadcast %1199 : i32 to vector<16x1xi32>
      %1205 = arith.cmpi sge, %0, %1204 : vector<16x1xi32>
      %1206 = vector.broadcast %1203 : i32 to vector<16x1xi32>
      %1207 = arith.cmpi slt, %0, %1206 : vector<16x1xi32>
      %1208 = arith.andi %1205, %1207 : vector<16x1xi1>
      %1209 = vector.shape_cast %1208 : vector<16x1xi1> to vector<16x1xi1>
      %1210 = vector.broadcast %1209 : vector<16x1xi1> to vector<16x512xi1>
      %1211 = vector.broadcast %cst : f32 to vector<16x512xf32>
      %1212 = arith.select %1210, %1080, %1211 : vector<16x512xi1>, vector<16x512xf32>
      %cst_329 = arith.constant dense<0xFF800000> : vector<512xf32>
      %1213 = vector.multi_reduction <maximumf>, %1212, %cst_329 [0] : vector<16x512xf32> to vector<512xf32>
      %1214 = vector.shape_cast %1213 : vector<512xf32> to vector<1x512xf32>
      %1215 = vector.broadcast %cst : f32 to vector<1x512xf32>
      %1216 = arith.cmpf oeq, %1214, %1215 : vector<1x512xf32>
      %cst_330 = arith.constant 0.000000e+00 : f32
      %1217 = vector.broadcast %cst_330 : f32 to vector<1x512xf32>
      %1218 = arith.select %1216, %1217, %1214 : vector<1x512xi1>, vector<1x512xf32>
      %c7_i32_331 = arith.constant 7 : i32
      %1219 = arith.muli %6, %c7_i32_331 : i32
      %c6_i32_332 = arith.constant 6 : i32
      %1220 = arith.addi %1219, %c6_i32_332 : i32
      %1221 = arith.index_cast %1220 : i32 to index
      %1222 = memref.load %arg3[%1221] : memref<112xi32, #tpu.memory_space<smem>>
      %c7_i32_333 = arith.constant 7 : i32
      %1223 = arith.muli %6, %c7_i32_333 : i32
      %c6_i32_334 = arith.constant 6 : i32
      %1224 = arith.addi %1223, %c6_i32_334 : i32
      %1225 = arith.index_cast %1224 : i32 to index
      %1226 = memref.load %arg4[%1225] : memref<112xi32, #tpu.memory_space<smem>>
      %1227 = vector.broadcast %1222 : i32 to vector<16x1xi32>
      %1228 = arith.cmpi sge, %0, %1227 : vector<16x1xi32>
      %1229 = vector.broadcast %1226 : i32 to vector<16x1xi32>
      %1230 = arith.cmpi slt, %0, %1229 : vector<16x1xi32>
      %1231 = arith.andi %1228, %1230 : vector<16x1xi1>
      %1232 = vector.shape_cast %1231 : vector<16x1xi1> to vector<16x1xi1>
      %1233 = vector.broadcast %1232 : vector<16x1xi1> to vector<16x512xi1>
      %1234 = vector.broadcast %cst : f32 to vector<16x512xf32>
      %1235 = arith.select %1233, %1080, %1234 : vector<16x512xi1>, vector<16x512xf32>
      %cst_335 = arith.constant dense<0xFF800000> : vector<512xf32>
      %1236 = vector.multi_reduction <maximumf>, %1235, %cst_335 [0] : vector<16x512xf32> to vector<512xf32>
      %1237 = vector.shape_cast %1236 : vector<512xf32> to vector<1x512xf32>
      %1238 = vector.broadcast %cst : f32 to vector<1x512xf32>
      %1239 = arith.cmpf oeq, %1237, %1238 : vector<1x512xf32>
      %cst_336 = arith.constant 0.000000e+00 : f32
      %1240 = vector.broadcast %cst_336 : f32 to vector<1x512xf32>
      %1241 = arith.select %1239, %1240, %1237 : vector<1x512xi1>, vector<1x512xf32>
      %1242 = tpu.concatenate %1103, %1126, %1149, %1172, %1195, %1218, %1241 in 0 : vector<1x512xf32>, vector<1x512xf32>, vector<1x512xf32>, vector<1x512xf32>, vector<1x512xf32>, vector<1x512xf32>, vector<1x512xf32> -> vector<7x512xf32>
      %1243 = vector.shape_cast %1242 : vector<7x512xf32> to vector<1x7x512xf32>
      %1244 = arith.index_cast %arg8 : i32 to index
      %c42 = arith.constant 42 : index
      %c0_337 = arith.constant 0 : index
      %1245 = vector.load %arg7[%1244, %c42, %c0_337] : memref<8x49x512xf32, #tpu.memory_space<vmem>>, vector<1x7x512xf32>
      tpu.vector_store %arg7[%1244, %c42, %c0_337], %1243 {strides = array<i32>} : memref<8x49x512xf32, #tpu.memory_space<vmem>>, vector<1x7x512xf32>,
    }
    %c8_i32_0 = arith.constant 8 : i32
    %c0 = arith.constant 0 : index
    %c0_1 = arith.constant 0 : index
    %c0_2 = arith.constant 0 : index
    %2 = vector.load %arg7[%c0, %c0_1, %c0_2] : memref<8x49x512xf32, #tpu.memory_space<vmem>>, vector<8x49x512xf32>
    %3 = arith.truncf %2 : vector<8x49x512xf32> to vector<8x49x512xbf16>
    %c0_3 = arith.constant 0 : index
    %c0_4 = arith.constant 0 : index
    %c0_5 = arith.constant 0 : index
    %4 = vector.load %arg6[%c0_3, %c0_4, %c0_5] : memref<8x49x512xbf16, #tpu.memory_space<vmem>>, vector<8x49x512xbf16>
    tpu.vector_store %arg6[%c0_3, %c0_4, %c0_5], %3 {strides = array<i32>} : memref<8x49x512xbf16, #tpu.memory_space<vmem>>, vector<8x49x512xbf16>,
    return
  }
  func.func @transform_0(%arg0: i32, %arg1: memref<112xi32, #tpu.memory_space<smem>>, %arg2: memref<112xi32, #tpu.memory_space<smem>>, %arg3: memref<112xi32, #tpu.memory_space<smem>>, %arg4: memref<112xi32, #tpu.memory_space<smem>>) -> (i32, i32, i32) {
    %c0_i32 = arith.constant 0 : i32
    %c0_i32_0 = arith.constant 0 : i32
    %c0_i32_1 = arith.constant 0 : i32
    %c0_i32_2 = arith.constant 0 : i32
    return %c0_i32, %c0_i32_0, %c0_i32_1 : i32, i32, i32
  }
  func.func @transform_1(%arg0: i32, %arg1: memref<112xi32, #tpu.memory_space<smem>>, %arg2: memref<112xi32, #tpu.memory_space<smem>>, %arg3: memref<112xi32, #tpu.memory_space<smem>>, %arg4: memref<112xi32, #tpu.memory_space<smem>>) -> (i32, i32, i32) {
    %c0_i32 = arith.constant 0 : i32
    %c0_i32_0 = arith.constant 0 : i32
    %c0_i32_1 = arith.constant 0 : i32
    return %arg0, %c0_i32, %c0_i32_0 : i32, i32, i32
  }
}

</mosaic_0001>

<bundles_post_ra>
// kernel: tpu_custom_call.1
= control target key start
LH: loop header
LB: loop body
LE: loop exit
PB: predicated region body
PF: predicated region fallthrough
CT: control target
= control target key end

     0   :  { %s6391_s24 = smov [#allocation4]   ;;  %s6392_s25 = smov [#allocation5]   ;;  %s9815_s0 = inlined_call_operand.hbm [shape: s32[112], index: 0, kind: input, shape index: {}]   ;;  %s9816_s4 = inlined_call_operand.hbm [shape: f32[16,16,512], index: 4, kind: input, shape index: {}]   ;;  %s9817_s5 = inlined_call_operand.vmem [shape: bf16[16,49,512], index: 5, kind: output, shape index: {}]   ;;  %s9818_s1 = inlined_call_operand.hbm [shape: s32[112], index: 1, kind: input, shape index: {}]   ;;  %s9819_s2 = inlined_call_operand.vmem [shape: s32[112], index: 2, kind: input, shape index: {}]   ;;  %s9820_s3 = inlined_call_operand.vmem [shape: s32[112], index: 3, kind: input, shape index: {}]  }
   0x1   :  { %s11_s20 = sshll.u32 %s9815_s0, 4  ;;  %s16_s23 = sshll.u32 %s9818_s1, 4  ;;  %s12_s20 = int_to_ptr.hbm [resolvable:$true] %s11_s20  ;;  %s17_s23 = int_to_ptr.hbm [resolvable:$true] %s16_s23 }
   0x2   :  { %14 = dma.hbm_to_smem %s12_s20, 16, %s6391_s24, [#allocation3] }
   0x3   :  { %19 = dma.hbm_to_smem %s17_s23, 16, %s6392_s25, [#allocation3] }
   0x4   :  { %s21_s28 = sshll.u32 %s9819_s2, 4  ;;  %s26_s6 = sshll.u32 %s9820_s3, 4  ;;  %s22_s28 = int_to_ptr.vmem [resolvable:$true] %s21_s28  ;;  %s27_s6 = int_to_ptr.vmem [resolvable:$true] %s26_s6 }
   0x5   :  { %s6393_s0 = smov [#allocation6]   ;;  %s6394_s7 = smov [#allocation7]  }
   0x6   :  { %24 = dma.vmem_to_smem %s22_s28, 16, %s6393_s0, [#allocation3] }
   0x7   :  { %29 = dma.vmem_to_smem %s27_s6, 16, %s6394_s7, [#allocation3] }
   0x8   :  { %5901 = dma.done.wait [#allocation3], 64 }
   0x9   :  { %5902 = vsyncadd [#allocation3], 4294967232 }
   0xa   :  { %32 = sfence }
   0xb   :  { %33 = vsyncpa [#allocation9], 0  ;;  %s6440_s1 = smov 0  }
   0xc LB: > { %s102_s3 = sshll.u32 %s9816_s4, 4  ;;  %s4319_s9 = sadd.s32 4294967295, %s5909_s1   ;;  %s5909_s1 = sphi %s6440_s1, %s39_s1   ;;  %s103_s3 = int_to_ptr.hbm [resolvable:$true] %s102_s3 }
   0xd   : > { %p4321_p0 = scmp.ge.s32.totalorder %s5909_s1, 1  ;;  %p91_p1 = scmp.lt.s32.totalorder %s5909_s1, 3 }
   0xe   : > { %p4362_p2 = scmp.eq.s32.totalorder %s4319_s9, 0  ;;  %s6395_s10 = smov [#allocation8]  }
   0xf   : > { %p92_p3 = pnand %p4321_p0, %p91_p1  ;;  %s104_s11 = sshll.u32 %s6395_s10, 4  ;;  %s105_s11 = int_to_ptr.vmem [resolvable:$true] %s104_s11 }
  0x10   : > { %s6396_s12 = smov 512   ;;  %s6397_s13 = smov 32  }
  0x11   : > { %p4358_p4 = pneg %p92_p3  ;;  %120 = sbr.rel (%p92_p3) target bundleno = 1098 (0x44a), region = 24 }
  0x13   : > { %p4359_p5 = pnand %p4362_p2, %p4358_p4 }
  0x15   : > { %4361 = dma.hbm_to_vmem [thread:$0]  (!%p4359_p5), %s103_s3, 16384, %s105_s11, [#allocation9], %s6396_s12, %s6396_s12, %s6397_s13  }
  0x16   : > { %5904 = dma.done.wait (%p4362_p2), [#allocation9], 16384  }
  0x17   : > { %5906 = vsyncadd (%p4362_p2), [#allocation9], 4294950912  ;;  %s6451_s14 = sshll.u32 %s4319_s9, 3  ;;  %v144_v0 = vlaneseq  ;;  %s6465_s20 = smov 0  }
  0x18   : > { %p138_p6 = scmp.lt.s32.totalorder %s6451_s14, 15 }
  0x19   : > { %v6454_v1 = vshrl.u32 %v144_v0, 7 }
  0x1a   : > { %s139_s15 = scalar_select %p138_p6, %s6451_s14, 15 }
  0x1b   : > { %v6458_v2 = vadd.s32 8, %v6454_v1 }
  0x1c   : > { %s4353_s16 = smul.u32 112, %s139_s15 }
  0x1e   : > { %s6463_s19 = scalar_lea.vmem %s9817_s5, %s4353_s16 }
  0x1f LB: >> { %s154_s21 = sadd.s32 %s5913_s20, %s6451_s14  ;;  %v6479_v3 = vmov -inf   ;;  %v6481_v4 = vmov -inf   ;;  %v6483_v5 = vmov -inf   ;;  %v6485_v6 = vmov -inf   ;;  %s5913_s20 = sphi %s6465_s20, %s152_s20  }
  0x20   : >> { %s6472_s22 = smul.u32 7, %s154_s21  ;;  %v6487_v7 = vmov -inf   ;;  %v6489_v8 = vmov -inf   ;;  %v6491_v9 = vmov -inf   ;;  %v6493_v10 = vmov -inf  }
  0x22   : >> { %s156_s23 = sld [smem:[#allocation4 + %s6472_s22]]  }
  0x23   : >> { %s6476_s24 = sld [smem:[#allocation5 + %s6472_s22]] }
  0x29   : >> { %p4089_p7 = scmp.ge.s32.totalorder %s156_s23, %s6476_s24 }
  0x2b   : >> { %4098 = sbr.rel (%p4089_p7) target bundleno = 60 (0x3c), region = 114 }
  0x30   : >> { %v5915_v11 = vmov -inf   ;;  %v5919_v12 = vmov -inf   ;;  %v5923_v13 = vmov -inf   ;;  %v5927_v14 = vmov -inf  }
  0x31   : >> { %v5931_v15 = vmov -inf   ;;  %v5935_v16 = vmov -inf   ;;  %v5939_v17 = vmov -inf   ;;  %v5943_v18 = vmov -inf  }
  0x32 LB: >>> { %s4345_s25 = sshll.u32 %s5949_s23, 6  ;;  %s161_s23 = sadd.s32 1, %s5949_s23   ;;  %s5949_s23 = sphi %s156_s23, %s161_s23   ;;  %v5945_v18 = vphi %v5943_v18, %v5944_v18   ;;  %v5941_v17 = vphi %v5939_v17, %v5940_v17   ;;  %v5937_v16 = vphi %v5935_v16, %v5936_v16   ;;  %v5933_v15 = vphi %v5931_v15, %v5932_v15   ;;  %v5929_v14 = vphi %v5927_v14, %v5928_v14   ;;  %v5925_v13 = vphi %v5923_v13, %v5924_v13   ;;  %v5921_v12 = vphi %v5919_v12, %v5920_v12   ;;  %v5917_v11 = vphi %v5915_v11, %v5916_v11  }
  0x33   : >>> { %s174_s26 = scalar_lea.vmem [#allocation8], %s4345_s25  ;;  %p160_p8 = scmp.ge.s32.totalorder %s161_s23, %s6476_s24 }
  0x34   : >>> { %v175_v19 = vld [vmem:[%s174_s26] sm:$0xff]  ;;  %v176_v20 = vld [vmem:[%s174_s26 + $0x8] sm:$0xff]  ;;  %v177_v21 = vld [vmem:[%s174_s26 + $0x10] sm:$0xff] }
  0x35   : >>> { %v178_v22 = vld [vmem:[%s174_s26 + $0x18] sm:$0xff]  ;;  %v179_v23 = vld [vmem:[%s174_s26 + $0x20] sm:$0xff]  ;;  %v180_v24 = vld [vmem:[%s174_s26 + $0x28] sm:$0xff]  ;;  %v183_v25 = vmax.f32 %v5945_v18, %v175_v19   ;;  %v184_v26 = vmax.f32 %v5941_v17, %v176_v20   ;;  %v185_v27 = vmax.f32 %v5937_v16, %v177_v21   ;;  %163 = sbr.rel (!%p160_p8) target bundleno = 50 (0x32), region = 120 }
  0x36   : >>> { %v181_v28 = vld [vmem:[%s174_s26 + $0x30] sm:$0xff]  ;;  %v182_v29 = vld [vmem:[%s174_s26 + $0x38] sm:$0xff]  ;;  %v186_v30 = vmax.f32 %v5933_v15, %v178_v22   ;;  %v187_v31 = vmax.f32 %v5929_v14, %v179_v23   ;;  %v188_v32 = vmax.f32 %v5925_v13, %v180_v24  }
  0x37   : >>> { %v189_v33 = vmax.f32 %v5921_v12, %v181_v28   ;;  %v190_v34 = vmax.f32 %v5917_v11, %v182_v29   ;;  %v5936_v16 = vmov %v185_v27   ;;  %v5940_v17 = vmov %v184_v26  }
  0x38   : >>> { %v5924_v13 = vmov %v188_v32   ;;  %v5928_v14 = vmov %v187_v31   ;;  %v5932_v15 = vmov %v186_v30   ;;  %v5944_v18 = vmov %v183_v25  }
  0x39   : >>> { %v5916_v11 = vmov %v190_v34   ;;  %v5920_v12 = vmov %v189_v33   ;;  %v9875_v3 = vmov (%p160_p8), %v190_v34  ;;  %v9876_v4 = vmov (%p160_p8), %v189_v33 }
  0x3a   : >> { %v9877_v5 = vmov %v188_v32  ;;  %v9878_v6 = vmov %v187_v31  ;;  %v9879_v7 = vmov %v186_v30  ;;  %v9880_v8 = vmov %v185_v27 }
  0x3b   : >> { %v9881_v9 = vmov %v184_v26  ;;  %v9882_v10 = vmov %v183_v25 }
  0x3c PF: >> { %s191_s27 = sld [smem:[#allocation6 + %s6472_s22]]  ;;  %s6547_s28 = sadd.s32 1, %s6472_s22  ;;  %v5981_v10 = vphi %v6493_v10, %v9882_v10   ;;  %v5977_v9 = vphi %v6491_v9, %v9881_v9   ;;  %v5973_v8 = vphi %v6489_v8, %v9880_v8   ;;  %v5969_v7 = vphi %v6487_v7, %v9879_v7   ;;  %v5965_v6 = vphi %v6485_v6, %v9878_v6   ;;  %v5961_v5 = vphi %v6483_v5, %v9877_v5   ;;  %v5957_v4 = vphi %v6481_v4, %v9876_v4   ;;  %v5953_v3 = vphi %v6479_v3, %v9875_v3  }
  0x3d   : >> { %s192_s29 = sld [smem:[#allocation7 + %s6472_s22]]  ;;  %s6551_s30 = sadd.s32 2, %s6472_s22 }
  0x3e   : >> { %s250_s6 = sld [smem:[#allocation6 + %s6547_s28]]  ;;  %s6642_s9 = sadd.s32 3, %s6472_s22 }
  0x3f   : >> { %s251_s0 = sld [smem:[#allocation7 + %s6547_s28]]  ;;  %s6645_s10 = sadd.s32 4, %s6472_s22 }
  0x40   : >> { %s6556_s7 = sld [smem:[#allocation6 + %s6551_s30]]  ;;  %s6760_s16 = sadd.s32 5, %s6472_s22 }
  0x41   : >> { %s6559_s2 = sld [smem:[#allocation7 + %s6551_s30]]  ;;  %s6771_s17 = sadd.s32 6, %s6472_s22 }
  0x42   : >> { %v193_v35 = vstv %s191_s27  ;;  %s6606_s8 = sld [smem:[#allocation4 + %s6547_s28]]   ;;  %s4346_s25 = smul.u32 224, %s5913_s20 }
  0x43   : >> { %vm194_vm0 = vcmp.ge.s32.totalorder %v6454_v1, %v193_v35  ;;  %vm195_vm1 = vcmp.ge.s32.totalorder %v6458_v2, %v193_v35  ;;  %v196_v36 = vstv %s192_s29  ;;  %s6627_s3 = sld [smem:[#allocation5 + %s6547_s28]] }
  0x44   : >> { %vm197_vm2 = vcmp.lt.s32.totalorder %v6454_v1, %v196_v36  ;;  %vm198_vm3 = vcmp.lt.s32.totalorder %v6458_v2, %v196_v36  ;;  %v252_v37 = vstv %s250_s6  ;;  %s6648_s11 = sld [smem:[#allocation6 + %s6642_s9]]  ;;  %s6966_s26 = scalar_lea.vmem [#allocation2], %s4346_s25 }
  0x45   : >> { %vm6565_vm4 = vmand %vm194_vm0, %vm197_vm2  ;;  %vm6570_vm5 = vcmp.ge.s32.totalorder %v6454_v1, %v252_v37  ;;  %vm6575_vm6 = vcmp.ge.s32.totalorder %v6458_v2, %v252_v37  ;;  %v255_v41 = vstv %s251_s0  ;;  %s6659_s12 = sld [smem:[#allocation7 + %s6642_s9]] }
  0x46   : >> { %vm200_vm7 = vmand %vm195_vm1, %vm198_vm3  ;;  %v205_v42 = vsel %vm6565_vm4, %v5981_v10, -inf  ;;  %v206_v43 = vsel %vm6565_vm4, %v5977_v9, -inf  ;;  %v207_v44 = vsel %vm6565_vm4, %v5973_v8, -inf  ;;  %v208_v45 = vsel %vm6565_vm4, %v5969_v7, -inf  ;;  %s6662_s13 = sld [smem:[#allocation6 + %s6645_s10]] }
  0x47   : >> { %v209_v46 = vsel %vm200_vm7, %v5965_v6, -inf  ;;  %v210_v47 = vsel %vm200_vm7, %v5961_v5, -inf  ;;  %v211_v48 = vsel %vm200_vm7, %v5957_v4, -inf  ;;  %v212_v49 = vsel %vm200_vm7, %v5953_v3, -inf  ;;  %s6677_s15 = sld [smem:[#allocation7 + %s6645_s10]] }
  0x48   : >> { %v213_v50 = vmax.f32 %v205_v42, %v209_v46  ;;  %v220_v51 = vmax.f32 %v206_v43, %v210_v47  ;;  %v227_v52 = vmax.f32 %v207_v44, %v211_v48  ;;  %v234_v53 = vmax.f32 %v208_v45, %v212_v49  ;;  %s6774_s18 = sld [smem:[#allocation6 + %s6760_s16]] }
  0x49   : >> { %vm256_vm8 = vcmp.lt.s32.totalorder %v6454_v1, %v255_v41  ;;  %vm257_vm9 = vcmp.lt.s32.totalorder %v6458_v2, %v255_v41  ;;  %v311_v54 = vstv %s6556_s7  ;;  %v314_v55 = vstv %s6559_s2  ;;  %s6789_s21 = sld [smem:[#allocation7 + %s6760_s16]]  ;;  %p4118_p9 = scmp.ge.s32.totalorder %s6606_s8, %s6627_s3 }
  0x4a   : >> { %v214_v56 = vrot.slane %v213_v50, 4  ;;  %v221_v57 = vrot.slane %v220_v51, 4  ;;  %v228_v58 = vrot.slane %v227_v52, 4  ;;  %v235_v59 = vrot.slane %v234_v53, 4  ;;  %vm6601_vm10 = vmand %vm6570_vm5, %vm256_vm8  ;;  %s6796_s23 = sld [smem:[#allocation6 + %s6771_s17]] }
  0x4b   : >> { %vm6610_vm11 = vmand %vm6575_vm6, %vm257_vm9  ;;  %v264_v62 = vsel %vm6601_vm10, %v5981_v10, -inf  ;;  %v265_v63 = vsel %vm6601_vm10, %v5977_v9, -inf  ;;  %v266_v0 = vsel %vm6601_vm10, %v5973_v8, -inf  ;;  %v267_v11 = vsel %vm6601_vm10, %v5969_v7, -inf  ;;  %s6815_s24 = sld [smem:[#allocation7 + %s6771_s17]] }
  0x4c   : >> { %v215_v12 = vmax.f32 %v213_v50, %v214_v56  ;;  %v222_v13 = vmax.f32 %v220_v51, %v221_v57  ;;  %v229_v14 = vmax.f32 %v227_v52, %v228_v58  ;;  %v236_v15 = vmax.f32 %v234_v53, %v235_v59 }
  0x4d   : >> { %v268_v16 = vsel %vm6610_vm11, %v5965_v6, -inf  ;;  %v269_v17 = vsel %vm6610_vm11, %v5961_v5, -inf  ;;  %v270_v18 = vsel %vm6610_vm11, %v5957_v4, -inf  ;;  %v271_v19 = vsel %vm6610_vm11, %v5953_v3, -inf }
  0x4e   : >> { %v216_v20 = vrot.slane %v215_v12, 2  ;;  %v223_v21 = vrot.slane %v222_v13, 2  ;;  %v230_v22 = vrot.slane %v229_v14, 2  ;;  %v237_v23 = vrot.slane %v236_v15, 2 }
  0x4f   : >> { %v272_v24 = vmax.f32 %v264_v62, %v268_v16  ;;  %v279_v25 = vmax.f32 %v265_v63, %v269_v17  ;;  %v286_v26 = vmax.f32 %v266_v0, %v270_v18  ;;  %v293_v27 = vmax.f32 %v267_v11, %v271_v19 }
  0x50   : >> { %v217_v28 = vmax.f32 %v215_v12, %v216_v20  ;;  %v224_v29 = vmax.f32 %v222_v13, %v223_v21  ;;  %v231_v30 = vmax.f32 %v229_v14, %v230_v22  ;;  %v238_v31 = vmax.f32 %v236_v15, %v237_v23 }
  0x51   : >> { %v273_v32 = vrot.slane %v272_v24, 4  ;;  %v280_v33 = vrot.slane %v279_v25, 4  ;;  %v287_v34 = vrot.slane %v286_v26, 4  ;;  %v294_v35 = vrot.slane %v293_v27, 4 }
  0x52   : >> { %v218_v36 = vrot.slane %v217_v28, 1  ;;  %v225_v37 = vrot.slane %v224_v29, 1  ;;  %v232_v38 = vrot.slane %v231_v30, 1  ;;  %v239_v39 = vrot.slane %v238_v31, 1 }
  0x53   : >> { %v274_v40 = vmax.f32 %v272_v24, %v273_v32  ;;  %v281_v41 = vmax.f32 %v279_v25, %v280_v33  ;;  %v288_v42 = vmax.f32 %v286_v26, %v287_v34  ;;  %v295_v43 = vmax.f32 %v293_v27, %v294_v35 }
  0x54   : >> { %v219_v44 = vmax.f32 %v217_v28, %v218_v36  ;;  %v226_v45 = vmax.f32 %v224_v29, %v225_v37  ;;  %v233_v46 = vmax.f32 %v231_v30, %v232_v38  ;;  %v240_v47 = vmax.f32 %v238_v31, %v239_v39 }
  0x55   : >> { %v275_v48 = vrot.slane %v274_v40, 2  ;;  %v282_v49 = vrot.slane %v281_v41, 2  ;;  %v289_v50 = vrot.slane %v288_v42, 2  ;;  %v296_v51 = vrot.slane %v295_v43, 2 }
  0x56   : >> { %vm241_vm12 = vcmp.eq.f32.partialorder %v219_v44, -inf  ;;  %vm242_vm13 = vcmp.eq.f32.partialorder %v226_v45, -inf  ;;  %vm243_vm14 = vcmp.eq.f32.partialorder %v233_v46, -inf  ;;  %vm244_vm15 = vcmp.eq.f32.partialorder %v240_v47, -inf }
  0x57   : >> { %v6650_v52 = vsel %vm241_vm12, 0.0, %v219_v44  ;;  %v6652_v53 = vsel %vm242_vm13, 0.0, %v226_v45  ;;  %v6654_v56 = vsel %vm243_vm14, 0.0, %v233_v46  ;;  %v6656_v57 = vsel %vm244_vm15, 0.0, %v240_v47 }
  0x58   : >> { %v276_v58 = vmax.f32 %v274_v40, %v275_v48  ;;  %v283_v59 = vmax.f32 %v281_v41, %v282_v49  ;;  %v290_v60 = vmax.f32 %v288_v42, %v289_v50  ;;  %v297_v61 = vmax.f32 %v295_v43, %v296_v51 }
  0x59   : >> { %vm312_vm0 = vcmp.ge.s32.totalorder %v6454_v1, %v311_v54  ;;  %vm313_vm1 = vcmp.ge.s32.totalorder %v6458_v2, %v311_v54  ;;  %vm315_vm2 = vcmp.lt.s32.totalorder %v6454_v1, %v314_v55  ;;  %vm316_vm3 = vcmp.lt.s32.totalorder %v6458_v2, %v314_v55 }
  0x5a   : >> { %v277_v62 = vrot.slane %v276_v58, 1  ;;  %v284_v63 = vrot.slane %v283_v59, 1  ;;  %v291_v0 = vrot.slane %v290_v60, 1  ;;  %v298_v11 = vrot.slane %v297_v61, 1  ;;  %vm6679_vm4 = vmand %vm312_vm0, %vm315_vm2 }
  0x5b   : >> { %vm6683_vm5 = vmand %vm313_vm1, %vm316_vm3  ;;  %v323_v54 = vsel %vm6679_vm4, %v5981_v10, -inf  ;;  %v324_v55 = vsel %vm6679_vm4, %v5977_v9, -inf  ;;  %v325_v14 = vsel %vm6679_vm4, %v5973_v8, -inf  ;;  %v326_v15 = vsel %vm6679_vm4, %v5969_v7, -inf }
  0x5c   : >> { %v278_v16 = vmax.f32 %v276_v58, %v277_v62  ;;  %v285_v17 = vmax.f32 %v283_v59, %v284_v63  ;;  %v292_v18 = vmax.f32 %v290_v60, %v291_v0  ;;  %v299_v19 = vmax.f32 %v297_v61, %v298_v11 }
  0x5d   : >> { %v327_v20 = vsel %vm6683_vm5, %v5965_v6, -inf  ;;  %v328_v21 = vsel %vm6683_vm5, %v5961_v5, -inf  ;;  %v329_v22 = vsel %vm6683_vm5, %v5957_v4, -inf  ;;  %v330_v23 = vsel %vm6683_vm5, %v5953_v3, -inf }
  0x5e   : >> { %vm300_vm6 = vcmp.eq.f32.partialorder %v278_v16, -inf  ;;  %vm301_vm7 = vcmp.eq.f32.partialorder %v285_v17, -inf  ;;  %vm302_vm8 = vcmp.eq.f32.partialorder %v292_v18, -inf  ;;  %vm303_vm9 = vcmp.eq.f32.partialorder %v299_v19, -inf }
  0x5f   : >> { %v6711_v24 = vsel %vm300_vm6, 0.0, %v278_v16  ;;  %v6713_v25 = vsel %vm301_vm7, 0.0, %v285_v17  ;;  %v6715_v26 = vsel %vm302_vm8, 0.0, %v292_v18  ;;  %v6717_v27 = vsel %vm303_vm9, 0.0, %v299_v19 }
  0x60   : >> { %v331_v28 = vmax.f32 %v323_v54, %v327_v20  ;;  %v338_v29 = vmax.f32 %v324_v55, %v328_v21  ;;  %v345_v30 = vmax.f32 %v325_v14, %v329_v22  ;;  %v352_v31 = vmax.f32 %v326_v15, %v330_v23 }
  0x61   : >> { %v370_v32 = vstv %s6648_s11  ;;  %v373_v33 = vstv %s6659_s12  ;;  %v429_v34 = vstv %s6662_s13  ;;  %v432_v35 = vstv %s6677_s15 }
  0x62   : >> { %v332_v36 = vrot.slane %v331_v28, 4  ;;  %v339_v37 = vrot.slane %v338_v29, 4  ;;  %v346_v38 = vrot.slane %v345_v30, 4  ;;  %v353_v39 = vrot.slane %v352_v31, 4 }
  0x63   : >> { %vm371_vm10 = vcmp.ge.s32.totalorder %v6454_v1, %v370_v32  ;;  %vm372_vm11 = vcmp.ge.s32.totalorder %v6458_v2, %v370_v32  ;;  %vm374_vm12 = vcmp.lt.s32.totalorder %v6454_v1, %v373_v33  ;;  %vm375_vm13 = vcmp.lt.s32.totalorder %v6458_v2, %v373_v33 }
  0x64   : >> { %v333_v40 = vmax.f32 %v331_v28, %v332_v36  ;;  %v340_v41 = vmax.f32 %v338_v29, %v339_v37  ;;  %v347_v42 = vmax.f32 %v345_v30, %v346_v38  ;;  %v354_v43 = vmax.f32 %v352_v31, %v353_v39  ;;  %vm6727_vm14 = vmand %vm371_vm10, %vm374_vm12 }
  0x65   : >> { %vm6731_vm15 = vmand %vm372_vm11, %vm375_vm13  ;;  %v382_v46 = vsel %vm6727_vm14, %v5981_v10, -inf  ;;  %v383_v47 = vsel %vm6727_vm14, %v5977_v9, -inf  ;;  %v384_v48 = vsel %vm6727_vm14, %v5973_v8, -inf  ;;  %v385_v49 = vsel %vm6727_vm14, %v5969_v7, -inf }
  0x66   : >> { %v334_v50 = vrot.slane %v333_v40, 2  ;;  %v341_v51 = vrot.slane %v340_v41, 2  ;;  %v348_v58 = vrot.slane %v347_v42, 2  ;;  %v355_v59 = vrot.slane %v354_v43, 2 }
  0x67   : >> { %v386_v60 = vsel %vm6731_vm15, %v5965_v6, -inf  ;;  %v387_v61 = vsel %vm6731_vm15, %v5961_v5, -inf  ;;  %v388_v62 = vsel %vm6731_vm15, %v5957_v4, -inf  ;;  %v389_v63 = vsel %vm6731_vm15, %v5953_v3, -inf }
  0x68   : >> { %v335_v0 = vmax.f32 %v333_v40, %v334_v50  ;;  %v342_v11 = vmax.f32 %v340_v41, %v341_v51  ;;  %v349_v12 = vmax.f32 %v347_v42, %v348_v58  ;;  %v356_v13 = vmax.f32 %v354_v43, %v355_v59 }
  0x69   : >> { %v390_v54 = vmax.f32 %v382_v46, %v386_v60  ;;  %v397_v55 = vmax.f32 %v383_v47, %v387_v61  ;;  %v404_v14 = vmax.f32 %v384_v48, %v388_v62  ;;  %v411_v15 = vmax.f32 %v385_v49, %v389_v63 }
  0x6a   : >> { %v336_v16 = vrot.slane %v335_v0, 1  ;;  %v343_v17 = vrot.slane %v342_v11, 1  ;;  %v350_v18 = vrot.slane %v349_v12, 1  ;;  %v357_v19 = vrot.slane %v356_v13, 1 }
  0x6b   : >> { %v391_v20 = vrot.slane %v390_v54, 4  ;;  %v398_v21 = vrot.slane %v397_v55, 4  ;;  %v405_v22 = vrot.slane %v404_v14, 4  ;;  %v412_v23 = vrot.slane %v411_v15, 4 }
  0x6c   : >> { %v337_v28 = vmax.f32 %v335_v0, %v336_v16  ;;  %v344_v29 = vmax.f32 %v342_v11, %v343_v17  ;;  %v351_v30 = vmax.f32 %v349_v12, %v350_v18  ;;  %v358_v31 = vmax.f32 %v356_v13, %v357_v19 }
  0x6d   : >> { %v392_v32 = vmax.f32 %v390_v54, %v391_v20  ;;  %v399_v33 = vmax.f32 %v397_v55, %v398_v21  ;;  %v406_v36 = vmax.f32 %v404_v14, %v405_v22  ;;  %v413_v37 = vmax.f32 %v411_v15, %v412_v23 }
  0x6e   : >> { %vm359_vm0 = vcmp.eq.f32.partialorder %v337_v28, -inf  ;;  %vm360_vm1 = vcmp.eq.f32.partialorder %v344_v29, -inf  ;;  %vm361_vm2 = vcmp.eq.f32.partialorder %v351_v30, -inf  ;;  %vm362_vm3 = vcmp.eq.f32.partialorder %v358_v31, -inf }
  0x6f   : >> { %v6762_v38 = vsel %vm359_vm0, 0.0, %v337_v28  ;;  %v6764_v39 = vsel %vm360_vm1, 0.0, %v344_v29  ;;  %v6766_v40 = vsel %vm361_vm2, 0.0, %v351_v30  ;;  %v6768_v41 = vsel %vm362_vm3, 0.0, %v358_v31 }
  0x70   : >> { %v393_v42 = vrot.slane %v392_v32, 2  ;;  %v400_v43 = vrot.slane %v399_v33, 2  ;;  %v407_v44 = vrot.slane %v406_v36, 2  ;;  %v414_v45 = vrot.slane %v413_v37, 2 }
  0x71   : >> { %vm430_vm4 = vcmp.ge.s32.totalorder %v6454_v1, %v429_v34  ;;  %vm431_vm5 = vcmp.ge.s32.totalorder %v6458_v2, %v429_v34  ;;  %vm433_vm6 = vcmp.lt.s32.totalorder %v6454_v1, %v432_v35  ;;  %vm434_vm7 = vcmp.lt.s32.totalorder %v6458_v2, %v432_v35 }
  0x72   : >> { %v394_v46 = vmax.f32 %v392_v32, %v393_v42  ;;  %v401_v47 = vmax.f32 %v399_v33, %v400_v43  ;;  %v408_v48 = vmax.f32 %v406_v36, %v407_v44  ;;  %v415_v49 = vmax.f32 %v413_v37, %v414_v45  ;;  %vm6791_vm8 = vmand %vm430_vm4, %vm433_vm6 }
  0x73   : >> { %vm6798_vm9 = vmand %vm431_vm5, %vm434_vm7  ;;  %v441_v35 = vsel %vm6791_vm8, %v5981_v10, -inf  ;;  %v442_v51 = vsel %vm6791_vm8, %v5977_v9, -inf  ;;  %v443_v58 = vsel %vm6791_vm8, %v5973_v8, -inf  ;;  %v444_v59 = vsel %vm6791_vm8, %v5969_v7, -inf }
  0x74   : >> { %v395_v60 = vrot.slane %v394_v46, 1  ;;  %v402_v61 = vrot.slane %v401_v47, 1  ;;  %v409_v62 = vrot.slane %v408_v48, 1  ;;  %v416_v63 = vrot.slane %v415_v49, 1 }
  0x75   : >> { %v445_v0 = vsel %vm6798_vm9, %v5965_v6, -inf  ;;  %v446_v11 = vsel %vm6798_vm9, %v5961_v5, -inf  ;;  %v447_v12 = vsel %vm6798_vm9, %v5957_v4, -inf  ;;  %v448_v13 = vsel %vm6798_vm9, %v5953_v3, -inf }
  0x76   : >> { %v396_v54 = vmax.f32 %v394_v46, %v395_v60  ;;  %v403_v55 = vmax.f32 %v401_v47, %v402_v61  ;;  %v410_v14 = vmax.f32 %v408_v48, %v409_v62  ;;  %v417_v15 = vmax.f32 %v415_v49, %v416_v63 }
  0x77   : >> { %v449_v16 = vmax.f32 %v441_v35, %v445_v0  ;;  %v456_v17 = vmax.f32 %v442_v51, %v446_v11  ;;  %v463_v18 = vmax.f32 %v443_v58, %v447_v12  ;;  %v470_v19 = vmax.f32 %v444_v59, %v448_v13 }
  0x78   : >> { %vm418_vm10 = vcmp.eq.f32.partialorder %v396_v54, -inf  ;;  %vm419_vm11 = vcmp.eq.f32.partialorder %v403_v55, -inf  ;;  %vm420_vm12 = vcmp.eq.f32.partialorder %v410_v14, -inf  ;;  %vm421_vm13 = vcmp.eq.f32.partialorder %v417_v15, -inf }
  0x79   : >> { %v6829_v20 = vsel %vm418_vm10, 0.0, %v396_v54  ;;  %v6831_v21 = vsel %vm419_vm11, 0.0, %v403_v55  ;;  %v6833_v22 = vsel %vm420_vm12, 0.0, %v410_v14  ;;  %v6835_v23 = vsel %vm421_vm13, 0.0, %v417_v15 }
  0x7a   : >> { %v450_v28 = vrot.slane %v449_v16, 4  ;;  %v457_v29 = vrot.slane %v456_v17, 4  ;;  %v464_v30 = vrot.slane %v463_v18, 4  ;;  %v471_v31 = vrot.slane %v470_v19, 4 }
  0x7b   : >> { %v488_v32 = vstv %s6774_s18  ;;  %v491_v33 = vstv %s6789_s21  ;;  %v547_v36 = vstv %s6796_s23  ;;  %v550_v37 = vstv %s6815_s24 }
  0x7c   : >> { %v451_v42 = vmax.f32 %v449_v16, %v450_v28  ;;  %v458_v43 = vmax.f32 %v456_v17, %v457_v29  ;;  %v465_v44 = vmax.f32 %v463_v18, %v464_v30  ;;  %v472_v45 = vmax.f32 %v470_v19, %v471_v31 }
  0x7d   : >> { %vm489_vm14 = vcmp.ge.s32.totalorder %v6454_v1, %v488_v32  ;;  %vm490_vm15 = vcmp.ge.s32.totalorder %v6458_v2, %v488_v32  ;;  %vm492_vm0 = vcmp.lt.s32.totalorder %v6454_v1, %v491_v33  ;;  %vm493_vm1 = vcmp.lt.s32.totalorder %v6458_v2, %v491_v33 }
  0x7e   : >> { %v452_v46 = vrot.slane %v451_v42, 2  ;;  %v459_v47 = vrot.slane %v458_v43, 2  ;;  %v466_v48 = vrot.slane %v465_v44, 2  ;;  %v473_v49 = vrot.slane %v472_v45, 2  ;;  %vm6845_vm2 = vmand %vm489_vm14, %vm492_vm0 }
  0x7f   : >> { %vm6849_vm3 = vmand %vm490_vm15, %vm493_vm1  ;;  %v500_v35 = vsel %vm6845_vm2, %v5981_v10, -inf  ;;  %v501_v51 = vsel %vm6845_vm2, %v5977_v9, -inf  ;;  %v502_v58 = vsel %vm6845_vm2, %v5973_v8, -inf  ;;  %v503_v59 = vsel %vm6845_vm2, %v5969_v7, -inf }
  0x80   : >> { %v453_v60 = vmax.f32 %v451_v42, %v452_v46  ;;  %v460_v61 = vmax.f32 %v458_v43, %v459_v47  ;;  %v467_v62 = vmax.f32 %v465_v44, %v466_v48  ;;  %v474_v63 = vmax.f32 %v472_v45, %v473_v49 }
  0x81   : >> { %v504_v0 = vsel %vm6849_vm3, %v5965_v6, -inf  ;;  %v505_v11 = vsel %vm6849_vm3, %v5961_v5, -inf  ;;  %v506_v12 = vsel %vm6849_vm3, %v5957_v4, -inf  ;;  %v507_v13 = vsel %vm6849_vm3, %v5953_v3, -inf }
  0x82   : >> { %v454_v54 = vrot.slane %v453_v60, 1  ;;  %v461_v55 = vrot.slane %v460_v61, 1  ;;  %v468_v14 = vrot.slane %v467_v62, 1  ;;  %v475_v15 = vrot.slane %v474_v63, 1 }
  0x83   : >> { %v508_v16 = vmax.f32 %v500_v35, %v504_v0  ;;  %v515_v17 = vmax.f32 %v501_v51, %v505_v11  ;;  %v522_v18 = vmax.f32 %v502_v58, %v506_v12  ;;  %v529_v19 = vmax.f32 %v503_v59, %v507_v13 }
  0x84   : >> { %v455_v28 = vmax.f32 %v453_v60, %v454_v54  ;;  %v462_v29 = vmax.f32 %v460_v61, %v461_v55  ;;  %v469_v30 = vmax.f32 %v467_v62, %v468_v14  ;;  %v476_v31 = vmax.f32 %v474_v63, %v475_v15 }
  0x85   : >> { %v509_v32 = vrot.slane %v508_v16, 4  ;;  %v516_v33 = vrot.slane %v515_v17, 4  ;;  %v523_v42 = vrot.slane %v522_v18, 4  ;;  %v530_v43 = vrot.slane %v529_v19, 4 }
  0x86   : >> { %vm477_vm4 = vcmp.eq.f32.partialorder %v455_v28, -inf  ;;  %vm478_vm5 = vcmp.eq.f32.partialorder %v462_v29, -inf  ;;  %vm479_vm6 = vcmp.eq.f32.partialorder %v469_v30, -inf  ;;  %vm480_vm7 = vcmp.eq.f32.partialorder %v476_v31, -inf }
  0x87   : >> { %v6877_v44 = vsel %vm477_vm4, 0.0, %v455_v28  ;;  %v6879_v45 = vsel %vm478_vm5, 0.0, %v462_v29  ;;  %v6881_v46 = vsel %vm479_vm6, 0.0, %v469_v30  ;;  %v6883_v47 = vsel %vm480_vm7, 0.0, %v476_v31 }
  0x88   : >> { %v510_v48 = vmax.f32 %v508_v16, %v509_v32  ;;  %v517_v49 = vmax.f32 %v515_v17, %v516_v33  ;;  %v524_v50 = vmax.f32 %v522_v18, %v523_v42  ;;  %v531_v34 = vmax.f32 %v529_v19, %v530_v43 }
  0x89   : >> { %vm548_vm8 = vcmp.ge.s32.totalorder %v6454_v1, %v547_v36  ;;  %vm549_vm9 = vcmp.ge.s32.totalorder %v6458_v2, %v547_v36  ;;  %vm551_vm10 = vcmp.lt.s32.totalorder %v6454_v1, %v550_v37  ;;  %vm552_vm11 = vcmp.lt.s32.totalorder %v6458_v2, %v550_v37 }
  0x8a   : >> { %v511_v35 = vrot.slane %v510_v48, 2  ;;  %v518_v51 = vrot.slane %v517_v49, 2  ;;  %v525_v58 = vrot.slane %v524_v50, 2  ;;  %v532_v59 = vrot.slane %v531_v34, 2  ;;  %vm6889_vm12 = vmand %vm548_vm8, %vm551_vm10 }
  0x8b   : >> { %vm6893_vm13 = vmand %vm549_vm9, %vm552_vm11  ;;  %v559_v36 = vsel %vm6889_vm12, %v5981_v10, -inf  ;;  %v560_v37 = vsel %vm6889_vm12, %v5977_v9, -inf  ;;  %v561_v62 = vsel %vm6889_vm12, %v5973_v8, -inf  ;;  %v562_v63 = vsel %vm6889_vm12, %v5969_v7, -inf }
  0x8c   : >> { %v512_v0 = vmax.f32 %v510_v48, %v511_v35  ;;  %v519_v11 = vmax.f32 %v517_v49, %v518_v51  ;;  %v526_v12 = vmax.f32 %v524_v50, %v525_v58  ;;  %v533_v13 = vmax.f32 %v531_v34, %v532_v59 }
  0x8d   : >> { %v563_v10 = vsel %vm6893_vm13, %v5965_v6, -inf  ;;  %v564_v9 = vsel %vm6893_vm13, %v5961_v5, -inf  ;;  %v565_v8 = vsel %vm6893_vm13, %v5957_v4, -inf  ;;  %v566_v7 = vsel %vm6893_vm13, %v5953_v3, -inf }
  0x8e   : >> { %v513_v54 = vrot.slane %v512_v0, 1  ;;  %v520_v55 = vrot.slane %v519_v11, 1  ;;  %v527_v14 = vrot.slane %v526_v12, 1  ;;  %v534_v15 = vrot.slane %v533_v13, 1 }
  0x8f   : >> { %v567_v16 = vmax.f32 %v559_v36, %v563_v10  ;;  %v574_v17 = vmax.f32 %v560_v37, %v564_v9  ;;  %v581_v18 = vmax.f32 %v561_v62, %v565_v8  ;;  %v588_v6 = vmax.f32 %v562_v63, %v566_v7 }
  0x90   : >> { %v514_v19 = vmax.f32 %v512_v0, %v513_v54  ;;  %v521_v28 = vmax.f32 %v519_v11, %v520_v55  ;;  %v528_v29 = vmax.f32 %v526_v12, %v527_v14  ;;  %v535_v5 = vmax.f32 %v533_v13, %v534_v15 }
  0x91   : >> { %v568_v30 = vrot.slane %v567_v16, 4  ;;  %v575_v31 = vrot.slane %v574_v17, 4  ;;  %v582_v32 = vrot.slane %v581_v18, 4  ;;  %v589_v4 = vrot.slane %v588_v6, 4 }
  0x92   : >> { %vm536_vm14 = vcmp.eq.f32.partialorder %v514_v19, -inf  ;;  %vm537_vm15 = vcmp.eq.f32.partialorder %v521_v28, -inf  ;;  %vm538_vm0 = vcmp.eq.f32.partialorder %v528_v29, -inf  ;;  %vm539_vm1 = vcmp.eq.f32.partialorder %v535_v5, -inf }
  0x93   : >> { %v540_v3 = vsel %vm536_vm14, 0.0, %v514_v19  ;;  %v541_v33 = vsel %vm537_vm15, 0.0, %v521_v28  ;;  %v542_v42 = vsel %vm538_vm0, 0.0, %v528_v29  ;;  %v543_v43 = vsel %vm539_vm1, 0.0, %v535_v5 }
  0x94   : >> { %v569_v48 = vmax.f32 %v567_v16, %v568_v30  ;;  %v576_v49 = vmax.f32 %v574_v17, %v575_v31  ;;  %v583_v50 = vmax.f32 %v581_v18, %v582_v32  ;;  %v590_v34 = vmax.f32 %v588_v6, %v589_v4 }
  0x95   : >> { %vm9826_vm2 = vcmask 1040384   ;;  %vm9825_vm3 = vcmask 1041408   ;;  %vm9824_vm4 = vcmask 1042432   ;;  %vm9823_vm5 = vcmask 1043456  }
  0x96   : >> { %v570_v35 = vrot.slane %v569_v48, 2  ;;  %v577_v51 = vrot.slane %v576_v49, 2  ;;  %v584_v58 = vrot.slane %v583_v50, 2  ;;  %v591_v59 = vrot.slane %v590_v34, 2 }
  0x97   : >> { %v604_v60 = vsel %vm9826_vm2, %v6650_v52, %v6711_v24  ;;  %v605_v61 = vsel %vm9826_vm2, %v6652_v53, %v6713_v25  ;;  %v606_v36 = vsel %vm9826_vm2, %v6654_v56, %v6715_v26  ;;  %v607_v37 = vsel %vm9826_vm2, %v6656_v57, %v6717_v27 }
  0x98   : >> { %v571_v62 = vmax.f32 %v569_v48, %v570_v35  ;;  %v578_v63 = vmax.f32 %v576_v49, %v577_v51  ;;  %v585_v0 = vmax.f32 %v583_v50, %v584_v58  ;;  %v592_v11 = vmax.f32 %v590_v34, %v591_v59 }
  0x99   : >> { %v609_v12 = vsel %vm9825_vm3, %v604_v60, %v6762_v38  ;;  %v610_v52 = vsel %vm9825_vm3, %v605_v61, %v6764_v39  ;;  %v611_v53 = vsel %vm9825_vm3, %v606_v36, %v6766_v40  ;;  %v612_v56 = vsel %vm9825_vm3, %v607_v37, %v6768_v41 }
  0x9a   : >> { %v572_v24 = vrot.slane %v571_v62, 1  ;;  %v579_v25 = vrot.slane %v578_v63, 1  ;;  %v586_v57 = vrot.slane %v585_v0, 1  ;;  %v593_v26 = vrot.slane %v592_v11, 1 }
  0x9b   : >> { %v614_v27 = vsel %vm9824_vm4, %v609_v12, %v6829_v20  ;;  %v615_v38 = vsel %vm9824_vm4, %v610_v52, %v6831_v21  ;;  %v616_v13 = vsel %vm9824_vm4, %v611_v53, %v6833_v22  ;;  %v617_v39 = vsel %vm9824_vm4, %v612_v56, %v6835_v23 }
  0x9c   : >> { %v573_v40 = vmax.f32 %v571_v62, %v572_v24  ;;  %v580_v10 = vmax.f32 %v578_v63, %v579_v25  ;;  %v587_v9 = vmax.f32 %v585_v0, %v586_v57  ;;  %v594_v41 = vmax.f32 %v592_v11, %v593_v26 }
  0x9d   : >> { %v619_v8 = vsel %vm9823_vm5, %v614_v27, %v6877_v44  ;;  %v620_v20 = vsel %vm9823_vm5, %v615_v38, %v6879_v45  ;;  %v621_v21 = vsel %vm9823_vm5, %v616_v13, %v6881_v46  ;;  %v622_v22 = vsel %vm9823_vm5, %v617_v39, %v6883_v47 }
  0x9e   : >> { %vm595_vm6 = vcmp.eq.f32.partialorder %v573_v40, -inf  ;;  %vm596_vm7 = vcmp.eq.f32.partialorder %v580_v10, -inf  ;;  %vm597_vm8 = vcmp.eq.f32.partialorder %v587_v9, -inf  ;;  %vm598_vm9 = vcmp.eq.f32.partialorder %v594_v41, -inf }
  0x9f   : >> { %v599_v23 = vsel %vm595_vm6, 0.0, %v573_v40  ;;  %v600_v7 = vsel %vm596_vm7, 0.0, %v580_v10  ;;  %v601_v54 = vsel %vm597_vm8, 0.0, %v587_v9  ;;  %v602_v55 = vsel %vm598_vm9, 0.0, %v594_v41 }
  0xa0   : >> { %vm9822_vm10 = vcmask 1044480   ;;  %vm9821_vm11 = vcmask 1045504   ;;  %v6974_v18 = vmov -inf   ;;  %v6976_v6 = vmov -inf  }
  0xa1   : >> { %v624_v44 = vsel %vm9822_vm10, %v619_v8, %v540_v3  ;;  %v625_v45 = vsel %vm9822_vm10, %v620_v20, %v541_v33  ;;  %v626_v14 = vsel %vm9822_vm10, %v621_v21, %v542_v42  ;;  %v627_v46 = vsel %vm9822_vm10, %v622_v22, %v543_v43 }
  0xa2   : >> { %v629_v47 = vsel %vm9821_vm11, %v624_v44, %v599_v23  ;;  %v630_v15 = vsel %vm9821_vm11, %v625_v45, %v600_v7  ;;  %v631_v16 = vsel %vm9821_vm11, %v626_v14, %v601_v54  ;;  %v632_v17 = vsel %vm9821_vm11, %v627_v46, %v602_v55  ;;  %4127 = sbr.rel (%p4118_p9) target bundleno = 179 (0xb3), region = 125 }
  0xa3   : >> { %636 = vst [vmem:[%s6966_s26] sm:$0x7f] %v629_v47  ;;  %v6978_v19 = vmov -inf   ;;  %v6980_v28 = vmov -inf   ;;  %v6982_v29 = vmov -inf   ;;  %v6984_v5 = vmov -inf  }
  0xa4   : >> { %637 = vst [vmem:[%s6966_s26 + $0x8] sm:$0x7f] %v630_v15  ;;  %v6986_v30 = vmov -inf   ;;  %v6988_v31 = vmov -inf  }
  0xa5   : >> { %638 = vst [vmem:[%s6966_s26 + $0x10] sm:$0x7f] %v631_v16 }
  0xa6   : >> { %639 = vst [vmem:[%s6966_s26 + $0x18] sm:$0x7f] %v632_v17 }
  0xa7   : >> { %v5983_v32 = vmov -inf   ;;  %v5987_v4 = vmov -inf   ;;  %v5991_v3 = vmov -inf   ;;  %v5995_v33 = vmov -inf  }
  0xa8   : >> { %v5999_v42 = vmov -inf   ;;  %v6003_v43 = vmov -inf   ;;  %v6007_v48 = vmov -inf   ;;  %v6011_v49 = vmov -inf  }
  0xa9 LB: >>> { %s4347_s27 = sshll.u32 %s6017_s8, 6  ;;  %s645_s8 = sadd.s32 1, %s6017_s8   ;;  %s6017_s8 = sphi %s6606_s8, %s645_s8   ;;  %v6013_v49 = vphi %v6011_v49, %v6012_v49   ;;  %v6009_v48 = vphi %v6007_v48, %v6008_v48   ;;  %v6005_v43 = vphi %v6003_v43, %v6004_v43   ;;  %v6001_v42 = vphi %v5999_v42, %v6000_v42   ;;  %v5997_v33 = vphi %v5995_v33, %v5996_v33   ;;  %v5993_v3 = vphi %v5991_v3, %v5992_v3   ;;  %v5989_v4 = vphi %v5987_v4, %v5988_v4   ;;  %v5985_v32 = vphi %v5983_v32, %v5984_v32  }
  0xaa   : >>> { %s658_s29 = scalar_lea.vmem [#allocation8], %s4347_s27  ;;  %p644_p10 = scmp.ge.s32.totalorder %s645_s8, %s6627_s3 }
  0xab   : >>> { %v659_v50 = vld [vmem:[%s658_s29] sm:$0xff]  ;;  %v660_v34 = vld [vmem:[%s658_s29 + $0x8] sm:$0xff]  ;;  %v661_v35 = vld [vmem:[%s658_s29 + $0x10] sm:$0xff] }
  0xac   : >>> { %v662_v51 = vld [vmem:[%s658_s29 + $0x18] sm:$0xff]  ;;  %v663_v58 = vld [vmem:[%s658_s29 + $0x20] sm:$0xff]  ;;  %v664_v59 = vld [vmem:[%s658_s29 + $0x28] sm:$0xff]  ;;  %v667_v60 = vmax.f32 %v6013_v49, %v659_v50   ;;  %v668_v61 = vmax.f32 %v6009_v48, %v660_v34   ;;  %v669_v36 = vmax.f32 %v6005_v43, %v661_v35   ;;  %647 = sbr.rel (!%p644_p10) target bundleno = 169 (0xa9), region = 131 }
  0xad   : >>> { %v665_v37 = vld [vmem:[%s658_s29 + $0x30] sm:$0xff]  ;;  %v666_v62 = vld [vmem:[%s658_s29 + $0x38] sm:$0xff]  ;;  %v670_v63 = vmax.f32 %v6001_v42, %v662_v51   ;;  %v671_v0 = vmax.f32 %v5997_v33, %v663_v58   ;;  %v672_v11 = vmax.f32 %v5993_v3, %v664_v59  }
  0xae   : >>> { %v673_v12 = vmax.f32 %v5989_v4, %v665_v37   ;;  %v674_v52 = vmax.f32 %v5985_v32, %v666_v62   ;;  %v6004_v43 = vmov %v669_v36   ;;  %v6008_v48 = vmov %v668_v61  }
  0xaf   : >>> { %v5992_v3 = vmov %v672_v11   ;;  %v5996_v33 = vmov %v671_v0   ;;  %v6000_v42 = vmov %v670_v63   ;;  %v6012_v49 = vmov %v667_v60  }
  0xb0   : >>> { %v5984_v32 = vmov %v674_v52   ;;  %v5988_v4 = vmov %v673_v12   ;;  %v9913_v18 = vmov (%p644_p10), %v674_v52  ;;  %v9914_v6 = vmov (%p644_p10), %v673_v12 }
  0xb1   : >> { %v9915_v19 = vmov %v672_v11  ;;  %v9916_v28 = vmov %v671_v0  ;;  %v9917_v29 = vmov %v670_v63  ;;  %v9918_v5 = vmov %v669_v36 }
  0xb2   : >> { %v9919_v30 = vmov %v668_v61  ;;  %v9920_v31 = vmov %v667_v60 }
  0xb3 PF: >> { %s675_s6 = sld [smem:[#allocation6 + %s6472_s22]]  ;;  %v9943_v60 = vmov 0  ;;  %v9947_v37 = vmov 0  ;;  %v6049_v31 = vphi %v6988_v31, %v9920_v31   ;;  %v6045_v30 = vphi %v6986_v30, %v9919_v30   ;;  %v6041_v5 = vphi %v6984_v5, %v9918_v5   ;;  %v6037_v29 = vphi %v6982_v29, %v9917_v29   ;;  %v6033_v28 = vphi %v6980_v28, %v9916_v28   ;;  %v6029_v19 = vphi %v6978_v19, %v9915_v19   ;;  %v6025_v6 = vphi %v6976_v6, %v9914_v6   ;;  %v6021_v18 = vphi %v6974_v18, %v9913_v18  }
  0xb4   : >> { %s676_s0 = sld [smem:[#allocation7 + %s6472_s22]] }
  0xb5   : >> { %s733_s7 = sld [smem:[#allocation6 + %s6547_s28]] }
  0xb6   : >> { %s734_s2 = sld [smem:[#allocation7 + %s6547_s28]] }
  0xb7   : >> { %s791_s8 = sld [smem:[#allocation6 + %s6551_s30]] }
  0xb8   : >> { %s7047_s3 = sld [smem:[#allocation7 + %s6551_s30]] }
  0xb9   : >> { %v677_v53 = vstv %s675_s6  ;;  %s7050_s11 = sld [smem:[#allocation6 + %s6642_s9]] }
  0xba   : >> { %vm678_vm12 = vcmp.ge.s32.totalorder %v6454_v1, %v677_v53  ;;  %vm679_vm13 = vcmp.ge.s32.totalorder %v6458_v2, %v677_v53  ;;  %v680_v56 = vstv %s676_s0  ;;  %s7055_s12 = sld [smem:[#allocation7 + %s6642_s9]] }
  0xbb   : >> { %vm681_vm14 = vcmp.lt.s32.totalorder %v6454_v1, %v680_v56  ;;  %vm682_vm15 = vcmp.lt.s32.totalorder %v6458_v2, %v680_v56  ;;  %v735_v24 = vstv %s733_s7  ;;  %s7060_s13 = sld [smem:[#allocation6 + %s6645_s10]] }
  0xbc   : >> { %vm7062_vm0 = vmand %vm678_vm12, %vm681_vm14  ;;  %vm736_vm1 = vcmp.ge.s32.totalorder %v6454_v1, %v735_v24  ;;  %vm7068_vm6 = vcmp.ge.s32.totalorder %v6458_v2, %v735_v24  ;;  %v738_v26 = vstv %s734_s2  ;;  %s7073_s15 = sld [smem:[#allocation7 + %s6645_s10]] }
  0xbd   : >> { %vm7075_vm7 = vmand %vm679_vm13, %vm682_vm15  ;;  %v689_v38 = vsel %vm7062_vm0, %v6049_v31, -inf  ;;  %vm739_vm8 = vcmp.lt.s32.totalorder %v6454_v1, %v738_v26  ;;  %vm740_vm9 = vcmp.lt.s32.totalorder %v6458_v2, %v738_v26  ;;  %v793_v13 = vstv %s791_s8  ;;  %s7099_s18 = sld [smem:[#allocation6 + %s6760_s16]] }
  0xbe   : >> { %v693_v39 = vsel %vm7075_vm7, %v6033_v28, -inf  ;;  %vm7087_vm12 = vmand %vm736_vm1, %vm739_vm8  ;;  %vm794_vm13 = vcmp.ge.s32.totalorder %v6454_v1, %v793_v13  ;;  %vm7093_vm14 = vcmp.ge.s32.totalorder %v6458_v2, %v793_v13  ;;  %v796_v9 = vstv %s7047_s3  ;;  %s7122_s21 = sld [smem:[#allocation7 + %s6760_s16]] }
  0xbf   : >> { %v697_v41 = vmax.f32 %v689_v38, %v693_v39  ;;  %vm7103_vm15 = vmand %vm7068_vm6, %vm740_vm9  ;;  %v747_v20 = vsel %vm7087_vm12, %v6049_v31, -inf  ;;  %vm797_vm1 = vcmp.lt.s32.totalorder %v6454_v1, %v796_v9  ;;  %vm798_vm8 = vcmp.lt.s32.totalorder %v6458_v2, %v796_v9  ;;  %s7138_s23 = sld [smem:[#allocation4 + %s6551_s30]]  }
  0xc0   : >> { %v751_v21 = vsel %vm7103_vm15, %v6033_v28, -inf  ;;  %vm7115_vm11 = vmand %vm794_vm13, %vm797_vm1  ;;  %v851_v23 = vstv %s7050_s11  ;;  %v854_v7 = vstv %s7055_s12  ;;  %v690_v54 = vsel %vm7062_vm0, %v6045_v30, -inf  ;;  %s7147_s24 = sld [smem:[#allocation5 + %s6551_s30]] }
  0xc1   : >> { %v698_v55 = vrot.slane %v697_v41, 4  ;;  %v755_v44 = vmax.f32 %v747_v20, %v751_v21  ;;  %vm7129_vm6 = vmand %vm7093_vm14, %vm798_vm8  ;;  %v805_v14 = vsel %vm7115_vm11, %v6049_v31, -inf  ;;  %vm852_vm9 = vcmp.ge.s32.totalorder %v6454_v1, %v851_v23  ;;  %s7155_s25 = sld [smem:[#allocation6 + %s6771_s17]] }
  0xc2   : >> { %v809_v46 = vsel %vm7129_vm6, %v6033_v28, -inf  ;;  %vm853_vm13 = vcmp.ge.s32.totalorder %v6458_v2, %v851_v23  ;;  %vm855_vm14 = vcmp.lt.s32.totalorder %v6454_v1, %v854_v7  ;;  %vm856_vm1 = vcmp.lt.s32.totalorder %v6458_v2, %v854_v7  ;;  %s7187_s27 = sld [smem:[#allocation7 + %s6771_s17]] }
  0xc3   : >> { %v699_v47 = vmax.f32 %v697_v41, %v698_v55  ;;  %v756_v15 = vrot.slane %v755_v44, 4  ;;  %v813_v16 = vmax.f32 %v805_v14, %v809_v46  ;;  %vm7149_vm8 = vmand %vm852_vm9, %vm855_vm14  ;;  %v909_v32 = vstv %s7060_s13 }
  0xc4   : >> { %vm7157_vm10 = vmand %vm853_vm13, %vm856_vm1  ;;  %v863_v3 = vsel %vm7149_vm8, %v6049_v31, -inf  ;;  %vm910_vm5 = vcmp.ge.s32.totalorder %v6454_v1, %v909_v32  ;;  %vm7166_vm4 = vcmp.ge.s32.totalorder %v6458_v2, %v909_v32  ;;  %v912_v42 = vstv %s7073_s15 }
  0xc5   : >> { %v700_v43 = vrot.slane %v699_v47, 2  ;;  %v757_v48 = vmax.f32 %v755_v44, %v756_v15  ;;  %v814_v49 = vrot.slane %v813_v16, 4  ;;  %v867_v50 = vsel %vm7157_vm10, %v6033_v28, -inf }
  0xc6   : >> { %v871_v34 = vmax.f32 %v863_v3, %v867_v50  ;;  %vm913_vm9 = vcmp.lt.s32.totalorder %v6454_v1, %v912_v42  ;;  %vm914_vm13 = vcmp.lt.s32.totalorder %v6458_v2, %v912_v42  ;;  %v967_v35 = vstv %s7099_s18  ;;  %p4147_p11 = scmp.ge.s32.totalorder %s7138_s23, %s7147_s24 }
  0xc7   : >> { %v701_v51 = vmax.f32 %v699_v47, %v700_v43  ;;  %v758_v58 = vrot.slane %v757_v48, 2  ;;  %v815_v59 = vmax.f32 %v813_v16, %v814_v49  ;;  %vm7177_vm14 = vmand %vm910_vm5, %vm913_vm9  ;;  %vm7182_vm1 = vcmp.ge.s32.totalorder %v6454_v1, %v967_v35 }
  0xc8   : >> { %v9944_v60 = vsel %vm7177_vm14, 4294967295, %v9943_v60  ;;  %v872_v36 = vrot.slane %v871_v34, 4  ;;  %vm7191_vm3 = vmand %vm7166_vm4, %vm914_vm13  ;;  %v921_v62 = vsel %vm7177_vm14, %v6049_v31, -inf  ;;  %vm7199_vm5 = vcmp.ge.s32.totalorder %v6458_v2, %v967_v35 }
  0xc9   : >> { %v9948_v37 = vsel %vm7191_vm3, 4294967295, %v9947_v37  ;;  %v970_v0 = vstv %s7122_s21  ;;  %v702_v11 = vrot.slane %v701_v51, 1  ;;  %v759_v12 = vmax.f32 %v757_v48, %v758_v58 }
  0xca   : >> { %v816_v52 = vrot.slane %v815_v59, 2  ;;  %v925_v53 = vsel %vm7191_vm3, %v6033_v28, -inf  ;;  %v873_v56 = vmax.f32 %v871_v34, %v872_v36  ;;  %vm971_vm4 = vcmp.lt.s32.totalorder %v6454_v1, %v970_v0 }
  0xcb   : >> { %v929_v24 = vmax.f32 %v921_v62, %v925_v53  ;;  %vm972_vm9 = vcmp.lt.s32.totalorder %v6458_v2, %v970_v0  ;;  %v703_v57 = vmax.f32 %v701_v51, %v702_v11  ;;  %v760_v26 = vrot.slane %v759_v12, 1  ;;  %vm7211_vm13 = vmand %vm7182_vm1, %vm971_vm4 }
  0xcc   : >> { %v817_v38 = vmax.f32 %v815_v59, %v816_v52  ;;  %v9951_v13 = vmov 0  ;;  %v1025_v39 = vstv %s7155_s25  ;;  %v874_v10 = vrot.slane %v873_v56, 2  ;;  %vm7218_vm2 = vmand %vm7199_vm5, %vm972_vm9 }
  0xcd   : >> { %v9952_v13 = vsel %vm7211_vm13, 4294967295, %v9951_v13  ;;  %v930_v9 = vrot.slane %v929_v24, 4  ;;  %v9953_v41 = vmov 0  ;;  %v979_v20 = vsel %vm7211_vm13, %v6049_v31, -inf }
  0xce   : >> { %v9954_v41 = vsel %vm7218_vm2, 4294967295, %v9953_v41  ;;  %vm7226_vm3 = vcmp.ge.s32.totalorder %v6454_v1, %v1025_v39  ;;  %vm725_vm1 = vcmp.eq.f32.partialorder %v703_v57, -inf  ;;  %v761_v23 = vmax.f32 %v759_v12, %v760_v26 }
  0xcf   : >> { %v818_v7 = vrot.slane %v817_v38, 1  ;;  %v983_v55 = vsel %vm7218_vm2, %v6033_v28, -inf  ;;  %v729_v44 = vsel %vm725_vm1, 0.0, %v703_v57  ;;  %v875_v14 = vmax.f32 %v873_v56, %v874_v10 }
  0xd0   : >> { %v931_v46 = vmax.f32 %v929_v24, %v930_v9  ;;  %v987_v47 = vmax.f32 %v979_v20, %v983_v55  ;;  %vm783_vm5 = vcmp.eq.f32.partialorder %v761_v23, -inf  ;;  %vm7234_vm4 = vcmp.ge.s32.totalorder %v6458_v2, %v1025_v39 }
  0xd1   : >> { %v819_v15 = vmax.f32 %v817_v38, %v818_v7  ;;  %v1028_v32 = vstv %s7187_s27  ;;  %v787_v3 = vsel %vm783_vm5, 0.0, %v761_v23  ;;  %v876_v33 = vrot.slane %v875_v14, 1 }
  0xd2   : >> { %v932_v42 = vrot.slane %v931_v46, 2  ;;  %v988_v43 = vrot.slane %v987_v47, 4  ;;  %vm1029_vm13 = vcmp.lt.s32.totalorder %v6454_v1, %v1028_v32  ;;  %vm1030_vm1 = vcmp.lt.s32.totalorder %v6458_v2, %v1028_v32 }
  0xd3   : >> { %vm841_vm9 = vcmp.eq.f32.partialorder %v819_v15, -inf  ;;  %vm9959_vm2 = vcmask 1040384   ;;  %v877_v50 = vmax.f32 %v875_v14, %v876_v33  ;;  %vm7244_vm14 = vmand %vm7226_vm3, %vm1029_vm13  ;;  %v694_v36 = vsel %vm7075_vm7, %v6029_v19, -inf }
  0xd4   : >> { %v1081_v48 = vsel %vm9959_vm2, %v729_v44, %v787_v3  ;;  %v845_v49 = vsel %vm841_vm9, 0.0, %v819_v15  ;;  %v933_v34 = vmax.f32 %v931_v46, %v932_v42  ;;  %v989_v35 = vmax.f32 %v987_v47, %v988_v43  ;;  %vm7250_vm5 = vmand %vm7234_vm4, %vm1030_vm1 }
  0xd5   : >> { %v1037_v59 = vsel %vm7244_vm14, %v6049_v31, -inf  ;;  %vm9964_vm2 = vcmask 1041408   ;;  %v748_v62 = vsel %vm7087_vm12, %v6045_v30, -inf  ;;  %vm899_vm3 = vcmp.eq.f32.partialorder %v877_v50, -inf }
  0xd6   : >> { %v1085_v61 = vsel %vm9964_vm2, %v1081_v48, %v845_v49  ;;  %v934_v63 = vrot.slane %v933_v34, 1  ;;  %v990_v0 = vrot.slane %v989_v35, 2  ;;  %v1041_v11 = vsel %vm7250_vm5, %v6033_v28, -inf }
  0xd7   : >> { %v903_v12 = vsel %vm899_vm3, 0.0, %v877_v50  ;;  %v1045_v52 = vmax.f32 %v1037_v59, %v1041_v11  ;;  %v704_v31 = vmax.f32 %v690_v54, %v694_v36  ;;  %v752_v53 = vsel %vm7103_vm15, %v6029_v19, -inf }
  0xd8   : >> { %v935_v56 = vmax.f32 %v933_v34, %v934_v63  ;;  %v991_v24 = vmax.f32 %v989_v35, %v990_v0  ;;  %vm9965_vm13 = vcmask 1042432   ;;  %v762_v26 = vmax.f32 %v748_v62, %v752_v53 }
  0xd9   : >> { %v1089_v57 = vsel %vm9965_vm13, %v1085_v61, %v903_v12  ;;  %v1046_v38 = vrot.slane %v1045_v52, 4  ;;  %v705_v39 = vrot.slane %v704_v31, 4  ;;  %v806_v28 = vsel %vm7115_vm11, %v6045_v30, -inf }
  0xda   : >> { %v810_v10 = vsel %vm7129_vm6, %v6029_v19, -inf  ;;  %vm957_vm4 = vcmp.eq.f32.partialorder %v935_v56, -inf  ;;  %v992_v54 = vrot.slane %v991_v24, 1  ;;  %v763_v9 = vrot.slane %v762_v26, 4 }
  0xdb   : >> { %v820_v20 = vmax.f32 %v806_v28, %v810_v10  ;;  %v961_v21 = vsel %vm957_vm4, 0.0, %v935_v56  ;;  %v1047_v23 = vmax.f32 %v1045_v52, %v1046_v38  ;;  %v706_v7 = vmax.f32 %v704_v31, %v705_v39 }
  0xdc   : >> { %v864_v55 = vsel %vm7149_vm8, %v6045_v30, -inf  ;;  %v993_v44 = vmax.f32 %v991_v24, %v992_v54  ;;  %vm9966_vm9 = vcmask 1043456   ;;  %v764_v46 = vmax.f32 %v762_v26, %v763_v9 }
  0xdd   : >> { %v1093_v14 = vsel %vm9966_vm9, %v1089_v57, %v961_v21  ;;  %v821_v47 = vrot.slane %v820_v20, 4  ;;  %v1048_v15 = vrot.slane %v1047_v23, 2  ;;  %v707_v16 = vrot.slane %v706_v7, 2 }
  0xde   : >> { %v868_v32 = vsel %vm7157_vm10, %v6029_v19, -inf  ;;  %vm9967_vm1 = vnez %v9944_v60  ;;  %vm1015_vm2 = vcmp.eq.f32.partialorder %v993_v44, -inf  ;;  %v765_v33 = vrot.slane %v764_v46, 2 }
  0xdf   : >> { %v922_v3 = vsel %vm9967_vm1, %v6045_v30, -inf  ;;  %v822_v42 = vmax.f32 %v820_v20, %v821_v47  ;;  %v878_v43 = vmax.f32 %v864_v55, %v868_v32  ;;  %v1019_v48 = vsel %vm1015_vm2, 0.0, %v993_v44 }
  0xe0   : >> { %v1049_v49 = vmax.f32 %v1047_v23, %v1048_v15  ;;  %v708_v50 = vmax.f32 %v706_v7, %v707_v16  ;;  %vm9968_vm3 = vnez %v9948_v37  ;;  %vm9969_vm13 = vcmask 1044480  }
  0xe1   : >> { %v926_v34 = vsel %vm9968_vm3, %v6029_v19, -inf  ;;  %v1097_v35 = vsel %vm9969_vm13, %v1093_v14, %v1019_v48  ;;  %v766_v59 = vmax.f32 %v764_v46, %v765_v33  ;;  %v823_v61 = vrot.slane %v822_v42, 2 }
  0xe2   : >> { %v879_v36 = vrot.slane %v878_v43, 4  ;;  %v1050_v62 = vrot.slane %v1049_v49, 1  ;;  %v709_v63 = vrot.slane %v708_v50, 1  ;;  %v936_v0 = vmax.f32 %v922_v3, %v926_v34 }
  0xe3   : >> { %vm9970_vm4 = vnez %v9952_v13  ;;  %v767_v12 = vrot.slane %v766_v59, 1  ;;  %v824_v52 = vmax.f32 %v822_v42, %v823_v61  ;;  %vm9971_vm9 = vnez %v9954_v41 }
  0xe4   : >> { %v980_v11 = vsel %vm9970_vm4, %v6045_v30, -inf  ;;  %v880_v31 = vmax.f32 %v878_v43, %v879_v36  ;;  %v984_v53 = vsel %vm9971_vm9, %v6029_v19, -inf  ;;  %v1051_v56 = vmax.f32 %v1049_v49, %v1050_v62 }
  0xe5   : >> { %v710_v24 = vmax.f32 %v708_v50, %v709_v63  ;;  %v937_v57 = vrot.slane %v936_v0, 4  ;;  %v994_v26 = vmax.f32 %v980_v11, %v984_v53  ;;  %v768_v38 = vmax.f32 %v766_v59, %v767_v12 }
  0xe6   : >> { %v825_v39 = vrot.slane %v824_v52, 1  ;;  %v881_v28 = vrot.slane %v880_v31, 2  ;;  %v1038_v10 = vsel %vm7244_vm14, %v6045_v30, -inf  ;;  %vm1073_vm2 = vcmp.eq.f32.partialorder %v1051_v56, -inf }
  0xe7   : >> { %vm726_vm13 = vcmp.eq.f32.partialorder %v710_v24, -inf  ;;  %v938_v54 = vmax.f32 %v936_v0, %v937_v57  ;;  %v995_v9 = vrot.slane %v994_v26, 4  ;;  %v1077_v20 = vsel %vm1073_vm2, 0.0, %v1051_v56 }
  0xe8   : >> { %v730_v21 = vsel %vm726_vm13, 0.0, %v710_v24  ;;  %vm784_vm4 = vcmp.eq.f32.partialorder %v768_v38, -inf  ;;  %v826_v23 = vmax.f32 %v824_v52, %v825_v39  ;;  %vm9972_vm9 = vcmask 1045504  }
  0xe9   : >> { %v1101_v7 = vsel %vm9972_vm9, %v1097_v35, %v1077_v20  ;;  %v788_v55 = vsel %vm784_vm4, 0.0, %v768_v38  ;;  %v882_v44 = vmax.f32 %v880_v31, %v881_v28  ;;  %v939_v14 = vrot.slane %v938_v54, 2 }
  0xea   : >> { %v1109_v46 = vrot.slane %v1101_v7, 1  ;;  %vm842_vm3 = vcmp.eq.f32.partialorder %v826_v23, -inf  ;;  %v996_v47 = vmax.f32 %v994_v26, %v995_v9  ;;  %v1042_v30 = vsel %vm7250_vm5, %v6029_v19, -inf }
  0xeb   : >> { %v846_v15 = vsel %vm842_vm3, 0.0, %v826_v23  ;;  %v883_v16 = vrot.slane %v882_v44, 1  ;;  %v940_v32 = vmax.f32 %v938_v54, %v939_v14  ;;  %v1052_v3 = vmax.f32 %v1038_v10, %v1042_v30 }
  0xec   : >> { %1117 = vst [vmem:[%s6966_s26] sm:$0x80] %v1109_v46  ;;  %v997_v33 = vrot.slane %v996_v47, 2  ;;  %vm9973_vm2 = vcmask 1040384   ;;  %v691_v43 = vsel %vm7062_vm0, %v6041_v5, -inf  ;;  %v695_v48 = vsel %vm7075_vm7, %v6025_v6, -inf }
  0xed   : >> { %v1082_v42 = vsel %vm9973_vm2, %v730_v21, %v788_v55  ;;  %1121 = vst [vmem:[%s6966_s26 + $0x20] sm:$0x3f] %v1109_v46  ;;  %v884_v49 = vmax.f32 %v882_v44, %v883_v16  ;;  %v941_v50 = vrot.slane %v940_v32, 1  ;;  %v1053_v19 = vrot.slane %v1052_v3, 4 }
  0xee   : >> { %vm9974_vm3 = vcmask 1041408   ;;  %v998_v35 = vmax.f32 %v996_v47, %v997_v33  ;;  %v711_v59 = vmax.f32 %v691_v43, %v695_v48  ;;  %v749_v61 = vsel %vm7087_vm12, %v6041_v5, -inf }
  0xef   : >> { %v1086_v34 = vsel %vm9974_vm3, %v1082_v42, %v846_v15  ;;  %v753_v36 = vsel %vm7103_vm15, %v6025_v6, -inf  ;;  %vm900_vm4 = vcmp.eq.f32.partialorder %v884_v49, -inf  ;;  %v942_v62 = vmax.f32 %v940_v32, %v941_v50 }
  0xf0   : >> { %v1054_v63 = vmax.f32 %v1052_v3, %v1053_v19  ;;  %v769_v0 = vmax.f32 %v749_v61, %v753_v36  ;;  %v904_v11 = vsel %vm900_vm4, 0.0, %v884_v49  ;;  %v999_v12 = vrot.slane %v998_v35, 1 }
  0xf1   : >> { %v712_v52 = vrot.slane %v711_v59, 4  ;;  %v807_v31 = vsel %vm7115_vm11, %v6041_v5, -inf  ;;  %vm958_vm9 = vcmp.eq.f32.partialorder %v942_v62, -inf  ;;  %vm9975_vm13 = vcmask 1042432  }
  0xf2   : >> { %v1055_v53 = vrot.slane %v1054_v63, 2  ;;  %v1090_v56 = vsel %vm9975_vm13, %v1086_v34, %v904_v11  ;;  %v770_v24 = vrot.slane %v769_v0, 4  ;;  %v962_v57 = vsel %vm958_vm9, 0.0, %v942_v62 }
  0xf3   : >> { %v1000_v26 = vmax.f32 %v998_v35, %v999_v12  ;;  %v713_v38 = vmax.f32 %v711_v59, %v712_v52  ;;  %v811_v39 = vsel %vm7129_vm6, %v6025_v6, -inf  ;;  %vm9976_vm2 = vcmask 1043456  }
  0xf4   : >> { %v1056_v28 = vmax.f32 %v1054_v63, %v1055_v53  ;;  %v1094_v10 = vsel %vm9976_vm2, %v1090_v56, %v962_v57  ;;  %v771_v54 = vmax.f32 %v769_v0, %v770_v24  ;;  %v827_v9 = vmax.f32 %v807_v31, %v811_v39 }
  0xf5   : >> { %vm1016_vm3 = vcmp.eq.f32.partialorder %v1000_v26, -inf  ;;  %v714_v20 = vrot.slane %v713_v38, 2  ;;  %v865_v21 = vsel %vm7149_vm8, %v6041_v5, -inf  ;;  %v869_v23 = vsel %vm7157_vm10, %v6025_v6, -inf }
  0xf6   : >> { %v1020_v7 = vsel %vm1016_vm3, 0.0, %v1000_v26  ;;  %v1057_v55 = vrot.slane %v1056_v28, 1  ;;  %v772_v44 = vrot.slane %v771_v54, 2  ;;  %v828_v14 = vrot.slane %v827_v9, 4 }
  0xf7   : >> { %vm9977_vm4 = vcmask 1044480   ;;  %v715_v47 = vmax.f32 %v713_v38, %v714_v20  ;;  %v885_v30 = vmax.f32 %v865_v21, %v869_v23  ;;  %v923_v15 = vsel %vm9967_vm1, %v6041_v5, -inf }
  0xf8   : >> { %v1098_v46 = vsel %vm9977_vm4, %v1094_v10, %v1020_v7  ;;  %v1058_v16 = vmax.f32 %v1056_v28, %v1057_v55  ;;  %v773_v32 = vmax.f32 %v771_v54, %v772_v44  ;;  %v829_v3 = vmax.f32 %v827_v9, %v828_v14 }
  0xf9   : >> { %vm9978_vm9 = vnez %v9948_v37  ;;  %v716_v42 = vrot.slane %v715_v47, 1  ;;  %v886_v43 = vrot.slane %v885_v30, 4  ;;  %vm9979_vm13 = vnez %v9952_v13 }
  0xfa   : >> { %v927_v33 = vsel %vm9978_vm9, %v6025_v6, -inf  ;;  %v981_v49 = vsel %vm9979_vm13, %v6041_v5, -inf  ;;  %vm1074_vm2 = vcmp.eq.f32.partialorder %v1058_v16, -inf  ;;  %v774_v50 = vrot.slane %v773_v32, 1 }
  0xfb   : >> { %v943_v48 = vmax.f32 %v923_v15, %v927_v33  ;;  %v830_v19 = vrot.slane %v829_v3, 2  ;;  %vm9980_vm3 = vnez %v9954_v41  ;;  %v1078_v35 = vsel %vm1074_vm2, 0.0, %v1058_v16 }
  0xfc   : >> { %v985_v34 = vsel %vm9980_vm3, %v6025_v6, -inf  ;;  %v717_v59 = vmax.f32 %v715_v47, %v716_v42  ;;  %v887_v61 = vmax.f32 %v885_v30, %v886_v43  ;;  %vm9981_vm4 = vcmask 1045504  }
  0xfd   : >> { %v944_v36 = vrot.slane %v943_v48, 4  ;;  %v1102_v62 = vsel %vm9981_vm4, %v1098_v46, %v1078_v35  ;;  %v775_v63 = vmax.f32 %v773_v32, %v774_v50  ;;  %v831_v0 = vmax.f32 %v829_v3, %v830_v19 }
  0xfe   : >> { %v1001_v11 = vmax.f32 %v981_v49, %v985_v34  ;;  %v1110_v12 = vrot.slane %v1102_v62, 1  ;;  %vm727_vm13 = vcmp.eq.f32.partialorder %v717_v59, -inf  ;;  %v888_v52 = vrot.slane %v887_v61, 2 }
  0xff   : >> { %v945_v31 = vmax.f32 %v943_v48, %v944_v36  ;;  %v731_v53 = vsel %vm727_vm13, 0.0, %v717_v59  ;;  %vm785_vm9 = vcmp.eq.f32.partialorder %v775_v63, -inf  ;;  %v832_v56 = vrot.slane %v831_v0, 1 }
 0x100   : >> { %v1002_v24 = vrot.slane %v1001_v11, 4  ;;  %1118 = vst [vmem:[%s6966_s26 + $0x8] sm:$0x80] %v1110_v12  ;;  %v789_v57 = vsel %vm785_vm9, 0.0, %v775_v63  ;;  %v889_v26 = vmax.f32 %v887_v61, %v888_v52  ;;  %v1039_v39 = vsel %vm7244_vm14, %v6041_v5, -inf }
 0x101   : >> { %v946_v38 = vrot.slane %v945_v31, 2  ;;  %1122 = vst [vmem:[%s6966_s26 + $0x28] sm:$0x3f] %v1110_v12  ;;  %v833_v28 = vmax.f32 %v831_v0, %v832_v56  ;;  %v1043_v54 = vsel %vm7250_vm5, %v6025_v6, -inf  ;;  %vm9982_vm2 = vcmask 1040384  }
 0x102   : >> { %v1003_v10 = vmax.f32 %v1001_v11, %v1002_v24  ;;  %v1083_v9 = vsel %vm9982_vm2, %v731_v53, %v789_v57  ;;  %v890_v20 = vrot.slane %v889_v26, 1  ;;  %v1059_v23 = vmax.f32 %v1039_v39, %v1043_v54 }
 0x103   : >> { %v947_v21 = vmax.f32 %v945_v31, %v946_v38  ;;  %v692_v7 = vsel %vm7062_vm0, %v6037_v29, -inf  ;;  %vm843_vm9 = vcmp.eq.f32.partialorder %v833_v28, -inf  ;;  %v696_v5 = vsel %vm7075_vm7, %v6021_v18, -inf }
 0x104   : >> { %v1004_v55 = vrot.slane %v1003_v10, 2  ;;  %v750_v44 = vsel %vm7087_vm12, %v6037_v29, -inf  ;;  %v847_v6 = vsel %vm843_vm9, 0.0, %v833_v28  ;;  %v891_v14 = vmax.f32 %v889_v26, %v890_v20 }
 0x105   : >> { %v948_v46 = vrot.slane %v947_v21, 1  ;;  %v1060_v47 = vrot.slane %v1059_v23, 4  ;;  %vm9983_vm13 = vcmask 1041408   ;;  %v718_v16 = vmax.f32 %v692_v7, %v696_v5 }
 0x106   : >> { %v1005_v30 = vmax.f32 %v1003_v10, %v1004_v55  ;;  %v1087_v15 = vsel %vm9983_vm13, %v1083_v9, %v847_v6  ;;  %v754_v25 = vsel %vm7103_vm15, %v6021_v18, -inf  ;;  %vm901_vm0 = vcmp.eq.f32.partialorder %v891_v14, -inf }
 0x107   : >> { %v949_v32 = vmax.f32 %v947_v21, %v948_v46  ;;  %v1061_v27 = vmax.f32 %v1059_v23, %v1060_v47  ;;  %v776_v3 = vmax.f32 %v750_v44, %v754_v25  ;;  %v905_v33 = vsel %vm901_vm0, 0.0, %v891_v14 }
 0x108   : >> { %v1006_v42 = vrot.slane %v1005_v30, 1  ;;  %v719_v40 = vrot.slane %v718_v16, 4  ;;  %v808_v43 = vsel %vm7115_vm11, %v6037_v29, -inf  ;;  %vm9984_vm12 = vcmask 1042432  }
 0x109   : >> { %vm959_vm7 = vcmp.eq.f32.partialorder %v949_v32, -inf  ;;  %v1062_v48 = vrot.slane %v1061_v27, 2  ;;  %v1091_v49 = vsel %vm9984_vm12, %v1087_v15, %v905_v33  ;;  %v777_v50 = vrot.slane %v776_v3, 4 }
 0x10a   : >> { %v963_v19 = vsel %vm959_vm7, 0.0, %v949_v32  ;;  %v1007_v34 = vmax.f32 %v1005_v30, %v1006_v42  ;;  %v720_v8 = vmax.f32 %v718_v16, %v719_v40  ;;  %v812_v35 = vsel %vm7129_vm6, %v6021_v18, -inf  ;;  %vm9992_vm7 = vmmov %vm9984_vm12 }
 0x10b   : >> { %v1063_v59 = vmax.f32 %v1061_v27, %v1062_v48  ;;  %vm9985_vm15 = vcmask 1043456   ;;  %v778_v36 = vmax.f32 %v776_v3, %v777_v50  ;;  %v834_v62 = vmax.f32 %v808_v43, %v812_v35 }
 0x10c   : >> { %v1095_v61 = vsel %vm9985_vm15, %v1091_v49, %v963_v19  ;;  %vm1017_vm4 = vcmp.eq.f32.partialorder %v1007_v34, -inf  ;;  %v721_v22 = vrot.slane %v720_v8, 2  ;;  %v866_v63 = vsel %vm7149_vm8, %v6037_v29, -inf }
 0x10d   : >> { %v870_v0 = vsel %vm7157_vm10, %v6021_v18, -inf  ;;  %v1021_v11 = vsel %vm1017_vm4, 0.0, %v1007_v34  ;;  %v1064_v12 = vrot.slane %v1063_v59, 1  ;;  %v779_v52 = vrot.slane %v778_v36, 2 }
 0x10e   : >> { %v835_v45 = vrot.slane %v834_v62, 4  ;;  %vm9986_vm11 = vcmask 1044480   ;;  %v722_v53 = vmax.f32 %v720_v8, %v721_v22  ;;  %v892_v56 = vmax.f32 %v866_v63, %v870_v0 }
 0x10f   : >> { %v1099_v31 = vsel %vm9986_vm11, %v1095_v61, %v1021_v11  ;;  %v924_v24 = vsel %vm9967_vm1, %v6037_v29, -inf  ;;  %v1065_v57 = vmax.f32 %v1063_v59, %v1064_v12  ;;  %v780_v26 = vmax.f32 %v778_v36, %v779_v52  ;;  %vm9993_vm4 = vmmov %vm9986_vm11 }
 0x110   : >> { %v836_v17 = vmax.f32 %v834_v62, %v835_v45  ;;  %vm9987_vm6 = vnez %v9948_v37  ;;  %v723_v38 = vrot.slane %v722_v53, 1  ;;  %v893_v39 = vrot.slane %v892_v56, 4 }
 0x111   : >> { %v928_v4 = vsel %vm9987_vm6, %v6021_v18, -inf  ;;  %vm9988_vm10 = vnez %v9952_v13  ;;  %vm1075_vm8 = vcmp.eq.f32.partialorder %v1065_v57, -inf  ;;  %v781_v54 = vrot.slane %v780_v26, 1 }
 0x112   : >> { %v950_v28 = vmax.f32 %v924_v24, %v928_v4  ;;  %v982_v10 = vsel %vm9988_vm10, %v6037_v29, -inf  ;;  %v837_v9 = vrot.slane %v836_v17, 2  ;;  %v986_v60 = vsel %vm9980_vm3, %v6021_v18, -inf }
 0x113   : >> { %v1079_v20 = vsel %vm1075_vm8, 0.0, %v1065_v57  ;;  %v724_v21 = vmax.f32 %v722_v53, %v723_v38  ;;  %v894_v23 = vmax.f32 %v892_v56, %v893_v39  ;;  %vm9989_vm1 = vcmask 1045504  }
 0x114   : >> { %v951_v37 = vrot.slane %v950_v28, 4  ;;  %v1103_v7 = vsel %vm9989_vm1, %v1099_v31, %v1079_v20  ;;  %v782_v55 = vmax.f32 %v780_v26, %v781_v54  ;;  %v838_v5 = vmax.f32 %v836_v17, %v837_v9  ;;  %vm9994_vm6 = vmmov %vm9989_vm1 }
 0x115   : >> { %v1008_v44 = vmax.f32 %v982_v10, %v986_v60  ;;  %v1111_v13 = vrot.slane %v1103_v7, 1  ;;  %vm728_vm2 = vcmp.eq.f32.partialorder %v724_v21, -inf  ;;  %v895_v6 = vrot.slane %v894_v23, 2 }
 0x116   : >> { %v952_v14 = vmax.f32 %v950_v28, %v951_v37  ;;  %v732_v46 = vsel %vm728_vm2, 0.0, %v724_v21  ;;  %vm786_vm9 = vcmp.eq.f32.partialorder %v782_v55, -inf  ;;  %v839_v47 = vrot.slane %v838_v5, 1 }
 0x117   : >> { %v1009_v41 = vrot.slane %v1008_v44, 4  ;;  %1119 = vst [vmem:[%s6966_s26 + $0x10] sm:$0x80] %v1111_v13  ;;  %v790_v30 = vsel %vm786_vm9, 0.0, %v782_v55  ;;  %v896_v15 = vmax.f32 %v894_v23, %v895_v6  ;;  %v1040_v25 = vsel %vm7244_vm14, %v6037_v29, -inf }
 0x118   : >> { %v953_v16 = vrot.slane %v952_v14, 2  ;;  %1123 = vst [vmem:[%s6966_s26 + $0x30] sm:$0x3f] %v1111_v13  ;;  %v840_v32 = vmax.f32 %v838_v5, %v839_v47  ;;  %v1044_v3 = vsel %vm7250_vm5, %v6021_v18, -inf  ;;  %vm9990_vm13 = vcmask 1040384  }
 0x119   : >> { %v1010_v27 = vmax.f32 %v1008_v44, %v1009_v41  ;;  %v897_v33 = vrot.slane %v896_v15, 1  ;;  %v1066_v40 = vmax.f32 %v1040_v25, %v1044_v3  ;;  %v1084_v48 = vsel %vm9990_vm13, %v732_v46, %v790_v30 }
 0x11a   : >> { %v954_v42 = vmax.f32 %v952_v14, %v953_v16  ;;  %vm844_vm3 = vcmp.eq.f32.partialorder %v840_v32, -inf  ;;  %vm9991_vm0 = vcmask 1041408   ;;  %v7420_v56 = vmov -inf  }
 0x11b   : >> { %v1011_v43 = vrot.slane %v1010_v27, 2  ;;  %v848_v49 = vsel %vm844_vm3, 0.0, %v840_v32  ;;  %v898_v50 = vmax.f32 %v896_v15, %v897_v33  ;;  %v1067_v34 = vrot.slane %v1066_v40, 4 }
 0x11c   : >> { %v955_v19 = vrot.slane %v954_v42, 1  ;;  %v1088_v35 = vsel %vm9991_vm0, %v1084_v48, %v848_v49  ;;  %v7422_v24 = vmov -inf   ;;  %v7424_v57 = vmov -inf  }
 0x11d   : >> { %v1012_v51 = vmax.f32 %v1010_v27, %v1011_v43  ;;  %vm902_vm14 = vcmp.eq.f32.partialorder %v898_v50, -inf  ;;  %v1068_v8 = vmax.f32 %v1066_v40, %v1067_v34  ;;  %v7426_v26 = vmov -inf  }
 0x11e   : >> { %v956_v29 = vmax.f32 %v954_v42, %v955_v19  ;;  %v906_v59 = vsel %vm902_vm14, 0.0, %v898_v50  ;;  %v7428_v17 = vmov -inf   ;;  %v7430_v4 = vmov -inf  }
 0x11f   : >> { %v1013_v58 = vrot.slane %v1012_v51, 1  ;;  %v1069_v18 = vrot.slane %v1068_v8, 2  ;;  %v1092_v62 = vsel %vm9992_vm7, %v1088_v35, %v906_v59  ;;  %v7432_v38 = vmov -inf  }
 0x120   : >> { %vm960_vm5 = vcmp.eq.f32.partialorder %v956_v29, -inf  ;;  %v7434_v39 = vmov -inf  }
 0x121   : >> { %v964_v61 = vsel %vm960_vm5, 0.0, %v956_v29  ;;  %v1014_v36 = vmax.f32 %v1012_v51, %v1013_v58  ;;  %v1070_v22 = vmax.f32 %v1068_v8, %v1069_v18 }
 0x122   : >> { %v1096_v11 = vsel %vm9985_vm15, %v1092_v62, %v964_v61 }
 0x123   : >> { %vm1018_vm12 = vcmp.eq.f32.partialorder %v1014_v36, -inf  ;;  %v1071_v0 = vrot.slane %v1070_v22, 1 }
 0x124   : >> { %v1022_v63 = vsel %vm1018_vm12, 0.0, %v1014_v36 }
 0x125   : >> { %v1072_v12 = vmax.f32 %v1070_v22, %v1071_v0  ;;  %v1100_v52 = vsel %vm9993_vm4, %v1096_v11, %v1022_v63 }
 0x127   : >> { %vm1076_vm11 = vcmp.eq.f32.partialorder %v1072_v12, -inf }
 0x128   : >> { %v1080_v45 = vsel %vm1076_vm11, 0.0, %v1072_v12 }
 0x129   : >> { %v1104_v31 = vsel %vm9994_vm6, %v1100_v52, %v1080_v45  ;;  %4156 = sbr.rel (%p4147_p11) target bundleno = 314 (0x13a), region = 136 }
 0x12a   : >> { %v1112_v53 = vrot.slane %v1104_v31, 1 }
 0x12c   : >> { %1120 = vst [vmem:[%s6966_s26 + $0x18] sm:$0x80] %v1112_v53 }
 0x12d   : >> { %1124 = vst [vmem:[%s6966_s26 + $0x38] sm:$0x3f] %v1112_v53 }
 0x12e   : >> { %v6051_v28 = vmov -inf   ;;  %v6055_v10 = vmov -inf   ;;  %v6059_v54 = vmov -inf   ;;  %v6063_v9 = vmov -inf  }
 0x12f   : >> { %v6067_v60 = vmov -inf   ;;  %v6071_v20 = vmov -inf   ;;  %v6075_v21 = vmov -inf   ;;  %v6079_v23 = vmov -inf  }
 0x130 LB: >>> { %s4348_s29 = sshll.u32 %s6085_s23, 6  ;;  %s1130_s23 = sadd.s32 1, %s6085_s23   ;;  %s6085_s23 = sphi %s7138_s23, %s1130_s23   ;;  %v6081_v23 = vphi %v6079_v23, %v6080_v23   ;;  %v6077_v21 = vphi %v6075_v21, %v6076_v21   ;;  %v6073_v20 = vphi %v6071_v20, %v6072_v20   ;;  %v6069_v60 = vphi %v6067_v60, %v6068_v60   ;;  %v6065_v9 = vphi %v6063_v9, %v6064_v9   ;;  %v6061_v54 = vphi %v6059_v54, %v6060_v54   ;;  %v6057_v10 = vphi %v6055_v10, %v6056_v10   ;;  %v6053_v28 = vphi %v6051_v28, %v6052_v28  }
 0x131   : >>> { %s1143_s6 = scalar_lea.vmem [#allocation8], %s4348_s29  ;;  %p1129_p12 = scmp.ge.s32.totalorder %s1130_s23, %s7147_s24 }
 0x132   : >>> { %v1144_v37 = vld [vmem:[%s1143_s6] sm:$0xff]  ;;  %v1145_v7 = vld [vmem:[%s1143_s6 + $0x8] sm:$0xff]  ;;  %v1146_v55 = vld [vmem:[%s1143_s6 + $0x10] sm:$0xff] }
 0x133   : >>> { %v1147_v5 = vld [vmem:[%s1143_s6 + $0x18] sm:$0xff]  ;;  %v1148_v44 = vld [vmem:[%s1143_s6 + $0x20] sm:$0xff]  ;;  %v1149_v13 = vld [vmem:[%s1143_s6 + $0x28] sm:$0xff]  ;;  %v1152_v6 = vmax.f32 %v6081_v23, %v1144_v37   ;;  %v1153_v14 = vmax.f32 %v6077_v21, %v1145_v7   ;;  %v1154_v46 = vmax.f32 %v6073_v20, %v1146_v55   ;;  %1132 = sbr.rel (!%p1129_p12) target bundleno = 304 (0x130), region = 142 }
 0x134   : >>> { %v1150_v47 = vld [vmem:[%s1143_s6 + $0x30] sm:$0xff]  ;;  %v1151_v41 = vld [vmem:[%s1143_s6 + $0x38] sm:$0xff]  ;;  %v1155_v30 = vmax.f32 %v6069_v60, %v1147_v5   ;;  %v1156_v15 = vmax.f32 %v6065_v9, %v1148_v44   ;;  %v1157_v16 = vmax.f32 %v6061_v54, %v1149_v13  }
 0x135   : >>> { %v1158_v25 = vmax.f32 %v6057_v10, %v1150_v47   ;;  %v1159_v32 = vmax.f32 %v6053_v28, %v1151_v41   ;;  %v6072_v20 = vmov %v1154_v46   ;;  %v6076_v21 = vmov %v1153_v14  }
 0x136   : >>> { %v6060_v54 = vmov %v1157_v16   ;;  %v6064_v9 = vmov %v1156_v15   ;;  %v6068_v60 = vmov %v1155_v30   ;;  %v6080_v23 = vmov %v1152_v6  }
 0x137   : >>> { %v6052_v28 = vmov %v1159_v32   ;;  %v6056_v10 = vmov %v1158_v25   ;;  %v9995_v56 = vmov (%p1129_p12), %v1159_v32  ;;  %v9996_v24 = vmov (%p1129_p12), %v1158_v25 }
 0x138   : >> { %v9997_v57 = vmov %v1157_v16  ;;  %v9998_v26 = vmov %v1156_v15  ;;  %v9999_v17 = vmov %v1155_v30  ;;  %v10000_v4 = vmov %v1154_v46 }
 0x139   : >> { %v10001_v38 = vmov %v1153_v14  ;;  %v10002_v39 = vmov %v1152_v6 }
 0x13a PF: >> { %s1160_s0 = sld [smem:[#allocation6 + %s6472_s22]]  ;;  %v10025_v6 = vmov 0  ;;  %v10029_v47 = vmov 0  ;;  %v6117_v39 = vphi %v7434_v39, %v10002_v39   ;;  %v6113_v38 = vphi %v7432_v38, %v10001_v38   ;;  %v6109_v4 = vphi %v7430_v4, %v10000_v4   ;;  %v6105_v17 = vphi %v7428_v17, %v9999_v17   ;;  %v6101_v26 = vphi %v7426_v26, %v9998_v26   ;;  %v6097_v57 = vphi %v7424_v57, %v9997_v57   ;;  %v6093_v24 = vphi %v7422_v24, %v9996_v24   ;;  %v6089_v56 = vphi %v7420_v56, %v9995_v56  }
 0x13b   : >> { %s1161_s7 = sld [smem:[#allocation7 + %s6472_s22]] }
 0x13c   : >> { %s1218_s2 = sld [smem:[#allocation6 + %s6547_s28]] }
 0x13d   : >> { %s1219_s8 = sld [smem:[#allocation7 + %s6547_s28]] }
 0x13e   : >> { %s1276_s3 = sld [smem:[#allocation6 + %s6551_s30]] }
 0x13f   : >> { %s7493_s11 = sld [smem:[#allocation7 + %s6551_s30]] }
 0x140   : >> { %v1162_v27 = vstv %s1160_s0  ;;  %s7496_s12 = sld [smem:[#allocation6 + %s6642_s9]] }
 0x141   : >> { %vm1163_vm10 = vcmp.ge.s32.totalorder %v6454_v1, %v1162_v27  ;;  %vm1164_vm8 = vcmp.ge.s32.totalorder %v6458_v2, %v1162_v27  ;;  %v1165_v3 = vstv %s1161_s7  ;;  %s7501_s13 = sld [smem:[#allocation7 + %s6642_s9]] }
 0x142   : >> { %vm1166_vm1 = vcmp.lt.s32.totalorder %v6454_v1, %v1165_v3  ;;  %vm1167_vm2 = vcmp.lt.s32.totalorder %v6458_v2, %v1165_v3  ;;  %v1220_v33 = vstv %s1218_s2  ;;  %s7506_s15 = sld [smem:[#allocation6 + %s6645_s10]] }
 0x143   : >> { %vm7508_vm9 = vmand %vm1163_vm10, %vm1166_vm1  ;;  %vm1221_vm3 = vcmp.ge.s32.totalorder %v6454_v1, %v1220_v33  ;;  %vm7514_vm13 = vcmp.ge.s32.totalorder %v6458_v2, %v1220_v33  ;;  %v1223_v43 = vstv %s1219_s8  ;;  %s7519_s18 = sld [smem:[#allocation7 + %s6645_s10]] }
 0x144   : >> { %vm7521_vm14 = vmand %vm1164_vm8, %vm1167_vm2  ;;  %v1174_v49 = vsel %vm7508_vm9, %v6117_v39, -inf  ;;  %vm1224_vm0 = vcmp.lt.s32.totalorder %v6454_v1, %v1223_v43  ;;  %vm1225_vm5 = vcmp.lt.s32.totalorder %v6458_v2, %v1223_v43  ;;  %v1278_v50 = vstv %s1276_s3  ;;  %s7545_s21 = sld [smem:[#allocation6 + %s6760_s16]] }
 0x145   : >> { %v1178_v19 = vsel %vm7521_vm14, %v6101_v26, -inf  ;;  %vm7533_vm7 = vmand %vm1221_vm3, %vm1224_vm0  ;;  %vm1279_vm12 = vcmp.ge.s32.totalorder %v6454_v1, %v1278_v50  ;;  %vm7539_vm15 = vcmp.ge.s32.totalorder %v6458_v2, %v1278_v50  ;;  %v1281_v29 = vstv %s7493_s11  ;;  %s7568_s23 = sld [smem:[#allocation7 + %s6760_s16]] }
 0x146   : >> { %v1182_v8 = vmax.f32 %v1174_v49, %v1178_v19  ;;  %vm7549_vm4 = vmand %vm7514_vm13, %vm1225_vm5  ;;  %v1232_v59 = vsel %vm7533_vm7, %v6117_v39, -inf  ;;  %vm1282_vm11 = vcmp.lt.s32.totalorder %v6454_v1, %v1281_v29  ;;  %vm1283_vm6 = vcmp.lt.s32.totalorder %v6458_v2, %v1281_v29  ;;  %s7584_s24 = sld [smem:[#allocation4 + %s6642_s9]]  }
 0x147   : >> { %v1236_v58 = vsel %vm7549_vm4, %v6101_v26, -inf  ;;  %vm7561_vm10 = vmand %vm1279_vm12, %vm1282_vm11  ;;  %v1336_v61 = vstv %s7496_s12  ;;  %v1339_v36 = vstv %s7501_s13  ;;  %v1175_v62 = vsel %vm7508_vm9, %v6113_v38, -inf  ;;  %s7593_s25 = sld [smem:[#allocation5 + %s6642_s9]] }
 0x148   : >> { %v1183_v22 = vrot.slane %v1182_v8, 4  ;;  %v1240_v63 = vmax.f32 %v1232_v59, %v1236_v58  ;;  %vm7575_vm8 = vmand %vm7539_vm15, %vm1283_vm6  ;;  %v1290_v11 = vsel %vm7561_vm10, %v6117_v39, -inf  ;;  %vm1337_vm1 = vcmp.ge.s32.totalorder %v6454_v1, %v1336_v61  ;;  %s7601_s27 = sld [smem:[#allocation6 + %s6771_s17]] }
 0x149   : >> { %v1294_v12 = vsel %vm7575_vm8, %v6101_v26, -inf  ;;  %vm1338_vm2 = vcmp.ge.s32.totalorder %v6458_v2, %v1336_v61  ;;  %vm1340_vm3 = vcmp.lt.s32.totalorder %v6454_v1, %v1339_v36  ;;  %vm1341_vm13 = vcmp.lt.s32.totalorder %v6458_v2, %v1339_v36  ;;  %s7633_s29 = sld [smem:[#allocation7 + %s6771_s17]] }
 0x14a   : >> { %v1184_v52 = vmax.f32 %v1182_v8, %v1183_v22  ;;  %v1241_v45 = vrot.slane %v1240_v63, 4  ;;  %v1298_v31 = vmax.f32 %v1290_v11, %v1294_v12  ;;  %vm7595_vm0 = vmand %vm1337_vm1, %vm1340_vm3  ;;  %v1394_v28 = vstv %s7506_s15 }
 0x14b   : >> { %vm7603_vm5 = vmand %vm1338_vm2, %vm1341_vm13  ;;  %v1348_v54 = vsel %vm7595_vm0, %v6117_v39, -inf  ;;  %vm1395_vm12 = vcmp.ge.s32.totalorder %v6454_v1, %v1394_v28  ;;  %vm7612_vm15 = vcmp.ge.s32.totalorder %v6458_v2, %v1394_v28  ;;  %v1397_v60 = vstv %s7519_s18 }
 0x14c   : >> { %v1185_v20 = vrot.slane %v1184_v52, 2  ;;  %v1242_v21 = vmax.f32 %v1240_v63, %v1241_v45  ;;  %v1299_v23 = vrot.slane %v1298_v31, 4  ;;  %v1352_v37 = vsel %vm7603_vm5, %v6101_v26, -inf }
 0x14d   : >> { %v1356_v7 = vmax.f32 %v1348_v54, %v1352_v37  ;;  %vm1398_vm11 = vcmp.lt.s32.totalorder %v6454_v1, %v1397_v60  ;;  %vm1399_vm6 = vcmp.lt.s32.totalorder %v6458_v2, %v1397_v60  ;;  %v1452_v55 = vstv %s7545_s21  ;;  %p4176_p13 = scmp.ge.s32.totalorder %s7584_s24, %s7593_s25 }
 0x14e   : >> { %v1186_v5 = vmax.f32 %v1184_v52, %v1185_v20  ;;  %v1243_v44 = vrot.slane %v1242_v21, 2  ;;  %v1300_v13 = vmax.f32 %v1298_v31, %v1299_v23  ;;  %vm7623_vm1 = vmand %vm1395_vm12, %vm1398_vm11  ;;  %vm7628_vm2 = vcmp.ge.s32.totalorder %v6454_v1, %v1452_v55 }
 0x14f   : >> { %v10026_v6 = vsel %vm7623_vm1, 4294967295, %v10025_v6  ;;  %v1357_v46 = vrot.slane %v1356_v7, 4  ;;  %vm7637_vm3 = vmand %vm7612_vm15, %vm1399_vm6  ;;  %v1406_v41 = vsel %vm7623_vm1, %v6117_v39, -inf  ;;  %vm7645_vm13 = vcmp.ge.s32.totalorder %v6458_v2, %v1452_v55 }
 0x150   : >> { %v10030_v47 = vsel %vm7637_vm3, 4294967295, %v10029_v47  ;;  %v1455_v15 = vstv %s7568_s23  ;;  %v1187_v16 = vrot.slane %v1186_v5, 1  ;;  %v1244_v25 = vmax.f32 %v1242_v21, %v1243_v44 }
 0x151   : >> { %v1301_v32 = vrot.slane %v1300_v13, 2  ;;  %v1410_v27 = vsel %vm7637_vm3, %v6101_v26, -inf  ;;  %v1358_v3 = vmax.f32 %v1356_v7, %v1357_v46  ;;  %vm1456_vm12 = vcmp.lt.s32.totalorder %v6454_v1, %v1455_v15 }
 0x152   : >> { %v1414_v33 = vmax.f32 %v1406_v41, %v1410_v27  ;;  %vm1457_vm15 = vcmp.lt.s32.totalorder %v6458_v2, %v1455_v15  ;;  %v1188_v40 = vmax.f32 %v1186_v5, %v1187_v16  ;;  %v1245_v43 = vrot.slane %v1244_v25, 1  ;;  %vm7657_vm11 = vmand %vm7628_vm2, %vm1456_vm12 }
 0x153   : >> { %v1302_v49 = vmax.f32 %v1300_v13, %v1301_v32  ;;  %v10033_v50 = vmov 0  ;;  %v1510_v19 = vstv %s7601_s27  ;;  %v1359_v51 = vrot.slane %v1358_v3, 2  ;;  %vm7664_vm6 = vmand %vm7645_vm13, %vm1457_vm15 }
 0x154   : >> { %v10034_v50 = vsel %vm7657_vm11, 4294967295, %v10033_v50  ;;  %v1415_v29 = vrot.slane %v1414_v33, 4  ;;  %v10035_v8 = vmov 0  ;;  %v1464_v59 = vsel %vm7657_vm11, %v6117_v39, -inf }
 0x155   : >> { %v10036_v8 = vsel %vm7664_vm6, 4294967295, %v10035_v8  ;;  %vm7672_vm3 = vcmp.ge.s32.totalorder %v6454_v1, %v1510_v19  ;;  %vm1210_vm2 = vcmp.eq.f32.partialorder %v1188_v40, -inf  ;;  %v1246_v61 = vmax.f32 %v1244_v25, %v1245_v43 }
 0x156   : >> { %v1303_v36 = vrot.slane %v1302_v49, 1  ;;  %v1468_v22 = vsel %vm7664_vm6, %v6101_v26, -inf  ;;  %v1214_v63 = vsel %vm1210_vm2, 0.0, %v1188_v40  ;;  %v1360_v11 = vmax.f32 %v1358_v3, %v1359_v51 }
 0x157   : >> { %v1416_v12 = vmax.f32 %v1414_v33, %v1415_v29  ;;  %v1472_v52 = vmax.f32 %v1464_v59, %v1468_v22  ;;  %vm1268_vm13 = vcmp.eq.f32.partialorder %v1246_v61, -inf  ;;  %vm7680_vm12 = vcmp.ge.s32.totalorder %v6458_v2, %v1510_v19 }
 0x158   : >> { %v1304_v45 = vmax.f32 %v1302_v49, %v1303_v36  ;;  %v1513_v28 = vstv %s7633_s29  ;;  %v1272_v54 = vsel %vm1268_vm13, 0.0, %v1246_v61  ;;  %v1361_v9 = vrot.slane %v1360_v11, 1 }
 0x159   : >> { %v1417_v60 = vrot.slane %v1416_v12, 2  ;;  %v1473_v20 = vrot.slane %v1472_v52, 4  ;;  %vm1514_vm11 = vcmp.lt.s32.totalorder %v6454_v1, %v1513_v28  ;;  %vm1515_vm2 = vcmp.lt.s32.totalorder %v6458_v2, %v1513_v28 }
 0x15a   : >> { %vm1326_vm15 = vcmp.eq.f32.partialorder %v1304_v45, -inf  ;;  %vm10041_vm6 = vcmask 1040384   ;;  %v1362_v37 = vmax.f32 %v1360_v11, %v1361_v9  ;;  %vm7690_vm1 = vmand %vm7672_vm3, %vm1514_vm11  ;;  %v1179_v46 = vsel %vm7521_vm14, %v6097_v57, -inf }
 0x15b   : >> { %v1566_v21 = vsel %vm10041_vm6, %v1214_v63, %v1272_v54  ;;  %v1330_v23 = vsel %vm1326_vm15, 0.0, %v1304_v45  ;;  %v1418_v7 = vmax.f32 %v1416_v12, %v1417_v60  ;;  %v1474_v55 = vmax.f32 %v1472_v52, %v1473_v20  ;;  %vm7696_vm13 = vmand %vm7680_vm12, %vm1515_vm2 }
 0x15c   : >> { %v1522_v13 = vsel %vm7690_vm1, %v6117_v39, -inf  ;;  %vm10046_vm6 = vcmask 1041408   ;;  %v1233_v41 = vsel %vm7533_vm7, %v6113_v38, -inf  ;;  %vm1384_vm3 = vcmp.eq.f32.partialorder %v1362_v37, -inf }
 0x15d   : >> { %v1570_v14 = vsel %vm10046_vm6, %v1566_v21, %v1330_v23  ;;  %v1419_v30 = vrot.slane %v1418_v7, 1  ;;  %v1475_v15 = vrot.slane %v1474_v55, 2  ;;  %v1526_v16 = vsel %vm7696_vm13, %v6101_v26, -inf }
 0x15e   : >> { %v1388_v25 = vsel %vm1384_vm3, 0.0, %v1362_v37  ;;  %v1530_v32 = vmax.f32 %v1522_v13, %v1526_v16  ;;  %v1189_v39 = vmax.f32 %v1175_v62, %v1179_v46  ;;  %v1237_v27 = vsel %vm7549_vm4, %v6097_v57, -inf }
 0x15f   : >> { %v1420_v3 = vmax.f32 %v1418_v7, %v1419_v30  ;;  %v1476_v33 = vmax.f32 %v1474_v55, %v1475_v15  ;;  %vm10047_vm11 = vcmask 1042432   ;;  %v1247_v43 = vmax.f32 %v1233_v41, %v1237_v27 }
 0x160   : >> { %v1574_v40 = vsel %vm10047_vm11, %v1570_v14, %v1388_v25  ;;  %v1531_v49 = vrot.slane %v1530_v32, 4  ;;  %v1190_v19 = vrot.slane %v1189_v39, 4  ;;  %v1291_v26 = vsel %vm7561_vm10, %v6113_v38, -inf }
 0x161   : >> { %v1295_v51 = vsel %vm7575_vm8, %v6097_v57, -inf  ;;  %vm1442_vm12 = vcmp.eq.f32.partialorder %v1420_v3, -inf  ;;  %v1477_v62 = vrot.slane %v1476_v33, 1  ;;  %v1248_v29 = vrot.slane %v1247_v43, 4 }
 0x162   : >> { %v1305_v59 = vmax.f32 %v1291_v26, %v1295_v51  ;;  %v1446_v58 = vsel %vm1442_vm12, 0.0, %v1420_v3  ;;  %v1532_v61 = vmax.f32 %v1530_v32, %v1531_v49  ;;  %v1191_v36 = vmax.f32 %v1189_v39, %v1190_v19 }
 0x163   : >> { %v1349_v22 = vsel %vm7595_vm0, %v6113_v38, -inf  ;;  %v1478_v63 = vmax.f32 %v1476_v33, %v1477_v62  ;;  %vm10048_vm15 = vcmask 1043456   ;;  %v1249_v12 = vmax.f32 %v1247_v43, %v1248_v29 }
 0x164   : >> { %v1578_v11 = vsel %vm10048_vm15, %v1574_v40, %v1446_v58  ;;  %v1306_v52 = vrot.slane %v1305_v59, 4  ;;  %v1533_v45 = vrot.slane %v1532_v61, 2  ;;  %v1192_v31 = vrot.slane %v1191_v36, 2 }
 0x165   : >> { %v1353_v28 = vsel %vm7603_vm5, %v6097_v57, -inf  ;;  %vm10049_vm2 = vnez %v10026_v6  ;;  %vm1500_vm6 = vcmp.eq.f32.partialorder %v1478_v63, -inf  ;;  %v1250_v9 = vrot.slane %v1249_v12, 2 }
 0x166   : >> { %v1407_v54 = vsel %vm10049_vm2, %v6113_v38, -inf  ;;  %v1307_v60 = vmax.f32 %v1305_v59, %v1306_v52  ;;  %v1363_v20 = vmax.f32 %v1349_v22, %v1353_v28  ;;  %v1504_v21 = vsel %vm1500_vm6, 0.0, %v1478_v63 }
 0x167   : >> { %v1534_v23 = vmax.f32 %v1532_v61, %v1533_v45  ;;  %v1193_v37 = vmax.f32 %v1191_v36, %v1192_v31  ;;  %vm10050_vm3 = vnez %v10030_v47  ;;  %vm10051_vm11 = vcmask 1044480  }
 0x168   : >> { %v1411_v7 = vsel %vm10050_vm3, %v6097_v57, -inf  ;;  %v1582_v55 = vsel %vm10051_vm11, %v1578_v11, %v1504_v21  ;;  %v1251_v13 = vmax.f32 %v1249_v12, %v1250_v9  ;;  %v1308_v14 = vrot.slane %v1307_v60, 2 }
 0x169   : >> { %v1364_v46 = vrot.slane %v1363_v20, 4  ;;  %v1535_v41 = vrot.slane %v1534_v23, 1  ;;  %v1194_v30 = vrot.slane %v1193_v37, 1  ;;  %v1421_v15 = vmax.f32 %v1407_v54, %v1411_v7 }
 0x16a   : >> { %vm10052_vm12 = vnez %v10034_v50  ;;  %v1252_v25 = vrot.slane %v1251_v13, 1  ;;  %v1309_v32 = vmax.f32 %v1307_v60, %v1308_v14  ;;  %vm10053_vm15 = vnez %v10036_v8 }
 0x16b   : >> { %v1465_v16 = vsel %vm10052_vm12, %v6113_v38, -inf  ;;  %v1365_v39 = vmax.f32 %v1363_v20, %v1364_v46  ;;  %v1469_v27 = vsel %vm10053_vm15, %v6097_v57, -inf  ;;  %v1536_v3 = vmax.f32 %v1534_v23, %v1535_v41 }
 0x16c   : >> { %v1195_v33 = vmax.f32 %v1193_v37, %v1194_v30  ;;  %v1422_v40 = vrot.slane %v1421_v15, 4  ;;  %v1479_v43 = vmax.f32 %v1465_v16, %v1469_v27  ;;  %v1253_v49 = vmax.f32 %v1251_v13, %v1252_v25 }
 0x16d   : >> { %v1310_v19 = vrot.slane %v1309_v32, 1  ;;  %v1366_v26 = vrot.slane %v1365_v39, 2  ;;  %v1523_v51 = vsel %vm7690_vm1, %v6113_v38, -inf  ;;  %vm1558_vm6 = vcmp.eq.f32.partialorder %v1536_v3, -inf }
 0x16e   : >> { %vm1211_vm11 = vcmp.eq.f32.partialorder %v1195_v33, -inf  ;;  %v1423_v62 = vmax.f32 %v1421_v15, %v1422_v40  ;;  %v1480_v29 = vrot.slane %v1479_v43, 4  ;;  %v1562_v59 = vsel %vm1558_vm6, 0.0, %v1536_v3 }
 0x16f   : >> { %v1215_v58 = vsel %vm1211_vm11, 0.0, %v1195_v33  ;;  %vm1269_vm12 = vcmp.eq.f32.partialorder %v1253_v49, -inf  ;;  %v1311_v61 = vmax.f32 %v1309_v32, %v1310_v19  ;;  %vm10054_vm15 = vcmask 1045504  }
 0x170   : >> { %v1586_v36 = vsel %vm10054_vm15, %v1582_v55, %v1562_v59  ;;  %v1273_v22 = vsel %vm1269_vm12, 0.0, %v1253_v49  ;;  %v1367_v63 = vmax.f32 %v1365_v39, %v1366_v26  ;;  %v1424_v11 = vrot.slane %v1423_v62, 2 }
 0x171   : >> { %v1594_v12 = vrot.slane %v1586_v36, 2  ;;  %vm1327_vm3 = vcmp.eq.f32.partialorder %v1311_v61, -inf  ;;  %v1481_v52 = vmax.f32 %v1479_v43, %v1480_v29  ;;  %v1527_v38 = vsel %vm7696_vm13, %v6097_v57, -inf }
 0x172   : >> { %v1331_v45 = vsel %vm1327_vm3, 0.0, %v1311_v61  ;;  %v1368_v31 = vrot.slane %v1367_v63, 1  ;;  %v1425_v28 = vmax.f32 %v1423_v62, %v1424_v11  ;;  %v1537_v54 = vmax.f32 %v1523_v51, %v1527_v38 }
 0x173   : >> { %1602 = vst [vmem:[%s6966_s26 + $0x20] sm:$0xc0] %v1594_v12  ;;  %v1482_v9 = vrot.slane %v1481_v52, 2  ;;  %vm10055_vm6 = vcmask 1040384   ;;  %v1176_v20 = vsel %vm7508_vm9, %v6109_v4, -inf  ;;  %v1180_v21 = vsel %vm7521_vm14, %v6093_v24, -inf }
 0x174   : >> { %v1567_v60 = vsel %vm10055_vm6, %v1215_v58, %v1273_v22  ;;  %1606 = vst [vmem:[%s6966_s26 + $0x40] sm:$0x1f] %v1594_v12  ;;  %v1369_v23 = vmax.f32 %v1367_v63, %v1368_v31  ;;  %v1426_v37 = vrot.slane %v1425_v28, 1  ;;  %v1538_v57 = vrot.slane %v1537_v54, 4 }
 0x175   : >> { %vm10056_vm3 = vcmask 1041408   ;;  %v1483_v55 = vmax.f32 %v1481_v52, %v1482_v9  ;;  %v1196_v13 = vmax.f32 %v1176_v20, %v1180_v21  ;;  %v1234_v14 = vsel %vm7533_vm7, %v6109_v4, -inf }
 0x176   : >> { %v1571_v7 = vsel %vm10056_vm3, %v1567_v60, %v1331_v45  ;;  %v1238_v46 = vsel %vm7549_vm4, %v6093_v24, -inf  ;;  %vm1385_vm12 = vcmp.eq.f32.partialorder %v1369_v23, -inf  ;;  %v1427_v41 = vmax.f32 %v1425_v28, %v1426_v37 }
 0x177   : >> { %v1539_v30 = vmax.f32 %v1537_v54, %v1538_v57  ;;  %v1254_v15 = vmax.f32 %v1234_v14, %v1238_v46  ;;  %v1389_v16 = vsel %vm1385_vm12, 0.0, %v1369_v23  ;;  %v1484_v25 = vrot.slane %v1483_v55, 1 }
 0x178   : >> { %v1197_v32 = vrot.slane %v1196_v13, 4  ;;  %v1292_v39 = vsel %vm7561_vm10, %v6109_v4, -inf  ;;  %vm1443_vm15 = vcmp.eq.f32.partialorder %v1427_v41, -inf  ;;  %vm10057_vm11 = vcmask 1042432  }
 0x179   : >> { %v1540_v27 = vrot.slane %v1539_v30, 2  ;;  %v1575_v3 = vsel %vm10057_vm11, %v1571_v7, %v1389_v16  ;;  %v1255_v33 = vrot.slane %v1254_v15, 4  ;;  %v1447_v40 = vsel %vm1443_vm15, 0.0, %v1427_v41 }
 0x17a   : >> { %v1485_v43 = vmax.f32 %v1483_v55, %v1484_v25  ;;  %v1198_v49 = vmax.f32 %v1196_v13, %v1197_v32  ;;  %v1296_v19 = vsel %vm7575_vm8, %v6093_v24, -inf  ;;  %vm10058_vm6 = vcmask 1043456  }
 0x17b   : >> { %v1541_v26 = vmax.f32 %v1539_v30, %v1540_v27  ;;  %v1579_v51 = vsel %vm10058_vm6, %v1575_v3, %v1447_v40  ;;  %v1256_v62 = vmax.f32 %v1254_v15, %v1255_v33  ;;  %v1312_v29 = vmax.f32 %v1292_v39, %v1296_v19 }
 0x17c   : >> { %vm1501_vm3 = vcmp.eq.f32.partialorder %v1485_v43, -inf  ;;  %v1199_v59 = vrot.slane %v1198_v49, 2  ;;  %v1350_v58 = vsel %vm7595_vm0, %v6109_v4, -inf  ;;  %v1354_v61 = vsel %vm7603_vm5, %v6093_v24, -inf }
 0x17d   : >> { %v1505_v36 = vsel %vm1501_vm3, 0.0, %v1485_v43  ;;  %v1542_v22 = vrot.slane %v1541_v26, 1  ;;  %v1257_v63 = vrot.slane %v1256_v62, 2  ;;  %v1313_v11 = vrot.slane %v1312_v29, 4 }
 0x17e   : >> { %vm10059_vm12 = vcmask 1044480   ;;  %v1200_v52 = vmax.f32 %v1198_v49, %v1199_v59  ;;  %v1370_v38 = vmax.f32 %v1350_v58, %v1354_v61  ;;  %v1408_v45 = vsel %vm10049_vm2, %v6109_v4, -inf }
 0x17f   : >> { %v1583_v12 = vsel %vm10059_vm12, %v1579_v51, %v1505_v36  ;;  %v1543_v31 = vmax.f32 %v1541_v26, %v1542_v22  ;;  %v1258_v28 = vmax.f32 %v1256_v62, %v1257_v63  ;;  %v1314_v54 = vmax.f32 %v1312_v29, %v1313_v11 }
 0x180   : >> { %vm10060_vm15 = vnez %v10030_v47  ;;  %v1201_v60 = vrot.slane %v1200_v52, 1  ;;  %v1371_v20 = vrot.slane %v1370_v38, 4  ;;  %vm10061_vm11 = vnez %v10034_v50 }
 0x181   : >> { %v1412_v9 = vsel %vm10060_vm15, %v6093_v24, -inf  ;;  %v1466_v23 = vsel %vm10061_vm11, %v6109_v4, -inf  ;;  %vm1559_vm6 = vcmp.eq.f32.partialorder %v1543_v31, -inf  ;;  %v1259_v37 = vrot.slane %v1258_v28, 1 }
 0x182   : >> { %v1428_v21 = vmax.f32 %v1408_v45, %v1412_v9  ;;  %v1315_v57 = vrot.slane %v1314_v54, 2  ;;  %vm10062_vm3 = vnez %v10036_v8  ;;  %v1563_v55 = vsel %vm1559_vm6, 0.0, %v1543_v31 }
 0x183   : >> { %v1470_v7 = vsel %vm10062_vm3, %v6093_v24, -inf  ;;  %v1202_v13 = vmax.f32 %v1200_v52, %v1201_v60  ;;  %v1372_v14 = vmax.f32 %v1370_v38, %v1371_v20  ;;  %vm10063_vm12 = vcmask 1045504  }
 0x184   : >> { %v1429_v46 = vrot.slane %v1428_v21, 4  ;;  %v1587_v41 = vsel %vm10063_vm12, %v1583_v12, %v1563_v55  ;;  %v1260_v30 = vmax.f32 %v1258_v28, %v1259_v37  ;;  %v1316_v15 = vmax.f32 %v1314_v54, %v1315_v57 }
 0x185   : >> { %v1486_v16 = vmax.f32 %v1466_v23, %v1470_v7  ;;  %v1595_v25 = vrot.slane %v1587_v41, 2  ;;  %vm1212_vm11 = vcmp.eq.f32.partialorder %v1202_v13, -inf  ;;  %v1373_v32 = vrot.slane %v1372_v14, 2 }
 0x186   : >> { %v1430_v39 = vmax.f32 %v1428_v21, %v1429_v46  ;;  %v1216_v27 = vsel %vm1212_vm11, 0.0, %v1202_v13  ;;  %vm1270_vm15 = vcmp.eq.f32.partialorder %v1260_v30, -inf  ;;  %v1317_v3 = vrot.slane %v1316_v15, 1 }
 0x187   : >> { %v1487_v33 = vrot.slane %v1486_v16, 4  ;;  %1603 = vst [vmem:[%s6966_s26 + $0x28] sm:$0xc0] %v1595_v25  ;;  %v1274_v40 = vsel %vm1270_vm15, 0.0, %v1260_v30  ;;  %v1374_v43 = vmax.f32 %v1372_v14, %v1373_v32  ;;  %v1524_v19 = vsel %vm7690_vm1, %v6109_v4, -inf }
 0x188   : >> { %v1431_v49 = vrot.slane %v1430_v39, 2  ;;  %1607 = vst [vmem:[%s6966_s26 + $0x48] sm:$0x1f] %v1595_v25  ;;  %v1318_v26 = vmax.f32 %v1316_v15, %v1317_v3  ;;  %v1528_v62 = vsel %vm7696_vm13, %v6093_v24, -inf  ;;  %vm10064_vm6 = vcmask 1040384  }
 0x189   : >> { %v1488_v51 = vmax.f32 %v1486_v16, %v1487_v33  ;;  %v1568_v29 = vsel %vm10064_vm6, %v1216_v27, %v1274_v40  ;;  %v1375_v59 = vrot.slane %v1374_v43, 1  ;;  %v1544_v61 = vmax.f32 %v1524_v19, %v1528_v62 }
 0x18a   : >> { %v1432_v58 = vmax.f32 %v1430_v39, %v1431_v49  ;;  %v1177_v36 = vsel %vm7508_vm9, %v6105_v17, -inf  ;;  %vm1328_vm15 = vcmp.eq.f32.partialorder %v1318_v26, -inf  ;;  %v1181_v4 = vsel %vm7521_vm14, %v6089_v56, -inf }
 0x18b   : >> { %v1489_v22 = vrot.slane %v1488_v51, 2  ;;  %v1235_v63 = vsel %vm7533_vm7, %v6105_v17, -inf  ;;  %v1332_v24 = vsel %vm1328_vm15, 0.0, %v1318_v26  ;;  %v1376_v11 = vmax.f32 %v1374_v43, %v1375_v59 }
 0x18c   : >> { %v1433_v12 = vrot.slane %v1432_v58, 1  ;;  %v1545_v52 = vrot.slane %v1544_v61, 4  ;;  %vm10065_vm11 = vcmask 1041408   ;;  %v1203_v31 = vmax.f32 %v1177_v36, %v1181_v4 }
 0x18d   : >> { %v1490_v38 = vmax.f32 %v1488_v51, %v1489_v22  ;;  %v1572_v45 = vsel %vm10065_vm11, %v1568_v29, %v1332_v24  ;;  %v1239_v42 = vsel %vm7549_vm4, %v6089_v56, -inf  ;;  %vm1386_vm9 = vcmp.eq.f32.partialorder %v1376_v11, -inf }
 0x18e   : >> { %v1434_v28 = vmax.f32 %v1432_v58, %v1433_v12  ;;  %v1546_v48 = vmax.f32 %v1544_v61, %v1545_v52  ;;  %v1261_v54 = vmax.f32 %v1235_v63, %v1239_v42  ;;  %v1390_v9 = vsel %vm1386_vm9, 0.0, %v1376_v11 }
 0x18f   : >> { %v1491_v60 = vrot.slane %v1490_v38, 1  ;;  %v1204_v34 = vrot.slane %v1203_v31, 4  ;;  %v1293_v20 = vsel %vm7561_vm10, %v6105_v17, -inf  ;;  %vm10066_vm7 = vcmask 1042432  }
 0x190   : >> { %vm1444_vm14 = vcmp.eq.f32.partialorder %v1434_v28, -inf  ;;  %v1547_v21 = vrot.slane %v1546_v48, 2  ;;  %v1576_v23 = vsel %vm10066_vm7, %v1572_v45, %v1390_v9  ;;  %v1262_v37 = vrot.slane %v1261_v54, 4 }
 0x191   : >> { %v1448_v57 = vsel %vm1444_vm14, 0.0, %v1434_v28  ;;  %v1492_v7 = vmax.f32 %v1490_v38, %v1491_v60  ;;  %v1205_v35 = vmax.f32 %v1203_v31, %v1204_v34  ;;  %v1297_v55 = vsel %vm7575_vm8, %v6089_v56, -inf  ;;  %vm10074_vm14 = vmmov %vm10066_vm7 }
 0x192   : >> { %v1548_v13 = vmax.f32 %v1546_v48, %v1547_v21  ;;  %vm10067_vm4 = vcmask 1043456   ;;  %v1263_v46 = vmax.f32 %v1261_v54, %v1262_v37  ;;  %v1319_v41 = vmax.f32 %v1293_v20, %v1297_v55 }
 0x193   : >> { %v1580_v14 = vsel %vm10067_vm4, %v1576_v23, %v1448_v57  ;;  %vm1502_vm12 = vcmp.eq.f32.partialorder %v1492_v7, -inf  ;;  %v1206_v18 = vrot.slane %v1205_v35, 2  ;;  %v1351_v30 = vsel %vm7595_vm0, %v6105_v17, -inf }
 0x194   : >> { %v1355_v15 = vsel %vm7603_vm5, %v6089_v56, -inf  ;;  %v1506_v16 = vsel %vm1502_vm12, 0.0, %v1492_v7  ;;  %v1549_v25 = vrot.slane %v1548_v13, 1  ;;  %v1264_v32 = vrot.slane %v1263_v46, 2 }
 0x195   : >> { %v1320_v0 = vrot.slane %v1319_v41, 4  ;;  %vm10068_vm10 = vcmask 1044480   ;;  %v1207_v27 = vmax.f32 %v1205_v35, %v1206_v18  ;;  %v1377_v3 = vmax.f32 %v1351_v30, %v1355_v15 }
 0x196   : >> { %v1584_v39 = vsel %vm10068_vm10, %v1580_v14, %v1506_v16  ;;  %v1409_v33 = vsel %vm10049_vm2, %v6105_v17, -inf  ;;  %v1550_v40 = vmax.f32 %v1548_v13, %v1549_v25  ;;  %v1265_v43 = vmax.f32 %v1263_v46, %v1264_v32  ;;  %vm10075_vm12 = vmmov %vm10068_vm10 }
 0x197   : >> { %v1321_v53 = vmax.f32 %v1319_v41, %v1320_v0  ;;  %vm10069_vm8 = vnez %v10030_v47  ;;  %v1208_v49 = vrot.slane %v1207_v27, 1  ;;  %v1378_v19 = vrot.slane %v1377_v3, 4 }
 0x198   : >> { %v1413_v10 = vsel %vm10069_vm8, %v6089_v56, -inf  ;;  %vm10070_vm0 = vnez %v10034_v50  ;;  %vm1560_vm5 = vcmp.eq.f32.partialorder %v1550_v40, -inf  ;;  %v1266_v62 = vrot.slane %v1265_v43, 1 }
 0x199   : >> { %v1435_v26 = vmax.f32 %v1409_v33, %v1413_v10  ;;  %v1467_v51 = vsel %vm10070_vm0, %v6105_v17, -inf  ;;  %v1322_v29 = vrot.slane %v1321_v53, 2  ;;  %v1471_v6 = vsel %vm10062_vm3, %v6089_v56, -inf }
 0x19a   : >> { %v1564_v59 = vsel %vm1560_vm5, 0.0, %v1550_v40  ;;  %v1209_v58 = vmax.f32 %v1207_v27, %v1208_v49  ;;  %v1379_v61 = vmax.f32 %v1377_v3, %v1378_v19  ;;  %vm10071_vm2 = vcmask 1045504  }
 0x19b   : >> { %v1436_v47 = vrot.slane %v1435_v26, 4  ;;  %v1588_v36 = vsel %vm10071_vm2, %v1584_v39, %v1564_v59  ;;  %v1267_v22 = vmax.f32 %v1265_v43, %v1266_v62  ;;  %v1323_v4 = vmax.f32 %v1321_v53, %v1322_v29  ;;  %vm10076_vm8 = vmmov %vm10071_vm2 }
 0x19c   : >> { %v1493_v63 = vmax.f32 %v1467_v51, %v1471_v6  ;;  %v1596_v50 = vrot.slane %v1588_v36, 2  ;;  %vm1213_vm6 = vcmp.eq.f32.partialorder %v1209_v58, -inf  ;;  %v1380_v24 = vrot.slane %v1379_v61, 2 }
 0x19d   : >> { %v1437_v11 = vmax.f32 %v1435_v26, %v1436_v47  ;;  %v1217_v12 = vsel %vm1213_vm6, 0.0, %v1209_v58  ;;  %vm1271_vm15 = vcmp.eq.f32.partialorder %v1267_v22, -inf  ;;  %v1324_v52 = vrot.slane %v1323_v4, 1 }
 0x19e   : >> { %v1494_v8 = vrot.slane %v1493_v63, 4  ;;  %1604 = vst [vmem:[%s6966_s26 + $0x30] sm:$0xc0] %v1596_v50  ;;  %v1275_v38 = vsel %vm1271_vm15, 0.0, %v1267_v22  ;;  %v1381_v45 = vmax.f32 %v1379_v61, %v1380_v24  ;;  %v1525_v42 = vsel %vm7690_vm1, %v6105_v17, -inf }
 0x19f   : >> { %v1438_v31 = vrot.slane %v1437_v11, 2  ;;  %1608 = vst [vmem:[%s6966_s26 + $0x50] sm:$0x1f] %v1596_v50  ;;  %v1325_v28 = vmax.f32 %v1323_v4, %v1324_v52  ;;  %v1529_v54 = vsel %vm7696_vm13, %v6089_v56, -inf  ;;  %vm10072_vm11 = vcmask 1040384  }
 0x1a0   : >> { %v1495_v48 = vmax.f32 %v1493_v63, %v1494_v8  ;;  %v1382_v9 = vrot.slane %v1381_v45, 1  ;;  %v1551_v34 = vmax.f32 %v1525_v42, %v1529_v54  ;;  %v1569_v21 = vsel %vm10072_vm11, %v1217_v12, %v1275_v38 }
 0x1a1   : >> { %v1439_v60 = vmax.f32 %v1437_v11, %v1438_v31  ;;  %vm1329_vm3 = vcmp.eq.f32.partialorder %v1325_v28, -inf  ;;  %vm10073_vm9 = vcmask 1041408   ;;  %v7866_v3 = vmov -inf  }
 0x1a2   : >> { %v1496_v20 = vrot.slane %v1495_v48, 2  ;;  %v1333_v23 = vsel %vm1329_vm3, 0.0, %v1325_v28  ;;  %v1383_v37 = vmax.f32 %v1381_v45, %v1382_v9  ;;  %v1552_v7 = vrot.slane %v1551_v34, 4 }
 0x1a3   : >> { %v1440_v57 = vrot.slane %v1439_v60, 1  ;;  %v1573_v55 = vsel %vm10073_vm9, %v1569_v21, %v1333_v23  ;;  %v7868_v33 = vmov -inf   ;;  %v7870_v40 = vmov -inf  }
 0x1a4   : >> { %v1497_v5 = vmax.f32 %v1495_v48, %v1496_v20  ;;  %vm1387_vm1 = vcmp.eq.f32.partialorder %v1383_v37, -inf  ;;  %v1553_v35 = vmax.f32 %v1551_v34, %v1552_v7  ;;  %v7872_v43 = vmov -inf  }
 0x1a5   : >> { %v1441_v17 = vmax.f32 %v1439_v60, %v1440_v57  ;;  %v1391_v13 = vsel %vm1387_vm1, 0.0, %v1383_v37  ;;  %v7874_v53 = vmov -inf   ;;  %v7876_v10 = vmov -inf  }
 0x1a6   : >> { %v1498_v44 = vrot.slane %v1497_v5, 1  ;;  %v1554_v56 = vrot.slane %v1553_v35, 2  ;;  %v1577_v41 = vsel %vm10074_vm14, %v1573_v55, %v1391_v13  ;;  %v7878_v49 = vmov -inf  }
 0x1a7   : >> { %vm1445_vm13 = vcmp.eq.f32.partialorder %v1441_v17, -inf  ;;  %v7880_v19 = vmov -inf  }
 0x1a8   : >> { %v1449_v14 = vsel %vm1445_vm13, 0.0, %v1441_v17  ;;  %v1499_v46 = vmax.f32 %v1497_v5, %v1498_v44  ;;  %v1555_v18 = vmax.f32 %v1553_v35, %v1554_v56 }
 0x1a9   : >> { %v1581_v16 = vsel %vm10067_vm4, %v1577_v41, %v1449_v14 }
 0x1aa   : >> { %vm1503_vm7 = vcmp.eq.f32.partialorder %v1499_v46, -inf  ;;  %v1556_v15 = vrot.slane %v1555_v18, 1 }
 0x1ab   : >> { %v1507_v30 = vsel %vm1503_vm7, 0.0, %v1499_v46 }
 0x1ac   : >> { %v1557_v25 = vmax.f32 %v1555_v18, %v1556_v15  ;;  %v1585_v32 = vsel %vm10075_vm12, %v1581_v16, %v1507_v30 }
 0x1ae   : >> { %vm1561_vm10 = vcmp.eq.f32.partialorder %v1557_v25, -inf }
 0x1af   : >> { %v1565_v0 = vsel %vm1561_vm10, 0.0, %v1557_v25 }
 0x1b0   : >> { %v1589_v39 = vsel %vm10076_vm8, %v1585_v32, %v1565_v0  ;;  %4185 = sbr.rel (%p4176_p13) target bundleno = 449 (0x1c1), region = 147 }
 0x1b1   : >> { %v1597_v27 = vrot.slane %v1589_v39, 2 }
 0x1b3   : >> { %1605 = vst [vmem:[%s6966_s26 + $0x38] sm:$0xc0] %v1597_v27 }
 0x1b4   : >> { %1609 = vst [vmem:[%s6966_s26 + $0x58] sm:$0x1f] %v1597_v27 }
 0x1b5   : >> { %v6119_v26 = vmov -inf   ;;  %v6123_v51 = vmov -inf   ;;  %v6127_v62 = vmov -inf   ;;  %v6131_v29 = vmov -inf  }
 0x1b6   : >> { %v6135_v6 = vmov -inf   ;;  %v6139_v59 = vmov -inf   ;;  %v6143_v58 = vmov -inf   ;;  %v6147_v61 = vmov -inf  }
 0x1b7 LB: >>> { %s4349_s6 = sshll.u32 %s6153_s24, 6  ;;  %s1615_s24 = sadd.s32 1, %s6153_s24   ;;  %s6153_s24 = sphi %s7584_s24, %s1615_s24   ;;  %v6149_v61 = vphi %v6147_v61, %v6148_v61   ;;  %v6145_v58 = vphi %v6143_v58, %v6144_v58   ;;  %v6141_v59 = vphi %v6139_v59, %v6140_v59   ;;  %v6137_v6 = vphi %v6135_v6, %v6136_v6   ;;  %v6133_v29 = vphi %v6131_v29, %v6132_v29   ;;  %v6129_v62 = vphi %v6127_v62, %v6128_v62   ;;  %v6125_v51 = vphi %v6123_v51, %v6124_v51   ;;  %v6121_v26 = vphi %v6119_v26, %v6120_v26  }
 0x1b8   : >>> { %s1628_s0 = scalar_lea.vmem [#allocation8], %s4349_s6  ;;  %p1614_p0 = scmp.ge.s32.totalorder %s1615_s24, %s7593_s25 }
 0x1b9   : >>> { %v1629_v47 = vld [vmem:[%s1628_s0] sm:$0xff]  ;;  %v1630_v36 = vld [vmem:[%s1628_s0 + $0x8] sm:$0xff]  ;;  %v1631_v22 = vld [vmem:[%s1628_s0 + $0x10] sm:$0xff] }
 0x1ba   : >>> { %v1632_v4 = vld [vmem:[%s1628_s0 + $0x18] sm:$0xff]  ;;  %v1633_v63 = vld [vmem:[%s1628_s0 + $0x20] sm:$0xff]  ;;  %v1634_v50 = vld [vmem:[%s1628_s0 + $0x28] sm:$0xff]  ;;  %v1637_v24 = vmax.f32 %v6149_v61, %v1629_v47   ;;  %v1638_v11 = vmax.f32 %v6145_v58, %v1630_v36   ;;  %v1639_v12 = vmax.f32 %v6141_v59, %v1631_v22   ;;  %1617 = sbr.rel (!%p1614_p0) target bundleno = 439 (0x1b7), region = 153 }
 0x1bb   : >>> { %v1635_v52 = vld [vmem:[%s1628_s0 + $0x30] sm:$0xff]  ;;  %v1636_v8 = vld [vmem:[%s1628_s0 + $0x38] sm:$0xff]  ;;  %v1640_v38 = vmax.f32 %v6137_v6, %v1632_v4   ;;  %v1641_v45 = vmax.f32 %v6133_v29, %v1633_v63   ;;  %v1642_v31 = vmax.f32 %v6129_v62, %v1634_v50  }
 0x1bc   : >>> { %v1643_v42 = vmax.f32 %v6125_v51, %v1635_v52   ;;  %v1644_v28 = vmax.f32 %v6121_v26, %v1636_v8   ;;  %v6140_v59 = vmov %v1639_v12   ;;  %v6144_v58 = vmov %v1638_v11  }
 0x1bd   : >>> { %v6128_v62 = vmov %v1642_v31   ;;  %v6132_v29 = vmov %v1641_v45   ;;  %v6136_v6 = vmov %v1640_v38   ;;  %v6148_v61 = vmov %v1637_v24  }
 0x1be   : >>> { %v6120_v26 = vmov %v1644_v28   ;;  %v6124_v51 = vmov %v1643_v42   ;;  %v10077_v3 = vmov (%p1614_p0), %v1644_v28  ;;  %v10078_v33 = vmov (%p1614_p0), %v1643_v42 }
 0x1bf   : >> { %v10079_v40 = vmov %v1642_v31  ;;  %v10080_v43 = vmov %v1641_v45  ;;  %v10081_v53 = vmov %v1640_v38  ;;  %v10082_v10 = vmov %v1639_v12 }
 0x1c0   : >> { %v10083_v49 = vmov %v1638_v11  ;;  %v10084_v19 = vmov %v1637_v24 }
 0x1c1 PF: >> { %s1645_s7 = sld [smem:[#allocation6 + %s6472_s22]]  ;;  %v10107_v24 = vmov 0  ;;  %v10111_v52 = vmov 0  ;;  %v6185_v19 = vphi %v7880_v19, %v10084_v19   ;;  %v6181_v49 = vphi %v7878_v49, %v10083_v49   ;;  %v6177_v10 = vphi %v7876_v10, %v10082_v10   ;;  %v6173_v53 = vphi %v7874_v53, %v10081_v53   ;;  %v6169_v43 = vphi %v7872_v43, %v10080_v43   ;;  %v6165_v40 = vphi %v7870_v40, %v10079_v40   ;;  %v6161_v33 = vphi %v7868_v33, %v10078_v33   ;;  %v6157_v3 = vphi %v7866_v3, %v10077_v3  }
 0x1c2   : >> { %s1646_s2 = sld [smem:[#allocation7 + %s6472_s22]] }
 0x1c3   : >> { %s1703_s8 = sld [smem:[#allocation6 + %s6547_s28]] }
 0x1c4   : >> { %s1704_s3 = sld [smem:[#allocation7 + %s6547_s28]] }
 0x1c5   : >> { %s1761_s11 = sld [smem:[#allocation6 + %s6551_s30]] }
 0x1c6   : >> { %s7939_s12 = sld [smem:[#allocation7 + %s6551_s30]] }
 0x1c7   : >> { %v1647_v48 = vstv %s1645_s7  ;;  %s7942_s13 = sld [smem:[#allocation6 + %s6642_s9]] }
 0x1c8   : >> { %vm1648_vm0 = vcmp.ge.s32.totalorder %v6454_v1, %v1647_v48  ;;  %vm1649_vm5 = vcmp.ge.s32.totalorder %v6458_v2, %v1647_v48  ;;  %v1650_v54 = vstv %s1646_s2  ;;  %s7947_s15 = sld [smem:[#allocation7 + %s6642_s9]] }
 0x1c9   : >> { %vm1651_vm2 = vcmp.lt.s32.totalorder %v6454_v1, %v1650_v54  ;;  %vm1652_vm6 = vcmp.lt.s32.totalorder %v6458_v2, %v1650_v54  ;;  %v1705_v9 = vstv %s1703_s8  ;;  %s7952_s18 = sld [smem:[#allocation6 + %s6645_s10]] }
 0x1ca   : >> { %vm7954_vm15 = vmand %vm1648_vm0, %vm1651_vm2  ;;  %vm1706_vm3 = vcmp.ge.s32.totalorder %v6454_v1, %v1705_v9  ;;  %vm7960_vm11 = vcmp.ge.s32.totalorder %v6458_v2, %v1705_v9  ;;  %v1708_v20 = vstv %s1704_s3  ;;  %s7965_s21 = sld [smem:[#allocation7 + %s6645_s10]] }
 0x1cb   : >> { %vm7967_vm1 = vmand %vm1649_vm5, %vm1652_vm6  ;;  %v1659_v23 = vsel %vm7954_vm15, %v6185_v19, -inf  ;;  %vm1709_vm9 = vcmp.lt.s32.totalorder %v6454_v1, %v1708_v20  ;;  %vm1710_vm13 = vcmp.lt.s32.totalorder %v6458_v2, %v1708_v20  ;;  %v1763_v37 = vstv %s1761_s11  ;;  %s7991_s23 = sld [smem:[#allocation6 + %s6760_s16]] }
 0x1cc   : >> { %v1663_v57 = vsel %vm7967_vm1, %v6169_v43, -inf  ;;  %vm7979_vm14 = vmand %vm1706_vm3, %vm1709_vm9  ;;  %vm1764_vm7 = vcmp.ge.s32.totalorder %v6454_v1, %v1763_v37  ;;  %vm7985_vm4 = vcmp.ge.s32.totalorder %v6458_v2, %v1763_v37  ;;  %v1766_v17 = vstv %s7939_s12  ;;  %s8014_s24 = sld [smem:[#allocation7 + %s6760_s16]] }
 0x1cd   : >> { %v1667_v35 = vmax.f32 %v1659_v23, %v1663_v57  ;;  %vm7995_vm12 = vmand %vm7960_vm11, %vm1710_vm13  ;;  %v1717_v13 = vsel %vm7979_vm14, %v6185_v19, -inf  ;;  %vm1767_vm10 = vcmp.lt.s32.totalorder %v6454_v1, %v1766_v17  ;;  %vm1768_vm8 = vcmp.lt.s32.totalorder %v6458_v2, %v1766_v17  ;;  %s8030_s25 = sld [smem:[#allocation4 + %s6645_s10]]  }
 0x1ce   : >> { %v1721_v44 = vsel %vm7995_vm12, %v6169_v43, -inf  ;;  %vm8007_vm0 = vmand %vm1764_vm7, %vm1767_vm10  ;;  %v1821_v14 = vstv %s7942_s13  ;;  %v1824_v46 = vstv %s7947_s15  ;;  %v1660_v41 = vsel %vm7954_vm15, %v6181_v49, -inf  ;;  %s8039_s27 = sld [smem:[#allocation5 + %s6645_s10]] }
 0x1cf   : >> { %v1668_v18 = vrot.slane %v1667_v35, 4  ;;  %v1725_v30 = vmax.f32 %v1717_v13, %v1721_v44  ;;  %vm8021_vm5 = vmand %vm7985_vm4, %vm1768_vm8  ;;  %v1775_v16 = vsel %vm8007_vm0, %v6185_v19, -inf  ;;  %vm1822_vm2 = vcmp.ge.s32.totalorder %v6454_v1, %v1821_v14  ;;  %s8047_s29 = sld [smem:[#allocation6 + %s6771_s17]] }
 0x1d0   : >> { %v1779_v25 = vsel %vm8021_vm5, %v6169_v43, -inf  ;;  %vm1823_vm6 = vcmp.ge.s32.totalorder %v6458_v2, %v1821_v14  ;;  %vm1825_vm3 = vcmp.lt.s32.totalorder %v6454_v1, %v1824_v46  ;;  %vm1826_vm11 = vcmp.lt.s32.totalorder %v6458_v2, %v1824_v46  ;;  %s8079_s6 = sld [smem:[#allocation7 + %s6771_s17]] }
 0x1d1   : >> { %v1669_v32 = vmax.f32 %v1667_v35, %v1668_v18  ;;  %v1726_v0 = vrot.slane %v1725_v30, 4  ;;  %v1783_v39 = vmax.f32 %v1775_v16, %v1779_v25  ;;  %vm8041_vm9 = vmand %vm1822_vm2, %vm1825_vm3  ;;  %v1879_v26 = vstv %s7952_s18 }
 0x1d2   : >> { %vm8049_vm13 = vmand %vm1823_vm6, %vm1826_vm11  ;;  %v1833_v62 = vsel %vm8041_vm9, %v6185_v19, -inf  ;;  %vm1880_vm7 = vcmp.ge.s32.totalorder %v6454_v1, %v1879_v26  ;;  %vm8058_vm4 = vcmp.ge.s32.totalorder %v6458_v2, %v1879_v26  ;;  %v1882_v6 = vstv %s7965_s21 }
 0x1d3   : >> { %v1670_v59 = vrot.slane %v1669_v32, 2  ;;  %v1727_v58 = vmax.f32 %v1725_v30, %v1726_v0  ;;  %v1784_v61 = vrot.slane %v1783_v39, 4  ;;  %v1837_v47 = vsel %vm8049_vm13, %v6169_v43, -inf }
 0x1d4   : >> { %v1841_v36 = vmax.f32 %v1833_v62, %v1837_v47  ;;  %vm1883_vm10 = vcmp.lt.s32.totalorder %v6454_v1, %v1882_v6  ;;  %vm1884_vm8 = vcmp.lt.s32.totalorder %v6458_v2, %v1882_v6  ;;  %v1937_v22 = vstv %s7991_s23  ;;  %p4205_p1 = scmp.ge.s32.totalorder %s8030_s25, %s8039_s27 }
 0x1d5   : >> { %v1671_v4 = vmax.f32 %v1669_v32, %v1670_v59  ;;  %v1728_v63 = vrot.slane %v1727_v58, 2  ;;  %v1785_v50 = vmax.f32 %v1783_v39, %v1784_v61  ;;  %vm8069_vm2 = vmand %vm1880_vm7, %vm1883_vm10  ;;  %vm8074_vm6 = vcmp.ge.s32.totalorder %v6454_v1, %v1937_v22 }
 0x1d6   : >> { %v10108_v24 = vsel %vm8069_vm2, 4294967295, %v10107_v24  ;;  %v1842_v12 = vrot.slane %v1841_v36, 4  ;;  %vm8083_vm3 = vmand %vm8058_vm4, %vm1884_vm8  ;;  %v1891_v8 = vsel %vm8069_vm2, %v6185_v19, -inf  ;;  %vm8091_vm11 = vcmp.ge.s32.totalorder %v6458_v2, %v1937_v22 }
 0x1d7   : >> { %v10112_v52 = vsel %vm8083_vm3, 4294967295, %v10111_v52  ;;  %v1940_v45 = vstv %s8014_s24  ;;  %v1672_v31 = vrot.slane %v1671_v4, 1  ;;  %v1729_v42 = vmax.f32 %v1727_v58, %v1728_v63 }
 0x1d8   : >> { %v1786_v28 = vrot.slane %v1785_v50, 2  ;;  %v1895_v48 = vsel %vm8083_vm3, %v6169_v43, -inf  ;;  %v1843_v54 = vmax.f32 %v1841_v36, %v1842_v12  ;;  %vm1941_vm7 = vcmp.lt.s32.totalorder %v6454_v1, %v1940_v45 }
 0x1d9   : >> { %v1899_v9 = vmax.f32 %v1891_v8, %v1895_v48  ;;  %vm1942_vm4 = vcmp.lt.s32.totalorder %v6458_v2, %v1940_v45  ;;  %v1673_v34 = vmax.f32 %v1671_v4, %v1672_v31  ;;  %v1730_v20 = vrot.slane %v1729_v42, 1  ;;  %vm8103_vm10 = vmand %vm8074_vm6, %vm1941_vm7 }
 0x1da   : >> { %v1787_v23 = vmax.f32 %v1785_v50, %v1786_v28  ;;  %v10115_v37 = vmov 0  ;;  %v1995_v57 = vstv %s8047_s29  ;;  %v1844_v5 = vrot.slane %v1843_v54, 2  ;;  %vm8110_vm8 = vmand %vm8091_vm11, %vm1942_vm4 }
 0x1db   : >> { %v10116_v37 = vsel %vm8103_vm10, 4294967295, %v10115_v37  ;;  %v1900_v17 = vrot.slane %v1899_v9, 4  ;;  %v10117_v35 = vmov 0  ;;  %v1949_v13 = vsel %vm8103_vm10, %v6185_v19, -inf }
 0x1dc   : >> { %v10118_v35 = vsel %vm8110_vm8, 4294967295, %v10117_v35  ;;  %vm8118_vm3 = vcmp.ge.s32.totalorder %v6454_v1, %v1995_v57  ;;  %vm1695_vm6 = vcmp.eq.f32.partialorder %v1673_v34, -inf  ;;  %v1731_v14 = vmax.f32 %v1729_v42, %v1730_v20 }
 0x1dd   : >> { %v1788_v46 = vrot.slane %v1787_v23, 1  ;;  %v1953_v18 = vsel %vm8110_vm8, %v6169_v43, -inf  ;;  %v1699_v30 = vsel %vm1695_vm6, 0.0, %v1673_v34  ;;  %v1845_v16 = vmax.f32 %v1843_v54, %v1844_v5 }
 0x1de   : >> { %v1901_v25 = vmax.f32 %v1899_v9, %v1900_v17  ;;  %v1957_v32 = vmax.f32 %v1949_v13, %v1953_v18  ;;  %vm1753_vm11 = vcmp.eq.f32.partialorder %v1731_v14, -inf  ;;  %vm8126_vm7 = vcmp.ge.s32.totalorder %v6458_v2, %v1995_v57 }
 0x1df   : >> { %v1789_v0 = vmax.f32 %v1787_v23, %v1788_v46  ;;  %v1998_v26 = vstv %s8079_s6  ;;  %v1757_v62 = vsel %vm1753_vm11, 0.0, %v1731_v14  ;;  %v1846_v29 = vrot.slane %v1845_v16, 1 }
 0x1e0   : >> { %v1902_v6 = vrot.slane %v1901_v25, 2  ;;  %v1958_v59 = vrot.slane %v1957_v32, 4  ;;  %vm1999_vm10 = vcmp.lt.s32.totalorder %v6454_v1, %v1998_v26  ;;  %vm2000_vm6 = vcmp.lt.s32.totalorder %v6458_v2, %v1998_v26 }
 0x1e1   : >> { %vm1811_vm4 = vcmp.eq.f32.partialorder %v1789_v0, -inf  ;;  %vm10123_vm8 = vcmask 1040384   ;;  %v1847_v47 = vmax.f32 %v1845_v16, %v1846_v29  ;;  %vm8136_vm2 = vmand %vm8118_vm3, %vm1999_vm10  ;;  %v1664_v12 = vsel %vm7967_vm1, %v6165_v40, -inf }
 0x1e2   : >> { %v2051_v58 = vsel %vm10123_vm8, %v1699_v30, %v1757_v62  ;;  %v1815_v61 = vsel %vm1811_vm4, 0.0, %v1789_v0  ;;  %v1903_v36 = vmax.f32 %v1901_v25, %v1902_v6  ;;  %v1959_v22 = vmax.f32 %v1957_v32, %v1958_v59  ;;  %vm8142_vm11 = vmand %vm8126_vm7, %vm2000_vm6 }
 0x1e3   : >> { %v2007_v50 = vsel %vm8136_vm2, %v6185_v19, -inf  ;;  %vm10128_vm8 = vcmask 1041408   ;;  %v1718_v8 = vsel %vm7979_vm14, %v6181_v49, -inf  ;;  %vm1869_vm3 = vcmp.eq.f32.partialorder %v1847_v47, -inf }
 0x1e4   : >> { %v2055_v11 = vsel %vm10128_vm8, %v2051_v58, %v1815_v61  ;;  %v1904_v38 = vrot.slane %v1903_v36, 1  ;;  %v1960_v45 = vrot.slane %v1959_v22, 2  ;;  %v2011_v31 = vsel %vm8142_vm11, %v6169_v43, -inf }
 0x1e5   : >> { %v1873_v42 = vsel %vm1869_vm3, 0.0, %v1847_v47  ;;  %v2015_v28 = vmax.f32 %v2007_v50, %v2011_v31  ;;  %v1674_v19 = vmax.f32 %v1660_v41, %v1664_v12  ;;  %v1722_v48 = vsel %vm7995_vm12, %v6165_v40, -inf }
 0x1e6   : >> { %v1905_v54 = vmax.f32 %v1903_v36, %v1904_v38  ;;  %v1961_v9 = vmax.f32 %v1959_v22, %v1960_v45  ;;  %vm10129_vm10 = vcmask 1042432   ;;  %v1732_v20 = vmax.f32 %v1718_v8, %v1722_v48 }
 0x1e7   : >> { %v2059_v34 = vsel %vm10129_vm10, %v2055_v11, %v1873_v42  ;;  %v2016_v23 = vrot.slane %v2015_v28, 4  ;;  %v1675_v57 = vrot.slane %v1674_v19, 4  ;;  %v1776_v43 = vsel %vm8007_vm0, %v6181_v49, -inf }
 0x1e8   : >> { %v1780_v5 = vsel %vm8021_vm5, %v6165_v40, -inf  ;;  %vm1927_vm7 = vcmp.eq.f32.partialorder %v1905_v54, -inf  ;;  %v1962_v41 = vrot.slane %v1961_v9, 1  ;;  %v1733_v17 = vrot.slane %v1732_v20, 4 }
 0x1e9   : >> { %v1790_v13 = vmax.f32 %v1776_v43, %v1780_v5  ;;  %v1931_v44 = vsel %vm1927_vm7, 0.0, %v1905_v54  ;;  %v2017_v14 = vmax.f32 %v2015_v28, %v2016_v23  ;;  %v1676_v46 = vmax.f32 %v1674_v19, %v1675_v57 }
 0x1ea   : >> { %v1834_v18 = vsel %vm8041_vm9, %v6181_v49, -inf  ;;  %v1963_v30 = vmax.f32 %v1961_v9, %v1962_v41  ;;  %vm10130_vm4 = vcmask 1043456   ;;  %v1734_v25 = vmax.f32 %v1732_v20, %v1733_v17 }
 0x1eb   : >> { %v2063_v16 = vsel %vm10130_vm4, %v2059_v34, %v1931_v44  ;;  %v1791_v32 = vrot.slane %v1790_v13, 4  ;;  %v2018_v0 = vrot.slane %v2017_v14, 2  ;;  %v1677_v39 = vrot.slane %v1676_v46, 2 }
 0x1ec   : >> { %v1838_v26 = vsel %vm8049_vm13, %v6165_v40, -inf  ;;  %vm10131_vm6 = vnez %v10108_v24  ;;  %vm1985_vm8 = vcmp.eq.f32.partialorder %v1963_v30, -inf  ;;  %v1735_v29 = vrot.slane %v1734_v25, 2 }
 0x1ed   : >> { %v1892_v62 = vsel %vm10131_vm6, %v6181_v49, -inf  ;;  %v1792_v6 = vmax.f32 %v1790_v13, %v1791_v32  ;;  %v1848_v59 = vmax.f32 %v1834_v18, %v1838_v26  ;;  %v1989_v58 = vsel %vm1985_vm8, 0.0, %v1963_v30 }
 0x1ee   : >> { %v2019_v61 = vmax.f32 %v2017_v14, %v2018_v0  ;;  %v1678_v47 = vmax.f32 %v1676_v46, %v1677_v39  ;;  %vm10132_vm3 = vnez %v10112_v52  ;;  %vm10133_vm10 = vcmask 1044480  }
 0x1ef   : >> { %v1896_v36 = vsel %vm10132_vm3, %v6165_v40, -inf  ;;  %v2067_v22 = vsel %vm10133_vm10, %v2063_v16, %v1989_v58  ;;  %v1736_v50 = vmax.f32 %v1734_v25, %v1735_v29  ;;  %v1793_v11 = vrot.slane %v1792_v6, 2 }
 0x1f0   : >> { %v1849_v12 = vrot.slane %v1848_v59, 4  ;;  %v2020_v8 = vrot.slane %v2019_v61, 1  ;;  %v1679_v38 = vrot.slane %v1678_v47, 1  ;;  %v1906_v45 = vmax.f32 %v1892_v62, %v1896_v36 }
 0x1f1   : >> { %vm10134_vm7 = vnez %v10116_v37  ;;  %v1737_v42 = vrot.slane %v1736_v50, 1  ;;  %v1794_v28 = vmax.f32 %v1792_v6, %v1793_v11  ;;  %vm10135_vm4 = vnez %v10118_v35 }
 0x1f2   : >> { %v1950_v31 = vsel %vm10134_vm7, %v6181_v49, -inf  ;;  %v1850_v19 = vmax.f32 %v1848_v59, %v1849_v12  ;;  %v1954_v48 = vsel %vm10135_vm4, %v6165_v40, -inf  ;;  %v2021_v54 = vmax.f32 %v2019_v61, %v2020_v8 }
 0x1f3   : >> { %v1680_v9 = vmax.f32 %v1678_v47, %v1679_v38  ;;  %v1907_v34 = vrot.slane %v1906_v45, 4  ;;  %v1964_v20 = vmax.f32 %v1950_v31, %v1954_v48  ;;  %v1738_v23 = vmax.f32 %v1736_v50, %v1737_v42 }
 0x1f4   : >> { %v1795_v57 = vrot.slane %v1794_v28, 1  ;;  %v1851_v43 = vrot.slane %v1850_v19, 2  ;;  %v2008_v5 = vsel %vm8136_vm2, %v6181_v49, -inf  ;;  %vm2043_vm8 = vcmp.eq.f32.partialorder %v2021_v54, -inf }
 0x1f5   : >> { %vm1696_vm10 = vcmp.eq.f32.partialorder %v1680_v9, -inf  ;;  %v1908_v41 = vmax.f32 %v1906_v45, %v1907_v34  ;;  %v1965_v17 = vrot.slane %v1964_v20, 4  ;;  %v2047_v13 = vsel %vm2043_vm8, 0.0, %v2021_v54 }
 0x1f6   : >> { %v1700_v44 = vsel %vm1696_vm10, 0.0, %v1680_v9  ;;  %vm1754_vm7 = vcmp.eq.f32.partialorder %v1738_v23, -inf  ;;  %v1796_v14 = vmax.f32 %v1794_v28, %v1795_v57  ;;  %vm10136_vm4 = vcmask 1045504  }
 0x1f7   : >> { %v2071_v46 = vsel %vm10136_vm4, %v2067_v22, %v2047_v13  ;;  %v1758_v18 = vsel %vm1754_vm7, 0.0, %v1738_v23  ;;  %v1852_v30 = vmax.f32 %v1850_v19, %v1851_v43  ;;  %v1909_v16 = vrot.slane %v1908_v41, 2 }
 0x1f8   : >> { %v2079_v25 = vrot.slane %v2071_v46, 3  ;;  %vm1812_vm3 = vcmp.eq.f32.partialorder %v1796_v14, -inf  ;;  %v1966_v32 = vmax.f32 %v1964_v20, %v1965_v17  ;;  %v2012_v49 = vsel %vm8142_vm11, %v6165_v40, -inf }
 0x1f9   : >> { %v1816_v0 = vsel %vm1812_vm3, 0.0, %v1796_v14  ;;  %v1853_v39 = vrot.slane %v1852_v30, 1  ;;  %v1910_v26 = vmax.f32 %v1908_v41, %v1909_v16  ;;  %v2022_v62 = vmax.f32 %v2008_v5, %v2012_v49 }
 0x1fa   : >> { %2087 = vst [vmem:[%s6966_s26 + $0x40] sm:$0xe0] %v2079_v25  ;;  %v1967_v29 = vrot.slane %v1966_v32, 2  ;;  %vm10137_vm8 = vcmask 1040384   ;;  %v1661_v59 = vsel %vm7954_vm15, %v6177_v10, -inf  ;;  %v1665_v58 = vsel %vm7967_vm1, %v6161_v33, -inf }
 0x1fb   : >> { %v2052_v6 = vsel %vm10137_vm8, %v1700_v44, %v1758_v18  ;;  %2091 = vst [vmem:[%s6966_s26 + $0x60] sm:$0xf] %v2079_v25  ;;  %v1854_v61 = vmax.f32 %v1852_v30, %v1853_v39  ;;  %v1911_v47 = vrot.slane %v1910_v26, 1  ;;  %v2023_v40 = vrot.slane %v2022_v62, 4 }
 0x1fc   : >> { %vm10138_vm3 = vcmask 1041408   ;;  %v1968_v22 = vmax.f32 %v1966_v32, %v1967_v29  ;;  %v1681_v50 = vmax.f32 %v1661_v59, %v1665_v58  ;;  %v1719_v11 = vsel %vm7979_vm14, %v6177_v10, -inf }
 0x1fd   : >> { %v2056_v36 = vsel %vm10138_vm3, %v2052_v6, %v1816_v0  ;;  %v1723_v12 = vsel %vm7995_vm12, %v6161_v33, -inf  ;;  %vm1870_vm7 = vcmp.eq.f32.partialorder %v1854_v61, -inf  ;;  %v1912_v8 = vmax.f32 %v1910_v26, %v1911_v47 }
 0x1fe   : >> { %v2024_v38 = vmax.f32 %v2022_v62, %v2023_v40  ;;  %v1739_v45 = vmax.f32 %v1719_v11, %v1723_v12  ;;  %v1874_v31 = vsel %vm1870_vm7, 0.0, %v1854_v61  ;;  %v1969_v42 = vrot.slane %v1968_v22, 1 }
 0x1ff   : >> { %v1682_v28 = vrot.slane %v1681_v50, 4  ;;  %v1777_v19 = vsel %vm8007_vm0, %v6177_v10, -inf  ;;  %vm1928_vm4 = vcmp.eq.f32.partialorder %v1912_v8, -inf  ;;  %vm10139_vm10 = vcmask 1042432  }
 0x200   : >> { %v2025_v48 = vrot.slane %v2024_v38, 2  ;;  %v2060_v54 = vsel %vm10139_vm10, %v2056_v36, %v1874_v31  ;;  %v1740_v9 = vrot.slane %v1739_v45, 4  ;;  %v1932_v34 = vsel %vm1928_vm4, 0.0, %v1912_v8 }
 0x201   : >> { %v1970_v20 = vmax.f32 %v1968_v22, %v1969_v42  ;;  %v1683_v23 = vmax.f32 %v1681_v50, %v1682_v28  ;;  %v1781_v57 = vsel %vm8021_vm5, %v6161_v33, -inf  ;;  %vm10140_vm8 = vcmask 1043456  }
 0x202   : >> { %v2026_v43 = vmax.f32 %v2024_v38, %v2025_v48  ;;  %v2064_v5 = vsel %vm10140_vm8, %v2060_v54, %v1932_v34  ;;  %v1741_v41 = vmax.f32 %v1739_v45, %v1740_v9  ;;  %v1797_v17 = vmax.f32 %v1777_v19, %v1781_v57 }
 0x203   : >> { %vm1986_vm3 = vcmp.eq.f32.partialorder %v1970_v20, -inf  ;;  %v1684_v13 = vrot.slane %v1683_v23, 2  ;;  %v1835_v44 = vsel %vm8041_vm9, %v6177_v10, -inf  ;;  %v1839_v14 = vsel %vm8049_vm13, %v6161_v33, -inf }
 0x204   : >> { %v1990_v46 = vsel %vm1986_vm3, 0.0, %v1970_v20  ;;  %v2027_v18 = vrot.slane %v2026_v43, 1  ;;  %v1742_v30 = vrot.slane %v1741_v41, 2  ;;  %v1798_v16 = vrot.slane %v1797_v17, 4 }
 0x205   : >> { %vm10141_vm7 = vcmask 1044480   ;;  %v1685_v32 = vmax.f32 %v1683_v23, %v1684_v13  ;;  %v1855_v49 = vmax.f32 %v1835_v44, %v1839_v14  ;;  %v1893_v0 = vsel %vm10131_vm6, %v6177_v10, -inf }
 0x206   : >> { %v2068_v25 = vsel %vm10141_vm7, %v2064_v5, %v1990_v46  ;;  %v2028_v39 = vmax.f32 %v2026_v43, %v2027_v18  ;;  %v1743_v26 = vmax.f32 %v1741_v41, %v1742_v30  ;;  %v1799_v62 = vmax.f32 %v1797_v17, %v1798_v16 }
 0x207   : >> { %vm10142_vm4 = vnez %v10112_v52  ;;  %v1686_v6 = vrot.slane %v1685_v32, 1  ;;  %v1856_v59 = vrot.slane %v1855_v49, 4  ;;  %vm10143_vm10 = vnez %v10116_v37 }
 0x208   : >> { %v1897_v29 = vsel %vm10142_vm4, %v6161_v33, -inf  ;;  %v1951_v61 = vsel %vm10143_vm10, %v6177_v10, -inf  ;;  %vm2044_vm8 = vcmp.eq.f32.partialorder %v2028_v39, -inf  ;;  %v1744_v47 = vrot.slane %v1743_v26, 1 }
 0x209   : >> { %v1913_v58 = vmax.f32 %v1893_v0, %v1897_v29  ;;  %v1800_v40 = vrot.slane %v1799_v62, 2  ;;  %vm10144_vm3 = vnez %v10118_v35  ;;  %v2048_v22 = vsel %vm2044_vm8, 0.0, %v2028_v39 }
 0x20a   : >> { %v1955_v36 = vsel %vm10144_vm3, %v6161_v33, -inf  ;;  %v1687_v50 = vmax.f32 %v1685_v32, %v1686_v6  ;;  %v1857_v11 = vmax.f32 %v1855_v49, %v1856_v59  ;;  %vm10145_vm7 = vcmask 1045504  }
 0x20b   : >> { %v1914_v12 = vrot.slane %v1913_v58, 4  ;;  %v2072_v8 = vsel %vm10145_vm7, %v2068_v25, %v2048_v22  ;;  %v1745_v38 = vmax.f32 %v1743_v26, %v1744_v47  ;;  %v1801_v45 = vmax.f32 %v1799_v62, %v1800_v40 }
 0x20c   : >> { %v1971_v31 = vmax.f32 %v1951_v61, %v1955_v36  ;;  %v2080_v42 = vrot.slane %v2072_v8, 3  ;;  %vm1697_vm10 = vcmp.eq.f32.partialorder %v1687_v50, -inf  ;;  %v1858_v28 = vrot.slane %v1857_v11, 2 }
 0x20d   : >> { %v1915_v19 = vmax.f32 %v1913_v58, %v1914_v12  ;;  %v1701_v48 = vsel %vm1697_vm10, 0.0, %v1687_v50  ;;  %vm1755_vm4 = vcmp.eq.f32.partialorder %v1745_v38, -inf  ;;  %v1802_v54 = vrot.slane %v1801_v45, 1 }
 0x20e   : >> { %v1972_v9 = vrot.slane %v1971_v31, 4  ;;  %2088 = vst [vmem:[%s6966_s26 + $0x48] sm:$0xe0] %v2080_v42  ;;  %v1759_v34 = vsel %vm1755_vm4, 0.0, %v1745_v38  ;;  %v1859_v20 = vmax.f32 %v1857_v11, %v1858_v28  ;;  %v2009_v57 = vsel %vm8136_vm2, %v6177_v10, -inf }
 0x20f   : >> { %v1916_v23 = vrot.slane %v1915_v19, 2  ;;  %2092 = vst [vmem:[%s6966_s26 + $0x68] sm:$0xf] %v2080_v42  ;;  %v1803_v43 = vmax.f32 %v1801_v45, %v1802_v54  ;;  %v2013_v41 = vsel %vm8142_vm11, %v6161_v33, -inf  ;;  %vm10146_vm8 = vcmask 1040384  }
 0x210   : >> { %v1973_v5 = vmax.f32 %v1971_v31, %v1972_v9  ;;  %v2053_v17 = vsel %vm10146_vm8, %v1701_v48, %v1759_v34  ;;  %v1860_v13 = vrot.slane %v1859_v20, 1  ;;  %v2029_v14 = vmax.f32 %v2009_v57, %v2013_v41 }
 0x211   : >> { %v1917_v44 = vmax.f32 %v1915_v19, %v1916_v23  ;;  %v1662_v46 = vsel %vm7954_vm15, %v6173_v53, -inf  ;;  %vm1813_vm4 = vcmp.eq.f32.partialorder %v1803_v43, -inf  ;;  %v1666_v10 = vsel %vm7967_vm1, %v6157_v3, -inf }
 0x212   : >> { %v1974_v18 = vrot.slane %v1973_v5, 2  ;;  %v1720_v30 = vsel %vm7979_vm14, %v6173_v53, -inf  ;;  %v1817_v33 = vsel %vm1813_vm4, 0.0, %v1803_v43  ;;  %v1861_v16 = vmax.f32 %v1859_v20, %v1860_v13 }
 0x213   : >> { %v1918_v25 = vrot.slane %v1917_v44, 1  ;;  %v2030_v32 = vrot.slane %v2029_v14, 4  ;;  %vm10147_vm10 = vcmask 1041408   ;;  %v1688_v39 = vmax.f32 %v1662_v46, %v1666_v10 }
 0x214   : >> { %v1975_v49 = vmax.f32 %v1973_v5, %v1974_v18  ;;  %v2057_v0 = vsel %vm10147_vm10, %v2053_v17, %v1817_v33  ;;  %v1724_v60 = vsel %vm7995_vm12, %v6157_v3, -inf  ;;  %vm1871_vm15 = vcmp.eq.f32.partialorder %v1861_v16, -inf }
 0x215   : >> { %v1919_v26 = vmax.f32 %v1917_v44, %v1918_v25  ;;  %v2031_v21 = vmax.f32 %v2029_v14, %v2030_v32  ;;  %v1746_v62 = vmax.f32 %v1720_v30, %v1724_v60  ;;  %v1875_v29 = vsel %vm1871_vm15, 0.0, %v1861_v16 }
 0x216   : >> { %v1976_v6 = vrot.slane %v1975_v49, 1  ;;  %v1689_v7 = vrot.slane %v1688_v39, 4  ;;  %v1778_v59 = vsel %vm8007_vm0, %v6173_v53, -inf  ;;  %vm10148_vm14 = vcmask 1042432  }
 0x217   : >> { %vm1929_vm1 = vcmp.eq.f32.partialorder %v1919_v26, -inf  ;;  %v2032_v58 = vrot.slane %v2031_v21, 2  ;;  %v2061_v61 = vsel %vm10148_vm14, %v2057_v0, %v1875_v29  ;;  %v1747_v47 = vrot.slane %v1746_v62, 4 }
 0x218   : >> { %v1933_v40 = vsel %vm1929_vm1, 0.0, %v1919_v26  ;;  %v1977_v36 = vmax.f32 %v1975_v49, %v1976_v6  ;;  %v1690_v55 = vmax.f32 %v1688_v39, %v1689_v7  ;;  %v1782_v22 = vsel %vm8021_vm5, %v6157_v3, -inf  ;;  %vm10156_vm1 = vmmov %vm10148_vm14 }
 0x219   : >> { %v2033_v50 = vmax.f32 %v2031_v21, %v2032_v58  ;;  %vm10149_vm12 = vcmask 1043456   ;;  %v1748_v12 = vmax.f32 %v1746_v62, %v1747_v47  ;;  %v1804_v8 = vmax.f32 %v1778_v59, %v1782_v22 }
 0x21a   : >> { %v2065_v11 = vsel %vm10149_vm12, %v2061_v61, %v1933_v40  ;;  %vm1987_vm7 = vcmp.eq.f32.partialorder %v1977_v36, -inf  ;;  %v1691_v56 = vrot.slane %v1690_v55, 2  ;;  %v1836_v38 = vsel %vm8041_vm9, %v6173_v53, -inf }
 0x21b   : >> { %v1840_v45 = vsel %vm8049_vm13, %v6157_v3, -inf  ;;  %v1991_v31 = vsel %vm1987_vm7, 0.0, %v1977_v36  ;;  %v2034_v42 = vrot.slane %v2033_v50, 1  ;;  %v1749_v28 = vrot.slane %v1748_v12, 2 }
 0x21c   : >> { %v1805_v15 = vrot.slane %v1804_v8, 4  ;;  %vm10150_vm0 = vcmask 1044480   ;;  %v1692_v48 = vmax.f32 %v1690_v55, %v1691_v56  ;;  %v1862_v54 = vmax.f32 %v1836_v38, %v1840_v45 }
 0x21d   : >> { %v2069_v19 = vsel %vm10150_vm0, %v2065_v11, %v1991_v31  ;;  %v1894_v9 = vsel %vm10131_vm6, %v6173_v53, -inf  ;;  %v2035_v34 = vmax.f32 %v2033_v50, %v2034_v42  ;;  %v1750_v20 = vmax.f32 %v1748_v12, %v1749_v28  ;;  %vm10157_vm7 = vmmov %vm10150_vm0 }
 0x21e   : >> { %v1806_v27 = vmax.f32 %v1804_v8, %v1805_v15  ;;  %vm10151_vm5 = vnez %v10112_v52  ;;  %v1693_v23 = vrot.slane %v1692_v48, 1  ;;  %v1863_v57 = vrot.slane %v1862_v54, 4 }
 0x21f   : >> { %v1898_v51 = vsel %vm10151_vm5, %v6157_v3, -inf  ;;  %vm10152_vm9 = vnez %v10116_v37  ;;  %vm2045_vm13 = vcmp.eq.f32.partialorder %v2035_v34, -inf  ;;  %v1751_v41 = vrot.slane %v1750_v20, 1 }
 0x220   : >> { %v1920_v43 = vmax.f32 %v1894_v9, %v1898_v51  ;;  %v1952_v5 = vsel %vm10152_vm9, %v6173_v53, -inf  ;;  %v1807_v17 = vrot.slane %v1806_v27, 2  ;;  %v1956_v24 = vsel %vm10144_vm3, %v6157_v3, -inf }
 0x221   : >> { %v2049_v13 = vsel %vm2045_vm13, 0.0, %v2035_v34  ;;  %v1694_v44 = vmax.f32 %v1692_v48, %v1693_v23  ;;  %v1864_v14 = vmax.f32 %v1862_v54, %v1863_v57  ;;  %vm10153_vm6 = vcmask 1045504  }
 0x222   : >> { %v1921_v52 = vrot.slane %v1920_v43, 4  ;;  %v2073_v46 = vsel %vm10153_vm6, %v2069_v19, %v2049_v13  ;;  %v1752_v18 = vmax.f32 %v1750_v20, %v1751_v41  ;;  %v1808_v10 = vmax.f32 %v1806_v27, %v1807_v17  ;;  %vm10158_vm5 = vmmov %vm10153_vm6 }
 0x223   : >> { %v1978_v30 = vmax.f32 %v1952_v5, %v1956_v24  ;;  %v2081_v37 = vrot.slane %v2073_v46, 3  ;;  %vm1698_vm8 = vcmp.eq.f32.partialorder %v1694_v44, -inf  ;;  %v1865_v33 = vrot.slane %v1864_v14, 2 }
 0x224   : >> { %v1922_v16 = vmax.f32 %v1920_v43, %v1921_v52  ;;  %v1702_v25 = vsel %vm1698_vm8, 0.0, %v1694_v44  ;;  %vm1756_vm4 = vcmp.eq.f32.partialorder %v1752_v18, -inf  ;;  %v1809_v32 = vrot.slane %v1808_v10, 1 }
 0x225   : >> { %v1979_v35 = vrot.slane %v1978_v30, 4  ;;  %2089 = vst [vmem:[%s6966_s26 + $0x50] sm:$0xe0] %v2081_v37  ;;  %v1760_v49 = vsel %vm1756_vm4, 0.0, %v1752_v18  ;;  %v1866_v0 = vmax.f32 %v1864_v14, %v1865_v33  ;;  %v2010_v60 = vsel %vm8136_vm2, %v6173_v53, -inf }
 0x226   : >> { %v1923_v39 = vrot.slane %v1922_v16, 2  ;;  %2093 = vst [vmem:[%s6966_s26 + $0x70] sm:$0xf] %v2081_v37  ;;  %v1810_v26 = vmax.f32 %v1808_v10, %v1809_v32  ;;  %v2014_v62 = vsel %vm8142_vm11, %v6157_v3, -inf  ;;  %vm10154_vm10 = vcmask 1040384  }
 0x227   : >> { %v1980_v21 = vmax.f32 %v1978_v30, %v1979_v35  ;;  %v1867_v29 = vrot.slane %v1866_v0, 1  ;;  %v2036_v7 = vmax.f32 %v2010_v60, %v2014_v62  ;;  %v2054_v58 = vsel %vm10154_vm10, %v1702_v25, %v1760_v49 }
 0x228   : >> { %v1924_v6 = vmax.f32 %v1922_v16, %v1923_v39  ;;  %vm1814_vm3 = vcmp.eq.f32.partialorder %v1810_v26, -inf  ;;  %vm10155_vm15 = vcmask 1041408   ;;  %v8312_v54 = vmov -inf  }
 0x229   : >> { %v1981_v59 = vrot.slane %v1980_v21, 2  ;;  %v1818_v61 = vsel %vm1814_vm3, 0.0, %v1810_v26  ;;  %v1868_v47 = vmax.f32 %v1866_v0, %v1867_v29  ;;  %v2037_v36 = vrot.slane %v2036_v7, 4 }
 0x22a   : >> { %v1925_v40 = vrot.slane %v1924_v6, 1  ;;  %v2058_v22 = vsel %vm10155_vm15, %v2054_v58, %v1818_v61  ;;  %v8314_v9 = vmov -inf   ;;  %v8316_v34 = vmov -inf  }
 0x22b   : >> { %v1982_v4 = vmax.f32 %v1980_v21, %v1981_v59  ;;  %vm1872_vm2 = vcmp.eq.f32.partialorder %v1868_v47, -inf  ;;  %v2038_v55 = vmax.f32 %v2036_v7, %v2037_v36  ;;  %v8318_v20 = vmov -inf  }
 0x22c   : >> { %v1926_v53 = vmax.f32 %v1924_v6, %v1925_v40  ;;  %v1876_v50 = vsel %vm1872_vm2, 0.0, %v1868_v47  ;;  %v8320_v27 = vmov -inf   ;;  %v8322_v51 = vmov -inf  }
 0x22d   : >> { %v1983_v63 = vrot.slane %v1982_v4, 1  ;;  %v2039_v3 = vrot.slane %v2038_v55, 2  ;;  %v2062_v8 = vsel %vm10156_vm1, %v2058_v22, %v1876_v50  ;;  %v8324_v23 = vmov -inf  }
 0x22e   : >> { %vm1930_vm11 = vcmp.eq.f32.partialorder %v1926_v53, -inf  ;;  %v8326_v57 = vmov -inf  }
 0x22f   : >> { %v1934_v11 = vsel %vm1930_vm11, 0.0, %v1926_v53  ;;  %v1984_v12 = vmax.f32 %v1982_v4, %v1983_v63  ;;  %v2040_v56 = vmax.f32 %v2038_v55, %v2039_v3 }
 0x230   : >> { %v2066_v31 = vsel %vm10149_vm12, %v2062_v8, %v1934_v11 }
 0x231   : >> { %vm1988_vm14 = vcmp.eq.f32.partialorder %v1984_v12, -inf  ;;  %v2041_v45 = vrot.slane %v2040_v56, 1 }
 0x232   : >> { %v1992_v38 = vsel %vm1988_vm14, 0.0, %v1984_v12 }
 0x233   : >> { %v2042_v42 = vmax.f32 %v2040_v56, %v2041_v45  ;;  %v2070_v28 = vsel %vm10157_vm7, %v2066_v31, %v1992_v38 }
 0x235   : >> { %vm2046_vm0 = vcmp.eq.f32.partialorder %v2042_v42, -inf }
 0x236   : >> { %v2050_v15 = vsel %vm2046_vm0, 0.0, %v2042_v42 }
 0x237   : >> { %v2074_v19 = vsel %vm10158_vm5, %v2070_v28, %v2050_v15  ;;  %4214 = sbr.rel (%p4205_p1) target bundleno = 584 (0x248), region = 158 }
 0x238   : >> { %v2082_v48 = vrot.slane %v2074_v19, 3 }
 0x23a   : >> { %2090 = vst [vmem:[%s6966_s26 + $0x58] sm:$0xe0] %v2082_v48 }
 0x23b   : >> { %2094 = vst [vmem:[%s6966_s26 + $0x78] sm:$0xf] %v2082_v48 }
 0x23c   : >> { %v6187_v43 = vmov -inf   ;;  %v6191_v5 = vmov -inf   ;;  %v6195_v41 = vmov -inf   ;;  %v6199_v17 = vmov -inf  }
 0x23d   : >> { %v6203_v24 = vmov -inf   ;;  %v6207_v13 = vmov -inf   ;;  %v6211_v44 = vmov -inf   ;;  %v6215_v14 = vmov -inf  }
 0x23e LB: >>> { %s4350_s0 = sshll.u32 %s6221_s25, 6  ;;  %s2100_s25 = sadd.s32 1, %s6221_s25   ;;  %s6221_s25 = sphi %s8030_s25, %s2100_s25   ;;  %v6217_v14 = vphi %v6215_v14, %v6216_v14   ;;  %v6213_v44 = vphi %v6211_v44, %v6212_v44   ;;  %v6209_v13 = vphi %v6207_v13, %v6208_v13   ;;  %v6205_v24 = vphi %v6203_v24, %v6204_v24   ;;  %v6201_v17 = vphi %v6199_v17, %v6200_v17   ;;  %v6197_v41 = vphi %v6195_v41, %v6196_v41   ;;  %v6193_v5 = vphi %v6191_v5, %v6192_v5   ;;  %v6189_v43 = vphi %v6187_v43, %v6188_v43  }
 0x23f   : >>> { %s2113_s7 = scalar_lea.vmem [#allocation8], %s4350_s0  ;;  %p2099_p2 = scmp.ge.s32.totalorder %s2100_s25, %s8039_s27 }
 0x240   : >>> { %v2114_v52 = vld [vmem:[%s2113_s7] sm:$0xff]  ;;  %v2115_v46 = vld [vmem:[%s2113_s7 + $0x8] sm:$0xff]  ;;  %v2116_v18 = vld [vmem:[%s2113_s7 + $0x10] sm:$0xff] }
 0x241   : >>> { %v2117_v10 = vld [vmem:[%s2113_s7 + $0x18] sm:$0xff]  ;;  %v2118_v30 = vld [vmem:[%s2113_s7 + $0x20] sm:$0xff]  ;;  %v2119_v37 = vld [vmem:[%s2113_s7 + $0x28] sm:$0xff]  ;;  %v2122_v33 = vmax.f32 %v6217_v14, %v2114_v52   ;;  %v2123_v16 = vmax.f32 %v6213_v44, %v2115_v46   ;;  %v2124_v25 = vmax.f32 %v6209_v13, %v2116_v18   ;;  %2102 = sbr.rel (!%p2099_p2) target bundleno = 574 (0x23e), region = 164 }
 0x242   : >>> { %v2120_v32 = vld [vmem:[%s2113_s7 + $0x30] sm:$0xff]  ;;  %v2121_v35 = vld [vmem:[%s2113_s7 + $0x38] sm:$0xff]  ;;  %v2125_v49 = vmax.f32 %v6205_v24, %v2117_v10   ;;  %v2126_v0 = vmax.f32 %v6201_v17, %v2118_v30   ;;  %v2127_v39 = vmax.f32 %v6197_v41, %v2119_v37  }
 0x243   : >>> { %v2128_v60 = vmax.f32 %v6193_v5, %v2120_v32   ;;  %v2129_v26 = vmax.f32 %v6189_v43, %v2121_v35   ;;  %v6208_v13 = vmov %v2124_v25   ;;  %v6212_v44 = vmov %v2123_v16  }
 0x244   : >>> { %v6196_v41 = vmov %v2127_v39   ;;  %v6200_v17 = vmov %v2126_v0   ;;  %v6204_v24 = vmov %v2125_v49   ;;  %v6216_v14 = vmov %v2122_v33  }
 0x245   : >>> { %v6188_v43 = vmov %v2129_v26   ;;  %v6192_v5 = vmov %v2128_v60   ;;  %v10159_v54 = vmov (%p2099_p2), %v2129_v26  ;;  %v10160_v9 = vmov (%p2099_p2), %v2128_v60 }
 0x246   : >> { %v10161_v34 = vmov %v2127_v39  ;;  %v10162_v20 = vmov %v2126_v0  ;;  %v10163_v27 = vmov %v2125_v49  ;;  %v10164_v51 = vmov %v2124_v25 }
 0x247   : >> { %v10165_v23 = vmov %v2123_v16  ;;  %v10166_v57 = vmov %v2122_v33 }
 0x248 PF: >> { %s2130_s2 = sld [smem:[#allocation6 + %s6472_s22]]  ;;  %v10189_v33 = vmov 0  ;;  %v10193_v32 = vmov 0  ;;  %v6253_v57 = vphi %v8326_v57, %v10166_v57   ;;  %v6249_v23 = vphi %v8324_v23, %v10165_v23   ;;  %v6245_v51 = vphi %v8322_v51, %v10164_v51   ;;  %v6241_v27 = vphi %v8320_v27, %v10163_v27   ;;  %v6237_v20 = vphi %v8318_v20, %v10162_v20   ;;  %v6233_v34 = vphi %v8316_v34, %v10161_v34   ;;  %v6229_v9 = vphi %v8314_v9, %v10160_v9   ;;  %v6225_v54 = vphi %v8312_v54, %v10159_v54  }
 0x249   : >> { %s2131_s8 = sld [smem:[#allocation7 + %s6472_s22]] }
 0x24a   : >> { %s2188_s3 = sld [smem:[#allocation6 + %s6547_s28]] }
 0x24b   : >> { %s2189_s11 = sld [smem:[#allocation7 + %s6547_s28]] }
 0x24c   : >> { %s2246_s12 = sld [smem:[#allocation6 + %s6551_s30]] }
 0x24d   : >> { %s8385_s13 = sld [smem:[#allocation7 + %s6551_s30]] }
 0x24e   : >> { %v2132_v21 = vstv %s2130_s2  ;;  %s8388_s15 = sld [smem:[#allocation6 + %s6642_s9]] }
 0x24f   : >> { %vm2133_vm9 = vcmp.ge.s32.totalorder %v6454_v1, %v2132_v21  ;;  %vm2134_vm13 = vcmp.ge.s32.totalorder %v6458_v2, %v2132_v21  ;;  %v2135_v62 = vstv %s2131_s8  ;;  %s8393_s18 = sld [smem:[#allocation7 + %s6642_s9]] }
 0x250   : >> { %vm2136_vm6 = vcmp.lt.s32.totalorder %v6454_v1, %v2135_v62  ;;  %vm2137_vm8 = vcmp.lt.s32.totalorder %v6458_v2, %v2135_v62  ;;  %v2190_v29 = vstv %s2188_s3  ;;  %s8398_s21 = sld [smem:[#allocation6 + %s6645_s10]] }
 0x251   : >> { %vm8400_vm4 = vmand %vm2133_vm9, %vm2136_vm6  ;;  %vm2191_vm3 = vcmp.ge.s32.totalorder %v6454_v1, %v2190_v29  ;;  %vm8406_vm10 = vcmp.ge.s32.totalorder %v6458_v2, %v2190_v29  ;;  %v2193_v59 = vstv %s2189_s11  ;;  %s8411_s23 = sld [smem:[#allocation7 + %s6645_s10]] }
 0x252   : >> { %vm8413_vm2 = vmand %vm2134_vm13, %vm2137_vm8  ;;  %v2144_v61 = vsel %vm8400_vm4, %v6253_v57, -inf  ;;  %vm2194_vm15 = vcmp.lt.s32.totalorder %v6454_v1, %v2193_v59  ;;  %vm2195_vm11 = vcmp.lt.s32.totalorder %v6458_v2, %v2193_v59  ;;  %v2248_v47 = vstv %s2246_s12  ;;  %s8437_s24 = sld [smem:[#allocation6 + %s6760_s16]] }
 0x253   : >> { %v2148_v40 = vsel %vm8413_vm2, %v6237_v20, -inf  ;;  %vm8425_vm1 = vmand %vm2191_vm3, %vm2194_vm15  ;;  %vm2249_vm14 = vcmp.ge.s32.totalorder %v6454_v1, %v2248_v47  ;;  %vm8431_vm12 = vcmp.ge.s32.totalorder %v6458_v2, %v2248_v47  ;;  %v2251_v53 = vstv %s8385_s13  ;;  %s8460_s25 = sld [smem:[#allocation7 + %s6760_s16]] }
 0x254   : >> { %v2152_v55 = vmax.f32 %v2144_v61, %v2148_v40  ;;  %vm8441_vm7 = vmand %vm8406_vm10, %vm2195_vm11  ;;  %v2202_v50 = vsel %vm8425_vm1, %v6253_v57, -inf  ;;  %vm2252_vm0 = vcmp.lt.s32.totalorder %v6454_v1, %v2251_v53  ;;  %vm2253_vm5 = vcmp.lt.s32.totalorder %v6458_v2, %v2251_v53  ;;  %s8476_s27 = sld [smem:[#allocation4 + %s6760_s16]]  }
 0x255   : >> { %v2206_v63 = vsel %vm8441_vm7, %v6237_v20, -inf  ;;  %vm8453_vm9 = vmand %vm2249_vm14, %vm2252_vm0  ;;  %v2306_v11 = vstv %s8388_s15  ;;  %v2309_v12 = vstv %s8393_s18  ;;  %v2145_v8 = vsel %vm8400_vm4, %v6249_v23, -inf  ;;  %s8485_s29 = sld [smem:[#allocation5 + %s6760_s16]] }
 0x256   : >> { %v2153_v56 = vrot.slane %v2152_v55, 4  ;;  %v2210_v38 = vmax.f32 %v2202_v50, %v2206_v63  ;;  %vm8467_vm13 = vmand %vm8431_vm12, %vm2253_vm5  ;;  %v2260_v31 = vsel %vm8453_vm9, %v6253_v57, -inf  ;;  %vm2307_vm6 = vcmp.ge.s32.totalorder %v6454_v1, %v2306_v11  ;;  %s8493_s6 = sld [smem:[#allocation6 + %s6771_s17]] }
 0x257   : >> { %v2264_v42 = vsel %vm8467_vm13, %v6237_v20, -inf  ;;  %vm2308_vm8 = vcmp.ge.s32.totalorder %v6458_v2, %v2306_v11  ;;  %vm2310_vm3 = vcmp.lt.s32.totalorder %v6454_v1, %v2309_v12  ;;  %vm2311_vm10 = vcmp.lt.s32.totalorder %v6458_v2, %v2309_v12  ;;  %s8525_s0 = sld [smem:[#allocation7 + %s6771_s17]] }
 0x258   : >> { %v2154_v28 = vmax.f32 %v2152_v55, %v2153_v56  ;;  %v2211_v15 = vrot.slane %v2210_v38, 4  ;;  %v2268_v19 = vmax.f32 %v2260_v31, %v2264_v42  ;;  %vm8487_vm15 = vmand %vm2307_vm6, %vm2310_vm3  ;;  %v2364_v43 = vstv %s8398_s21 }
 0x259   : >> { %vm8495_vm11 = vmand %vm2308_vm8, %vm2311_vm10  ;;  %v2318_v41 = vsel %vm8487_vm15, %v6253_v57, -inf  ;;  %vm2365_vm14 = vcmp.ge.s32.totalorder %v6454_v1, %v2364_v43  ;;  %vm8504_vm12 = vcmp.ge.s32.totalorder %v6458_v2, %v2364_v43  ;;  %v2367_v24 = vstv %s8411_s23 }
 0x25a   : >> { %v2155_v13 = vrot.slane %v2154_v28, 2  ;;  %v2212_v44 = vmax.f32 %v2210_v38, %v2211_v15  ;;  %v2269_v14 = vrot.slane %v2268_v19, 4  ;;  %v2322_v52 = vsel %vm8495_vm11, %v6237_v20, -inf }
 0x25b   : >> { %v2326_v46 = vmax.f32 %v2318_v41, %v2322_v52  ;;  %vm2368_vm0 = vcmp.lt.s32.totalorder %v6454_v1, %v2367_v24  ;;  %vm2369_vm5 = vcmp.lt.s32.totalorder %v6458_v2, %v2367_v24  ;;  %v2422_v18 = vstv %s8437_s24  ;;  %p4234_p3 = scmp.ge.s32.totalorder %s8476_s27, %s8485_s29 }
 0x25c   : >> { %v2156_v10 = vmax.f32 %v2154_v28, %v2155_v13  ;;  %v2213_v30 = vrot.slane %v2212_v44, 2  ;;  %v2270_v37 = vmax.f32 %v2268_v19, %v2269_v14  ;;  %vm8515_vm6 = vmand %vm2365_vm14, %vm2368_vm0  ;;  %vm8520_vm8 = vcmp.ge.s32.totalorder %v6454_v1, %v2422_v18 }
 0x25d   : >> { %v10190_v33 = vsel %vm8515_vm6, 4294967295, %v10189_v33  ;;  %v2327_v25 = vrot.slane %v2326_v46, 4  ;;  %vm8529_vm3 = vmand %vm8504_vm12, %vm2369_vm5  ;;  %v2376_v35 = vsel %vm8515_vm6, %v6253_v57, -inf  ;;  %vm8537_vm10 = vcmp.ge.s32.totalorder %v6458_v2, %v2422_v18 }
 0x25e   : >> { %v10194_v32 = vsel %vm8529_vm3, 4294967295, %v10193_v32  ;;  %v2425_v0 = vstv %s8460_s25  ;;  %v2157_v39 = vrot.slane %v2156_v10, 1  ;;  %v2214_v60 = vmax.f32 %v2212_v44, %v2213_v30 }
 0x25f   : >> { %v2271_v26 = vrot.slane %v2270_v37, 2  ;;  %v2380_v21 = vsel %vm8529_vm3, %v6237_v20, -inf  ;;  %v2328_v62 = vmax.f32 %v2326_v46, %v2327_v25  ;;  %vm2426_vm14 = vcmp.lt.s32.totalorder %v6454_v1, %v2425_v0 }
 0x260   : >> { %v2384_v29 = vmax.f32 %v2376_v35, %v2380_v21  ;;  %vm2427_vm12 = vcmp.lt.s32.totalorder %v6458_v2, %v2425_v0  ;;  %v2158_v7 = vmax.f32 %v2156_v10, %v2157_v39  ;;  %v2215_v59 = vrot.slane %v2214_v60, 1  ;;  %vm8549_vm0 = vmand %vm8520_vm8, %vm2426_vm14 }
 0x261   : >> { %v2272_v61 = vmax.f32 %v2270_v37, %v2271_v26  ;;  %v10197_v47 = vmov 0  ;;  %v2480_v40 = vstv %s8493_s6  ;;  %v2329_v4 = vrot.slane %v2328_v62, 2  ;;  %vm8556_vm5 = vmand %vm8537_vm10, %vm2427_vm12 }
 0x262   : >> { %v10198_v47 = vsel %vm8549_vm0, 4294967295, %v10197_v47  ;;  %v2385_v53 = vrot.slane %v2384_v29, 4  ;;  %v10199_v55 = vmov 0  ;;  %v2434_v50 = vsel %vm8549_vm0, %v6253_v57, -inf }
 0x263   : >> { %v10200_v55 = vsel %vm8556_vm5, 4294967295, %v10199_v55  ;;  %vm8564_vm3 = vcmp.ge.s32.totalorder %v6454_v1, %v2480_v40  ;;  %vm2180_vm8 = vcmp.eq.f32.partialorder %v2158_v7, -inf  ;;  %v2216_v11 = vmax.f32 %v2214_v60, %v2215_v59 }
 0x264   : >> { %v2273_v12 = vrot.slane %v2272_v61, 1  ;;  %v2438_v56 = vsel %vm8556_vm5, %v6237_v20, -inf  ;;  %v2184_v38 = vsel %vm2180_vm8, 0.0, %v2158_v7  ;;  %v2330_v31 = vmax.f32 %v2328_v62, %v2329_v4 }
 0x265   : >> { %v2386_v42 = vmax.f32 %v2384_v29, %v2385_v53  ;;  %v2442_v28 = vmax.f32 %v2434_v50, %v2438_v56  ;;  %vm2238_vm10 = vcmp.eq.f32.partialorder %v2216_v11, -inf  ;;  %vm8572_vm14 = vcmp.ge.s32.totalorder %v6458_v2, %v2480_v40 }
 0x266   : >> { %v2274_v15 = vmax.f32 %v2272_v61, %v2273_v12  ;;  %v2483_v43 = vstv %s8525_s0  ;;  %v2242_v41 = vsel %vm2238_vm10, 0.0, %v2216_v11  ;;  %v2331_v17 = vrot.slane %v2330_v31, 1 }
 0x267   : >> { %v2387_v24 = vrot.slane %v2386_v42, 2  ;;  %v2443_v13 = vrot.slane %v2442_v28, 4  ;;  %vm2484_vm0 = vcmp.lt.s32.totalorder %v6454_v1, %v2483_v43  ;;  %vm2485_vm8 = vcmp.lt.s32.totalorder %v6458_v2, %v2483_v43 }
 0x268   : >> { %vm2296_vm12 = vcmp.eq.f32.partialorder %v2274_v15, -inf  ;;  %vm10205_vm5 = vcmask 1040384   ;;  %v2332_v52 = vmax.f32 %v2330_v31, %v2331_v17  ;;  %vm8582_vm6 = vmand %vm8564_vm3, %vm2484_vm0  ;;  %v2149_v25 = vsel %vm8413_vm2, %v6233_v34, -inf }
 0x269   : >> { %v2536_v44 = vsel %vm10205_vm5, %v2184_v38, %v2242_v41  ;;  %v2300_v14 = vsel %vm2296_vm12, 0.0, %v2274_v15  ;;  %v2388_v46 = vmax.f32 %v2386_v42, %v2387_v24  ;;  %v2444_v18 = vmax.f32 %v2442_v28, %v2443_v13  ;;  %vm8588_vm10 = vmand %vm8572_vm14, %vm2485_vm8 }
 0x26a   : >> { %v2492_v37 = vsel %vm8582_vm6, %v6253_v57, -inf  ;;  %vm10210_vm5 = vcmask 1041408   ;;  %v2203_v35 = vsel %vm8425_vm1, %v6249_v23, -inf  ;;  %vm2354_vm3 = vcmp.eq.f32.partialorder %v2332_v52, -inf }
 0x26b   : >> { %v2540_v16 = vsel %vm10210_vm5, %v2536_v44, %v2300_v14  ;;  %v2389_v49 = vrot.slane %v2388_v46, 1  ;;  %v2445_v0 = vrot.slane %v2444_v18, 2  ;;  %v2496_v39 = vsel %vm8588_vm10, %v6237_v20, -inf }
 0x26c   : >> { %v2358_v60 = vsel %vm2354_vm3, 0.0, %v2332_v52  ;;  %v2500_v26 = vmax.f32 %v2492_v37, %v2496_v39  ;;  %v2159_v57 = vmax.f32 %v2145_v8, %v2149_v25  ;;  %v2207_v21 = vsel %vm8441_vm7, %v6233_v34, -inf }
 0x26d   : >> { %v2390_v62 = vmax.f32 %v2388_v46, %v2389_v49  ;;  %v2446_v29 = vmax.f32 %v2444_v18, %v2445_v0  ;;  %vm10211_vm0 = vcmask 1042432   ;;  %v2217_v59 = vmax.f32 %v2203_v35, %v2207_v21 }
 0x26e   : >> { %v2544_v7 = vsel %vm10211_vm0, %v2540_v16, %v2358_v60  ;;  %v2501_v61 = vrot.slane %v2500_v26, 4  ;;  %v2160_v40 = vrot.slane %v2159_v57, 4  ;;  %v2261_v20 = vsel %vm8453_vm9, %v6249_v23, -inf }
 0x26f   : >> { %v2265_v4 = vsel %vm8467_vm13, %v6233_v34, -inf  ;;  %vm2412_vm14 = vcmp.eq.f32.partialorder %v2390_v62, -inf  ;;  %v2447_v8 = vrot.slane %v2446_v29, 1  ;;  %v2218_v53 = vrot.slane %v2217_v59, 4 }
 0x270   : >> { %v2275_v50 = vmax.f32 %v2261_v20, %v2265_v4  ;;  %v2416_v63 = vsel %vm2412_vm14, 0.0, %v2390_v62  ;;  %v2502_v11 = vmax.f32 %v2500_v26, %v2501_v61  ;;  %v2161_v12 = vmax.f32 %v2159_v57, %v2160_v40 }
 0x271   : >> { %v2319_v56 = vsel %vm8487_vm15, %v6249_v23, -inf  ;;  %v2448_v38 = vmax.f32 %v2446_v29, %v2447_v8  ;;  %vm10212_vm12 = vcmask 1043456   ;;  %v2219_v42 = vmax.f32 %v2217_v59, %v2218_v53 }
 0x272   : >> { %v2548_v31 = vsel %vm10212_vm12, %v2544_v7, %v2416_v63  ;;  %v2276_v28 = vrot.slane %v2275_v50, 4  ;;  %v2503_v15 = vrot.slane %v2502_v11, 2  ;;  %v2162_v19 = vrot.slane %v2161_v12, 2 }
 0x273   : >> { %v2323_v43 = vsel %vm8495_vm11, %v6233_v34, -inf  ;;  %vm10213_vm8 = vnez %v10190_v33  ;;  %vm2470_vm5 = vcmp.eq.f32.partialorder %v2448_v38, -inf  ;;  %v2220_v17 = vrot.slane %v2219_v42, 2 }
 0x274   : >> { %v2377_v41 = vsel %vm10213_vm8, %v6249_v23, -inf  ;;  %v2277_v24 = vmax.f32 %v2275_v50, %v2276_v28  ;;  %v2333_v13 = vmax.f32 %v2319_v56, %v2323_v43  ;;  %v2474_v44 = vsel %vm2470_vm5, 0.0, %v2448_v38 }
 0x275   : >> { %v2504_v14 = vmax.f32 %v2502_v11, %v2503_v15  ;;  %v2163_v52 = vmax.f32 %v2161_v12, %v2162_v19  ;;  %vm10214_vm3 = vnez %v10194_v32  ;;  %vm10215_vm0 = vcmask 1044480  }
 0x276   : >> { %v2381_v46 = vsel %vm10214_vm3, %v6233_v34, -inf  ;;  %v2552_v18 = vsel %vm10215_vm0, %v2548_v31, %v2474_v44  ;;  %v2221_v37 = vmax.f32 %v2219_v42, %v2220_v17  ;;  %v2278_v16 = vrot.slane %v2277_v24, 2 }
 0x277   : >> { %v2334_v25 = vrot.slane %v2333_v13, 4  ;;  %v2505_v35 = vrot.slane %v2504_v14, 1  ;;  %v2164_v49 = vrot.slane %v2163_v52, 1  ;;  %v2391_v0 = vmax.f32 %v2377_v41, %v2381_v46 }
 0x278   : >> { %vm10216_vm14 = vnez %v10198_v47  ;;  %v2222_v60 = vrot.slane %v2221_v37, 1  ;;  %v2279_v26 = vmax.f32 %v2277_v24, %v2278_v16  ;;  %vm10217_vm12 = vnez %v10200_v55 }
 0x279   : >> { %v2435_v39 = vsel %vm10216_vm14, %v6249_v23, -inf  ;;  %v2335_v57 = vmax.f32 %v2333_v13, %v2334_v25  ;;  %v2439_v21 = vsel %vm10217_vm12, %v6233_v34, -inf  ;;  %v2506_v62 = vmax.f32 %v2504_v14, %v2505_v35 }
 0x27a   : >> { %v2165_v29 = vmax.f32 %v2163_v52, %v2164_v49  ;;  %v2392_v7 = vrot.slane %v2391_v0, 4  ;;  %v2449_v59 = vmax.f32 %v2435_v39, %v2439_v21  ;;  %v2223_v61 = vmax.f32 %v2221_v37, %v2222_v60 }
 0x27b   : >> { %v2280_v40 = vrot.slane %v2279_v26, 1  ;;  %v2336_v20 = vrot.slane %v2335_v57, 2  ;;  %v2493_v4 = vsel %vm8582_vm6, %v6249_v23, -inf  ;;  %vm2528_vm5 = vcmp.eq.f32.partialorder %v2506_v62, -inf }
 0x27c   : >> { %vm2181_vm0 = vcmp.eq.f32.partialorder %v2165_v29, -inf  ;;  %v2393_v8 = vmax.f32 %v2391_v0, %v2392_v7  ;;  %v2450_v53 = vrot.slane %v2449_v59, 4  ;;  %v2532_v50 = vsel %vm2528_vm5, 0.0, %v2506_v62 }
 0x27d   : >> { %v2185_v63 = vsel %vm2181_vm0, 0.0, %v2165_v29  ;;  %vm2239_vm14 = vcmp.eq.f32.partialorder %v2223_v61, -inf  ;;  %v2281_v11 = vmax.f32 %v2279_v26, %v2280_v40  ;;  %vm10218_vm12 = vcmask 1045504  }
 0x27e   : >> { %v2556_v12 = vsel %vm10218_vm12, %v2552_v18, %v2532_v50  ;;  %v2243_v56 = vsel %vm2239_vm14, 0.0, %v2223_v61  ;;  %v2337_v38 = vmax.f32 %v2335_v57, %v2336_v20  ;;  %v2394_v31 = vrot.slane %v2393_v8, 2 }
 0x27f   : >> { %v2564_v42 = vrot.slane %v2556_v12, 4  ;;  %vm2297_vm3 = vcmp.eq.f32.partialorder %v2281_v11, -inf  ;;  %v2451_v28 = vmax.f32 %v2449_v59, %v2450_v53  ;;  %v2497_v23 = vsel %vm8588_vm10, %v6233_v34, -inf }
 0x280   : >> { %v2301_v15 = vsel %vm2297_vm3, 0.0, %v2281_v11  ;;  %v2338_v19 = vrot.slane %v2337_v38, 1  ;;  %v2395_v43 = vmax.f32 %v2393_v8, %v2394_v31  ;;  %v2507_v41 = vmax.f32 %v2493_v4, %v2497_v23 }
 0x281   : >> { %2572 = vst [vmem:[%s6966_s26 + $0x60] sm:$0xf0] %v2564_v42  ;;  %v2452_v17 = vrot.slane %v2451_v28, 2  ;;  %vm10219_vm5 = vcmask 1040384   ;;  %v2146_v13 = vsel %vm8400_vm4, %v6245_v51, -inf  ;;  %v2150_v44 = vsel %vm8413_vm2, %v6229_v9, -inf }
 0x282   : >> { %v2537_v24 = vsel %vm10219_vm5, %v2185_v63, %v2243_v56  ;;  %2576 = vst [vmem:[%s6966_s26 + $0x80] sm:$0x7] %v2564_v42  ;;  %v2339_v14 = vmax.f32 %v2337_v38, %v2338_v19  ;;  %v2396_v52 = vrot.slane %v2395_v43, 1  ;;  %v2508_v34 = vrot.slane %v2507_v41, 4 }
 0x283   : >> { %vm10220_vm3 = vcmask 1041408   ;;  %v2453_v18 = vmax.f32 %v2451_v28, %v2452_v17  ;;  %v2166_v37 = vmax.f32 %v2146_v13, %v2150_v44  ;;  %v2204_v16 = vsel %vm8425_vm1, %v6245_v51, -inf }
 0x284   : >> { %v2541_v46 = vsel %vm10220_vm3, %v2537_v24, %v2301_v15  ;;  %v2208_v25 = vsel %vm8441_vm7, %v6229_v9, -inf  ;;  %vm2355_vm14 = vcmp.eq.f32.partialorder %v2339_v14, -inf  ;;  %v2397_v35 = vmax.f32 %v2395_v43, %v2396_v52 }
 0x285   : >> { %v2509_v49 = vmax.f32 %v2507_v41, %v2508_v34  ;;  %v2224_v0 = vmax.f32 %v2204_v16, %v2208_v25  ;;  %v2359_v39 = vsel %vm2355_vm14, 0.0, %v2339_v14  ;;  %v2454_v60 = vrot.slane %v2453_v18, 1 }
 0x286   : >> { %v2167_v26 = vrot.slane %v2166_v37, 4  ;;  %v2262_v57 = vsel %vm8453_vm9, %v6245_v51, -inf  ;;  %vm2413_vm12 = vcmp.eq.f32.partialorder %v2397_v35, -inf  ;;  %vm10221_vm0 = vcmask 1042432  }
 0x287   : >> { %v2510_v21 = vrot.slane %v2509_v49, 2  ;;  %v2545_v62 = vsel %vm10221_vm0, %v2541_v46, %v2359_v39  ;;  %v2225_v29 = vrot.slane %v2224_v0, 4  ;;  %v2417_v7 = vsel %vm2413_vm12, 0.0, %v2397_v35 }
 0x288   : >> { %v2455_v59 = vmax.f32 %v2453_v18, %v2454_v60  ;;  %v2168_v61 = vmax.f32 %v2166_v37, %v2167_v26  ;;  %v2266_v40 = vsel %vm8467_vm13, %v6229_v9, -inf  ;;  %vm10222_vm5 = vcmask 1043456  }
 0x289   : >> { %v2511_v20 = vmax.f32 %v2509_v49, %v2510_v21  ;;  %v2549_v4 = vsel %vm10222_vm5, %v2545_v62, %v2417_v7  ;;  %v2226_v8 = vmax.f32 %v2224_v0, %v2225_v29  ;;  %v2282_v53 = vmax.f32 %v2262_v57, %v2266_v40 }
 0x28a   : >> { %vm2471_vm3 = vcmp.eq.f32.partialorder %v2455_v59, -inf  ;;  %v2169_v50 = vrot.slane %v2168_v61, 2  ;;  %v2320_v63 = vsel %vm8487_vm15, %v6245_v51, -inf  ;;  %v2324_v11 = vsel %vm8495_vm11, %v6229_v9, -inf }
 0x28b   : >> { %v2475_v12 = vsel %vm2471_vm3, 0.0, %v2455_v59  ;;  %v2512_v56 = vrot.slane %v2511_v20, 1  ;;  %v2227_v38 = vrot.slane %v2226_v8, 2  ;;  %v2283_v31 = vrot.slane %v2282_v53, 4 }
 0x28c   : >> { %vm10223_vm14 = vcmask 1044480   ;;  %v2170_v28 = vmax.f32 %v2168_v61, %v2169_v50  ;;  %v2340_v23 = vmax.f32 %v2320_v63, %v2324_v11  ;;  %v2378_v15 = vsel %vm10213_vm8, %v6245_v51, -inf }
 0x28d   : >> { %v2553_v42 = vsel %vm10223_vm14, %v2549_v4, %v2475_v12  ;;  %v2513_v19 = vmax.f32 %v2511_v20, %v2512_v56  ;;  %v2228_v43 = vmax.f32 %v2226_v8, %v2227_v38  ;;  %v2284_v41 = vmax.f32 %v2282_v53, %v2283_v31 }
 0x28e   : >> { %vm10224_vm12 = vnez %v10194_v32  ;;  %v2171_v24 = vrot.slane %v2170_v28, 1  ;;  %v2341_v13 = vrot.slane %v2340_v23, 4  ;;  %vm10225_vm0 = vnez %v10198_v47 }
 0x28f   : >> { %v2382_v17 = vsel %vm10224_vm12, %v6229_v9, -inf  ;;  %v2436_v14 = vsel %vm10225_vm0, %v6245_v51, -inf  ;;  %vm2529_vm5 = vcmp.eq.f32.partialorder %v2513_v19, -inf  ;;  %v2229_v52 = vrot.slane %v2228_v43, 1 }
 0x290   : >> { %v2398_v44 = vmax.f32 %v2378_v15, %v2382_v17  ;;  %v2285_v34 = vrot.slane %v2284_v41, 2  ;;  %vm10226_vm3 = vnez %v10200_v55  ;;  %v2533_v18 = vsel %vm2529_vm5, 0.0, %v2513_v19 }
 0x291   : >> { %v2440_v46 = vsel %vm10226_vm3, %v6229_v9, -inf  ;;  %v2172_v37 = vmax.f32 %v2170_v28, %v2171_v24  ;;  %v2342_v16 = vmax.f32 %v2340_v23, %v2341_v13  ;;  %vm10227_vm14 = vcmask 1045504  }
 0x292   : >> { %v2399_v25 = vrot.slane %v2398_v44, 4  ;;  %v2557_v35 = vsel %vm10227_vm14, %v2553_v42, %v2533_v18  ;;  %v2230_v49 = vmax.f32 %v2228_v43, %v2229_v52  ;;  %v2286_v0 = vmax.f32 %v2284_v41, %v2285_v34 }
 0x293   : >> { %v2456_v39 = vmax.f32 %v2436_v14, %v2440_v46  ;;  %v2565_v60 = vrot.slane %v2557_v35, 4  ;;  %vm2182_vm0 = vcmp.eq.f32.partialorder %v2172_v37, -inf  ;;  %v2343_v26 = vrot.slane %v2342_v16, 2 }
 0x294   : >> { %v2400_v57 = vmax.f32 %v2398_v44, %v2399_v25  ;;  %v2186_v21 = vsel %vm2182_vm0, 0.0, %v2172_v37  ;;  %vm2240_vm12 = vcmp.eq.f32.partialorder %v2230_v49, -inf  ;;  %v2287_v62 = vrot.slane %v2286_v0, 1 }
 0x295   : >> { %v2457_v29 = vrot.slane %v2456_v39, 4  ;;  %2573 = vst [vmem:[%s6966_s26 + $0x68] sm:$0xf0] %v2565_v60  ;;  %v2244_v7 = vsel %vm2240_vm12, 0.0, %v2230_v49  ;;  %v2344_v59 = vmax.f32 %v2342_v16, %v2343_v26  ;;  %v2494_v40 = vsel %vm8582_vm6, %v6245_v51, -inf }
 0x296   : >> { %v2401_v61 = vrot.slane %v2400_v57, 2  ;;  %2577 = vst [vmem:[%s6966_s26 + $0x88] sm:$0x7] %v2565_v60  ;;  %v2288_v20 = vmax.f32 %v2286_v0, %v2287_v62  ;;  %v2498_v8 = vsel %vm8588_vm10, %v6229_v9, -inf  ;;  %vm10228_vm5 = vcmask 1040384  }
 0x297   : >> { %v2458_v4 = vmax.f32 %v2456_v39, %v2457_v29  ;;  %v2538_v53 = vsel %vm10228_vm5, %v2186_v21, %v2244_v7  ;;  %v2345_v50 = vrot.slane %v2344_v59, 1  ;;  %v2514_v11 = vmax.f32 %v2494_v40, %v2498_v8 }
 0x298   : >> { %v2402_v63 = vmax.f32 %v2400_v57, %v2401_v61  ;;  %v2147_v12 = vsel %vm8400_vm4, %v6241_v27, -inf  ;;  %vm2298_vm12 = vcmp.eq.f32.partialorder %v2288_v20, -inf  ;;  %v2151_v51 = vsel %vm8413_vm2, %v6225_v54, -inf }
 0x299   : >> { %v2459_v56 = vrot.slane %v2458_v4, 2  ;;  %v2205_v38 = vsel %vm8425_vm1, %v6241_v27, -inf  ;;  %v2302_v9 = vsel %vm2298_vm12, 0.0, %v2288_v20  ;;  %v2346_v31 = vmax.f32 %v2344_v59, %v2345_v50 }
 0x29a   : >> { %v2403_v42 = vrot.slane %v2402_v63, 1  ;;  %v2515_v28 = vrot.slane %v2514_v11, 4  ;;  %vm10229_vm0 = vcmask 1041408   ;;  %v2173_v19 = vmax.f32 %v2147_v12, %v2151_v51 }
 0x29b   : >> { %v2460_v23 = vmax.f32 %v2458_v4, %v2459_v56  ;;  %v2542_v15 = vsel %vm10229_vm0, %v2538_v53, %v2302_v9  ;;  %v2209_v6 = vsel %vm8441_vm7, %v6225_v54, -inf  ;;  %vm2356_vm4 = vcmp.eq.f32.partialorder %v2346_v31, -inf }
 0x29c   : >> { %v2404_v43 = vmax.f32 %v2402_v63, %v2403_v42  ;;  %v2516_v58 = vmax.f32 %v2514_v11, %v2515_v28  ;;  %v2231_v41 = vmax.f32 %v2205_v38, %v2209_v6  ;;  %v2360_v17 = vsel %vm2356_vm4, 0.0, %v2346_v31 }
 0x29d   : >> { %v2461_v24 = vrot.slane %v2460_v23, 1  ;;  %v2174_v36 = vrot.slane %v2173_v19, 4  ;;  %v2263_v13 = vsel %vm8453_vm9, %v6241_v27, -inf  ;;  %vm10230_vm1 = vcmask 1042432  }
 0x29e   : >> { %vm2414_vm2 = vcmp.eq.f32.partialorder %v2404_v43, -inf  ;;  %v2517_v44 = vrot.slane %v2516_v58, 2  ;;  %v2546_v14 = vsel %vm10230_vm1, %v2542_v15, %v2360_v17  ;;  %v2232_v52 = vrot.slane %v2231_v41, 4 }
 0x29f   : >> { %v2418_v34 = vsel %vm2414_vm2, 0.0, %v2404_v43  ;;  %v2462_v46 = vmax.f32 %v2460_v23, %v2461_v24  ;;  %v2175_v22 = vmax.f32 %v2173_v19, %v2174_v36  ;;  %v2267_v18 = vsel %vm8467_vm13, %v6225_v54, -inf  ;;  %vm10238_vm2 = vmmov %vm10230_vm1 }
 0x2a0   : >> { %v2518_v37 = vmax.f32 %v2516_v58, %v2517_v44  ;;  %vm10231_vm7 = vcmask 1043456   ;;  %v2233_v25 = vmax.f32 %v2231_v41, %v2232_v52  ;;  %v2289_v35 = vmax.f32 %v2263_v13, %v2267_v18 }
 0x2a1   : >> { %v2550_v16 = vsel %vm10231_vm7, %v2546_v14, %v2418_v34  ;;  %vm2472_vm14 = vcmp.eq.f32.partialorder %v2462_v46, -inf  ;;  %v2176_v3 = vrot.slane %v2175_v22, 2  ;;  %v2321_v49 = vsel %vm8487_vm15, %v6241_v27, -inf }
 0x2a2   : >> { %v2325_v0 = vsel %vm8495_vm11, %v6225_v54, -inf  ;;  %v2476_v39 = vsel %vm2472_vm14, 0.0, %v2462_v46  ;;  %v2519_v60 = vrot.slane %v2518_v37, 1  ;;  %v2234_v26 = vrot.slane %v2233_v25, 2 }
 0x2a3   : >> { %v2290_v45 = vrot.slane %v2289_v35, 4  ;;  %vm10232_vm9 = vcmask 1044480   ;;  %v2177_v21 = vmax.f32 %v2175_v22, %v2176_v3  ;;  %v2347_v62 = vmax.f32 %v2321_v49, %v2325_v0 }
 0x2a4   : >> { %v2554_v57 = vsel %vm10232_vm9, %v2550_v16, %v2476_v39  ;;  %v2379_v29 = vsel %vm10213_vm8, %v6241_v27, -inf  ;;  %v2520_v7 = vmax.f32 %v2518_v37, %v2519_v60  ;;  %v2235_v59 = vmax.f32 %v2233_v25, %v2234_v26  ;;  %vm10239_vm14 = vmmov %vm10232_vm9 }
 0x2a5   : >> { %v2291_v48 = vmax.f32 %v2289_v35, %v2290_v45  ;;  %vm10233_vm13 = vnez %v10194_v32  ;;  %v2178_v61 = vrot.slane %v2177_v21, 1  ;;  %v2348_v40 = vrot.slane %v2347_v62, 4 }
 0x2a6   : >> { %v2383_v5 = vsel %vm10233_vm13, %v6225_v54, -inf  ;;  %vm10234_vm15 = vnez %v10198_v47  ;;  %vm2530_vm11 = vcmp.eq.f32.partialorder %v2520_v7, -inf  ;;  %v2236_v8 = vrot.slane %v2235_v59, 1 }
 0x2a7   : >> { %v2405_v20 = vmax.f32 %v2379_v29, %v2383_v5  ;;  %v2437_v4 = vsel %vm10234_vm15, %v6241_v27, -inf  ;;  %v2292_v53 = vrot.slane %v2291_v48, 2  ;;  %v2441_v33 = vsel %vm10226_vm3, %v6225_v54, -inf }
 0x2a8   : >> { %v2534_v50 = vsel %vm2530_vm11, 0.0, %v2520_v7  ;;  %v2179_v63 = vmax.f32 %v2177_v21, %v2178_v61  ;;  %v2349_v11 = vmax.f32 %v2347_v62, %v2348_v40  ;;  %vm10235_vm8 = vcmask 1045504  }
 0x2a9   : >> { %v2406_v32 = vrot.slane %v2405_v20, 4  ;;  %v2558_v12 = vsel %vm10235_vm8, %v2554_v57, %v2534_v50  ;;  %v2237_v56 = vmax.f32 %v2235_v59, %v2236_v8  ;;  %v2293_v51 = vmax.f32 %v2291_v48, %v2292_v53  ;;  %vm10240_vm13 = vmmov %vm10235_vm8 }
 0x2aa   : >> { %v2463_v38 = vmax.f32 %v2437_v4, %v2441_v33  ;;  %v2566_v47 = vrot.slane %v2558_v12, 4  ;;  %vm2183_vm5 = vcmp.eq.f32.partialorder %v2179_v63, -inf  ;;  %v2350_v9 = vrot.slane %v2349_v11, 2 }
 0x2ab   : >> { %v2407_v31 = vmax.f32 %v2405_v20, %v2406_v32  ;;  %v2187_v42 = vsel %vm2183_vm5, 0.0, %v2179_v63  ;;  %vm2241_vm12 = vcmp.eq.f32.partialorder %v2237_v56, -inf  ;;  %v2294_v28 = vrot.slane %v2293_v51, 1 }
 0x2ac   : >> { %v2464_v55 = vrot.slane %v2463_v38, 4  ;;  %2574 = vst [vmem:[%s6966_s26 + $0x70] sm:$0xf0] %v2566_v47  ;;  %v2245_v23 = vsel %vm2241_vm12, 0.0, %v2237_v56  ;;  %v2351_v15 = vmax.f32 %v2349_v11, %v2350_v9  ;;  %v2495_v6 = vsel %vm8582_vm6, %v6241_v27, -inf }
 0x2ad   : >> { %v2408_v19 = vrot.slane %v2407_v31, 2  ;;  %2578 = vst [vmem:[%s6966_s26 + $0x90] sm:$0x7] %v2566_v47  ;;  %v2295_v43 = vmax.f32 %v2293_v51, %v2294_v28  ;;  %v2499_v41 = vsel %vm8588_vm10, %v6225_v54, -inf  ;;  %vm10236_vm0 = vcmask 1040384  }
 0x2ae   : >> { %v2465_v58 = vmax.f32 %v2463_v38, %v2464_v55  ;;  %v2352_v17 = vrot.slane %v2351_v15, 1  ;;  %v2521_v36 = vmax.f32 %v2495_v6, %v2499_v41  ;;  %v2539_v44 = vsel %vm10236_vm0, %v2187_v42, %v2245_v23 }
 0x2af   : >> { %v2409_v24 = vmax.f32 %v2407_v31, %v2408_v19  ;;  %vm2299_vm3 = vcmp.eq.f32.partialorder %v2295_v43, -inf  ;;  %vm10237_vm4 = vcmask 1041408   ;;  %v8758_v62 = vmov -inf  }
 0x2b0   : >> { %v2466_v13 = vrot.slane %v2465_v58, 2  ;;  %v2303_v14 = vsel %vm2299_vm3, 0.0, %v2295_v43  ;;  %v2353_v52 = vmax.f32 %v2351_v15, %v2352_v17  ;;  %v2522_v46 = vrot.slane %v2521_v36, 4 }
 0x2b1   : >> { %v2410_v34 = vrot.slane %v2409_v24, 1  ;;  %v2543_v18 = vsel %vm10237_vm4, %v2539_v44, %v2303_v14  ;;  %v8760_v29 = vmov -inf   ;;  %v8762_v7 = vmov -inf  }
 0x2b2   : >> { %v2467_v10 = vmax.f32 %v2465_v58, %v2466_v13  ;;  %vm2357_vm6 = vcmp.eq.f32.partialorder %v2353_v52, -inf  ;;  %v2523_v22 = vmax.f32 %v2521_v36, %v2522_v46  ;;  %v8764_v59 = vmov -inf  }
 0x2b3   : >> { %v2411_v27 = vmax.f32 %v2409_v24, %v2410_v34  ;;  %v2361_v37 = vsel %vm2357_vm6, 0.0, %v2353_v52  ;;  %v8766_v48 = vmov -inf   ;;  %v8768_v5 = vmov -inf  }
 0x2b4   : >> { %v2468_v30 = vrot.slane %v2467_v10, 1  ;;  %v2524_v54 = vrot.slane %v2523_v22, 2  ;;  %v2547_v35 = vsel %vm10238_vm2, %v2543_v18, %v2361_v37  ;;  %v8770_v61 = vmov -inf  }
 0x2b5   : >> { %vm2415_vm10 = vcmp.eq.f32.partialorder %v2411_v27, -inf  ;;  %v8772_v40 = vmov -inf  }
 0x2b6   : >> { %v2419_v16 = vsel %vm2415_vm10, 0.0, %v2411_v27  ;;  %v2469_v25 = vmax.f32 %v2467_v10, %v2468_v30  ;;  %v2525_v3 = vmax.f32 %v2523_v22, %v2524_v54 }
 0x2b7   : >> { %v2551_v39 = vsel %vm10231_vm7, %v2547_v35, %v2419_v16 }
 0x2b8   : >> { %vm2473_vm1 = vcmp.eq.f32.partialorder %v2469_v25, -inf  ;;  %v2526_v0 = vrot.slane %v2525_v3, 1 }
 0x2b9   : >> { %v2477_v49 = vsel %vm2473_vm1, 0.0, %v2469_v25 }
 0x2ba   : >> { %v2527_v60 = vmax.f32 %v2525_v3, %v2526_v0  ;;  %v2555_v26 = vsel %vm10239_vm14, %v2551_v39, %v2477_v49 }
 0x2bc   : >> { %vm2531_vm9 = vcmp.eq.f32.partialorder %v2527_v60, -inf }
 0x2bd   : >> { %v2535_v45 = vsel %vm2531_vm9, 0.0, %v2527_v60 }
 0x2be   : >> { %v2559_v57 = vsel %vm10240_vm13, %v2555_v26, %v2535_v45  ;;  %4243 = sbr.rel (%p4234_p3) target bundleno = 719 (0x2cf), region = 169 }
 0x2bf   : >> { %v2567_v21 = vrot.slane %v2559_v57, 4 }
 0x2c1   : >> { %2575 = vst [vmem:[%s6966_s26 + $0x78] sm:$0xf0] %v2567_v21 }
 0x2c2   : >> { %2579 = vst [vmem:[%s6966_s26 + $0x98] sm:$0x7] %v2567_v21 }
 0x2c3   : >> { %v6255_v20 = vmov -inf   ;;  %v6259_v4 = vmov -inf   ;;  %v6263_v8 = vmov -inf   ;;  %v6267_v53 = vmov -inf  }
 0x2c4   : >> { %v6271_v33 = vmov -inf   ;;  %v6275_v50 = vmov -inf   ;;  %v6279_v63 = vmov -inf   ;;  %v6283_v11 = vmov -inf  }
 0x2c5 LB: >>> { %s4351_s7 = sshll.u32 %s6289_s27, 6  ;;  %s2585_s27 = sadd.s32 1, %s6289_s27   ;;  %s6289_s27 = sphi %s8476_s27, %s2585_s27   ;;  %v6285_v11 = vphi %v6283_v11, %v6284_v11   ;;  %v6281_v63 = vphi %v6279_v63, %v6280_v63   ;;  %v6277_v50 = vphi %v6275_v50, %v6276_v50   ;;  %v6273_v33 = vphi %v6271_v33, %v6272_v33   ;;  %v6269_v53 = vphi %v6267_v53, %v6268_v53   ;;  %v6265_v8 = vphi %v6263_v8, %v6264_v8   ;;  %v6261_v4 = vphi %v6259_v4, %v6260_v4   ;;  %v6257_v20 = vphi %v6255_v20, %v6256_v20  }
 0x2c6   : >>> { %s2598_s2 = scalar_lea.vmem [#allocation8], %s4351_s7  ;;  %p2584_p4 = scmp.ge.s32.totalorder %s2585_s27, %s8485_s29 }
 0x2c7   : >>> { %v2599_v32 = vld [vmem:[%s2598_s2] sm:$0xff]  ;;  %v2600_v12 = vld [vmem:[%s2598_s2 + $0x8] sm:$0xff]  ;;  %v2601_v56 = vld [vmem:[%s2598_s2 + $0x10] sm:$0xff] }
 0x2c8   : >>> { %v2602_v51 = vld [vmem:[%s2598_s2 + $0x18] sm:$0xff]  ;;  %v2603_v38 = vld [vmem:[%s2598_s2 + $0x20] sm:$0xff]  ;;  %v2604_v47 = vld [vmem:[%s2598_s2 + $0x28] sm:$0xff]  ;;  %v2607_v9 = vmax.f32 %v6285_v11, %v2599_v32   ;;  %v2608_v31 = vmax.f32 %v6281_v63, %v2600_v12   ;;  %v2609_v42 = vmax.f32 %v6277_v50, %v2601_v56   ;;  %2587 = sbr.rel (!%p2584_p4) target bundleno = 709 (0x2c5), region = 175 }
 0x2c9   : >>> { %v2605_v28 = vld [vmem:[%s2598_s2 + $0x30] sm:$0xff]  ;;  %v2606_v55 = vld [vmem:[%s2598_s2 + $0x38] sm:$0xff]  ;;  %v2610_v23 = vmax.f32 %v6273_v33, %v2602_v51   ;;  %v2611_v15 = vmax.f32 %v6269_v53, %v2603_v38   ;;  %v2612_v19 = vmax.f32 %v6265_v8, %v2604_v47  }
 0x2ca   : >>> { %v2613_v6 = vmax.f32 %v6261_v4, %v2605_v28   ;;  %v2614_v43 = vmax.f32 %v6257_v20, %v2606_v55   ;;  %v6276_v50 = vmov %v2609_v42   ;;  %v6280_v63 = vmov %v2608_v31  }
 0x2cb   : >>> { %v6264_v8 = vmov %v2612_v19   ;;  %v6268_v53 = vmov %v2611_v15   ;;  %v6272_v33 = vmov %v2610_v23   ;;  %v6284_v11 = vmov %v2607_v9  }
 0x2cc   : >>> { %v6256_v20 = vmov %v2614_v43   ;;  %v6260_v4 = vmov %v2613_v6   ;;  %v10241_v62 = vmov (%p2584_p4), %v2614_v43  ;;  %v10242_v29 = vmov (%p2584_p4), %v2613_v6 }
 0x2cd   : >> { %v10243_v7 = vmov %v2612_v19  ;;  %v10244_v59 = vmov %v2611_v15  ;;  %v10245_v48 = vmov %v2610_v23  ;;  %v10246_v5 = vmov %v2609_v42 }
 0x2ce   : >> { %v10247_v61 = vmov %v2608_v31  ;;  %v10248_v40 = vmov %v2607_v9 }
 0x2cf PF: >> { %s2615_s8 = sld [smem:[#allocation6 + %s6472_s22]]  ;;  %v10271_v9 = vmov 0  ;;  %v10275_v28 = vmov 0  ;;  %v6321_v40 = vphi %v8772_v40, %v10248_v40   ;;  %v6317_v61 = vphi %v8770_v61, %v10247_v61   ;;  %v6313_v5 = vphi %v8768_v5, %v10246_v5   ;;  %v6309_v48 = vphi %v8766_v48, %v10245_v48   ;;  %v6305_v59 = vphi %v8764_v59, %v10244_v59   ;;  %v6301_v7 = vphi %v8762_v7, %v10243_v7   ;;  %v6297_v29 = vphi %v8760_v29, %v10242_v29   ;;  %v6293_v62 = vphi %v8758_v62, %v10241_v62  }
 0x2d0   : >> { %s2616_s3 = sld [smem:[#allocation7 + %s6472_s22]] }
 0x2d1   : >> { %s2673_s11 = sld [smem:[#allocation6 + %s6547_s28]] }
 0x2d2   : >> { %s2674_s12 = sld [smem:[#allocation7 + %s6547_s28]] }
 0x2d3   : >> { %s2731_s13 = sld [smem:[#allocation6 + %s6551_s30]] }
 0x2d4   : >> { %s8831_s15 = sld [smem:[#allocation7 + %s6551_s30]] }
 0x2d5   : >> { %v2617_v58 = vstv %s2615_s8  ;;  %s8834_s18 = sld [smem:[#allocation6 + %s6642_s9]] }
 0x2d6   : >> { %vm2618_vm15 = vcmp.ge.s32.totalorder %v6454_v1, %v2617_v58  ;;  %vm2619_vm11 = vcmp.ge.s32.totalorder %v6458_v2, %v2617_v58  ;;  %v2620_v41 = vstv %s2616_s3  ;;  %s8839_s21 = sld [smem:[#allocation7 + %s6642_s9]] }
 0x2d7   : >> { %vm2621_vm8 = vcmp.lt.s32.totalorder %v6454_v1, %v2620_v41  ;;  %vm2622_vm5 = vcmp.lt.s32.totalorder %v6458_v2, %v2620_v41  ;;  %v2675_v17 = vstv %s2673_s11  ;;  %s8844_s23 = sld [smem:[#allocation6 + %s6645_s10]] }
 0x2d8   : >> { %vm8846_vm12 = vmand %vm2618_vm15, %vm2621_vm8  ;;  %vm2676_vm3 = vcmp.ge.s32.totalorder %v6454_v1, %v2675_v17  ;;  %vm8852_vm0 = vcmp.ge.s32.totalorder %v6458_v2, %v2675_v17  ;;  %v2678_v13 = vstv %s2674_s12  ;;  %s8857_s24 = sld [smem:[#allocation7 + %s6645_s10]] }
 0x2d9   : >> { %vm8859_vm6 = vmand %vm2619_vm11, %vm2622_vm5  ;;  %v2629_v14 = vsel %vm8846_vm12, %v6321_v40, -inf  ;;  %vm2679_vm4 = vcmp.lt.s32.totalorder %v6454_v1, %v2678_v13  ;;  %vm2680_vm10 = vcmp.lt.s32.totalorder %v6458_v2, %v2678_v13  ;;  %v2733_v52 = vstv %s2731_s13  ;;  %s8883_s25 = sld [smem:[#allocation6 + %s6760_s16]] }
 0x2da   : >> { %v2633_v34 = vsel %vm8859_vm6, %v6305_v59, -inf  ;;  %vm8871_vm2 = vmand %vm2676_vm3, %vm2679_vm4  ;;  %vm2734_vm1 = vcmp.ge.s32.totalorder %v6454_v1, %v2733_v52  ;;  %vm8877_vm7 = vcmp.ge.s32.totalorder %v6458_v2, %v2733_v52  ;;  %v2736_v27 = vstv %s8831_s15  ;;  %s8906_s27 = sld [smem:[#allocation7 + %s6760_s16]] }
 0x2db   : >> { %v2637_v22 = vmax.f32 %v2629_v14, %v2633_v34  ;;  %vm8887_vm14 = vmand %vm8852_vm0, %vm2680_vm10  ;;  %v2687_v37 = vsel %vm8871_vm2, %v6321_v40, -inf  ;;  %vm2737_vm9 = vcmp.lt.s32.totalorder %v6454_v1, %v2736_v27  ;;  %vm2738_vm13 = vcmp.lt.s32.totalorder %v6458_v2, %v2736_v27  ;;  %s8922_s29 = sld [smem:[#allocation4 + %s6771_s17]]  }
 0x2dc   : >> { %v2691_v30 = vsel %vm8887_vm14, %v6305_v59, -inf  ;;  %vm8899_vm15 = vmand %vm2734_vm1, %vm2737_vm9  ;;  %v2791_v16 = vstv %s8834_s18  ;;  %v2794_v25 = vstv %s8839_s21  ;;  %v2630_v35 = vsel %vm8846_vm12, %v6317_v61, -inf  ;;  %s8931_s6 = sld [smem:[#allocation5 + %s6771_s17]] }
 0x2dd   : >> { %v2638_v3 = vrot.slane %v2637_v22, 4  ;;  %v2695_v49 = vmax.f32 %v2687_v37, %v2691_v30  ;;  %vm8913_vm11 = vmand %vm8877_vm7, %vm2738_vm13  ;;  %v2745_v39 = vsel %vm8899_vm15, %v6321_v40, -inf  ;;  %vm2792_vm8 = vcmp.ge.s32.totalorder %v6454_v1, %v2791_v16  ;;  %s8939_s0 = sld [smem:[#allocation6 + %s6771_s17]] }
 0x2de   : >> { %v2749_v60 = vsel %vm8913_vm11, %v6305_v59, -inf  ;;  %vm2793_vm5 = vcmp.ge.s32.totalorder %v6458_v2, %v2791_v16  ;;  %vm2795_vm3 = vcmp.lt.s32.totalorder %v6454_v1, %v2794_v25  ;;  %vm2796_vm0 = vcmp.lt.s32.totalorder %v6458_v2, %v2794_v25  ;;  %s8971_s7 = sld [smem:[#allocation7 + %s6771_s17]] }
 0x2df   : >> { %v2639_v26 = vmax.f32 %v2637_v22, %v2638_v3  ;;  %v2696_v45 = vrot.slane %v2695_v49, 4  ;;  %v2753_v57 = vmax.f32 %v2745_v39, %v2749_v60  ;;  %vm8933_vm4 = vmand %vm2792_vm8, %vm2795_vm3  ;;  %v2849_v20 = vstv %s8844_s23 }
 0x2e0   : >> { %vm8941_vm10 = vmand %vm2793_vm5, %vm2796_vm0  ;;  %v2803_v8 = vsel %vm8933_vm4, %v6321_v40, -inf  ;;  %vm2850_vm1 = vcmp.ge.s32.totalorder %v6454_v1, %v2849_v20  ;;  %vm8950_vm7 = vcmp.ge.s32.totalorder %v6458_v2, %v2849_v20  ;;  %v2852_v33 = vstv %s8857_s24 }
 0x2e1   : >> { %v2640_v50 = vrot.slane %v2639_v26, 2  ;;  %v2697_v63 = vmax.f32 %v2695_v49, %v2696_v45  ;;  %v2754_v11 = vrot.slane %v2753_v57, 4  ;;  %v2807_v32 = vsel %vm8941_vm10, %v6305_v59, -inf }
 0x2e2   : >> { %v2811_v12 = vmax.f32 %v2803_v8, %v2807_v32  ;;  %vm2853_vm9 = vcmp.lt.s32.totalorder %v6454_v1, %v2852_v33  ;;  %vm2854_vm13 = vcmp.lt.s32.totalorder %v6458_v2, %v2852_v33  ;;  %v2907_v56 = vstv %s8883_s25  ;;  %p4263_p5 = scmp.ge.s32.totalorder %s8922_s29, %s8931_s6 }
 0x2e3   : >> { %v2641_v51 = vmax.f32 %v2639_v26, %v2640_v50  ;;  %v2698_v38 = vrot.slane %v2697_v63, 2  ;;  %v2755_v47 = vmax.f32 %v2753_v57, %v2754_v11  ;;  %vm8961_vm8 = vmand %vm2850_vm1, %vm2853_vm9  ;;  %vm8966_vm5 = vcmp.ge.s32.totalorder %v6454_v1, %v2907_v56 }
 0x2e4   : >> { %v10272_v9 = vsel %vm8961_vm8, 4294967295, %v10271_v9  ;;  %v2812_v42 = vrot.slane %v2811_v12, 4  ;;  %vm8975_vm3 = vmand %vm8950_vm7, %vm2854_vm13  ;;  %v2861_v55 = vsel %vm8961_vm8, %v6321_v40, -inf  ;;  %vm8983_vm0 = vcmp.ge.s32.totalorder %v6458_v2, %v2907_v56 }
 0x2e5   : >> { %v10276_v28 = vsel %vm8975_vm3, 4294967295, %v10275_v28  ;;  %v2910_v15 = vstv %s8906_s27  ;;  %v2642_v19 = vrot.slane %v2641_v51, 1  ;;  %v2699_v6 = vmax.f32 %v2697_v63, %v2698_v38 }
 0x2e6   : >> { %v2756_v43 = vrot.slane %v2755_v47, 2  ;;  %v2865_v58 = vsel %vm8975_vm3, %v6305_v59, -inf  ;;  %v2813_v41 = vmax.f32 %v2811_v12, %v2812_v42  ;;  %vm2911_vm1 = vcmp.lt.s32.totalorder %v6454_v1, %v2910_v15 }
 0x2e7   : >> { %v2869_v17 = vmax.f32 %v2861_v55, %v2865_v58  ;;  %vm2912_vm7 = vcmp.lt.s32.totalorder %v6458_v2, %v2910_v15  ;;  %v2643_v36 = vmax.f32 %v2641_v51, %v2642_v19  ;;  %v2700_v13 = vrot.slane %v2699_v6, 1  ;;  %vm8995_vm9 = vmand %vm8966_vm5, %vm2911_vm1 }
 0x2e8   : >> { %v2757_v14 = vmax.f32 %v2755_v47, %v2756_v43  ;;  %v10279_v52 = vmov 0  ;;  %v2965_v34 = vstv %s8939_s0  ;;  %v2814_v10 = vrot.slane %v2813_v41, 2  ;;  %vm9002_vm13 = vmand %vm8983_vm0, %vm2912_vm7 }
 0x2e9   : >> { %v10280_v52 = vsel %vm8995_vm9, 4294967295, %v10279_v52  ;;  %v2870_v27 = vrot.slane %v2869_v17, 4  ;;  %v10281_v22 = vmov 0  ;;  %v2919_v37 = vsel %vm8995_vm9, %v6321_v40, -inf }
 0x2ea   : >> { %v10282_v22 = vsel %vm9002_vm13, 4294967295, %v10281_v22  ;;  %vm9010_vm3 = vcmp.ge.s32.totalorder %v6454_v1, %v2965_v34  ;;  %vm2665_vm5 = vcmp.eq.f32.partialorder %v2643_v36, -inf  ;;  %v2701_v16 = vmax.f32 %v2699_v6, %v2700_v13 }
 0x2eb   : >> { %v2758_v25 = vrot.slane %v2757_v14, 1  ;;  %v2923_v3 = vsel %vm9002_vm13, %v6305_v59, -inf  ;;  %v2669_v49 = vsel %vm2665_vm5, 0.0, %v2643_v36  ;;  %v2815_v39 = vmax.f32 %v2813_v41, %v2814_v10 }
 0x2ec   : >> { %v2871_v60 = vmax.f32 %v2869_v17, %v2870_v27  ;;  %v2927_v26 = vmax.f32 %v2919_v37, %v2923_v3  ;;  %vm2723_vm0 = vcmp.eq.f32.partialorder %v2701_v16, -inf  ;;  %vm9018_vm1 = vcmp.ge.s32.totalorder %v6458_v2, %v2965_v34 }
 0x2ed   : >> { %v2759_v45 = vmax.f32 %v2757_v14, %v2758_v25  ;;  %v2968_v20 = vstv %s8971_s7  ;;  %v2727_v8 = vsel %vm2723_vm0, 0.0, %v2701_v16  ;;  %v2816_v53 = vrot.slane %v2815_v39, 1 }
 0x2ee   : >> { %v2872_v33 = vrot.slane %v2871_v60, 2  ;;  %v2928_v50 = vrot.slane %v2927_v26, 4  ;;  %vm2969_vm9 = vcmp.lt.s32.totalorder %v6454_v1, %v2968_v20  ;;  %vm2970_vm5 = vcmp.lt.s32.totalorder %v6458_v2, %v2968_v20 }
 0x2ef   : >> { %vm2781_vm7 = vcmp.eq.f32.partialorder %v2759_v45, -inf  ;;  %vm10287_vm13 = vcmask 1040384   ;;  %v2817_v32 = vmax.f32 %v2815_v39, %v2816_v53  ;;  %vm9028_vm8 = vmand %vm9010_vm3, %vm2969_vm9  ;;  %v2634_v42 = vsel %vm8859_vm6, %v6301_v7, -inf }
 0x2f0   : >> { %v3021_v63 = vsel %vm10287_vm13, %v2669_v49, %v2727_v8  ;;  %v2785_v11 = vsel %vm2781_vm7, 0.0, %v2759_v45  ;;  %v2873_v12 = vmax.f32 %v2871_v60, %v2872_v33  ;;  %v2929_v56 = vmax.f32 %v2927_v26, %v2928_v50  ;;  %vm9034_vm0 = vmand %vm9018_vm1, %vm2970_vm5 }
 0x2f1   : >> { %v2977_v47 = vsel %vm9028_vm8, %v6321_v40, -inf  ;;  %vm10292_vm13 = vcmask 1041408   ;;  %v2688_v55 = vsel %vm8871_vm2, %v6317_v61, -inf  ;;  %vm2839_vm3 = vcmp.eq.f32.partialorder %v2817_v32, -inf }
 0x2f2   : >> { %v3025_v31 = vsel %vm10292_vm13, %v3021_v63, %v2785_v11  ;;  %v2874_v23 = vrot.slane %v2873_v12, 1  ;;  %v2930_v15 = vrot.slane %v2929_v56, 2  ;;  %v2981_v19 = vsel %vm9034_vm0, %v6305_v59, -inf }
 0x2f3   : >> { %v2843_v6 = vsel %vm2839_vm3, 0.0, %v2817_v32  ;;  %v2985_v43 = vmax.f32 %v2977_v47, %v2981_v19  ;;  %v2644_v40 = vmax.f32 %v2630_v35, %v2634_v42  ;;  %v2692_v58 = vsel %vm8887_vm14, %v6301_v7, -inf }
 0x2f4   : >> { %v2875_v41 = vmax.f32 %v2873_v12, %v2874_v23  ;;  %v2931_v17 = vmax.f32 %v2929_v56, %v2930_v15  ;;  %vm10293_vm9 = vcmask 1042432   ;;  %v2702_v13 = vmax.f32 %v2688_v55, %v2692_v58 }
 0x2f5   : >> { %v3029_v36 = vsel %vm10293_vm9, %v3025_v31, %v2843_v6  ;;  %v2986_v14 = vrot.slane %v2985_v43, 4  ;;  %v2645_v34 = vrot.slane %v2644_v40, 4  ;;  %v2746_v59 = vsel %vm8899_vm15, %v6317_v61, -inf }
 0x2f6   : >> { %v2750_v10 = vsel %vm8913_vm11, %v6301_v7, -inf  ;;  %vm2897_vm1 = vcmp.eq.f32.partialorder %v2875_v41, -inf  ;;  %v2932_v35 = vrot.slane %v2931_v17, 1  ;;  %v2703_v27 = vrot.slane %v2702_v13, 4 }
 0x2f7   : >> { %v2760_v37 = vmax.f32 %v2746_v59, %v2750_v10  ;;  %v2901_v30 = vsel %vm2897_vm1, 0.0, %v2875_v41  ;;  %v2987_v16 = vmax.f32 %v2985_v43, %v2986_v14  ;;  %v2646_v25 = vmax.f32 %v2644_v40, %v2645_v34 }
 0x2f8   : >> { %v2804_v3 = vsel %vm8933_vm4, %v6317_v61, -inf  ;;  %v2933_v49 = vmax.f32 %v2931_v17, %v2932_v35  ;;  %vm10294_vm7 = vcmask 1043456   ;;  %v2704_v60 = vmax.f32 %v2702_v13, %v2703_v27 }
 0x2f9   : >> { %v3033_v39 = vsel %vm10294_vm7, %v3029_v36, %v2901_v30  ;;  %v2761_v26 = vrot.slane %v2760_v37, 4  ;;  %v2988_v45 = vrot.slane %v2987_v16, 2  ;;  %v2647_v57 = vrot.slane %v2646_v25, 2 }
 0x2fa   : >> { %v2808_v20 = vsel %vm8941_vm10, %v6301_v7, -inf  ;;  %vm10295_vm5 = vnez %v10272_v9  ;;  %vm2955_vm13 = vcmp.eq.f32.partialorder %v2933_v49, -inf  ;;  %v2705_v53 = vrot.slane %v2704_v60, 2 }
 0x2fb   : >> { %v2862_v8 = vsel %vm10295_vm5, %v6317_v61, -inf  ;;  %v2762_v33 = vmax.f32 %v2760_v37, %v2761_v26  ;;  %v2818_v50 = vmax.f32 %v2804_v3, %v2808_v20  ;;  %v2959_v63 = vsel %vm2955_vm13, 0.0, %v2933_v49 }
 0x2fc   : >> { %v2989_v11 = vmax.f32 %v2987_v16, %v2988_v45  ;;  %v2648_v32 = vmax.f32 %v2646_v25, %v2647_v57  ;;  %vm10296_vm3 = vnez %v10276_v28  ;;  %vm10297_vm9 = vcmask 1044480  }
 0x2fd   : >> { %v2866_v12 = vsel %vm10296_vm3, %v6301_v7, -inf  ;;  %v3037_v56 = vsel %vm10297_vm9, %v3033_v39, %v2959_v63  ;;  %v2706_v47 = vmax.f32 %v2704_v60, %v2705_v53  ;;  %v2763_v31 = vrot.slane %v2762_v33, 2 }
 0x2fe   : >> { %v2819_v42 = vrot.slane %v2818_v50, 4  ;;  %v2990_v55 = vrot.slane %v2989_v11, 1  ;;  %v2649_v23 = vrot.slane %v2648_v32, 1  ;;  %v2876_v15 = vmax.f32 %v2862_v8, %v2866_v12 }
 0x2ff   : >> { %vm10298_vm1 = vnez %v10280_v52  ;;  %v2707_v6 = vrot.slane %v2706_v47, 1  ;;  %v2764_v43 = vmax.f32 %v2762_v33, %v2763_v31  ;;  %vm10299_vm7 = vnez %v10282_v22 }
 0x300   : >> { %v2920_v19 = vsel %vm10298_vm1, %v6317_v61, -inf  ;;  %v2820_v40 = vmax.f32 %v2818_v50, %v2819_v42  ;;  %v2924_v58 = vsel %vm10299_vm7, %v6301_v7, -inf  ;;  %v2991_v41 = vmax.f32 %v2989_v11, %v2990_v55 }
 0x301   : >> { %v2650_v17 = vmax.f32 %v2648_v32, %v2649_v23  ;;  %v2877_v36 = vrot.slane %v2876_v15, 4  ;;  %v2934_v13 = vmax.f32 %v2920_v19, %v2924_v58  ;;  %v2708_v14 = vmax.f32 %v2706_v47, %v2707_v6 }
 0x302   : >> { %v2765_v34 = vrot.slane %v2764_v43, 1  ;;  %v2821_v59 = vrot.slane %v2820_v40, 2  ;;  %v2978_v10 = vsel %vm9028_vm8, %v6317_v61, -inf  ;;  %vm3013_vm13 = vcmp.eq.f32.partialorder %v2991_v41, -inf }
 0x303   : >> { %vm2666_vm9 = vcmp.eq.f32.partialorder %v2650_v17, -inf  ;;  %v2878_v35 = vmax.f32 %v2876_v15, %v2877_v36  ;;  %v2935_v27 = vrot.slane %v2934_v13, 4  ;;  %v3017_v37 = vsel %vm3013_vm13, 0.0, %v2991_v41 }
 0x304   : >> { %v2670_v30 = vsel %vm2666_vm9, 0.0, %v2650_v17  ;;  %vm2724_vm1 = vcmp.eq.f32.partialorder %v2708_v14, -inf  ;;  %v2766_v16 = vmax.f32 %v2764_v43, %v2765_v34  ;;  %vm10300_vm7 = vcmask 1045504  }
 0x305   : >> { %v3041_v25 = vsel %vm10300_vm7, %v3037_v56, %v3017_v37  ;;  %v2728_v3 = vsel %vm2724_vm1, 0.0, %v2708_v14  ;;  %v2822_v49 = vmax.f32 %v2820_v40, %v2821_v59  ;;  %v2879_v39 = vrot.slane %v2878_v35, 2 }
 0x306   : >> { %v3049_v60 = vrot.slane %v3041_v25, 5  ;;  %vm2782_vm3 = vcmp.eq.f32.partialorder %v2766_v16, -inf  ;;  %v2936_v26 = vmax.f32 %v2934_v13, %v2935_v27  ;;  %v2982_v61 = vsel %vm9034_vm0, %v6301_v7, -inf }
 0x307   : >> { %v2786_v45 = vsel %vm2782_vm3, 0.0, %v2766_v16  ;;  %v2823_v57 = vrot.slane %v2822_v49, 1  ;;  %v2880_v20 = vmax.f32 %v2878_v35, %v2879_v39  ;;  %v2992_v8 = vmax.f32 %v2978_v10, %v2982_v61 }
 0x308   : >> { %3057 = vst [vmem:[%s6966_s26 + $0x80] sm:$0xf8] %v3049_v60  ;;  %v2937_v53 = vrot.slane %v2936_v26, 2  ;;  %vm10301_vm13 = vcmask 1040384   ;;  %v2631_v50 = vsel %vm8846_vm12, %v6313_v5, -inf  ;;  %v2635_v63 = vsel %vm8859_vm6, %v6297_v29, -inf }
 0x309   : >> { %v3022_v33 = vsel %vm10301_vm13, %v2670_v30, %v2728_v3  ;;  %3061 = vst [vmem:[%s6966_s26 + $0xa0] sm:$0x3] %v3049_v60  ;;  %v2824_v11 = vmax.f32 %v2822_v49, %v2823_v57  ;;  %v2881_v32 = vrot.slane %v2880_v20, 1  ;;  %v2993_v7 = vrot.slane %v2992_v8, 4 }
 0x30a   : >> { %vm10302_vm3 = vcmask 1041408   ;;  %v2938_v56 = vmax.f32 %v2936_v26, %v2937_v53  ;;  %v2651_v47 = vmax.f32 %v2631_v50, %v2635_v63  ;;  %v2689_v31 = vsel %vm8871_vm2, %v6313_v5, -inf }
 0x30b   : >> { %v3026_v12 = vsel %vm10302_vm3, %v3022_v33, %v2786_v45  ;;  %v2693_v42 = vsel %vm8887_vm14, %v6297_v29, -inf  ;;  %vm2840_vm1 = vcmp.eq.f32.partialorder %v2824_v11, -inf  ;;  %v2882_v55 = vmax.f32 %v2880_v20, %v2881_v32 }
 0x30c   : >> { %v2994_v23 = vmax.f32 %v2992_v8, %v2993_v7  ;;  %v2709_v15 = vmax.f32 %v2689_v31, %v2693_v42  ;;  %v2844_v19 = vsel %vm2840_vm1, 0.0, %v2824_v11  ;;  %v2939_v6 = vrot.slane %v2938_v56, 1 }
 0x30d   : >> { %v2652_v43 = vrot.slane %v2651_v47, 4  ;;  %v2747_v40 = vsel %vm8899_vm15, %v6313_v5, -inf  ;;  %vm2898_vm7 = vcmp.eq.f32.partialorder %v2882_v55, -inf  ;;  %vm10303_vm9 = vcmask 1042432  }
 0x30e   : >> { %v2995_v58 = vrot.slane %v2994_v23, 2  ;;  %v3030_v41 = vsel %vm10303_vm9, %v3026_v12, %v2844_v19  ;;  %v2710_v17 = vrot.slane %v2709_v15, 4  ;;  %v2902_v36 = vsel %vm2898_vm7, 0.0, %v2882_v55 }
 0x30f   : >> { %v2940_v13 = vmax.f32 %v2938_v56, %v2939_v6  ;;  %v2653_v14 = vmax.f32 %v2651_v47, %v2652_v43  ;;  %v2751_v34 = vsel %vm8913_vm11, %v6297_v29, -inf  ;;  %vm10304_vm13 = vcmask 1043456  }
 0x310   : >> { %v2996_v59 = vmax.f32 %v2994_v23, %v2995_v58  ;;  %v3034_v10 = vsel %vm10304_vm13, %v3030_v41, %v2902_v36  ;;  %v2711_v35 = vmax.f32 %v2709_v15, %v2710_v17  ;;  %v2767_v27 = vmax.f32 %v2747_v40, %v2751_v34 }
 0x311   : >> { %vm2956_vm3 = vcmp.eq.f32.partialorder %v2940_v13, -inf  ;;  %v2654_v37 = vrot.slane %v2653_v14, 2  ;;  %v2805_v30 = vsel %vm8933_vm4, %v6313_v5, -inf  ;;  %v2809_v16 = vsel %vm8941_vm10, %v6297_v29, -inf }
 0x312   : >> { %v2960_v25 = vsel %vm2956_vm3, 0.0, %v2940_v13  ;;  %v2997_v3 = vrot.slane %v2996_v59, 1  ;;  %v2712_v49 = vrot.slane %v2711_v35, 2  ;;  %v2768_v39 = vrot.slane %v2767_v27, 4 }
 0x313   : >> { %vm10305_vm1 = vcmask 1044480   ;;  %v2655_v26 = vmax.f32 %v2653_v14, %v2654_v37  ;;  %v2825_v61 = vmax.f32 %v2805_v30, %v2809_v16  ;;  %v2863_v45 = vsel %vm10295_vm5, %v6313_v5, -inf }
 0x314   : >> { %v3038_v60 = vsel %vm10305_vm1, %v3034_v10, %v2960_v25  ;;  %v2998_v57 = vmax.f32 %v2996_v59, %v2997_v3  ;;  %v2713_v20 = vmax.f32 %v2711_v35, %v2712_v49  ;;  %v2769_v8 = vmax.f32 %v2767_v27, %v2768_v39 }
 0x315   : >> { %vm10306_vm7 = vnez %v10276_v28  ;;  %v2656_v33 = vrot.slane %v2655_v26, 1  ;;  %v2826_v50 = vrot.slane %v2825_v61, 4  ;;  %vm10307_vm9 = vnez %v10280_v52 }
 0x316   : >> { %v2867_v53 = vsel %vm10306_vm7, %v6297_v29, -inf  ;;  %v2921_v11 = vsel %vm10307_vm9, %v6313_v5, -inf  ;;  %vm3014_vm13 = vcmp.eq.f32.partialorder %v2998_v57, -inf  ;;  %v2714_v32 = vrot.slane %v2713_v20, 1 }
 0x317   : >> { %v2883_v63 = vmax.f32 %v2863_v45, %v2867_v53  ;;  %v2770_v7 = vrot.slane %v2769_v8, 2  ;;  %vm10308_vm3 = vnez %v10282_v22  ;;  %v3018_v56 = vsel %vm3014_vm13, 0.0, %v2998_v57 }
 0x318   : >> { %v2925_v12 = vsel %vm10308_vm3, %v6297_v29, -inf  ;;  %v2657_v47 = vmax.f32 %v2655_v26, %v2656_v33  ;;  %v2827_v31 = vmax.f32 %v2825_v61, %v2826_v50  ;;  %vm10309_vm1 = vcmask 1045504  }
 0x319   : >> { %v2884_v42 = vrot.slane %v2883_v63, 4  ;;  %v3042_v55 = vsel %vm10309_vm1, %v3038_v60, %v3018_v56  ;;  %v2715_v23 = vmax.f32 %v2713_v20, %v2714_v32  ;;  %v2771_v15 = vmax.f32 %v2769_v8, %v2770_v7 }
 0x31a   : >> { %v2941_v19 = vmax.f32 %v2921_v11, %v2925_v12  ;;  %v3050_v6 = vrot.slane %v3042_v55, 5  ;;  %vm2667_vm9 = vcmp.eq.f32.partialorder %v2657_v47, -inf  ;;  %v2828_v43 = vrot.slane %v2827_v31, 2 }
 0x31b   : >> { %v2885_v40 = vmax.f32 %v2883_v63, %v2884_v42  ;;  %v2671_v58 = vsel %vm2667_vm9, 0.0, %v2657_v47  ;;  %vm2725_vm7 = vcmp.eq.f32.partialorder %v2715_v23, -inf  ;;  %v2772_v41 = vrot.slane %v2771_v15, 1 }
 0x31c   : >> { %v2942_v17 = vrot.slane %v2941_v19, 4  ;;  %3058 = vst [vmem:[%s6966_s26 + $0x88] sm:$0xf8] %v3050_v6  ;;  %v2729_v36 = vsel %vm2725_vm7, 0.0, %v2715_v23  ;;  %v2829_v13 = vmax.f32 %v2827_v31, %v2828_v43  ;;  %v2979_v34 = vsel %vm9028_vm8, %v6313_v5, -inf }
 0x31d   : >> { %v2886_v14 = vrot.slane %v2885_v40, 2  ;;  %3062 = vst [vmem:[%s6966_s26 + $0xa8] sm:$0x3] %v3050_v6  ;;  %v2773_v59 = vmax.f32 %v2771_v15, %v2772_v41  ;;  %v2983_v35 = vsel %vm9034_vm0, %v6297_v29, -inf  ;;  %vm10310_vm13 = vcmask 1040384  }
 0x31e   : >> { %v2943_v10 = vmax.f32 %v2941_v19, %v2942_v17  ;;  %v3023_v27 = vsel %vm10310_vm13, %v2671_v58, %v2729_v36  ;;  %v2830_v37 = vrot.slane %v2829_v13, 1  ;;  %v2999_v16 = vmax.f32 %v2979_v34, %v2983_v35 }
 0x31f   : >> { %v2887_v30 = vmax.f32 %v2885_v40, %v2886_v14  ;;  %v2632_v25 = vsel %vm8846_vm12, %v6309_v48, -inf  ;;  %vm2783_vm7 = vcmp.eq.f32.partialorder %v2773_v59, -inf  ;;  %v2636_v5 = vsel %vm8859_vm6, %v6293_v62, -inf }
 0x320   : >> { %v2944_v3 = vrot.slane %v2943_v10, 2  ;;  %v2690_v49 = vsel %vm8871_vm2, %v6309_v48, -inf  ;;  %v2787_v29 = vsel %vm2783_vm7, 0.0, %v2773_v59  ;;  %v2831_v39 = vmax.f32 %v2829_v13, %v2830_v37 }
 0x321   : >> { %v2888_v60 = vrot.slane %v2887_v30, 1  ;;  %v3000_v26 = vrot.slane %v2999_v16, 4  ;;  %vm10311_vm9 = vcmask 1041408   ;;  %v2658_v57 = vmax.f32 %v2632_v25, %v2636_v5 }
 0x322   : >> { %v2945_v61 = vmax.f32 %v2943_v10, %v2944_v3  ;;  %v3027_v45 = vsel %vm10311_vm9, %v3023_v27, %v2787_v29  ;;  %v2694_v24 = vsel %vm8887_vm14, %v6293_v62, -inf  ;;  %vm2841_vm12 = vcmp.eq.f32.partialorder %v2831_v39, -inf }
 0x323   : >> { %v2889_v20 = vmax.f32 %v2887_v30, %v2888_v60  ;;  %v3001_v44 = vmax.f32 %v2999_v16, %v3000_v26  ;;  %v2716_v8 = vmax.f32 %v2690_v49, %v2694_v24  ;;  %v2845_v53 = vsel %vm2841_vm12, 0.0, %v2831_v39 }
 0x324   : >> { %v2946_v33 = vrot.slane %v2945_v61, 1  ;;  %v2659_v46 = vrot.slane %v2658_v57, 4  ;;  %v2748_v50 = vsel %vm8899_vm15, %v6309_v48, -inf  ;;  %vm10312_vm2 = vcmask 1042432  }
 0x325   : >> { %vm2899_vm6 = vcmp.eq.f32.partialorder %v2889_v20, -inf  ;;  %v3002_v63 = vrot.slane %v3001_v44, 2  ;;  %v3031_v11 = vsel %vm10312_vm2, %v3027_v45, %v2845_v53  ;;  %v2717_v32 = vrot.slane %v2716_v8, 4 }
 0x326   : >> { %v2903_v7 = vsel %vm2899_vm6, 0.0, %v2889_v20  ;;  %v2947_v12 = vmax.f32 %v2945_v61, %v2946_v33  ;;  %v2660_v18 = vmax.f32 %v2658_v57, %v2659_v46  ;;  %v2752_v56 = vsel %vm8913_vm11, %v6293_v62, -inf  ;;  %vm10320_vm6 = vmmov %vm10312_vm2 }
 0x327   : >> { %v3003_v47 = vmax.f32 %v3001_v44, %v3002_v63  ;;  %vm10313_vm14 = vcmask 1043456   ;;  %v2718_v42 = vmax.f32 %v2716_v8, %v2717_v32  ;;  %v2774_v55 = vmax.f32 %v2748_v50, %v2752_v56 }
 0x328   : >> { %v3035_v31 = vsel %vm10313_vm14, %v3031_v11, %v2903_v7  ;;  %vm2957_vm1 = vcmp.eq.f32.partialorder %v2947_v12, -inf  ;;  %v2661_v54 = vrot.slane %v2660_v18, 2  ;;  %v2806_v23 = vsel %vm8933_vm4, %v6309_v48, -inf }
 0x329   : >> { %v2810_v15 = vsel %vm8941_vm10, %v6293_v62, -inf  ;;  %v2961_v19 = vsel %vm2957_vm1, 0.0, %v2947_v12  ;;  %v3004_v6 = vrot.slane %v3003_v47, 1  ;;  %v2719_v43 = vrot.slane %v2718_v42, 2 }
 0x32a   : >> { %v2775_v0 = vrot.slane %v2774_v55, 4  ;;  %vm10314_vm15 = vcmask 1044480   ;;  %v2662_v58 = vmax.f32 %v2660_v18, %v2661_v54  ;;  %v2832_v41 = vmax.f32 %v2806_v23, %v2810_v15 }
 0x32b   : >> { %v3039_v40 = vsel %vm10314_vm15, %v3035_v31, %v2961_v19  ;;  %v2864_v17 = vsel %vm10295_vm5, %v6309_v48, -inf  ;;  %v3005_v36 = vmax.f32 %v3003_v47, %v3004_v6  ;;  %v2720_v13 = vmax.f32 %v2718_v42, %v2719_v43  ;;  %vm10321_vm1 = vmmov %vm10314_vm15 }
 0x32c   : >> { %v2776_v21 = vmax.f32 %v2774_v55, %v2775_v0  ;;  %vm10315_vm11 = vnez %v10276_v28  ;;  %v2663_v14 = vrot.slane %v2662_v58, 1  ;;  %v2833_v34 = vrot.slane %v2832_v41, 4 }
 0x32d   : >> { %v2868_v4 = vsel %vm10315_vm11, %v6293_v62, -inf  ;;  %vm10316_vm4 = vnez %v10280_v52  ;;  %vm3015_vm10 = vcmp.eq.f32.partialorder %v3005_v36, -inf  ;;  %v2721_v35 = vrot.slane %v2720_v13, 1 }
 0x32e   : >> { %v2890_v59 = vmax.f32 %v2864_v17, %v2868_v4  ;;  %v2922_v10 = vsel %vm10316_vm4, %v6309_v48, -inf  ;;  %v2777_v27 = vrot.slane %v2776_v21, 2  ;;  %v2926_v9 = vsel %vm10308_vm3, %v6293_v62, -inf }
 0x32f   : >> { %v3019_v37 = vsel %vm3015_vm10, 0.0, %v3005_v36  ;;  %v2664_v30 = vmax.f32 %v2662_v58, %v2663_v14  ;;  %v2834_v16 = vmax.f32 %v2832_v41, %v2833_v34  ;;  %vm10317_vm5 = vcmask 1045504  }
 0x330   : >> { %v2891_v28 = vrot.slane %v2890_v59, 4  ;;  %v3043_v25 = vsel %vm10317_vm5, %v3039_v40, %v3019_v37  ;;  %v2722_v3 = vmax.f32 %v2720_v13, %v2721_v35  ;;  %v2778_v5 = vmax.f32 %v2776_v21, %v2777_v27  ;;  %vm10322_vm11 = vmmov %vm10317_vm5 }
 0x331   : >> { %v2948_v49 = vmax.f32 %v2922_v10, %v2926_v9  ;;  %v3051_v52 = vrot.slane %v3043_v25, 5  ;;  %vm2668_vm13 = vcmp.eq.f32.partialorder %v2664_v30, -inf  ;;  %v2835_v29 = vrot.slane %v2834_v16, 2 }
 0x332   : >> { %v2892_v39 = vmax.f32 %v2890_v59, %v2891_v28  ;;  %v2672_v60 = vsel %vm2668_vm13, 0.0, %v2664_v30  ;;  %vm2726_vm7 = vcmp.eq.f32.partialorder %v2722_v3, -inf  ;;  %v2779_v26 = vrot.slane %v2778_v5, 1 }
 0x333   : >> { %v2949_v22 = vrot.slane %v2948_v49, 4  ;;  %3059 = vst [vmem:[%s6966_s26 + $0x90] sm:$0xf8] %v3051_v52  ;;  %v2730_v61 = vsel %vm2726_vm7, 0.0, %v2722_v3  ;;  %v2836_v45 = vmax.f32 %v2834_v16, %v2835_v29  ;;  %v2980_v24 = vsel %vm9028_vm8, %v6309_v48, -inf }
 0x334   : >> { %v2893_v57 = vrot.slane %v2892_v39, 2  ;;  %3063 = vst [vmem:[%s6966_s26 + $0xb0] sm:$0x3] %v3051_v52  ;;  %v2780_v20 = vmax.f32 %v2778_v5, %v2779_v26  ;;  %v2984_v8 = vsel %vm9034_vm0, %v6293_v62, -inf  ;;  %vm10318_vm9 = vcmask 1040384  }
 0x335   : >> { %v2950_v44 = vmax.f32 %v2948_v49, %v2949_v22  ;;  %v2837_v53 = vrot.slane %v2836_v45, 1  ;;  %v3006_v46 = vmax.f32 %v2980_v24, %v2984_v8  ;;  %v3024_v63 = vsel %vm10318_vm9, %v2672_v60, %v2730_v61 }
 0x336   : >> { %v2894_v33 = vmax.f32 %v2892_v39, %v2893_v57  ;;  %vm2784_vm3 = vcmp.eq.f32.partialorder %v2780_v20, -inf  ;;  %vm10319_vm12 = vcmask 1041408   ;;  %v9204_v41 = vmov -inf  }
 0x337   : >> { %v2951_v50 = vrot.slane %v2950_v44, 2  ;;  %v2788_v11 = vsel %vm2784_vm3, 0.0, %v2780_v20  ;;  %v2838_v32 = vmax.f32 %v2836_v45, %v2837_v53  ;;  %v3007_v12 = vrot.slane %v3006_v46, 4 }
 0x338   : >> { %v2895_v7 = vrot.slane %v2894_v33, 1  ;;  %v3028_v56 = vsel %vm10319_vm12, %v3024_v63, %v2788_v11  ;;  %v9206_v17 = vmov -inf   ;;  %v9208_v36 = vmov -inf  }
 0x339   : >> { %v2952_v51 = vmax.f32 %v2950_v44, %v2951_v50  ;;  %vm2842_vm8 = vcmp.eq.f32.partialorder %v2838_v32, -inf  ;;  %v3008_v18 = vmax.f32 %v3006_v46, %v3007_v12  ;;  %v9210_v13 = vmov -inf  }
 0x33a   : >> { %v2896_v48 = vmax.f32 %v2894_v33, %v2895_v7  ;;  %v2846_v47 = vsel %vm2842_vm8, 0.0, %v2838_v32  ;;  %v9212_v21 = vmov -inf   ;;  %v9214_v4 = vmov -inf  }
 0x33b   : >> { %v2953_v38 = vrot.slane %v2952_v51, 1  ;;  %v3009_v62 = vrot.slane %v3008_v18, 2  ;;  %v3032_v55 = vsel %vm10320_vm6, %v3028_v56, %v2846_v47  ;;  %v9216_v14 = vmov -inf  }
 0x33c   : >> { %vm2900_vm0 = vcmp.eq.f32.partialorder %v2896_v48, -inf  ;;  %v9218_v34 = vmov -inf  }
 0x33d   : >> { %v2904_v31 = vsel %vm2900_vm0, 0.0, %v2896_v48  ;;  %v2954_v42 = vmax.f32 %v2952_v51, %v2953_v38  ;;  %v3010_v54 = vmax.f32 %v3008_v18, %v3009_v62 }
 0x33e   : >> { %v3036_v19 = vsel %vm10313_vm14, %v3032_v55, %v2904_v31 }
 0x33f   : >> { %vm2958_vm2 = vcmp.eq.f32.partialorder %v2954_v42, -inf  ;;  %v3011_v15 = vrot.slane %v3010_v54, 1 }
 0x340   : >> { %v2962_v23 = vsel %vm2958_vm2, 0.0, %v2954_v42 }
 0x341   : >> { %v3012_v6 = vmax.f32 %v3010_v54, %v3011_v15  ;;  %v3040_v43 = vsel %vm10321_vm1, %v3036_v19, %v2962_v23 }
 0x343   : >> { %vm3016_vm15 = vcmp.eq.f32.partialorder %v3012_v6, -inf }
 0x344   : >> { %v3020_v0 = vsel %vm3016_vm15, 0.0, %v3012_v6 }
 0x345   : >> { %v3044_v40 = vsel %vm10322_vm11, %v3040_v43, %v3020_v0  ;;  %4272 = sbr.rel (%p4263_p5) target bundleno = 854 (0x356), region = 180 }
 0x346   : >> { %v3052_v58 = vrot.slane %v3044_v40, 5 }
 0x348   : >> { %3060 = vst [vmem:[%s6966_s26 + $0x98] sm:$0xf8] %v3052_v58 }
 0x349   : >> { %3064 = vst [vmem:[%s6966_s26 + $0xb8] sm:$0x3] %v3052_v58 }
 0x34a   : >> { %v6323_v59 = vmov -inf   ;;  %v6327_v10 = vmov -inf   ;;  %v6331_v35 = vmov -inf   ;;  %v6335_v27 = vmov -inf  }
 0x34b   : >> { %v6339_v9 = vmov -inf   ;;  %v6343_v37 = vmov -inf   ;;  %v6347_v30 = vmov -inf   ;;  %v6351_v16 = vmov -inf  }
 0x34c LB: >>> { %s4352_s2 = sshll.u32 %s6357_s29, 6  ;;  %s3070_s29 = sadd.s32 1, %s6357_s29   ;;  %s6357_s29 = sphi %s8922_s29, %s3070_s29   ;;  %v6353_v16 = vphi %v6351_v16, %v6352_v16   ;;  %v6349_v30 = vphi %v6347_v30, %v6348_v30   ;;  %v6345_v37 = vphi %v6343_v37, %v6344_v37   ;;  %v6341_v9 = vphi %v6339_v9, %v6340_v9   ;;  %v6337_v27 = vphi %v6335_v27, %v6336_v27   ;;  %v6333_v35 = vphi %v6331_v35, %v6332_v35   ;;  %v6329_v10 = vphi %v6327_v10, %v6328_v10   ;;  %v6325_v59 = vphi %v6323_v59, %v6324_v59  }
 0x34d   : >>> { %s3083_s8 = scalar_lea.vmem [#allocation8], %s4352_s2  ;;  %p3069_p6 = scmp.ge.s32.totalorder %s3070_s29, %s8931_s6 }
 0x34e   : >>> { %v3084_v28 = vld [vmem:[%s3083_s8] sm:$0xff]  ;;  %v3085_v25 = vld [vmem:[%s3083_s8 + $0x8] sm:$0xff]  ;;  %v3086_v3 = vld [vmem:[%s3083_s8 + $0x10] sm:$0xff] }
 0x34f   : >>> { %v3087_v5 = vld [vmem:[%s3083_s8 + $0x18] sm:$0xff]  ;;  %v3088_v49 = vld [vmem:[%s3083_s8 + $0x20] sm:$0xff]  ;;  %v3089_v52 = vld [vmem:[%s3083_s8 + $0x28] sm:$0xff]  ;;  %v3092_v29 = vmax.f32 %v6353_v16, %v3084_v28   ;;  %v3093_v39 = vmax.f32 %v6349_v30, %v3085_v25   ;;  %v3094_v60 = vmax.f32 %v6345_v37, %v3086_v3   ;;  %3072 = sbr.rel (!%p3069_p6) target bundleno = 844 (0x34c), region = 186 }
 0x350   : >>> { %v3090_v26 = vld [vmem:[%s3083_s8 + $0x30] sm:$0xff]  ;;  %v3091_v22 = vld [vmem:[%s3083_s8 + $0x38] sm:$0xff]  ;;  %v3095_v61 = vmax.f32 %v6341_v9, %v3087_v5   ;;  %v3096_v45 = vmax.f32 %v6337_v27, %v3088_v49   ;;  %v3097_v57 = vmax.f32 %v6333_v35, %v3089_v52  }
 0x351   : >>> { %v3098_v24 = vmax.f32 %v6329_v10, %v3090_v26   ;;  %v3099_v20 = vmax.f32 %v6325_v59, %v3091_v22   ;;  %v6344_v37 = vmov %v3094_v60   ;;  %v6348_v30 = vmov %v3093_v39  }
 0x352   : >>> { %v6332_v35 = vmov %v3097_v57   ;;  %v6336_v27 = vmov %v3096_v45   ;;  %v6340_v9 = vmov %v3095_v61   ;;  %v6352_v16 = vmov %v3092_v29  }
 0x353   : >>> { %v6324_v59 = vmov %v3099_v20   ;;  %v6328_v10 = vmov %v3098_v24   ;;  %v10323_v41 = vmov (%p3069_p6), %v3099_v20  ;;  %v10324_v17 = vmov (%p3069_p6), %v3098_v24 }
 0x354   : >> { %v10325_v36 = vmov %v3097_v57  ;;  %v10326_v13 = vmov %v3096_v45  ;;  %v10327_v21 = vmov %v3095_v61  ;;  %v10328_v4 = vmov %v3094_v60 }
 0x355   : >> { %v10329_v14 = vmov %v3093_v39  ;;  %v10330_v34 = vmov %v3092_v29 }
 0x356 PF: >> { %s3100_s3 = sld [smem:[#allocation6 + %s6472_s22]]  ;;  %v10353_v29 = vmov 0  ;;  %v10357_v26 = vmov 0  ;;  %s152_s20 = sadd.s32 1, %s5913_s20   ;;  %v6389_v34 = vphi %v9218_v34, %v10330_v34   ;;  %v6385_v14 = vphi %v9216_v14, %v10329_v14   ;;  %v6381_v4 = vphi %v9214_v4, %v10328_v4   ;;  %v6377_v21 = vphi %v9212_v21, %v10327_v21   ;;  %v6373_v13 = vphi %v9210_v13, %v10326_v13   ;;  %v6369_v36 = vphi %v9208_v36, %v10325_v36   ;;  %v6365_v17 = vphi %v9206_v17, %v10324_v17   ;;  %v6361_v41 = vphi %v9204_v41, %v10323_v41  }
 0x357   : >> { %s3101_s11 = sld [smem:[#allocation7 + %s6472_s22]]  ;;  %p149_p7 = scmp.ge.s32.totalorder %s152_s20, 8  }
 0x358   : >> { %s3158_s12 = sld [smem:[#allocation6 + %s6547_s28]] }
 0x359   : >> { %s3159_s13 = sld [smem:[#allocation7 + %s6547_s28]] }
 0x35a   : >> { %s3216_s15 = sld [smem:[#allocation6 + %s6551_s30]] }
 0x35b   : >> { %s9277_s18 = sld [smem:[#allocation7 + %s6551_s30]] }
 0x35c   : >> { %v3102_v44 = vstv %s3100_s3  ;;  %s9280_s21 = sld [smem:[#allocation6 + %s6642_s9]] }
 0x35d   : >> { %vm3103_vm4 = vcmp.ge.s32.totalorder %v6454_v1, %v3102_v44  ;;  %vm3104_vm10 = vcmp.ge.s32.totalorder %v6458_v2, %v3102_v44  ;;  %v3105_v8 = vstv %s3101_s11  ;;  %s9285_s23 = sld [smem:[#allocation7 + %s6642_s9]] }
 0x35e   : >> { %vm3106_vm5 = vcmp.lt.s32.totalorder %v6454_v1, %v3105_v8  ;;  %vm3107_vm13 = vcmp.lt.s32.totalorder %v6458_v2, %v3105_v8  ;;  %v3160_v53 = vstv %s3158_s12  ;;  %s9290_s22 = sld [smem:[#allocation6 + %s6645_s10]] }
 0x35f   : >> { %vm9292_vm7 = vmand %vm3103_vm4, %vm3106_vm5  ;;  %vm3161_vm3 = vcmp.ge.s32.totalorder %v6454_v1, %v3160_v53  ;;  %vm9298_vm9 = vcmp.ge.s32.totalorder %v6458_v2, %v3160_v53  ;;  %v3163_v50 = vstv %s3159_s13  ;;  %s9303_s28 = sld [smem:[#allocation7 + %s6645_s10]] }
 0x360   : >> { %vm9305_vm8 = vmand %vm3104_vm10, %vm3107_vm13  ;;  %v3114_v11 = vsel %vm9292_vm7, %v6389_v34, -inf  ;;  %vm3164_vm12 = vcmp.lt.s32.totalorder %v6454_v1, %v3163_v50  ;;  %vm3165_vm0 = vcmp.lt.s32.totalorder %v6458_v2, %v3163_v50  ;;  %v3218_v32 = vstv %s3216_s15  ;;  %s9329_s30 = sld [smem:[#allocation6 + %s6760_s16]] }
 0x361   : >> { %v3118_v7 = vsel %vm9305_vm8, %v6373_v13, -inf  ;;  %vm9317_vm6 = vmand %vm3161_vm3, %vm3164_vm12  ;;  %vm3219_vm2 = vcmp.ge.s32.totalorder %v6454_v1, %v3218_v32  ;;  %vm9323_vm14 = vcmp.ge.s32.totalorder %v6458_v2, %v3218_v32  ;;  %v3221_v48 = vstv %s9277_s18  ;;  %s9352_s9 = sld [smem:[#allocation7 + %s6760_s16]] }
 0x362   : >> { %v3122_v18 = vmax.f32 %v3114_v11, %v3118_v7  ;;  %vm9333_vm1 = vmand %vm9298_vm9, %vm3165_vm0  ;;  %v3172_v47 = vsel %vm9317_vm6, %v6389_v34, -inf  ;;  %vm3222_vm15 = vcmp.lt.s32.totalorder %v6454_v1, %v3221_v48  ;;  %vm3223_vm11 = vcmp.lt.s32.totalorder %v6458_v2, %v3221_v48  ;;  %s9379_s10 = sld [smem:[#allocation6 + %s6771_s17]] }
 0x363   : >> { %v3176_v38 = vsel %vm9333_vm1, %v6373_v13, -inf  ;;  %vm9345_vm4 = vmand %vm3219_vm2, %vm3222_vm15  ;;  %v3276_v31 = vstv %s9280_s21  ;;  %v3279_v42 = vstv %s9285_s23  ;;  %v3115_v55 = vsel %vm9292_vm7, %v6385_v14, -inf  ;;  %s9411_s16 = sld [smem:[#allocation7 + %s6771_s17]] }
 0x364   : >> { %v3123_v54 = vrot.slane %v3122_v18, 4  ;;  %v3180_v23 = vmax.f32 %v3172_v47, %v3176_v38  ;;  %vm9359_vm10 = vmand %vm9323_vm14, %vm3223_vm11  ;;  %v3230_v19 = vsel %vm9345_vm4, %v6389_v34, -inf  ;;  %vm3277_vm5 = vcmp.ge.s32.totalorder %v6454_v1, %v3276_v31 }
 0x365   : >> { %v3234_v6 = vsel %vm9359_vm10, %v6373_v13, -inf  ;;  %vm3278_vm13 = vcmp.ge.s32.totalorder %v6458_v2, %v3276_v31  ;;  %vm3280_vm3 = vcmp.lt.s32.totalorder %v6454_v1, %v3279_v42  ;;  %vm3281_vm9 = vcmp.lt.s32.totalorder %v6458_v2, %v3279_v42 }
 0x366   : >> { %v3124_v43 = vmax.f32 %v3122_v18, %v3123_v54  ;;  %v3181_v0 = vrot.slane %v3180_v23, 4  ;;  %v3238_v40 = vmax.f32 %v3230_v19, %v3234_v6  ;;  %vm9373_vm12 = vmand %vm3277_vm5, %vm3280_vm3  ;;  %v3334_v59 = vstv %s9290_s22 }
 0x367   : >> { %vm9381_vm0 = vmand %vm3278_vm13, %vm3281_vm9  ;;  %v3288_v35 = vsel %vm9373_vm12, %v6389_v34, -inf  ;;  %vm3335_vm2 = vcmp.ge.s32.totalorder %v6454_v1, %v3334_v59  ;;  %vm9390_vm14 = vcmp.ge.s32.totalorder %v6458_v2, %v3334_v59  ;;  %v3337_v9 = vstv %s9303_s28 }
 0x368   : >> { %v3125_v37 = vrot.slane %v3124_v43, 2  ;;  %v3182_v30 = vmax.f32 %v3180_v23, %v3181_v0  ;;  %v3239_v16 = vrot.slane %v3238_v40, 4  ;;  %v3292_v28 = vsel %vm9381_vm0, %v6373_v13, -inf }
 0x369   : >> { %v3296_v25 = vmax.f32 %v3288_v35, %v3292_v28  ;;  %vm3338_vm15 = vcmp.lt.s32.totalorder %v6454_v1, %v3337_v9  ;;  %vm3339_vm11 = vcmp.lt.s32.totalorder %v6458_v2, %v3337_v9  ;;  %v3392_v3 = vstv %s9329_s30 }
 0x36a   : >> { %v3126_v5 = vmax.f32 %v3124_v43, %v3125_v37  ;;  %v3183_v49 = vrot.slane %v3182_v30, 2  ;;  %v3240_v52 = vmax.f32 %v3238_v40, %v3239_v16  ;;  %vm9401_vm5 = vmand %vm3335_vm2, %vm3338_vm15  ;;  %vm9406_vm13 = vcmp.ge.s32.totalorder %v6454_v1, %v3392_v3 }
 0x36b   : >> { %v10354_v29 = vsel %vm9401_vm5, 4294967295, %v10353_v29  ;;  %v3297_v60 = vrot.slane %v3296_v25, 4  ;;  %vm9415_vm3 = vmand %vm9390_vm14, %vm3339_vm11  ;;  %v3346_v22 = vsel %vm9401_vm5, %v6389_v34, -inf  ;;  %vm9423_vm9 = vcmp.ge.s32.totalorder %v6458_v2, %v3392_v3 }
 0x36c   : >> { %v10358_v26 = vsel %vm9415_vm3, 4294967295, %v10357_v26  ;;  %v3395_v45 = vstv %s9352_s9  ;;  %v3127_v57 = vrot.slane %v3126_v5, 1  ;;  %v3184_v24 = vmax.f32 %v3182_v30, %v3183_v49 }
 0x36d   : >> { %v3241_v20 = vrot.slane %v3240_v52, 2  ;;  %v3350_v44 = vsel %vm9415_vm3, %v6373_v13, -inf  ;;  %v3298_v8 = vmax.f32 %v3296_v25, %v3297_v60  ;;  %vm3396_vm2 = vcmp.lt.s32.totalorder %v6454_v1, %v3395_v45 }
 0x36e   : >> { %v3354_v53 = vmax.f32 %v3346_v22, %v3350_v44  ;;  %vm3397_vm14 = vcmp.lt.s32.totalorder %v6458_v2, %v3395_v45  ;;  %v3128_v46 = vmax.f32 %v3126_v5, %v3127_v57  ;;  %v3185_v50 = vrot.slane %v3184_v24, 1  ;;  %vm9435_vm15 = vmand %vm9406_vm13, %vm3396_vm2 }
 0x36f   : >> { %v3242_v11 = vmax.f32 %v3240_v52, %v3241_v20  ;;  %v10361_v32 = vmov 0  ;;  %v3450_v7 = vstv %s9379_s10  ;;  %v3299_v51 = vrot.slane %v3298_v8, 2  ;;  %vm9442_vm11 = vmand %vm9423_vm9, %vm3397_vm14 }
 0x370   : >> { %v10362_v32 = vsel %vm9435_vm15, 4294967295, %v10361_v32  ;;  %v3355_v48 = vrot.slane %v3354_v53, 4  ;;  %v10363_v18 = vmov 0  ;;  %v3404_v47 = vsel %vm9435_vm15, %v6389_v34, -inf }
 0x371   : >> { %v10364_v18 = vsel %vm9442_vm11, 4294967295, %v10363_v18  ;;  %vm9450_vm3 = vcmp.ge.s32.totalorder %v6454_v1, %v3450_v7  ;;  %vm3150_vm13 = vcmp.eq.f32.partialorder %v3128_v46, -inf  ;;  %v3186_v31 = vmax.f32 %v3184_v24, %v3185_v50 }
 0x372   : >> { %v3243_v42 = vrot.slane %v3242_v11, 1  ;;  %v3408_v54 = vsel %vm9442_vm11, %v6373_v13, -inf  ;;  %v3154_v23 = vsel %vm3150_vm13, 0.0, %v3128_v46  ;;  %v3300_v19 = vmax.f32 %v3298_v8, %v3299_v51 }
 0x373   : >> { %v3356_v6 = vmax.f32 %v3354_v53, %v3355_v48  ;;  %v3412_v43 = vmax.f32 %v3404_v47, %v3408_v54  ;;  %vm3208_vm9 = vcmp.eq.f32.partialorder %v3186_v31, -inf  ;;  %vm9458_vm2 = vcmp.ge.s32.totalorder %v6458_v2, %v3450_v7 }
 0x374   : >> { %v3244_v0 = vmax.f32 %v3242_v11, %v3243_v42  ;;  %v3453_v59 = vstv %s9411_s16  ;;  %v3212_v35 = vsel %vm3208_vm9, 0.0, %v3186_v31  ;;  %v3301_v27 = vrot.slane %v3300_v19, 1 }
 0x375   : >> { %v3357_v9 = vrot.slane %v3356_v6, 2  ;;  %v3413_v37 = vrot.slane %v3412_v43, 4  ;;  %vm3454_vm15 = vcmp.lt.s32.totalorder %v6454_v1, %v3453_v59  ;;  %vm3455_vm13 = vcmp.lt.s32.totalorder %v6458_v2, %v3453_v59 }
 0x376   : >> { %vm3266_vm14 = vcmp.eq.f32.partialorder %v3244_v0, -inf  ;;  %vm10369_vm11 = vcmask 1040384   ;;  %v3302_v28 = vmax.f32 %v3300_v19, %v3301_v27  ;;  %vm9468_vm5 = vmand %vm9450_vm3, %vm3454_vm15  ;;  %v3119_v60 = vsel %vm9305_vm8, %v6369_v36, -inf }
 0x377   : >> { %v3506_v30 = vsel %vm10369_vm11, %v3154_v23, %v3212_v35  ;;  %v3270_v16 = vsel %vm3266_vm14, 0.0, %v3244_v0  ;;  %v3358_v25 = vmax.f32 %v3356_v6, %v3357_v9  ;;  %v3414_v3 = vmax.f32 %v3412_v43, %v3413_v37  ;;  %vm9474_vm9 = vmand %vm9458_vm2, %vm3455_vm13 }
 0x378   : >> { %v3462_v52 = vsel %vm9468_vm5, %v6389_v34, -inf  ;;  %vm10374_vm11 = vcmask 1041408   ;;  %v3173_v22 = vsel %vm9317_vm6, %v6385_v14, -inf  ;;  %vm3324_vm3 = vcmp.eq.f32.partialorder %v3302_v28, -inf }
 0x379   : >> { %v3510_v39 = vsel %vm10374_vm11, %v3506_v30, %v3270_v16  ;;  %v3359_v61 = vrot.slane %v3358_v25, 1  ;;  %v3415_v45 = vrot.slane %v3414_v3, 2  ;;  %v3466_v57 = vsel %vm9474_vm9, %v6373_v13, -inf }
 0x37a   : >> { %v3328_v24 = vsel %vm3324_vm3, 0.0, %v3302_v28  ;;  %v3470_v20 = vmax.f32 %v3462_v52, %v3466_v57  ;;  %v3129_v34 = vmax.f32 %v3115_v55, %v3119_v60  ;;  %v3177_v44 = vsel %vm9333_vm1, %v6369_v36, -inf }
 0x37b   : >> { %v3360_v8 = vmax.f32 %v3358_v25, %v3359_v61  ;;  %v3416_v53 = vmax.f32 %v3414_v3, %v3415_v45  ;;  %vm10375_vm15 = vcmask 1042432   ;;  %v3187_v50 = vmax.f32 %v3173_v22, %v3177_v44 }
 0x37c   : >> { %v3514_v46 = vsel %vm10375_vm15, %v3510_v39, %v3328_v24  ;;  %v3471_v11 = vrot.slane %v3470_v20, 4  ;;  %v3130_v7 = vrot.slane %v3129_v34, 4  ;;  %v3231_v13 = vsel %vm9345_vm4, %v6385_v14, -inf }
 0x37d   : >> { %v3235_v51 = vsel %vm9359_vm10, %v6369_v36, -inf  ;;  %vm3382_vm2 = vcmp.eq.f32.partialorder %v3360_v8, -inf  ;;  %v3417_v55 = vrot.slane %v3416_v53, 1  ;;  %v3188_v48 = vrot.slane %v3187_v50, 4 }
 0x37e   : >> { %v3245_v47 = vmax.f32 %v3231_v13, %v3235_v51  ;;  %v3386_v38 = vsel %vm3382_vm2, 0.0, %v3360_v8  ;;  %v3472_v31 = vmax.f32 %v3470_v20, %v3471_v11  ;;  %v3131_v42 = vmax.f32 %v3129_v34, %v3130_v7 }
 0x37f   : >> { %v3289_v54 = vsel %vm9373_vm12, %v6385_v14, -inf  ;;  %v3418_v23 = vmax.f32 %v3416_v53, %v3417_v55  ;;  %vm10376_vm14 = vcmask 1043456   ;;  %v3189_v6 = vmax.f32 %v3187_v50, %v3188_v48 }
 0x380   : >> { %v3518_v19 = vsel %vm10376_vm14, %v3514_v46, %v3386_v38  ;;  %v3246_v43 = vrot.slane %v3245_v47, 4  ;;  %v3473_v0 = vrot.slane %v3472_v31, 2  ;;  %v3132_v40 = vrot.slane %v3131_v42, 2 }
 0x381   : >> { %v3293_v59 = vsel %vm9381_vm0, %v6369_v36, -inf  ;;  %vm10377_vm13 = vnez %v10354_v29  ;;  %vm3440_vm11 = vcmp.eq.f32.partialorder %v3418_v23, -inf  ;;  %v3190_v27 = vrot.slane %v3189_v6, 2 }
 0x382   : >> { %v3347_v35 = vsel %vm10377_vm13, %v6385_v14, -inf  ;;  %v3247_v9 = vmax.f32 %v3245_v47, %v3246_v43  ;;  %v3303_v37 = vmax.f32 %v3289_v54, %v3293_v59  ;;  %v3444_v30 = vsel %vm3440_vm11, 0.0, %v3418_v23 }
 0x383   : >> { %v3474_v16 = vmax.f32 %v3472_v31, %v3473_v0  ;;  %v3133_v28 = vmax.f32 %v3131_v42, %v3132_v40  ;;  %vm10378_vm3 = vnez %v10358_v26  ;;  %vm10379_vm15 = vcmask 1044480  }
 0x384   : >> { %v3351_v25 = vsel %vm10378_vm3, %v6369_v36, -inf  ;;  %v3522_v3 = vsel %vm10379_vm15, %v3518_v19, %v3444_v30  ;;  %v3191_v52 = vmax.f32 %v3189_v6, %v3190_v27  ;;  %v3248_v39 = vrot.slane %v3247_v9, 2 }
 0x385   : >> { %v3304_v60 = vrot.slane %v3303_v37, 4  ;;  %v3475_v22 = vrot.slane %v3474_v16, 1  ;;  %v3134_v61 = vrot.slane %v3133_v28, 1  ;;  %v3361_v45 = vmax.f32 %v3347_v35, %v3351_v25 }
 0x386   : >> { %vm10380_vm2 = vnez %v10362_v32  ;;  %v3192_v24 = vrot.slane %v3191_v52, 1  ;;  %v3249_v20 = vmax.f32 %v3247_v9, %v3248_v39  ;;  %vm10381_vm14 = vnez %v10364_v18 }
 0x387   : >> { %v3405_v57 = vsel %vm10380_vm2, %v6385_v14, -inf  ;;  %v3305_v34 = vmax.f32 %v3303_v37, %v3304_v60  ;;  %v3409_v44 = vsel %vm10381_vm14, %v6369_v36, -inf  ;;  %v3476_v8 = vmax.f32 %v3474_v16, %v3475_v22 }
 0x388   : >> { %v3135_v53 = vmax.f32 %v3133_v28, %v3134_v61  ;;  %v3362_v46 = vrot.slane %v3361_v45, 4  ;;  %v3419_v50 = vmax.f32 %v3405_v57, %v3409_v44  ;;  %v3193_v11 = vmax.f32 %v3191_v52, %v3192_v24 }
 0x389   : >> { %v3250_v7 = vrot.slane %v3249_v20, 1  ;;  %v3306_v13 = vrot.slane %v3305_v34, 2  ;;  %v3463_v51 = vsel %vm9468_vm5, %v6385_v14, -inf  ;;  %vm3498_vm11 = vcmp.eq.f32.partialorder %v3476_v8, -inf }
 0x38a   : >> { %vm3151_vm15 = vcmp.eq.f32.partialorder %v3135_v53, -inf  ;;  %v3363_v55 = vmax.f32 %v3361_v45, %v3362_v46  ;;  %v3420_v48 = vrot.slane %v3419_v50, 4  ;;  %v3502_v47 = vsel %vm3498_vm11, 0.0, %v3476_v8 }
 0x38b   : >> { %v3155_v38 = vsel %vm3151_vm15, 0.0, %v3135_v53  ;;  %vm3209_vm2 = vcmp.eq.f32.partialorder %v3193_v11, -inf  ;;  %v3251_v31 = vmax.f32 %v3249_v20, %v3250_v7  ;;  %vm10382_vm14 = vcmask 1045504  }
 0x38c   : >> { %v3526_v42 = vsel %vm10382_vm14, %v3522_v3, %v3502_v47  ;;  %v3213_v54 = vsel %vm3209_vm2, 0.0, %v3193_v11  ;;  %v3307_v23 = vmax.f32 %v3305_v34, %v3306_v13  ;;  %v3364_v19 = vrot.slane %v3363_v55, 2 }
 0x38d   : >> { %v3534_v6 = vrot.slane %v3526_v42, 6  ;;  %vm3267_vm3 = vcmp.eq.f32.partialorder %v3251_v31, -inf  ;;  %v3421_v43 = vmax.f32 %v3419_v50, %v3420_v48  ;;  %v3467_v14 = vsel %vm9474_vm9, %v6369_v36, -inf }
 0x38e   : >> { %v3271_v0 = vsel %vm3267_vm3, 0.0, %v3251_v31  ;;  %v3308_v40 = vrot.slane %v3307_v23, 1  ;;  %v3365_v59 = vmax.f32 %v3363_v55, %v3364_v19  ;;  %v3477_v35 = vmax.f32 %v3463_v51, %v3467_v14 }
 0x38f   : >> { %3542 = vst [vmem:[%s6966_s26 + $0xa0] sm:$0xfc] %v3534_v6  ;;  %v3422_v27 = vrot.slane %v3421_v43, 2  ;;  %vm10383_vm11 = vcmask 1040384   ;;  %v3116_v37 = vsel %vm9292_vm7, %v6381_v4, -inf  ;;  %v3120_v30 = vsel %vm9305_vm8, %v6365_v17, -inf }
 0x390   : >> { %v3507_v9 = vsel %vm10383_vm11, %v3155_v38, %v3213_v54  ;;  %3546 = vst [vmem:[%s6966_s26 + $0xc0] sm:$0x1] %v3534_v6  ;;  %v3309_v16 = vmax.f32 %v3307_v23, %v3308_v40  ;;  %v3366_v28 = vrot.slane %v3365_v59, 1  ;;  %v3478_v36 = vrot.slane %v3477_v35, 4 }
 0x391   : >> { %vm10384_vm3 = vcmask 1041408   ;;  %v3423_v3 = vmax.f32 %v3421_v43, %v3422_v27  ;;  %v3136_v52 = vmax.f32 %v3116_v37, %v3120_v30  ;;  %v3174_v39 = vsel %vm9317_vm6, %v6381_v4, -inf }
 0x392   : >> { %v3511_v25 = vsel %vm10384_vm3, %v3507_v9, %v3271_v0  ;;  %v3178_v60 = vsel %vm9333_vm1, %v6365_v17, -inf  ;;  %vm3325_vm2 = vcmp.eq.f32.partialorder %v3309_v16, -inf  ;;  %v3367_v22 = vmax.f32 %v3365_v59, %v3366_v28 }
 0x393   : >> { %v3479_v61 = vmax.f32 %v3477_v35, %v3478_v36  ;;  %v3194_v45 = vmax.f32 %v3174_v39, %v3178_v60  ;;  %v3329_v57 = vsel %vm3325_vm2, 0.0, %v3309_v16  ;;  %v3424_v24 = vrot.slane %v3423_v3, 1 }
 0x394   : >> { %v3137_v20 = vrot.slane %v3136_v52, 4  ;;  %v3232_v34 = vsel %vm9345_vm4, %v6381_v4, -inf  ;;  %vm3383_vm14 = vcmp.eq.f32.partialorder %v3367_v22, -inf  ;;  %vm10385_vm15 = vcmask 1042432  }
 0x395   : >> { %v3480_v44 = vrot.slane %v3479_v61, 2  ;;  %v3515_v8 = vsel %vm10385_vm15, %v3511_v25, %v3329_v57  ;;  %v3195_v53 = vrot.slane %v3194_v45, 4  ;;  %v3387_v46 = vsel %vm3383_vm14, 0.0, %v3367_v22 }
 0x396   : >> { %v3425_v50 = vmax.f32 %v3423_v3, %v3424_v24  ;;  %v3138_v11 = vmax.f32 %v3136_v52, %v3137_v20  ;;  %v3236_v7 = vsel %vm9359_vm10, %v6365_v17, -inf  ;;  %vm10386_vm11 = vcmask 1043456  }
 0x397   : >> { %v3481_v13 = vmax.f32 %v3479_v61, %v3480_v44  ;;  %v3519_v51 = vsel %vm10386_vm11, %v3515_v8, %v3387_v46  ;;  %v3196_v55 = vmax.f32 %v3194_v45, %v3195_v53  ;;  %v3252_v48 = vmax.f32 %v3232_v34, %v3236_v7 }
 0x398   : >> { %vm3441_vm3 = vcmp.eq.f32.partialorder %v3425_v50, -inf  ;;  %v3139_v47 = vrot.slane %v3138_v11, 2  ;;  %v3290_v38 = vsel %vm9373_vm12, %v6381_v4, -inf  ;;  %v3294_v31 = vsel %vm9381_vm0, %v6365_v17, -inf }
 0x399   : >> { %v3445_v42 = vsel %vm3441_vm3, 0.0, %v3425_v50  ;;  %v3482_v54 = vrot.slane %v3481_v13, 1  ;;  %v3197_v23 = vrot.slane %v3196_v55, 2  ;;  %v3253_v19 = vrot.slane %v3252_v48, 4 }
 0x39a   : >> { %vm10387_vm2 = vcmask 1044480   ;;  %v3140_v43 = vmax.f32 %v3138_v11, %v3139_v47  ;;  %v3310_v14 = vmax.f32 %v3290_v38, %v3294_v31  ;;  %v3348_v0 = vsel %vm10377_vm13, %v6381_v4, -inf }
 0x39b   : >> { %v3523_v6 = vsel %vm10387_vm2, %v3519_v51, %v3445_v42  ;;  %v3483_v40 = vmax.f32 %v3481_v13, %v3482_v54  ;;  %v3198_v59 = vmax.f32 %v3196_v55, %v3197_v23  ;;  %v3254_v35 = vmax.f32 %v3252_v48, %v3253_v19 }
 0x39c   : >> { %vm10388_vm14 = vnez %v10358_v26  ;;  %v3141_v9 = vrot.slane %v3140_v43, 1  ;;  %v3311_v37 = vrot.slane %v3310_v14, 4  ;;  %vm10389_vm15 = vnez %v10362_v32 }
 0x39d   : >> { %v3352_v27 = vsel %vm10388_vm14, %v6365_v17, -inf  ;;  %v3406_v16 = vsel %vm10389_vm15, %v6381_v4, -inf  ;;  %vm3499_vm11 = vcmp.eq.f32.partialorder %v3483_v40, -inf  ;;  %v3199_v28 = vrot.slane %v3198_v59, 1 }
 0x39e   : >> { %v3368_v30 = vmax.f32 %v3348_v0, %v3352_v27  ;;  %v3255_v36 = vrot.slane %v3254_v35, 2  ;;  %vm10390_vm3 = vnez %v10364_v18  ;;  %v3503_v3 = vsel %vm3499_vm11, 0.0, %v3483_v40 }
 0x39f   : >> { %v3410_v25 = vsel %vm10390_vm3, %v6365_v17, -inf  ;;  %v3142_v52 = vmax.f32 %v3140_v43, %v3141_v9  ;;  %v3312_v39 = vmax.f32 %v3310_v14, %v3311_v37  ;;  %vm10391_vm2 = vcmask 1045504  }
 0x3a0   : >> { %v3369_v60 = vrot.slane %v3368_v30, 4  ;;  %v3527_v22 = vsel %vm10391_vm2, %v3523_v6, %v3503_v3  ;;  %v3200_v61 = vmax.f32 %v3198_v59, %v3199_v28  ;;  %v3256_v45 = vmax.f32 %v3254_v35, %v3255_v36 }
 0x3a1   : >> { %v3426_v57 = vmax.f32 %v3406_v16, %v3410_v25  ;;  %v3535_v24 = vrot.slane %v3527_v22, 6  ;;  %vm3152_vm15 = vcmp.eq.f32.partialorder %v3142_v52, -inf  ;;  %v3313_v20 = vrot.slane %v3312_v39, 2 }
 0x3a2   : >> { %v3370_v34 = vmax.f32 %v3368_v30, %v3369_v60  ;;  %v3156_v44 = vsel %vm3152_vm15, 0.0, %v3142_v52  ;;  %vm3210_vm14 = vcmp.eq.f32.partialorder %v3200_v61, -inf  ;;  %v3257_v8 = vrot.slane %v3256_v45, 1 }
 0x3a3   : >> { %v3427_v53 = vrot.slane %v3426_v57, 4  ;;  %3543 = vst [vmem:[%s6966_s26 + $0xa8] sm:$0xfc] %v3535_v24  ;;  %v3214_v46 = vsel %vm3210_vm14, 0.0, %v3200_v61  ;;  %v3314_v50 = vmax.f32 %v3312_v39, %v3313_v20  ;;  %v3464_v7 = vsel %vm9468_vm5, %v6381_v4, -inf }
 0x3a4   : >> { %v3371_v11 = vrot.slane %v3370_v34, 2  ;;  %3547 = vst [vmem:[%s6966_s26 + $0xc8] sm:$0x1] %v3535_v24  ;;  %v3258_v13 = vmax.f32 %v3256_v45, %v3257_v8  ;;  %v3468_v55 = vsel %vm9474_vm9, %v6365_v17, -inf  ;;  %vm10392_vm11 = vcmask 1040384  }
 0x3a5   : >> { %v3428_v51 = vmax.f32 %v3426_v57, %v3427_v53  ;;  %v3508_v48 = vsel %vm10392_vm11, %v3156_v44, %v3214_v46  ;;  %v3315_v47 = vrot.slane %v3314_v50, 1  ;;  %v3484_v31 = vmax.f32 %v3464_v7, %v3468_v55 }
 0x3a6   : >> { %v3372_v38 = vmax.f32 %v3370_v34, %v3371_v11  ;;  %v3117_v42 = vsel %vm9292_vm7, %v6377_v21, -inf  ;;  %vm3268_vm14 = vcmp.eq.f32.partialorder %v3258_v13, -inf  ;;  %v3121_v4 = vsel %vm9305_vm8, %v6361_v41, -inf }
 0x3a7   : >> { %v3429_v54 = vrot.slane %v3428_v51, 2  ;;  %v3175_v23 = vsel %vm9317_vm6, %v6377_v21, -inf  ;;  %v3272_v17 = vsel %vm3268_vm14, 0.0, %v3258_v13  ;;  %v3316_v19 = vmax.f32 %v3314_v50, %v3315_v47 }
 0x3a8   : >> { %v3373_v6 = vrot.slane %v3372_v38, 1  ;;  %v3485_v43 = vrot.slane %v3484_v31, 4  ;;  %vm10393_vm15 = vcmask 1041408   ;;  %v3143_v40 = vmax.f32 %v3117_v42, %v3121_v4 }
 0x3a9   : >> { %v3430_v14 = vmax.f32 %v3428_v51, %v3429_v54  ;;  %v3512_v0 = vsel %vm10393_vm15, %v3508_v48, %v3272_v17  ;;  %v3179_v33 = vsel %vm9333_vm1, %v6361_v41, -inf  ;;  %vm3326_vm7 = vcmp.eq.f32.partialorder %v3316_v19, -inf }
 0x3aa   : >> { %v3374_v59 = vmax.f32 %v3372_v38, %v3373_v6  ;;  %v3486_v63 = vmax.f32 %v3484_v31, %v3485_v43  ;;  %v3201_v35 = vmax.f32 %v3175_v23, %v3179_v33  ;;  %v3330_v27 = vsel %vm3326_vm7, 0.0, %v3316_v19 }
 0x3ab   : >> { %v3431_v9 = vrot.slane %v3430_v14, 1  ;;  %v3144_v12 = vrot.slane %v3143_v40, 4  ;;  %v3233_v37 = vsel %vm9345_vm4, %v6377_v21, -inf  ;;  %vm10394_vm6 = vcmask 1042432  }
 0x3ac   : >> { %vm3384_vm8 = vcmp.eq.f32.partialorder %v3374_v59, -inf  ;;  %v3487_v30 = vrot.slane %v3486_v63, 2  ;;  %v3516_v16 = vsel %vm10394_vm6, %v3512_v0, %v3330_v27  ;;  %v3202_v28 = vrot.slane %v3201_v35, 4 }
 0x3ad   : >> { %v3388_v36 = vsel %vm3384_vm8, 0.0, %v3374_v59  ;;  %v3432_v25 = vmax.f32 %v3430_v14, %v3431_v9  ;;  %v3145_v56 = vmax.f32 %v3143_v40, %v3144_v12  ;;  %v3237_v3 = vsel %vm9359_vm10, %v6361_v41, -inf  ;;  %vm10402_vm8 = vmmov %vm10394_vm6 }
 0x3ae   : >> { %v3488_v52 = vmax.f32 %v3486_v63, %v3487_v30  ;;  %vm10395_vm1 = vcmask 1043456   ;;  %v3203_v60 = vmax.f32 %v3201_v35, %v3202_v28  ;;  %v3259_v22 = vmax.f32 %v3233_v37, %v3237_v3 }
 0x3af   : >> { %v3520_v39 = vsel %vm10395_vm1, %v3516_v16, %v3388_v36  ;;  %vm3442_vm2 = vcmp.eq.f32.partialorder %v3432_v25, -inf  ;;  %v3146_v62 = vrot.slane %v3145_v56, 2  ;;  %v3291_v61 = vsel %vm9373_vm12, %v6377_v21, -inf }
 0x3b0   : >> { %v3295_v45 = vsel %vm9381_vm0, %v6361_v41, -inf  ;;  %v3446_v57 = vsel %vm3442_vm2, 0.0, %v3432_v25  ;;  %v3489_v24 = vrot.slane %v3488_v52, 1  ;;  %v3204_v20 = vrot.slane %v3203_v60, 2 }
 0x3b1   : >> { %v3260_v15 = vrot.slane %v3259_v22, 4  ;;  %vm10396_vm4 = vcmask 1044480   ;;  %v3147_v44 = vmax.f32 %v3145_v56, %v3146_v62  ;;  %v3317_v8 = vmax.f32 %v3291_v61, %v3295_v45 }
 0x3b2   : >> { %v3524_v34 = vsel %vm10396_vm4, %v3520_v39, %v3446_v57  ;;  %v3349_v53 = vsel %vm10377_vm13, %v6377_v21, -inf  ;;  %v3490_v46 = vmax.f32 %v3488_v52, %v3489_v24  ;;  %v3205_v50 = vmax.f32 %v3203_v60, %v3204_v20  ;;  %vm10403_vm2 = vmmov %vm10396_vm4 }
 0x3b3   : >> { %v3261_v58 = vmax.f32 %v3259_v22, %v3260_v15  ;;  %vm10397_vm10 = vnez %v10358_v26  ;;  %v3148_v11 = vrot.slane %v3147_v44, 1  ;;  %v3318_v7 = vrot.slane %v3317_v8, 4 }
 0x3b4   : >> { %v3353_v10 = vsel %vm10397_vm10, %v6361_v41, -inf  ;;  %vm10398_vm12 = vnez %v10362_v32  ;;  %vm3500_vm0 = vcmp.eq.f32.partialorder %v3490_v46, -inf  ;;  %v3206_v55 = vrot.slane %v3205_v50, 1 }
 0x3b5   : >> { %v3375_v13 = vmax.f32 %v3349_v53, %v3353_v10  ;;  %v3407_v51 = vsel %vm10398_vm12, %v6377_v21, -inf  ;;  %v3262_v48 = vrot.slane %v3261_v58, 2  ;;  %v3411_v29 = vsel %vm10390_vm3, %v6361_v41, -inf }
 0x3b6   : >> { %v3504_v47 = vsel %vm3500_vm0, 0.0, %v3490_v46  ;;  %v3149_v38 = vmax.f32 %v3147_v44, %v3148_v11  ;;  %v3319_v31 = vmax.f32 %v3317_v8, %v3318_v7  ;;  %vm10399_vm13 = vcmask 1045504  }
 0x3b7   : >> { %v3376_v26 = vrot.slane %v3375_v13, 4  ;;  %v3528_v42 = vsel %vm10399_vm13, %v3524_v34, %v3504_v47  ;;  %v3207_v54 = vmax.f32 %v3205_v50, %v3206_v55  ;;  %v3263_v4 = vmax.f32 %v3261_v58, %v3262_v48  ;;  %vm10404_vm10 = vmmov %vm10399_vm13 }
 0x3b8   : >> { %v3433_v23 = vmax.f32 %v3407_v51, %v3411_v29  ;;  %v3536_v32 = vrot.slane %v3528_v42, 6  ;;  %vm3153_vm11 = vcmp.eq.f32.partialorder %v3149_v38, -inf  ;;  %v3320_v17 = vrot.slane %v3319_v31, 2 }
 0x3b9   : >> { %v3377_v19 = vmax.f32 %v3375_v13, %v3376_v26  ;;  %v3157_v6 = vsel %vm3153_vm11, 0.0, %v3149_v38  ;;  %vm3211_vm14 = vcmp.eq.f32.partialorder %v3207_v54, -inf  ;;  %v3264_v43 = vrot.slane %v3263_v4, 1 }
 0x3ba   : >> { %v3434_v18 = vrot.slane %v3433_v23, 4  ;;  %3544 = vst [vmem:[%s6966_s26 + $0xb0] sm:$0xfc] %v3536_v32  ;;  %v3215_v14 = vsel %vm3211_vm14, 0.0, %v3207_v54  ;;  %v3321_v0 = vmax.f32 %v3319_v31, %v3320_v17  ;;  %v3465_v33 = vsel %vm9468_vm5, %v6377_v21, -inf }
 0x3bb   : >> { %v3378_v40 = vrot.slane %v3377_v19, 2  ;;  %3548 = vst [vmem:[%s6966_s26 + $0xd0] sm:$0x1] %v3536_v32  ;;  %v3265_v59 = vmax.f32 %v3263_v4, %v3264_v43  ;;  %v3469_v35 = vsel %vm9474_vm9, %v6361_v41, -inf  ;;  %vm10400_vm15 = vcmask 1040384  }
 0x3bc   : >> { %v3435_v63 = vmax.f32 %v3433_v23, %v3434_v18  ;;  %v3322_v27 = vrot.slane %v3321_v0, 1  ;;  %v3491_v12 = vmax.f32 %v3465_v33, %v3469_v35  ;;  %v3509_v30 = vsel %vm10400_vm15, %v3157_v6, %v3215_v14 }
 0x3bd   : >> { %v3379_v9 = vmax.f32 %v3377_v19, %v3378_v40  ;;  %vm3269_vm3 = vcmp.eq.f32.partialorder %v3265_v59, -inf  ;;  %vm10401_vm7 = vcmask 1041408   ;;  %vm3899_vm12 = vsmask.f32 (%p149_p7), 256 }
 0x3be   : >> { %v3436_v37 = vrot.slane %v3435_v63, 2  ;;  %v3273_v16 = vsel %vm3269_vm3, 0.0, %v3265_v59  ;;  %v3323_v28 = vmax.f32 %v3321_v0, %v3322_v27  ;;  %v3492_v25 = vrot.slane %v3491_v12, 4 }
 0x3bf   : >> { %v3380_v36 = vrot.slane %v3379_v9, 1  ;;  %v3513_v3 = vsel %vm10401_vm7, %v3509_v30, %v3273_v16  ;;  %vm3901_vm0 = vcmask (%p149_p7), 1044484   ;;  %vm3902_vm13 = vsmask.f32 (%p149_p7), 4352 }
 0x3c0   : >> { %v3437_v5 = vmax.f32 %v3435_v63, %v3436_v37  ;;  %vm3327_vm5 = vcmp.eq.f32.partialorder %v3323_v28, -inf  ;;  %v3493_v56 = vmax.f32 %v3491_v12, %v3492_v25  ;;  %vm10405_vm11 = vcmask (%p149_p7), 1040384   ;;  %vm3903_vm3 = vmand (%p149_p7), %vm3901_vm0, %vm3902_vm13  ;;  %v3905_v12 = vld [vmem:[%s6463_s19 + $0x60] sm:$0x11] (%p149_p7) }
 0x3c1   : >> { %v3381_v21 = vmax.f32 %v3379_v9, %v3380_v36  ;;  %v3331_v52 = vsel %vm3327_vm5, 0.0, %v3323_v28  ;;  %vm3900_vm14 = vmand (%p149_p7), %vm10405_vm11, %vm3899_vm12  ;;  %v3908_v36 = vld [vmem:[%s6463_s19 + $0x68] sm:$0x11] (%p149_p7) }
 0x3c2   : >> { %v3438_v49 = vrot.slane %v3437_v5, 1  ;;  %v3494_v41 = vrot.slane %v3493_v56, 2  ;;  %v3517_v22 = vsel %vm10402_vm8, %v3513_v3, %v3331_v52  ;;  %vm9657_vm15 = vmor (%p149_p7), %vm3903_vm3, %vm3900_vm14 }
 0x3c3   : >> { %vm3385_vm9 = vcmp.eq.f32.partialorder %v3381_v21, -inf }
 0x3c4   : >> { %v3389_v39 = vsel %vm3385_vm9, 0.0, %v3381_v21  ;;  %v3439_v60 = vmax.f32 %v3437_v5, %v3438_v49  ;;  %v3495_v62 = vmax.f32 %v3493_v56, %v3494_v41 }
 0x3c5   : >> { %v3521_v57 = vsel %vm10395_vm1, %v3517_v22, %v3389_v39 }
 0x3c6   : >> { %vm3443_vm6 = vcmp.eq.f32.partialorder %v3439_v60, -inf  ;;  %v3496_v45 = vrot.slane %v3495_v62, 1 }
 0x3c7   : >> { %v3447_v61 = vsel %vm3443_vm6, 0.0, %v3439_v60 }
 0x3c8   : >> { %v3497_v24 = vmax.f32 %v3495_v62, %v3496_v45  ;;  %v3525_v20 = vsel %vm10403_vm2, %v3521_v57, %v3447_v61 }
 0x3ca   : >> { %vm3501_vm4 = vcmp.eq.f32.partialorder %v3497_v24, -inf }
 0x3cb   : >> { %v3505_v15 = vsel %vm3501_vm4, 0.0, %v3497_v24 }
 0x3cc   : >> { %v3529_v34 = vsel %vm10404_vm10, %v3525_v20, %v3505_v15  ;;  %151 = sbr.rel (!%p149_p7) target bundleno = 31 (0x1f), region = 197 }
 0x3cd   : >> { %v3537_v44 = vrot.slane %v3529_v34, 6 }
 0x3cf   : >> { %3545 = vst [vmem:[%s6966_s26 + $0xb8] sm:$0xfc] %v3537_v44 }
 0x3d0   : >> { %3549 = vst [vmem:[%s6966_s26 + $0xd8] sm:$0x1] %v3537_v44 }
 0x3d7   : > { %v3550_v8 = vld [vmem:[#allocation2] sm:$0xff]  ;;  %v3551_v53 = vld [vmem:[#allocation2 + $0x8] sm:$0xff]  ;;  %v3552_v46 = vld [vmem:[#allocation2 + $0x10] sm:$0xff] }
 0x3d8   : > { %v3774_v50 = vpack.c.bf16 %v3551_v53, %v3550_v8  ;;  %v3553_v58 = vld [vmem:[#allocation2 + $0x18] sm:$0xff]  ;;  %v3554_v10 = vld [vmem:[#allocation2 + $0x20] sm:$0xff]  ;;  %v3555_v11 = vld [vmem:[#allocation2 + $0x28] sm:$0xff] }
 0x3d9   : > { %v3775_v7 = vpack.c.bf16 %v3553_v58, %v3552_v46  ;;  %v3776_v13 = vpack.c.bf16 %v3555_v11, %v3554_v10  ;;  %v3556_v51 = vld [vmem:[#allocation2 + $0x30] sm:$0xff]  ;;  %v3557_v55 = vld [vmem:[#allocation2 + $0x38] sm:$0xff]  ;;  %v3558_v48 = vld [vmem:[#allocation2 + $0x40] sm:$0xff] }
 0x3da   : > { %3886 = vst [vmem:[%s6463_s19] sm:$0xff] %v3774_v50  ;;  %v3777_v29 = vpack.c.bf16 %v3557_v55, %v3556_v51  ;;  %v3559_v47 = vld [vmem:[#allocation2 + $0x48] sm:$0xff]  ;;  %v3560_v38 = vld [vmem:[#allocation2 + $0x50] sm:$0xff]  ;;  %v3561_v1 = vld [vmem:[#allocation2 + $0x58] sm:$0xff] }
 0x3db   : > { %3887 = vst [vmem:[%s6463_s19 + $0x8] sm:$0xff] %v3775_v7  ;;  %v3778_v2 = vpack.c.bf16 %v3559_v47, %v3558_v48  ;;  %v3779_v31 = vpack.c.bf16 %v3561_v1, %v3560_v38  ;;  %v3562_v26 = vld [vmem:[#allocation2 + $0x60] sm:$0xff]  ;;  %v3563_v42 = vld [vmem:[#allocation2 + $0x68] sm:$0xff]  ;;  %v3564_v54 = vld [vmem:[#allocation2 + $0x70] sm:$0xff] }
 0x3dc   : > { %3888 = vst [vmem:[%s6463_s19 + $0x10] sm:$0xff] %v3776_v13  ;;  %v3780_v4 = vpack.c.bf16 %v3563_v42, %v3562_v26  ;;  %v3565_v23 = vld [vmem:[#allocation2 + $0x78] sm:$0xff]  ;;  %v3566_v32 = vld [vmem:[#allocation2 + $0x80] sm:$0xff]  ;;  %v3567_v17 = vld [vmem:[#allocation2 + $0x88] sm:$0xff] }
 0x3dd   : > { %3889 = vst [vmem:[%s6463_s19 + $0x18] sm:$0xff] %v3777_v29  ;;  %v3781_v19 = vpack.c.bf16 %v3565_v23, %v3564_v54  ;;  %v3568_v6 = vld [vmem:[#allocation2 + $0x90] sm:$0xff]  ;;  %v3569_v43 = vld [vmem:[#allocation2 + $0x98] sm:$0xff]  ;;  %v3570_v18 = vld [vmem:[#allocation2 + $0xa0] sm:$0xff]  ;;  %v3782_v14 = vpack.c.bf16 %v3567_v17, %v3566_v32 }
 0x3de   : > { %3890 = vst [vmem:[%s6463_s19 + $0x20] sm:$0xff] %v3778_v2  ;;  %v3571_v0 = vld [vmem:[#allocation2 + $0xa8] sm:$0xff]  ;;  %v3572_v40 = vld [vmem:[#allocation2 + $0xb0] sm:$0xff]  ;;  %v3573_v33 = vld [vmem:[#allocation2 + $0xb8] sm:$0xff]  ;;  %v3783_v59 = vpack.c.bf16 %v3569_v43, %v3568_v6 }
 0x3df   : > { %3891 = vst [vmem:[%s6463_s19 + $0x28] sm:$0xff] %v3779_v31  ;;  %v3574_v63 = vld [vmem:[#allocation2 + $0xc0] sm:$0x1]  ;;  %v3575_v35 = vld [vmem:[#allocation2 + $0xc8] sm:$0x1]  ;;  %v3784_v27 = vpack.c.bf16 %v3571_v0, %v3570_v18  ;;  %v3785_v30 = vpack.c.bf16 %v3573_v33, %v3572_v40  ;;  %v3580_v56 = vld [vmem:[#allocation2 + $0xf0] sm:$0xff] }
 0x3e0   : > { %3892 = vst [vmem:[%s6463_s19 + $0x30] sm:$0xff] %v3780_v4  ;;  %v3786_v9 = vpack.c.bf16 %v3575_v35, %v3574_v63  ;;  %v3576_v37 = vld [vmem:[#allocation2 + $0xd0] sm:$0x1]  ;;  %v3577_v28 = vld [vmem:[#allocation2 + $0xd8] sm:$0x1]  ;;  %v3578_v5 = vld [vmem:[#allocation2 + $0xe0] sm:$0xff] }
 0x3e1   : > { %3893 = vst [vmem:[%s6463_s19 + $0x38] sm:$0xff] %v3781_v19  ;;  %v3787_v25 = vpack.c.bf16 %v3577_v28, %v3576_v37  ;;  %v3579_v21 = vld [vmem:[#allocation2 + $0xe8] sm:$0xff]  ;;  %v3581_v52 = vld [vmem:[#allocation2 + $0xf8] sm:$0xff]  ;;  %v3582_v49 = vld [vmem:[#allocation2 + $0x100] sm:$0xff] }
 0x3e2   : > { %3894 = vst [vmem:[%s6463_s19 + $0x40] sm:$0xff] %v3782_v14  ;;  %v3906_v3 = vsel %vm9657_vm15, %v3786_v9, %v3905_v12  ;;  %v3583_v41 = vld [vmem:[#allocation2 + $0x108] sm:$0xff]  ;;  %v3788_v60 = vpack.c.bf16 %v3579_v21, %v3578_v5  ;;  %v3584_v22 = vld [vmem:[#allocation2 + $0x110] sm:$0xff]  ;;  %v3585_v62 = vld [vmem:[#allocation2 + $0x118] sm:$0xff]  ;;  %v3789_v61 = vpack.c.bf16 %v3581_v52, %v3580_v56 }
 0x3e3   : > { %3895 = vst [vmem:[%s6463_s19 + $0x48] sm:$0xff] %v3783_v59  ;;  %v3909_v39 = vsel %vm9657_vm15, %v3787_v25, %v3908_v36  ;;  %v3586_v45 = vld [vmem:[#allocation2 + $0x120] sm:$0xff]  ;;  %v3587_v57 = vld [vmem:[#allocation2 + $0x128] sm:$0xff]  ;;  %v3790_v24 = vpack.c.bf16 %v3583_v41, %v3582_v49  ;;  %v3588_v20 = vld [vmem:[#allocation2 + $0x130] sm:$0xff]  ;;  %v3791_v34 = vpack.c.bf16 %v3585_v62, %v3584_v22 }
 0x3e4   : > { %3896 = vst [vmem:[%s6463_s19 + $0x50] sm:$0xff] %v3784_v27  ;;  %v3589_v15 = vld [vmem:[#allocation2 + $0x138] sm:$0xff]  ;;  %v3590_v44 = vld [vmem:[#allocation2 + $0x140] sm:$0xff]  ;;  %v3591_v8 = vld [vmem:[#allocation2 + $0x148] sm:$0xff]  ;;  %v3792_v53 = vpack.c.bf16 %v3587_v57, %v3586_v45 }
 0x3e5   : > { %3897 = vst [vmem:[%s6463_s19 + $0x58] sm:$0xff] %v3785_v30  ;;  %v3592_v46 = vld [vmem:[#allocation2 + $0x150] sm:$0xff]  ;;  %v3593_v50 = vld [vmem:[#allocation2 + $0x158] sm:$0xff]  ;;  %v3793_v58 = vpack.c.bf16 %v3589_v15, %v3588_v20  ;;  %v3594_v10 = vld [vmem:[#allocation2 + $0x160] sm:$0xff]  ;;  %v3794_v13 = vpack.c.bf16 %v3591_v8, %v3590_v44 }
 0x3e6   : > { %3907 = vst [vmem:[%s6463_s19 + $0x60] sm:$0x11] %v3906_v3  ;;  %v3595_v11 = vld [vmem:[#allocation2 + $0x168] sm:$0xff]  ;;  %v3596_v7 = vld [vmem:[#allocation2 + $0x170] sm:$0xff]  ;;  %v3597_v51 = vld [vmem:[#allocation2 + $0x178] sm:$0xff]  ;;  %v3795_v29 = vpack.c.bf16 %v3593_v50, %v3592_v46 }
 0x3e7   : > { %3910 = vst [vmem:[%s6463_s19 + $0x68] sm:$0x11] %v3909_v39  ;;  %v3602_v55 = vld [vmem:[#allocation2 + $0x1a0] sm:$0x1]  ;;  %v3603_v48 = vld [vmem:[#allocation2 + $0x1a8] sm:$0x1]  ;;  %v3796_v2 = vpack.c.bf16 %v3595_v11, %v3594_v10  ;;  %v3797_v54 = vpack.c.bf16 %v3597_v51, %v3596_v7 }
 0x3e8   : > { %3911 = vst [vmem:[%s6463_s19 + $0x70] sm:$0xff] %v3788_v60  ;;  %v3598_v47 = vld [vmem:[#allocation2 + $0x180] sm:$0xff]  ;;  %v3599_v38 = vld [vmem:[#allocation2 + $0x188] sm:$0xff]  ;;  %v3604_v1 = vld [vmem:[#allocation2 + $0x1b0] sm:$0x1]  ;;  %v3800_v4 = vpack.c.bf16 %v3603_v48, %v3602_v55 }
 0x3e9   : > { %3912 = vst [vmem:[%s6463_s19 + $0x78] sm:$0xff] %v3789_v61  ;;  %v3600_v31 = vld [vmem:[#allocation2 + $0x190] sm:$0xff]  ;;  %v3601_v26 = vld [vmem:[#allocation2 + $0x198] sm:$0xff]  ;;  %v3798_v23 = vpack.c.bf16 %v3599_v38, %v3598_v47  ;;  %v3606_v43 = vld [vmem:[#allocation2 + $0x1c0] sm:$0xff] }
 0x3ea   : > { %3913 = vst [vmem:[%s6463_s19 + $0x80] sm:$0xff] %v3790_v24  ;;  %v3605_v42 = vld [vmem:[#allocation2 + $0x1b8] sm:$0x1]  ;;  %v3923_v32 = vld [vmem:[%s6463_s19 + $0xd0] sm:$0x11]  ;;  %v3799_v19 = vpack.c.bf16 %v3601_v26, %v3600_v31  ;;  %v3607_v18 = vld [vmem:[#allocation2 + $0x1c8] sm:$0xff] }
 0x3eb   : > { %3914 = vst [vmem:[%s6463_s19 + $0x88] sm:$0xff] %v3791_v34  ;;  %v3801_v17 = vpack.c.bf16 %v3605_v42, %v3604_v1  ;;  %v3926_v6 = vld [vmem:[%s6463_s19 + $0xd8] sm:$0x11]  ;;  %v3608_v14 = vld [vmem:[#allocation2 + $0x1d0] sm:$0xff]  ;;  %v3924_v40 = vsel %vm9657_vm15, %v3800_v4, %v3923_v32  ;;  %v3610_v33 = vld [vmem:[#allocation2 + $0x1e0] sm:$0xff]  ;;  %v3802_v35 = vpack.c.bf16 %v3607_v18, %v3606_v43 }
 0x3ec   : > { %3915 = vst [vmem:[%s6463_s19 + $0x90] sm:$0xff] %v3792_v53  ;;  %v3609_v0 = vld [vmem:[#allocation2 + $0x1d8] sm:$0xff]  ;;  %v3611_v59 = vld [vmem:[#allocation2 + $0x1e8] sm:$0xff]  ;;  %v3612_v27 = vld [vmem:[#allocation2 + $0x1f0] sm:$0xff] }
 0x3ed   : > { %3916 = vst [vmem:[%s6463_s19 + $0x98] sm:$0xff] %v3793_v58  ;;  %v3927_v63 = vsel %vm9657_vm15, %v3801_v17, %v3926_v6  ;;  %v3613_v9 = vld [vmem:[#allocation2 + $0x1f8] sm:$0xff]  ;;  %v3803_v12 = vpack.c.bf16 %v3609_v0, %v3608_v14  ;;  %v3614_v37 = vld [vmem:[#allocation2 + $0x200] sm:$0xff]  ;;  %v3615_v30 = vld [vmem:[#allocation2 + $0x208] sm:$0xff]  ;;  %v3804_v28 = vpack.c.bf16 %v3611_v59, %v3610_v33 }
 0x3ee   : > { %3917 = vst [vmem:[%s6463_s19 + $0xa0] sm:$0xff] %v3794_v13  ;;  %v3616_v36 = vld [vmem:[#allocation2 + $0x210] sm:$0xff]  ;;  %v3617_v25 = vld [vmem:[#allocation2 + $0x218] sm:$0xff]  ;;  %v3805_v5 = vpack.c.bf16 %v3613_v9, %v3612_v27  ;;  %v3618_v21 = vld [vmem:[#allocation2 + $0x220] sm:$0xff]  ;;  %v3806_v3 = vpack.c.bf16 %v3615_v30, %v3614_v37 }
 0x3ef   : > { %3918 = vst [vmem:[%s6463_s19 + $0xa8] sm:$0xff] %v3795_v29  ;;  %v3619_v56 = vld [vmem:[#allocation2 + $0x228] sm:$0xff]  ;;  %v3620_v52 = vld [vmem:[#allocation2 + $0x230] sm:$0xff]  ;;  %v3621_v49 = vld [vmem:[#allocation2 + $0x238] sm:$0xff]  ;;  %v3807_v39 = vpack.c.bf16 %v3617_v25, %v3616_v36 }
 0x3f0   : > { %3919 = vst [vmem:[%s6463_s19 + $0xb0] sm:$0xff] %v3796_v2  ;;  %v3622_v41 = vld [vmem:[#allocation2 + $0x240] sm:$0xff]  ;;  %v3623_v60 = vld [vmem:[#allocation2 + $0x248] sm:$0xff]  ;;  %v3624_v22 = vld [vmem:[#allocation2 + $0x250] sm:$0xff]  ;;  %v3808_v61 = vpack.c.bf16 %v3619_v56, %v3618_v21  ;;  %v3809_v20 = vpack.c.bf16 %v3621_v49, %v3620_v52 }
 0x3f1   : > { %3920 = vst [vmem:[%s6463_s19 + $0xb8] sm:$0xff] %v3797_v54  ;;  %v3625_v62 = vld [vmem:[#allocation2 + $0x258] sm:$0xff]  ;;  %v3626_v45 = vld [vmem:[#allocation2 + $0x260] sm:$0xff]  ;;  %v3631_v24 = vld [vmem:[#allocation2 + $0x288] sm:$0x1]  ;;  %v3810_v8 = vpack.c.bf16 %v3623_v60, %v3622_v41 }
 0x3f2   : > { %3921 = vst [vmem:[%s6463_s19 + $0xc0] sm:$0xff] %v3798_v23  ;;  %v3630_v57 = vld [vmem:[#allocation2 + $0x280] sm:$0x1]  ;;  %v3627_v15 = vld [vmem:[#allocation2 + $0x268] sm:$0xff]  ;;  %v3632_v34 = vld [vmem:[#allocation2 + $0x290] sm:$0x1]  ;;  %v3811_v50 = vpack.c.bf16 %v3625_v62, %v3624_v22 }
 0x3f3   : > { %3922 = vst [vmem:[%s6463_s19 + $0xc8] sm:$0xff] %v3799_v19  ;;  %v3633_v44 = vld [vmem:[#allocation2 + $0x298] sm:$0x1]  ;;  %v3628_v53 = vld [vmem:[#allocation2 + $0x270] sm:$0xff]  ;;  %v3814_v58 = vpack.c.bf16 %v3631_v24, %v3630_v57  ;;  %v3812_v10 = vpack.c.bf16 %v3627_v15, %v3626_v45  ;;  %v3941_v11 = vld [vmem:[%s6463_s19 + $0x140] sm:$0x11] }
 0x3f4   : > { %3925 = vst [vmem:[%s6463_s19 + $0xd0] sm:$0x11] %v3924_v40  ;;  %v3629_v46 = vld [vmem:[#allocation2 + $0x278] sm:$0xff]  ;;  %v3815_v7 = vpack.c.bf16 %v3633_v44, %v3632_v34  ;;  %v3944_v51 = vld [vmem:[%s6463_s19 + $0x148] sm:$0x11]  ;;  %v3634_v55 = vld [vmem:[#allocation2 + $0x2a0] sm:$0xff] }
 0x3f5   : > { %3928 = vst [vmem:[%s6463_s19 + $0xd8] sm:$0x11] %v3927_v63  ;;  %v3813_v13 = vpack.c.bf16 %v3629_v46, %v3628_v53  ;;  %v3635_v48 = vld [vmem:[#allocation2 + $0x2a8] sm:$0xff]  ;;  %v3636_v29 = vld [vmem:[#allocation2 + $0x2b0] sm:$0xff]  ;;  %v3637_v47 = vld [vmem:[#allocation2 + $0x2b8] sm:$0xff]  ;;  %v3942_v38 = vsel %vm9657_vm15, %v3814_v58, %v3941_v11 }
 0x3f6   : > { %3929 = vst [vmem:[%s6463_s19 + $0xe0] sm:$0xff] %v3802_v35  ;;  %v3638_v1 = vld [vmem:[#allocation2 + $0x2c0] sm:$0xff]  ;;  %v3639_v2 = vld [vmem:[#allocation2 + $0x2c8] sm:$0xff]  ;;  %v3945_v31 = vsel %vm9657_vm15, %v3815_v7, %v3944_v51  ;;  %v3816_v26 = vpack.c.bf16 %v3635_v48, %v3634_v55  ;;  %v3640_v42 = vld [vmem:[#allocation2 + $0x2d0] sm:$0xff]  ;;  %v3817_v4 = vpack.c.bf16 %v3637_v47, %v3636_v29 }
 0x3f7   : > { %3930 = vst [vmem:[%s6463_s19 + $0xe8] sm:$0xff] %v3803_v12  ;;  %v3641_v54 = vld [vmem:[#allocation2 + $0x2d8] sm:$0xff]  ;;  %v3642_v23 = vld [vmem:[#allocation2 + $0x2e0] sm:$0xff]  ;;  %v3643_v32 = vld [vmem:[#allocation2 + $0x2e8] sm:$0xff]  ;;  %v3818_v17 = vpack.c.bf16 %v3639_v2, %v3638_v1 }
 0x3f8   : > { %3931 = vst [vmem:[%s6463_s19 + $0xf0] sm:$0xff] %v3804_v28  ;;  %v3644_v19 = vld [vmem:[#allocation2 + $0x2f0] sm:$0xff]  ;;  %v3645_v6 = vld [vmem:[#allocation2 + $0x2f8] sm:$0xff]  ;;  %v3819_v43 = vpack.c.bf16 %v3641_v54, %v3640_v42  ;;  %v3646_v18 = vld [vmem:[#allocation2 + $0x300] sm:$0xff]  ;;  %v3820_v0 = vpack.c.bf16 %v3643_v32, %v3642_v23 }
 0x3f9   : > { %3932 = vst [vmem:[%s6463_s19 + $0xf8] sm:$0xff] %v3805_v5  ;;  %v3647_v14 = vld [vmem:[#allocation2 + $0x308] sm:$0xff]  ;;  %v3648_v40 = vld [vmem:[#allocation2 + $0x310] sm:$0xff]  ;;  %v3649_v33 = vld [vmem:[#allocation2 + $0x318] sm:$0xff]  ;;  %v3821_v63 = vpack.c.bf16 %v3645_v6, %v3644_v19 }
 0x3fa   : > { %3933 = vst [vmem:[%s6463_s19 + $0x100] sm:$0xff] %v3806_v3  ;;  %v3650_v59 = vld [vmem:[#allocation2 + $0x320] sm:$0xff]  ;;  %v3651_v35 = vld [vmem:[#allocation2 + $0x328] sm:$0xff]  ;;  %v3652_v27 = vld [vmem:[#allocation2 + $0x330] sm:$0xff]  ;;  %v3822_v12 = vpack.c.bf16 %v3647_v14, %v3646_v18  ;;  %v3823_v36 = vpack.c.bf16 %v3649_v33, %v3648_v40 }
 0x3fb   : > { %3934 = vst [vmem:[%s6463_s19 + $0x108] sm:$0xff] %v3807_v39  ;;  %v3653_v9 = vld [vmem:[#allocation2 + $0x338] sm:$0xff]  ;;  %v3654_v37 = vld [vmem:[#allocation2 + $0x340] sm:$0xff]  ;;  %v3659_v28 = vld [vmem:[#allocation2 + $0x368] sm:$0x1]  ;;  %v3824_v56 = vpack.c.bf16 %v3651_v35, %v3650_v59 }
 0x3fc   : > { %3935 = vst [vmem:[%s6463_s19 + $0x110] sm:$0xff] %v3808_v61  ;;  %v3658_v30 = vld [vmem:[#allocation2 + $0x360] sm:$0x1]  ;;  %v3655_v25 = vld [vmem:[#allocation2 + $0x348] sm:$0xff]  ;;  %v3660_v5 = vld [vmem:[#allocation2 + $0x370] sm:$0x1]  ;;  %v3825_v49 = vpack.c.bf16 %v3653_v9, %v3652_v27 }
 0x3fd   : > { %3936 = vst [vmem:[%s6463_s19 + $0x118] sm:$0xff] %v3809_v20  ;;  %v3661_v21 = vld [vmem:[#allocation2 + $0x378] sm:$0x1]  ;;  %v3656_v3 = vld [vmem:[#allocation2 + $0x350] sm:$0xff]  ;;  %v3828_v41 = vpack.c.bf16 %v3659_v28, %v3658_v30  ;;  %v3826_v39 = vpack.c.bf16 %v3655_v25, %v3654_v37  ;;  %v3662_v45 = vld [vmem:[#allocation2 + $0x380] sm:$0xff] }
 0x3fe   : > { %3937 = vst [vmem:[%s6463_s19 + $0x120] sm:$0xff] %v3810_v8  ;;  %v3657_v52 = vld [vmem:[#allocation2 + $0x358] sm:$0xff]  ;;  %v3959_v60 = vld [vmem:[%s6463_s19 + $0x1b0] sm:$0x11]  ;;  %v3829_v22 = vpack.c.bf16 %v3661_v21, %v3660_v5  ;;  %v3663_v57 = vld [vmem:[#allocation2 + $0x388] sm:$0xff] }
 0x3ff   : > { %3938 = vst [vmem:[%s6463_s19 + $0x128] sm:$0xff] %v3811_v50  ;;  %v3827_v62 = vpack.c.bf16 %v3657_v52, %v3656_v3  ;;  %v3962_v61 = vld [vmem:[%s6463_s19 + $0x1b8] sm:$0x11]  ;;  %v3664_v24 = vld [vmem:[#allocation2 + $0x390] sm:$0xff]  ;;  %v3960_v15 = vsel %vm9657_vm15, %v3828_v41, %v3959_v60  ;;  %v3666_v34 = vld [vmem:[#allocation2 + $0x3a0] sm:$0xff]  ;;  %v3830_v53 = vpack.c.bf16 %v3663_v57, %v3662_v45 }
 0x400   : > { %3939 = vst [vmem:[%s6463_s19 + $0x130] sm:$0xff] %v3812_v10  ;;  %v3665_v20 = vld [vmem:[#allocation2 + $0x398] sm:$0xff]  ;;  %v3667_v44 = vld [vmem:[#allocation2 + $0x3a8] sm:$0xff]  ;;  %v3963_v8 = vsel %vm9657_vm15, %v3829_v22, %v3962_v61  ;;  %v3668_v46 = vld [vmem:[#allocation2 + $0x3b0] sm:$0xff] }
 0x401   : > { %3940 = vst [vmem:[%s6463_s19 + $0x138] sm:$0xff] %v3813_v13  ;;  %v3669_v50 = vld [vmem:[#allocation2 + $0x3b8] sm:$0xff]  ;;  %v3831_v58 = vpack.c.bf16 %v3665_v20, %v3664_v24  ;;  %v3670_v10 = vld [vmem:[#allocation2 + $0x3c0] sm:$0xff]  ;;  %v3671_v11 = vld [vmem:[#allocation2 + $0x3c8] sm:$0xff]  ;;  %v3832_v7 = vpack.c.bf16 %v3667_v44, %v3666_v34 }
 0x402   : > { %3943 = vst [vmem:[%s6463_s19 + $0x140] sm:$0x11] %v3942_v38  ;;  %v3672_v13 = vld [vmem:[#allocation2 + $0x3d0] sm:$0xff]  ;;  %v3673_v51 = vld [vmem:[#allocation2 + $0x3d8] sm:$0xff]  ;;  %v3833_v55 = vpack.c.bf16 %v3669_v50, %v3668_v46  ;;  %v3674_v48 = vld [vmem:[#allocation2 + $0x3e0] sm:$0xff]  ;;  %v3834_v47 = vpack.c.bf16 %v3671_v11, %v3670_v10 }
 0x403   : > { %3946 = vst [vmem:[%s6463_s19 + $0x148] sm:$0x11] %v3945_v31  ;;  %v3675_v29 = vld [vmem:[#allocation2 + $0x3e8] sm:$0xff]  ;;  %v3676_v38 = vld [vmem:[#allocation2 + $0x3f0] sm:$0xff]  ;;  %v3677_v1 = vld [vmem:[#allocation2 + $0x3f8] sm:$0xff]  ;;  %v3835_v31 = vpack.c.bf16 %v3673_v51, %v3672_v13 }
 0x404   : > { %3947 = vst [vmem:[%s6463_s19 + $0x150] sm:$0xff] %v3816_v26  ;;  %v3678_v2 = vld [vmem:[#allocation2 + $0x400] sm:$0xff]  ;;  %v3679_v26 = vld [vmem:[#allocation2 + $0x408] sm:$0xff]  ;;  %v3680_v42 = vld [vmem:[#allocation2 + $0x410] sm:$0xff]  ;;  %v3837_v19 = vpack.c.bf16 %v3677_v1, %v3676_v38 }
 0x405   : > { %3948 = vst [vmem:[%s6463_s19 + $0x158] sm:$0xff] %v3817_v4  ;;  %v3681_v54 = vld [vmem:[#allocation2 + $0x418] sm:$0xff]  ;;  %v3836_v4 = vpack.c.bf16 %v3675_v29, %v3674_v48  ;;  %v3682_v23 = vld [vmem:[#allocation2 + $0x420] sm:$0xff]  ;;  %v3683_v6 = vld [vmem:[#allocation2 + $0x428] sm:$0xff]  ;;  %v3838_v14 = vpack.c.bf16 %v3679_v26, %v3678_v2 }
 0x406   : > { %3949 = vst [vmem:[%s6463_s19 + $0x160] sm:$0xff] %v3818_v17  ;;  %v3686_v32 = vld [vmem:[#allocation2 + $0x440] sm:$0x1]  ;;  %v3687_v17 = vld [vmem:[#allocation2 + $0x448] sm:$0x1]  ;;  %v3685_v40 = vld [vmem:[#allocation2 + $0x438] sm:$0xff]  ;;  %v3839_v33 = vpack.c.bf16 %v3681_v54, %v3680_v42 }
 0x407   : > { %3950 = vst [vmem:[%s6463_s19 + $0x168] sm:$0xff] %v3819_v43  ;;  %v3688_v43 = vld [vmem:[#allocation2 + $0x450] sm:$0x1]  ;;  %v3689_v18 = vld [vmem:[#allocation2 + $0x458] sm:$0x1]  ;;  %v3842_v59 = vpack.c.bf16 %v3687_v17, %v3686_v32  ;;  %v3690_v37 = vld [vmem:[#allocation2 + $0x460] sm:$0xff] }
 0x408   : > { %3951 = vst [vmem:[%s6463_s19 + $0x170] sm:$0xff] %v3820_v0  ;;  %v3684_v0 = vld [vmem:[#allocation2 + $0x430] sm:$0xff]  ;;  %v3977_v35 = vld [vmem:[%s6463_s19 + $0x220] sm:$0x11]  ;;  %v3843_v27 = vpack.c.bf16 %v3689_v18, %v3688_v43  ;;  %v3691_v30 = vld [vmem:[#allocation2 + $0x468] sm:$0xff] }
 0x409   : > { %3952 = vst [vmem:[%s6463_s19 + $0x178] sm:$0xff] %v3821_v63  ;;  %v3840_v63 = vpack.c.bf16 %v3683_v6, %v3682_v23  ;;  %v3841_v9 = vpack.c.bf16 %v3685_v40, %v3684_v0  ;;  %v3692_v28 = vld [vmem:[#allocation2 + $0x470] sm:$0xff]  ;;  %v3978_v25 = vsel %vm9657_vm15, %v3842_v59, %v3977_v35  ;;  %v3694_v5 = vld [vmem:[#allocation2 + $0x480] sm:$0xff]  ;;  %v3695_v21 = vld [vmem:[#allocation2 + $0x488] sm:$0xff]  ;;  %v3844_v3 = vpack.c.bf16 %v3691_v30, %v3690_v37 }
 0x40a   : > { %3953 = vst [vmem:[%s6463_s19 + $0x180] sm:$0xff] %v3822_v12  ;;  %v3980_v12 = vld [vmem:[%s6463_s19 + $0x228] sm:$0x11]  ;;  %v3696_v52 = vld [vmem:[#allocation2 + $0x490] sm:$0xff]  ;;  %v3846_v22 = vpack.c.bf16 %v3695_v21, %v3694_v5  ;;  %v3701_v61 = vld [vmem:[#allocation2 + $0x4b8] sm:$0xff] }
 0x40b   : > { %3954 = vst [vmem:[%s6463_s19 + $0x188] sm:$0xff] %v3823_v36  ;;  %v3693_v36 = vld [vmem:[#allocation2 + $0x478] sm:$0xff]  ;;  %v3699_v60 = vld [vmem:[#allocation2 + $0x4a8] sm:$0xff]  ;;  %v3702_v57 = vld [vmem:[#allocation2 + $0x4c0] sm:$0xff] }
 0x40c   : > { %3955 = vst [vmem:[%s6463_s19 + $0x190] sm:$0xff] %v3824_v56  ;;  %v3981_v56 = vsel %vm9657_vm15, %v3843_v27, %v3980_v12  ;;  %v3845_v41 = vpack.c.bf16 %v3693_v36, %v3692_v28  ;;  %v3703_v24 = vld [vmem:[#allocation2 + $0x4c8] sm:$0xff]  ;;  %v3705_v34 = vld [vmem:[#allocation2 + $0x4d8] sm:$0xff]  ;;  %v3706_v44 = vld [vmem:[#allocation2 + $0x4e0] sm:$0xff] }
 0x40d   : > { %3956 = vst [vmem:[%s6463_s19 + $0x198] sm:$0xff] %v3825_v49  ;;  %v3697_v49 = vld [vmem:[#allocation2 + $0x498] sm:$0xff]  ;;  %v3708_v46 = vld [vmem:[#allocation2 + $0x4f0] sm:$0xff]  ;;  %v3710_v10 = vld [vmem:[#allocation2 + $0x500] sm:$0xff] }
 0x40e   : > { %3957 = vst [vmem:[%s6463_s19 + $0x1a0] sm:$0xff] %v3826_v39  ;;  %v3698_v39 = vld [vmem:[#allocation2 + $0x4a0] sm:$0xff]  ;;  %v3847_v45 = vpack.c.bf16 %v3697_v49, %v3696_v52  ;;  %v3709_v50 = vld [vmem:[#allocation2 + $0x4f8] sm:$0xff]  ;;  %v3711_v51 = vld [vmem:[#allocation2 + $0x508] sm:$0xff] }
 0x40f   : > { %3958 = vst [vmem:[%s6463_s19 + $0x1a8] sm:$0xff] %v3827_v62  ;;  %v3700_v62 = vld [vmem:[#allocation2 + $0x4b0] sm:$0xff]  ;;  %v3848_v20 = vpack.c.bf16 %v3699_v60, %v3698_v39  ;;  %v3714_v11 = vld [vmem:[#allocation2 + $0x520] sm:$0x1]  ;;  %v3717_v48 = vld [vmem:[#allocation2 + $0x538] sm:$0x1]  ;;  %v3853_v1 = vpack.c.bf16 %v3709_v50, %v3708_v46 }
 0x410   : > { %3961 = vst [vmem:[%s6463_s19 + $0x1b0] sm:$0x11] %v3960_v15  ;;  %v3704_v15 = vld [vmem:[#allocation2 + $0x4d0] sm:$0xff]  ;;  %v3713_v38 = vld [vmem:[#allocation2 + $0x518] sm:$0xff]  ;;  %v3718_v23 = vld [vmem:[#allocation2 + $0x540] sm:$0xff] }
 0x411   : > { %3964 = vst [vmem:[%s6463_s19 + $0x1b8] sm:$0x11] %v3963_v8  ;;  %v3849_v8 = vpack.c.bf16 %v3701_v61, %v3700_v62  ;;  %v3851_v13 = vpack.c.bf16 %v3705_v34, %v3704_v15  ;;  %v3995_v26 = vld [vmem:[%s6463_s19 + $0x290] sm:$0x11]  ;;  %v3719_v32 = vld [vmem:[#allocation2 + $0x548] sm:$0xff]  ;;  %v3722_v43 = vld [vmem:[#allocation2 + $0x560] sm:$0xff] }
 0x412   : > { %3965 = vst [vmem:[%s6463_s19 + $0x1c0] sm:$0xff] %v3830_v53  ;;  %v3707_v53 = vld [vmem:[#allocation2 + $0x4e8] sm:$0xff]  ;;  %v3720_v17 = vld [vmem:[#allocation2 + $0x550] sm:$0xff]  ;;  %v3858_v0 = vpack.c.bf16 %v3719_v32, %v3718_v23  ;;  %v3729_v12 = vld [vmem:[#allocation2 + $0x598] sm:$0xff] }
 0x413   : > { %3966 = vst [vmem:[%s6463_s19 + $0x1c8] sm:$0xff] %v3831_v58  ;;  %v3850_v58 = vpack.c.bf16 %v3703_v24, %v3702_v57  ;;  %v3852_v29 = vpack.c.bf16 %v3707_v53, %v3706_v44  ;;  %v3723_v18 = vld [vmem:[#allocation2 + $0x568] sm:$0xff]  ;;  %v3724_v40 = vld [vmem:[#allocation2 + $0x570] sm:$0xff]  ;;  %v3730_v30 = vld [vmem:[#allocation2 + $0x5a0] sm:$0xff] }
 0x414   : > { %3967 = vst [vmem:[%s6463_s19 + $0x1d0] sm:$0xff] %v3832_v7  ;;  %v3715_v7 = vld [vmem:[#allocation2 + $0x528] sm:$0x1]  ;;  %v3860_v27 = vpack.c.bf16 %v3723_v18, %v3722_v43  ;;  %v3733_v5 = vld [vmem:[#allocation2 + $0x5b8] sm:$0xff]  ;;  %v3734_v21 = vld [vmem:[#allocation2 + $0x5c0] sm:$0xff] }
 0x415   : > { %3968 = vst [vmem:[%s6463_s19 + $0x1d8] sm:$0xff] %v3833_v55  ;;  %v3716_v55 = vld [vmem:[#allocation2 + $0x530] sm:$0x1]  ;;  %v3856_v2 = vpack.c.bf16 %v3715_v7, %v3714_v11  ;;  %v3727_v35 = vld [vmem:[#allocation2 + $0x588] sm:$0xff]  ;;  %v3737_v49 = vld [vmem:[#allocation2 + $0x5d8] sm:$0xff] }
 0x416   : > { %3969 = vst [vmem:[%s6463_s19 + $0x1e0] sm:$0xff] %v3834_v47  ;;  %v3712_v47 = vld [vmem:[#allocation2 + $0x510] sm:$0xff]  ;;  %v3857_v42 = vpack.c.bf16 %v3717_v48, %v3716_v55  ;;  %v3731_v28 = vld [vmem:[#allocation2 + $0x5a8] sm:$0xff]  ;;  %v3738_v39 = vld [vmem:[#allocation2 + $0x5e0] sm:$0xff] }
 0x417   : > { %3970 = vst [vmem:[%s6463_s19 + $0x1e8] sm:$0xff] %v3835_v31  ;;  %v3854_v31 = vpack.c.bf16 %v3711_v51, %v3710_v10  ;;  %v3855_v54 = vpack.c.bf16 %v3713_v38, %v3712_v47  ;;  %v3996_v6 = vsel %vm9657_vm15, %v3856_v2, %v3995_v26  ;;  %v3736_v52 = vld [vmem:[#allocation2 + $0x5d0] sm:$0xff]  ;;  %v3742_v60 = vld [vmem:[#allocation2 + $0x600] sm:$0x1]  ;;  %v3739_v61 = vld [vmem:[#allocation2 + $0x5e8] sm:$0xff] }
 0x418   : > { %3971 = vst [vmem:[%s6463_s19 + $0x1f0] sm:$0xff] %v3836_v4  ;;  %v3998_v4 = vld [vmem:[%s6463_s19 + $0x298] sm:$0x11]  ;;  %v3867_v34 = vpack.c.bf16 %v3737_v49, %v3736_v52  ;;  %v4013_v53 = vld [vmem:[%s6463_s19 + $0x300] sm:$0x11]  ;;  %v3747_v11 = vld [vmem:[#allocation2 + $0x628] sm:$0xff] }
 0x419   : > { %3972 = vst [vmem:[%s6463_s19 + $0x1f8] sm:$0xff] %v3837_v19  ;;  %v3721_v19 = vld [vmem:[#allocation2 + $0x558] sm:$0xff]  ;;  %v3746_v10 = vld [vmem:[#allocation2 + $0x620] sm:$0xff]  ;;  %v3748_v7 = vld [vmem:[#allocation2 + $0x630] sm:$0xff] }
 0x41a   : > { %3973 = vst [vmem:[%s6463_s19 + $0x200] sm:$0xff] %v3838_v14  ;;  %v3999_v14 = vsel %vm9657_vm15, %v3857_v42, %v3998_v4  ;;  %v3859_v59 = vpack.c.bf16 %v3721_v19, %v3720_v17  ;;  %v3745_v57 = vld [vmem:[#allocation2 + $0x618] sm:$0x1]  ;;  %v3750_v55 = vld [vmem:[#allocation2 + $0x640] sm:$0xff]  ;;  %v3751_v48 = vld [vmem:[#allocation2 + $0x648] sm:$0xff]  ;;  %v3872_v47 = vpack.c.bf16 %v3747_v11, %v3746_v10 }
 0x41b   : > { %3974 = vst [vmem:[%s6463_s19 + $0x208] sm:$0xff] %v3839_v33  ;;  %v3725_v33 = vld [vmem:[#allocation2 + $0x578] sm:$0xff]  ;;  %v3752_v38 = vld [vmem:[#allocation2 + $0x650] sm:$0xff]  ;;  %v3755_v26 = vld [vmem:[#allocation2 + $0x668] sm:$0xff]  ;;  %v3874_v42 = vpack.c.bf16 %v3751_v48, %v3750_v55 }
 0x41c   : > { %3975 = vst [vmem:[%s6463_s19 + $0x210] sm:$0xff] %v3840_v63  ;;  %v3726_v63 = vld [vmem:[#allocation2 + $0x580] sm:$0xff]  ;;  %v3861_v37 = vpack.c.bf16 %v3725_v33, %v3724_v40  ;;  %v3741_v15 = vld [vmem:[#allocation2 + $0x5f8] sm:$0xff]  ;;  %v3759_v17 = vld [vmem:[#allocation2 + $0x688] sm:$0xff] }
 0x41d   : > { %3976 = vst [vmem:[%s6463_s19 + $0x218] sm:$0xff] %v3841_v9  ;;  %v3728_v9 = vld [vmem:[#allocation2 + $0x590] sm:$0xff]  ;;  %v3862_v36 = vpack.c.bf16 %v3727_v35, %v3726_v63  ;;  %v3757_v4 = vld [vmem:[#allocation2 + $0x678] sm:$0xff]  ;;  %v3758_v32 = vld [vmem:[#allocation2 + $0x680] sm:$0xff] }
 0x41e   : > { %3979 = vst [vmem:[%s6463_s19 + $0x220] sm:$0x11] %v3978_v25  ;;  %v3732_v25 = vld [vmem:[#allocation2 + $0x5b0] sm:$0xff]  ;;  %v3761_v43 = vld [vmem:[#allocation2 + $0x698] sm:$0xff]  ;;  %v3762_v18 = vld [vmem:[#allocation2 + $0x6a0] sm:$0xff] }
 0x41f   : > { %3982 = vst [vmem:[%s6463_s19 + $0x228] sm:$0x11] %v3981_v56  ;;  %v3863_v56 = vpack.c.bf16 %v3729_v12, %v3728_v9  ;;  %v3865_v62 = vpack.c.bf16 %v3733_v5, %v3732_v25  ;;  %v3764_v40 = vld [vmem:[#allocation2 + $0x6b0] sm:$0xff]  ;;  %v3765_v33 = vld [vmem:[#allocation2 + $0x6b8] sm:$0xff]  ;;  %v3766_v63 = vld [vmem:[#allocation2 + $0x6c0] sm:$0xff] }
 0x420   : > { %3983 = vst [vmem:[%s6463_s19 + $0x230] sm:$0xff] %v3844_v3  ;;  %v3735_v3 = vld [vmem:[#allocation2 + $0x5c8] sm:$0xff]  ;;  %v3770_v35 = vld [vmem:[#allocation2 + $0x6e0] sm:$0x1]  ;;  %v3769_v25 = vld [vmem:[#allocation2 + $0x6d8] sm:$0xff]  ;;  %v3881_v5 = vpack.c.bf16 %v3765_v33, %v3764_v40 }
 0x421   : > { %3984 = vst [vmem:[%s6463_s19 + $0x238] sm:$0xff] %v3845_v41  ;;  %v3864_v41 = vpack.c.bf16 %v3731_v28, %v3730_v30  ;;  %v3866_v24 = vpack.c.bf16 %v3735_v3, %v3734_v21  ;;  %v3767_v12 = vld [vmem:[#allocation2 + $0x6c8] sm:$0xff]  ;;  %v3773_v30 = vld [vmem:[#allocation2 + $0x6f8] sm:$0x1]  ;;  %v4031_v3 = vld [vmem:[%s6463_s19 + $0x370] sm:$0x11] }
 0x422   : > { %3985 = vst [vmem:[%s6463_s19 + $0x240] sm:$0xff] %v3846_v22  ;;  %v3743_v22 = vld [vmem:[#allocation2 + $0x608] sm:$0x1] }
 0x423   : > { %3986 = vst [vmem:[%s6463_s19 + $0x248] sm:$0xff] %v3847_v45  ;;  %v3744_v45 = vld [vmem:[#allocation2 + $0x610] sm:$0x1]  ;;  %v3870_v44 = vpack.c.bf16 %v3743_v22, %v3742_v60 }
 0x424   : > { %3987 = vst [vmem:[%s6463_s19 + $0x250] sm:$0xff] %v3848_v20  ;;  %v3740_v20 = vld [vmem:[#allocation2 + $0x5f0] sm:$0xff]  ;;  %v3871_v46 = vpack.c.bf16 %v3745_v57, %v3744_v45 }
 0x425   : > { %3988 = vst [vmem:[%s6463_s19 + $0x258] sm:$0xff] %v3849_v8  ;;  %v3868_v8 = vpack.c.bf16 %v3739_v61, %v3738_v39  ;;  %v3869_v50 = vpack.c.bf16 %v3741_v15, %v3740_v20  ;;  %v4014_v51 = vsel %vm9657_vm15, %v3870_v44, %v4013_v53 }
 0x426   : > { %3989 = vst [vmem:[%s6463_s19 + $0x260] sm:$0xff] %v3850_v58  ;;  %v4016_v58 = vld [vmem:[%s6463_s19 + $0x308] sm:$0x11] }
 0x427   : > { %3990 = vst [vmem:[%s6463_s19 + $0x268] sm:$0xff] %v3851_v13  ;;  %v3749_v13 = vld [vmem:[#allocation2 + $0x638] sm:$0xff] }
 0x428   : > { %3991 = vst [vmem:[%s6463_s19 + $0x270] sm:$0xff] %v3852_v29  ;;  %v4017_v29 = vsel %vm9657_vm15, %v3871_v46, %v4016_v58  ;;  %v3873_v2 = vpack.c.bf16 %v3749_v13, %v3748_v7 }
 0x429   : > { %3992 = vst [vmem:[%s6463_s19 + $0x278] sm:$0xff] %v3853_v1  ;;  %v3753_v1 = vld [vmem:[#allocation2 + $0x658] sm:$0xff] }
 0x42a   : > { %3993 = vst [vmem:[%s6463_s19 + $0x280] sm:$0xff] %v3854_v31  ;;  %v3754_v31 = vld [vmem:[#allocation2 + $0x660] sm:$0xff]  ;;  %v3875_v23 = vpack.c.bf16 %v3753_v1, %v3752_v38 }
 0x42b   : > { %3994 = vst [vmem:[%s6463_s19 + $0x288] sm:$0xff] %v3855_v54  ;;  %v3756_v54 = vld [vmem:[#allocation2 + $0x670] sm:$0xff]  ;;  %v3876_v19 = vpack.c.bf16 %v3755_v26, %v3754_v31 }
 0x42c   : > { %3997 = vst [vmem:[%s6463_s19 + $0x290] sm:$0x11] %v3996_v6  ;;  %v3760_v6 = vld [vmem:[#allocation2 + $0x690] sm:$0xff] }
 0x42d   : > { %4000 = vst [vmem:[%s6463_s19 + $0x298] sm:$0x11] %v3999_v14  ;;  %v3877_v14 = vpack.c.bf16 %v3757_v4, %v3756_v54  ;;  %v3879_v9 = vpack.c.bf16 %v3761_v43, %v3760_v6 }
 0x42e   : > { %4001 = vst [vmem:[%s6463_s19 + $0x2a0] sm:$0xff] %v3858_v0  ;;  %v3763_v0 = vld [vmem:[#allocation2 + $0x6a8] sm:$0xff] }
 0x42f   : > { %4002 = vst [vmem:[%s6463_s19 + $0x2a8] sm:$0xff] %v3859_v59  ;;  %v3878_v59 = vpack.c.bf16 %v3759_v17, %v3758_v32  ;;  %v3880_v28 = vpack.c.bf16 %v3763_v0, %v3762_v18 }
 0x430   : > { %4003 = vst [vmem:[%s6463_s19 + $0x2b0] sm:$0xff] %v3860_v27  ;;  %v3771_v27 = vld [vmem:[#allocation2 + $0x6e8] sm:$0x1] }
 0x431   : > { %4004 = vst [vmem:[%s6463_s19 + $0x2b8] sm:$0xff] %v3861_v37  ;;  %v3772_v37 = vld [vmem:[#allocation2 + $0x6f0] sm:$0x1]  ;;  %v3884_v21 = vpack.c.bf16 %v3771_v27, %v3770_v35 }
 0x432   : > { %4005 = vst [vmem:[%s6463_s19 + $0x2c0] sm:$0xff] %v3862_v36  ;;  %v3768_v36 = vld [vmem:[#allocation2 + $0x6d0] sm:$0xff]  ;;  %v3885_v52 = vpack.c.bf16 %v3773_v30, %v3772_v37 }
 0x433   : > { %4006 = vst [vmem:[%s6463_s19 + $0x2c8] sm:$0xff] %v3863_v56  ;;  %v3882_v56 = vpack.c.bf16 %v3767_v12, %v3766_v63  ;;  %v3883_v49 = vpack.c.bf16 %v3769_v25, %v3768_v36  ;;  %v4032_v39 = vsel %vm9657_vm15, %v3884_v21, %v4031_v3 }
 0x434   : > { %4007 = vst [vmem:[%s6463_s19 + $0x2d0] sm:$0xff] %v3864_v41  ;;  %v4034_v41 = vld [vmem:[%s6463_s19 + $0x378] sm:$0x11] }
 0x435   : > { %4008 = vst [vmem:[%s6463_s19 + $0x2d8] sm:$0xff] %v3865_v62  ;;  %v4035_v60 = vsel %vm9657_vm15, %v3885_v52, %v4034_v41 }
 0x436   : > { %4009 = vst [vmem:[%s6463_s19 + $0x2e0] sm:$0xff] %v3866_v24 }
 0x437   : > { %4010 = vst [vmem:[%s6463_s19 + $0x2e8] sm:$0xff] %v3867_v34 }
 0x438   : > { %4011 = vst [vmem:[%s6463_s19 + $0x2f0] sm:$0xff] %v3868_v8 }
 0x439   : > { %4012 = vst [vmem:[%s6463_s19 + $0x2f8] sm:$0xff] %v3869_v50 }
 0x43a   : > { %4015 = vst [vmem:[%s6463_s19 + $0x300] sm:$0x11] %v4014_v51 }
 0x43b   : > { %4018 = vst [vmem:[%s6463_s19 + $0x308] sm:$0x11] %v4017_v29 }
 0x43c   : > { %4019 = vst [vmem:[%s6463_s19 + $0x310] sm:$0xff] %v3872_v47 }
 0x43d   : > { %4020 = vst [vmem:[%s6463_s19 + $0x318] sm:$0xff] %v3873_v2 }
 0x43e   : > { %4021 = vst [vmem:[%s6463_s19 + $0x320] sm:$0xff] %v3874_v42 }
 0x43f   : > { %4022 = vst [vmem:[%s6463_s19 + $0x328] sm:$0xff] %v3875_v23 }
 0x440   : > { %4023 = vst [vmem:[%s6463_s19 + $0x330] sm:$0xff] %v3876_v19 }
 0x441   : > { %4024 = vst [vmem:[%s6463_s19 + $0x338] sm:$0xff] %v3877_v14 }
 0x442   : > { %4025 = vst [vmem:[%s6463_s19 + $0x340] sm:$0xff] %v3878_v59 }
 0x443   : > { %4026 = vst [vmem:[%s6463_s19 + $0x348] sm:$0xff] %v3879_v9 }
 0x444   : > { %4027 = vst [vmem:[%s6463_s19 + $0x350] sm:$0xff] %v3880_v28 }
 0x445   : > { %4028 = vst [vmem:[%s6463_s19 + $0x358] sm:$0xff] %v3881_v5 }
 0x446   : > { %4029 = vst [vmem:[%s6463_s19 + $0x360] sm:$0xff] %v3882_v56 }
 0x447   : > { %4030 = vst [vmem:[%s6463_s19 + $0x368] sm:$0xff] %v3883_v49 }
 0x448   : > { %4033 = vst [vmem:[%s6463_s19 + $0x370] sm:$0x11] %v4032_v39 }
 0x449   : > { %4036 = vst [vmem:[%s6463_s19 + $0x378] sm:$0x11] %v4035_v60 }
 0x44a PF: > { %s39_s1 = sadd.s32 1, %s5909_s1  }
 0x44b   : > { %p36_p8 = scmp.ge.s32.totalorder %s39_s1, 4  }
 0x44d   :  { %38 = sbr.rel (!%p36_p8) target bundleno = 12 (0xc), region = 208 }
 0x452   :  { %4061 = vsyncpa [#allocation9], 1 }
 0x453   :  { %4063 = vsyncpa [#allocation9 + $0x1], 1 }

</bundles_post_ra>
